<compile_context>
chip_gen: v5e
topology: v5e:2x2
jax: 0.10.0
libtpu: 0.0.40
codegen_flags: <defaults>
</compile_context>

<pallas_src>
import functools

import numpy as np
import jax
import jax.numpy as jnp
from jax import lax
from jax.experimental import pallas as pl
from jax.experimental.pallas import tpu as pltpu

LANE = 128


def _round_up(n, m):
    return (n + m - 1) // m * m


def _leaky_relu(x, slope=0.2):
    return jnp.where(x >= 0, x, slope * x)


# ------------------------------- kernel --------------------------------------

def _ublock_kernel(dilation, tile_l, halo, pad, cinp, hp, cmax,
                   xin_hbm, w_ref, bias_ref,
                   out_ref, buf_ref, stage_ref, sem_ref):
    d0, d1, d2, d3 = dilation
    te = tile_l + 2 * halo
    b = pl.program_id(0)
    i = pl.program_id(1)
    n_b = pl.num_programs(0)
    n_t = pl.num_programs(1)
    s = b * n_t + i                       # flat sequential step (grid is row-major)
    slot = s % 2

    def tile_copy(bb, ii, slot_idx):
        start = pl.multiple_of(ii * tile_l, tile_l)
        return pltpu.make_async_copy(
            xin_hbm.at[bb, pl.ds(start, te), :],
            buf_ref.at[slot_idx],
            sem_ref.at[slot_idx])

    # Cold start: only the very first grid step fetches its own tile; every
    # later tile (including the first tile of subsequent batch rows) has been
    # prefetched by the previous step, so no per-row exposed DMA wait remains.
    @pl.when(s == 0)
    def _():
        tile_copy(b, i, slot).start()

    # Prefetch the globally-next tile (possibly the next batch row) BEFORE
    # waiting on the current one so the transfer is in flight during any stall.
    @pl.when(s + 1 < n_b * n_t)
    def _():
        row_end = i + 1 == n_t
        nb = jnp.where(row_end, b + 1, b)
        ni = jnp.where(row_end, 0, i + 1)
        tile_copy(nb, ni, 1 - slot).start()

    tile_copy(b, i, slot).wait()

    xin = buf_ref[slot]                                  # (te, cinp + 2*hp) bf16
    x_up = xin[:, :cinp]                                 # upsampled input, stays bf16
    f_shift = xin[:, cinp:cinp + hp].astype(jnp.float32)
    f_scale = xin[:, cinp + hp:cinp + 2 * hp].astype(jnp.float32)

    # Zero the staging buffer's pad rows; they act as the convs' zero padding
    # and are never overwritten by the per-conv stores below.
    stage_ref[:pad, :] = jnp.zeros((pad, cmax), stage_ref.dtype)
    stage_ref[pad + te:, :] = jnp.zeros((pad, cmax), stage_ref.dtype)

    def conv3(act, w_row0, c, bias_row, d):
        """Dilated 3-tap conv: stage act once (bf16, cast on the (te,c) slab),
        then 3 accumulating MXU matmuls from statically-offset sublane views
        of the staging buffer.  f32 accumulation."""
        stage_ref[pad:pad + te, :c] = act.astype(stage_ref.dtype)
        acc = bias_ref[bias_row:bias_row + 1, :]
        for k, off in enumerate((pad - d, pad, pad + d)):    # taps a[t-d], a[t], a[t+d]
            w_k = w_ref[w_row0 + k * c:w_row0 + (k + 1) * c, :]
            acc = acc + jnp.dot(stage_ref[off:off + te, :c], w_k,
                                preferred_element_type=jnp.float32)
        return acc

    hid0 = 4 * cinp                                      # first row of the hidden convs

    # block1: 1x1 conv on the upsampled input (bf16 LHS, f32 accumulation).
    block1 = (jnp.dot(x_up, w_ref[:cinp, :], preferred_element_type=jnp.float32)
              + bias_ref[0:1, :])

    # block2 (leaky_relu commutes with nearest upsampling; it stays in bf16 so
    # the (te, cinp) slab never widens to f32 before hitting the MXU).
    block2 = conv3(_leaky_relu(x_up), cinp, cinp, 1, d0)
    block2 = f_shift + f_scale * block2
    block2 = conv3(_leaky_relu(block2), hid0, hp, 2, d1)

    x = block1 + block2

    # block3
    block3 = _leaky_relu(f_shift + f_scale * x)
    block3 = conv3(block3, hid0 + 3 * hp, hp, 3, d2)
    block3 = _leaky_relu(f_shift + f_scale * block3)
    block3 = conv3(block3, hid0 + 6 * hp, hp, 4, d3)

    out = x + block3
    # Only the central tile_l rows are valid; the halo belongs to neighbours.
    out_ref[0] = out[halo:halo + tile_l, :].astype(out_ref.dtype)


# ------------------------------- wrapper --------------------------------------

def ublock_forward(x, film_shift, film_scale, packed_params, factor, dilation, *,
                   tile_l=1024, compute_dtype=jnp.bfloat16):
    """x: (B, Cin, T), film_*: (B, H, T*factor) -> (B, H, T*factor)  (NCW)."""
    w_all, bias = packed_params
    B, Cin, T = x.shape
    H = film_shift.shape[1]
    L = T * factor
    assert film_shift.shape == (B, H, L) and film_scale.shape == (B, H, L)
    assert len(dilation) == 4 and factor >= 1

    cinp = _round_up(Cin, LANE)
    hp = _round_up(H, LANE)
    cmax = max(cinp, hp)
    ctot = cinp + 2 * hp
    # Receptive-field halo; multiple of 16 keeps the DMA window and output crop
    # aligned to the bf16 (16, 128) tile for any dilation tuple.
    halo = _round_up(sum(dilation), 16)
    assert halo >= sum(dilation)
    pad = _round_up(max(dilation), 8)                    # staging-buffer zero pad
    assert pad >= max(dilation)
    tile_l = _round_up(max(16, min(tile_l, _round_up(L, 16))), 16)
    n_t = pl.cdiv(L, tile_l)
    l_core = n_t * tile_l
    te = tile_l + 2 * halo
    l_tot = l_core + 2 * halo

    assert w_all.shape == (4 * cinp + 9 * hp, hp)
    assert bias.shape == (8, hp)

    # Channel-last + nearest upsample + halo/zero padding, with x_up,
    # film_shift, film_scale packed into a single bf16 array so the kernel
    # streams exactly one haloed window per tile.
    # TODO(synk): in a full model keep activations in this packed channel-last
    # bf16 layout between UBlocks (and fold the upsample into the kernel) to
    # avoid this wrapper HBM pre-pass.
    x_up = jnp.repeat(jnp.transpose(x, (0, 2, 1)), factor, axis=1)   # (B, L, Cin)
    fs = jnp.transpose(film_shift, (0, 2, 1))                        # (B, L, H)
    fc = jnp.transpose(film_scale, (0, 2, 1))                        # (B, L, H)

    def prep(a, c, cp):
        a = a.astype(compute_dtype)
        return jnp.pad(a, ((0, 0), (halo, l_tot - L - halo), (0, cp - c)))

    comb = jnp.concatenate(
        [prep(x_up, Cin, cinp), prep(fs, H, hp), prep(fc, H, hp)],
        axis=-1)                                                     # (B, l_tot, ctot)

    kernel = functools.partial(_ublock_kernel, tuple(dilation), tile_l, halo,
                               pad, cinp, hp, cmax)
    out = pl.pallas_call(
        kernel,
        out_shape=jax.ShapeDtypeStruct((B, l_core, hp), compute_dtype),
        grid=(B, n_t),
        in_specs=[
            pl.BlockSpec(memory_space=pl.ANY),                  # packed x_up+FiLM (manual DMA)
            # Resident operands: map the whole array into VMEM once (no grid
            # pipelining => no dead second buffer; v7x VMEM headroom).
            pl.BlockSpec(memory_space=pltpu.MemorySpace.VMEM),  # weight slab
            pl.BlockSpec(memory_space=pltpu.MemorySpace.VMEM),  # biases
        ],
        out_specs=pl.BlockSpec((1, tile_l, hp), lambda b, i: (b, i, 0)),
        scratch_shapes=[
            pltpu.VMEM((2, te, ctot), compute_dtype),           # DMA double buffer
            pltpu.VMEM((te + 2 * pad, cmax), compute_dtype),    # conv tap staging
            pltpu.SemaphoreType.DMA((2,)),
        ],
        compiler_params=pltpu.CompilerParams(
            # The DMA prefetch chain crosses tiles AND batch rows, so both grid
            # axes stay on one TensorCore ("arbitrary").  For large B on v7x,
            # switch batch back to "parallel" and cold-fetch per row instead.
            dimension_semantics=("arbitrary", "arbitrary"),
            # Above the 16/32 MiB scoped defaults, below v7x's 64 MiB physical
            # VMEM; raise on v5e/v6e (128 MiB) if tile_l is pushed to 2048.
            vmem_limit_bytes=48 * 1024 * 1024),
    )(comb, w_all, bias)

    out = out[:, :L, :H].astype(jnp.float32)
    return jnp.transpose(out, (0, 2, 1))                  # back to NCW (B, H, L)


# --------------------------- parameter handling -------------------------------

def _orthogonal(key, shape):
    """Deterministic orthogonal init (mimics nn.init.orthogonal_)."""
    rows = shape[0]
    cols = int(np.prod(shape[1:]))
    n = max(rows, cols)
    a = jax.random.normal(key, (n, n), dtype=jnp.float32)
    q, r = jnp.linalg.qr(a)
    q = q * jnp.sign(jnp.diagonal(r))
    return q[:rows, :cols].reshape(shape)


def make_params(key, input_size, hidden_size):
    """Torch-layout weights (Cout, Cin, K) + biases.

    The PyTorch module zero-inits biases; small random biases are used here so
    the bias path is actually exercised by the correctness check.
    """
    ks = jax.random.split(key, 10)
    w1 = _orthogonal(ks[0], (hidden_size, input_size, 1))
    w2a = _orthogonal(ks[1], (hidden_size, input_size, 3))
    w2b = _orthogonal(ks[2], (hidden_size, hidden_size, 3))
    w3a = _orthogonal(ks[3], (hidden_size, hidden_size, 3))
    w3b = _orthogonal(ks[4], (hidden_size, hidden_size, 3))
    bs = [0.1 * jax.random.normal(ks[5 + j], (hidden_size,), jnp.float32)
          for j in range(5)]
    return [(w1, bs[0]), (w2a, bs[1]), (w2b, bs[2]), (w3a, bs[3]), (w3b, bs[4])]


def pack_params(torch_params, compute_dtype=jnp.bfloat16):
    """Pack torch-layout params into one lane-padded bf16 weight slab + f32 bias.

    Row layout of the weight slab (lane dim = hp):
      [0, cinp)                        : 1x1 conv (block1)
      [cinp + k*cinp, ...)             : block2[0] tap k          (k = 0,1,2)
      [4*cinp + (3*j + k)*hp, ...)     : hidden conv j tap k      (j = 0,1,2)
    """
    (w1, b1), (w2a, b2a), (w2b, b2b), (w3a, b3a), (w3b, b3b) = torch_params
    hidden, cin = w1.shape[0], w1.shape[1]
    cinp = _round_up(cin, LANE)
    hp = _round_up(hidden, LANE)

    def fuse_taps(w, cp):
        # (Cout, Cin, 3) -> (3*cp, hp) with tap k at rows [k*cp, k*cp + Cin).
        cout, cin_w, _ = w.shape
        wt = jnp.transpose(w, (2, 1, 0))                  # (3, Cin, Cout)
        out = jnp.zeros((3 * cp, hp), jnp.float32)
        for k in range(3):
            out = out.at[k * cp:k * cp + cin_w, :cout].set(wt[k])
        return out

    w1p = jnp.zeros((cinp, hp), jnp.float32).at[:cin, :hidden].set(
        jnp.transpose(w1[:, :, 0], (1, 0)))
    w_all = jnp.concatenate(
        [w1p, fuse_taps(w2a, cinp),
         fuse_taps(w2b, hp), fuse_taps(w3a, hp), fuse_taps(w3b, hp)], axis=0)
    bias = jnp.zeros((8, hp), jnp.float32)
    for r, bv in enumerate([b1, b2a, b2b, b3a, b3b]):
        bias = bias.at[r, :bv.shape[0]].set(bv)
    return (w_all.astype(compute_dtype), bias)


# --------------------------- pure-JAX reference --------------------------------

def _conv1d_ref(x, w, b, dilation, padding):
    out = lax.conv_general_dilated(
        x, w, window_strides=(1,), padding=[(padding, padding)],
        rhs_dilation=(dilation,), dimension_numbers=("NCH", "OIH", "NCH"),
        precision=lax.Precision.HIGHEST,
        preferred_element_type=jnp.float32)
    return out + b[None, :, None]


def ublock_ref(x, film_shift, film_scale, torch_params, factor, dilation,
               conv_in_dtype=jnp.float32):
    """Reference; conv_in_dtype=bf16 mirrors the kernel's bf16 MXU inputs."""
    (w1, b1), (w2a, b2a), (w2b, b2b), (w3a, b3a), (w3b, b3b) = torch_params
    cast = lambda v: v.astype(conv_in_dtype)
    conv = lambda v, w, b, d, p: _conv1d_ref(cast(v), cast(w), b, d, p)
    lrelu = lambda v: jnp.where(v >= 0, v, 0.2 * v)
    interp = lambda v: jnp.repeat(v, factor, axis=-1)

    block1 = conv(interp(x), w1, b1, 1, 0)
    block2 = interp(lrelu(x))
    block2 = conv(block2, w2a, b2a, dilation[0], dilation[0])
    block2 = film_shift + film_scale * block2
    block2 = conv(lrelu(block2), w2b, b2b, dilation[1], dilation[1])
    x2 = block1 + block2
    block3 = film_shift + film_scale * x2
    block3 = conv(lrelu(block3), w3a, b3a, dilation[2], dilation[2])
    block3 = film_shift + film_scale * block3
    block3 = conv(lrelu(block3), w3b, b3b, dilation[3], dilation[3])
    return x2 + block3


# ---------------------------------- main ----------------------------------------

if __name__ == "__main__":
    B, Cin, T = 2, 4, 384
    H = 8
    factor = 2
    dilation = (1, 2, 4, 8)
    L = T * factor                     # 768

    key = jax.random.PRNGKey(0)
    kx, ks, kc, kp = jax.random.split(key, 4)
    x = jax.random.normal(kx, (B, Cin, T), dtype=jnp.float32)
    film_shift = jax.random.normal(ks, (B, H, L), dtype=jnp.float32)
    film_scale = jax.random.normal(kc, (B, H, L), dtype=jnp.float32)

    torch_params = make_params(kp, Cin, H)
    packed = pack_params(torch_params)

    # Small tile here so the multi-tile halo path and the cross-batch DMA
    # prefetch chain are exercised (grid = (2, 3)); production default is 1024.
    fwd = jax.jit(functools.partial(ublock_forward, factor=factor,
                                    dilation=dilation, tile_l=256))
    out = jax.block_until_ready(fwd(x, film_shift, film_scale, packed))

    # References use the same bf16-rounded inputs/weights as the kernel.
    rd = lambda a: a.astype(jnp.bfloat16).astype(jnp.float32)
    x_r, fs_r, fc_r = rd(x), rd(film_shift), rd(film_scale)
    params_r = [(rd(w), b) for (w, b) in torch_params]

    # (a) check vs a reference mirroring the kernel's bf16 MXU inputs
    #     (validates halo/tap/FiLM math; small slack because the kernel runs
    #     x_up's leaky_relu directly in bf16).
    ref_emu = ublock_ref(x_r, fs_r, fc_r, params_r, factor, dilation,
                         conv_in_dtype=jnp.bfloat16)
    np.testing.assert_allclose(np.asarray(out), np.asarray(ref_emu),
                               rtol=3e-2, atol=3e-2)

    # (b) sanity check vs full-f32 module semantics (bf16-pipeline tolerance).
    ref_f32 = ublock_ref(x_r, fs_r, fc_r, params_r, factor, dilation,
                         conv_in_dtype=jnp.float32)
    np.testing.assert_allclose(np.asarray(out), np.asarray(ref_f32),
                               rtol=1e-1, atol=1e-1)

    print("KERNEL_OK")
</pallas_src>

<mosaic_0001>
module attributes {stable_mosaic.version = 11 : i64} {
  func.func @_ublock_kernel(%arg0: i32, %arg1: i32, %arg2: memref<2x800x384xbf16, #tpu.memory_space<any>>, %arg3: memref<1664x128xbf16, #tpu.memory_space<vmem>>, %arg4: memref<8x128xf32, #tpu.memory_space<vmem>>, %arg5: memref<1x256x128xbf16, #tpu.memory_space<vmem>>, %arg6: memref<2x288x384xbf16, #tpu.memory_space<vmem>>, %arg7: memref<304x128xbf16, #tpu.memory_space<vmem>>, %arg8: memref<2x!tpu.dma_semaphore, #tpu.memory_space<semaphore_mem>>) attributes {dimension_semantics = [#tpu.dimension_semantics<arbitrary>, #tpu.dimension_semantics<arbitrary>], iteration_bounds = array<i64: 2, 3>, scalar_prefetch = 0 : i64, scratch_operands = 3 : i64, tpu.core_type = #tpu.core_type<tc>, window_params = [{}, {pipeline_mode = #tpu.pipeline_mode<synchronous>, transform_indices = @transform_1, window_bounds = array<i64: 1664, 128>}, {pipeline_mode = #tpu.pipeline_mode<synchronous>, transform_indices = @transform_2, window_bounds = array<i64: 8, 128>}, {transform_indices = @transform_3, window_bounds = array<i64: 1, 256, 128>}]} {
    %c3_i32 = arith.constant 3 : i32
    %0 = arith.muli %arg0, %c3_i32 : i32
    %1 = arith.addi %0, %arg1 : i32
    %c2_i32 = arith.constant 2 : i32
    %c0_i32 = arith.constant 0 : i32
    %2 = arith.cmpi eq, %c2_i32, %c0_i32 : i32
    %c1_i32 = arith.constant 1 : i32
    %3 = arith.select %2, %c1_i32, %c2_i32 : i32
    %4 = arith.remsi %1, %3 : i32
    %c0_i32_0 = arith.constant 0 : i32
    %5 = arith.cmpi ne, %4, %c0_i32_0 : i32
    %c0_i32_1 = arith.constant 0 : i32
    %6 = arith.cmpi slt, %4, %c0_i32_1 : i32
    %c0_i32_2 = arith.constant 0 : i32
    %7 = arith.cmpi slt, %3, %c0_i32_2 : i32
    %8 = arith.xori %6, %7 : i1
    %9 = arith.andi %8, %5 : i1
    %10 = arith.addi %4, %3 : i32
    %11 = arith.select %9, %10, %4 : i32
    %c0_i32_3 = arith.constant 0 : i32
    %12 = arith.cmpi eq, %1, %c0_i32_3 : i32
    %13 = arith.extui %12 : i1 to i32
    %c0_i32_4 = arith.constant 0 : i32
    %14 = arith.cmpi ne, %13, %c0_i32_4 : i32
    scf.if %14 {
      %c256_i32_84 = arith.constant 256 : i32
      %140 = arith.muli %arg1, %c256_i32_84 : i32
      %141 = tpu.assume_multiple %140, 256 : i32
      %c0_i32_85 = arith.constant 0 : i32
      %142 = tpu.memref_slice %arg2[%arg0, %141, %c0_i32_85] : memref<2x800x384xbf16, #tpu.memory_space<any>> -> memref<1x288x384xbf16, #tpu.memory_space<any>>
      %143 = tpu.memref_squeeze %142 : memref<1x288x384xbf16, #tpu.memory_space<any>> -> memref<288x384xbf16, #tpu.memory_space<any>>
      %c0_i32_86 = arith.constant 0 : i32
      %c0_i32_87 = arith.constant 0 : i32
      %144 = tpu.memref_slice %arg6[%11, %c0_i32_86, %c0_i32_87] : memref<2x288x384xbf16, #tpu.memory_space<vmem>> -> memref<1x288x384xbf16, #tpu.memory_space<vmem>>
      %145 = tpu.memref_squeeze %144 : memref<1x288x384xbf16, #tpu.memory_space<vmem>> -> memref<288x384xbf16, #tpu.memory_space<vmem>>
      %146 = tpu.memref_slice %arg8[%11] : memref<2x!tpu.dma_semaphore, #tpu.memory_space<semaphore_mem>> -> memref<1x!tpu.dma_semaphore, #tpu.memory_space<semaphore_mem>>
      %147 = tpu.memref_squeeze %146 : memref<1x!tpu.dma_semaphore, #tpu.memory_space<semaphore_mem>> -> memref<!tpu.dma_semaphore, #tpu.memory_space<semaphore_mem>>
      tpu.enqueue_dma source(%143 : memref<288x384xbf16, #tpu.memory_space<any>>) target(%145 : memref<288x384xbf16, #tpu.memory_space<vmem>>) target_semaphore(%147 : memref<!tpu.dma_semaphore, #tpu.memory_space<semaphore_mem>>)
    } else {
    }
    %c1_i32_5 = arith.constant 1 : i32
    %15 = arith.addi %1, %c1_i32_5 : i32
    %c6_i32 = arith.constant 6 : i32
    %16 = arith.cmpi slt, %15, %c6_i32 : i32
    %17 = arith.extui %16 : i1 to i32
    %c0_i32_6 = arith.constant 0 : i32
    %18 = arith.cmpi ne, %17, %c0_i32_6 : i32
    scf.if %18 {
      %c1_i32_84 = arith.constant 1 : i32
      %140 = arith.addi %arg1, %c1_i32_84 : i32
      %c3_i32_85 = arith.constant 3 : i32
      %141 = arith.cmpi eq, %140, %c3_i32_85 : i32
      %c1_i32_86 = arith.constant 1 : i32
      %142 = arith.addi %arg0, %c1_i32_86 : i32
      %143 = arith.select %141, %142, %arg0 : i32
      %c1_i32_87 = arith.constant 1 : i32
      %144 = arith.addi %arg1, %c1_i32_87 : i32
      %c0_i32_88 = arith.constant 0 : i32
      %145 = arith.select %141, %c0_i32_88, %144 : i32
      %c1_i32_89 = arith.constant 1 : i32
      %146 = arith.subi %c1_i32_89, %11 : i32
      %c256_i32_90 = arith.constant 256 : i32
      %147 = arith.muli %145, %c256_i32_90 : i32
      %148 = tpu.assume_multiple %147, 256 : i32
      %c0_i32_91 = arith.constant 0 : i32
      %149 = tpu.memref_slice %arg2[%143, %148, %c0_i32_91] : memref<2x800x384xbf16, #tpu.memory_space<any>> -> memref<1x288x384xbf16, #tpu.memory_space<any>>
      %150 = tpu.memref_squeeze %149 : memref<1x288x384xbf16, #tpu.memory_space<any>> -> memref<288x384xbf16, #tpu.memory_space<any>>
      %c0_i32_92 = arith.constant 0 : i32
      %c0_i32_93 = arith.constant 0 : i32
      %151 = tpu.memref_slice %arg6[%146, %c0_i32_92, %c0_i32_93] : memref<2x288x384xbf16, #tpu.memory_space<vmem>> -> memref<1x288x384xbf16, #tpu.memory_space<vmem>>
      %152 = tpu.memref_squeeze %151 : memref<1x288x384xbf16, #tpu.memory_space<vmem>> -> memref<288x384xbf16, #tpu.memory_space<vmem>>
      %153 = tpu.memref_slice %arg8[%146] : memref<2x!tpu.dma_semaphore, #tpu.memory_space<semaphore_mem>> -> memref<1x!tpu.dma_semaphore, #tpu.memory_space<semaphore_mem>>
      %154 = tpu.memref_squeeze %153 : memref<1x!tpu.dma_semaphore, #tpu.memory_space<semaphore_mem>> -> memref<!tpu.dma_semaphore, #tpu.memory_space<semaphore_mem>>
      tpu.enqueue_dma source(%150 : memref<288x384xbf16, #tpu.memory_space<any>>) target(%152 : memref<288x384xbf16, #tpu.memory_space<vmem>>) target_semaphore(%154 : memref<!tpu.dma_semaphore, #tpu.memory_space<semaphore_mem>>)
    } else {
    }
    %c256_i32 = arith.constant 256 : i32
    %19 = arith.muli %arg1, %c256_i32 : i32
    %20 = tpu.assume_multiple %19, 256 : i32
    %c0_i32_7 = arith.constant 0 : i32
    %21 = tpu.memref_slice %arg2[%arg0, %20, %c0_i32_7] : memref<2x800x384xbf16, #tpu.memory_space<any>> -> memref<1x288x384xbf16, #tpu.memory_space<any>>
    %22 = tpu.memref_squeeze %21 : memref<1x288x384xbf16, #tpu.memory_space<any>> -> memref<288x384xbf16, #tpu.memory_space<any>>
    %c0_i32_8 = arith.constant 0 : i32
    %c0_i32_9 = arith.constant 0 : i32
    %23 = tpu.memref_slice %arg6[%11, %c0_i32_8, %c0_i32_9] : memref<2x288x384xbf16, #tpu.memory_space<vmem>> -> memref<1x288x384xbf16, #tpu.memory_space<vmem>>
    %24 = tpu.memref_squeeze %23 : memref<1x288x384xbf16, #tpu.memory_space<vmem>> -> memref<288x384xbf16, #tpu.memory_space<vmem>>
    %25 = tpu.memref_slice %arg8[%11] : memref<2x!tpu.dma_semaphore, #tpu.memory_space<semaphore_mem>> -> memref<1x!tpu.dma_semaphore, #tpu.memory_space<semaphore_mem>>
    %26 = tpu.memref_squeeze %25 : memref<1x!tpu.dma_semaphore, #tpu.memory_space<semaphore_mem>> -> memref<!tpu.dma_semaphore, #tpu.memory_space<semaphore_mem>>
    tpu.wait_dma2 semaphore(%26 : memref<!tpu.dma_semaphore, #tpu.memory_space<semaphore_mem>>) src(%22 : memref<288x384xbf16, #tpu.memory_space<any>>) dst(%24 : memref<288x384xbf16, #tpu.memory_space<vmem>>)
    %27 = arith.index_cast %11 : i32 to index
    %c0 = arith.constant 0 : index
    %c0_10 = arith.constant 0 : index
    %28 = vector.load %arg6[%27, %c0, %c0_10] : memref<2x288x384xbf16, #tpu.memory_space<vmem>>, vector<1x288x384xbf16>
    %29 = vector.shape_cast %28 : vector<1x288x384xbf16> to vector<288x384xbf16>
    %30 = vector.extract_strided_slice %29 {offsets = [0, 0], sizes = [288, 128], strides = [1, 1]} : vector<288x384xbf16> to vector<288x128xbf16>
    %31 = vector.extract_strided_slice %29 {offsets = [0, 128], sizes = [288, 128], strides = [1, 1]} : vector<288x384xbf16> to vector<288x128xbf16>
    %32 = arith.extf %31 : vector<288x128xbf16> to vector<288x128xf32>
    %33 = vector.extract_strided_slice %29 {offsets = [0, 256], sizes = [288, 128], strides = [1, 1]} : vector<288x384xbf16> to vector<288x128xbf16>
    %34 = arith.extf %33 : vector<288x128xbf16> to vector<288x128xf32>
    %cst = arith.constant 0.000000e+00 : bf16
    %35 = vector.broadcast %cst : bf16 to vector<8x128xbf16>
    %c0_11 = arith.constant 0 : index
    %c0_12 = arith.constant 0 : index
    %36 = vector.load %arg7[%c0_11, %c0_12] : memref<304x128xbf16, #tpu.memory_space<vmem>>, vector<8x128xbf16>
    tpu.vector_store %arg7[%c0_11, %c0_12], %35 {strides = array<i32>} : memref<304x128xbf16, #tpu.memory_space<vmem>>, vector<8x128xbf16>,
    %cst_13 = arith.constant 0.000000e+00 : bf16
    %37 = vector.broadcast %cst_13 : bf16 to vector<8x128xbf16>
    %c296 = arith.constant 296 : index
    %c0_14 = arith.constant 0 : index
    %38 = vector.load %arg7[%c296, %c0_14] : memref<304x128xbf16, #tpu.memory_space<vmem>>, vector<8x128xbf16>
    tpu.vector_store %arg7[%c296, %c0_14], %37 {strides = array<i32>} : memref<304x128xbf16, #tpu.memory_space<vmem>>, vector<8x128xbf16>,
    %c0_15 = arith.constant 0 : index
    %c0_16 = arith.constant 0 : index
    %39 = vector.load %arg3[%c0_15, %c0_16] : memref<1664x128xbf16, #tpu.memory_space<vmem>>, vector<128x128xbf16>
    %cst_17 = arith.constant dense<0.000000e+00> : vector<288x128xf32>
    %40 = tpu.matmul %30, %39, %cst_17 {dimension_numbers = #tpu.dot_dimension_numbers<[1], [0], [0], [1], [0, 0, 1, 1], [], []>} : vector<288x128xbf16>, vector<128x128xbf16>, vector<288x128xf32> -> vector<288x128xf32>
    %c0_18 = arith.constant 0 : index
    %c0_19 = arith.constant 0 : index
    %41 = vector.load %arg4[%c0_18, %c0_19] : memref<8x128xf32, #tpu.memory_space<vmem>>, vector<1x128xf32>
    %42 = vector.broadcast %41 : vector<1x128xf32> to vector<288x128xf32>
    %43 = arith.addf %40, %42 : vector<288x128xf32>
    %cst_20 = arith.constant 0.000000e+00 : bf16
    %44 = vector.broadcast %cst_20 : bf16 to vector<288x128xbf16>
    %45 = arith.cmpf oge, %30, %44 : vector<288x128xbf16>
    %cst_21 = arith.constant 2.001950e-01 : bf16
    %46 = vector.broadcast %cst_21 : bf16 to vector<288x128xbf16>
    %47 = arith.mulf %46, %30 : vector<288x128xbf16>
    %48 = arith.select %45, %30, %47 : vector<288x128xi1>, vector<288x128xbf16>
    %c8 = arith.constant 8 : index
    %c0_22 = arith.constant 0 : index
    %49 = vector.load %arg7[%c8, %c0_22] : memref<304x128xbf16, #tpu.memory_space<vmem>>, vector<288x128xbf16>
    tpu.vector_store %arg7[%c8, %c0_22], %48 {strides = array<i32>} : memref<304x128xbf16, #tpu.memory_space<vmem>>, vector<288x128xbf16>,
    %c1 = arith.constant 1 : index
    %c0_23 = arith.constant 0 : index
    %50 = vector.load %arg4[%c1, %c0_23] : memref<8x128xf32, #tpu.memory_space<vmem>>, vector<1x128xf32>
    %c128 = arith.constant 128 : index
    %c0_24 = arith.constant 0 : index
    %51 = vector.load %arg3[%c128, %c0_24] : memref<1664x128xbf16, #tpu.memory_space<vmem>>, vector<128x128xbf16>
    %c7 = arith.constant 7 : index
    %c0_25 = arith.constant 0 : index
    %52 = vector.load %arg7[%c7, %c0_25] : memref<304x128xbf16, #tpu.memory_space<vmem>>, vector<288x128xbf16>
    %cst_26 = arith.constant dense<0.000000e+00> : vector<288x128xf32>
    %53 = tpu.matmul %52, %51, %cst_26 {dimension_numbers = #tpu.dot_dimension_numbers<[1], [0], [0], [1], [0, 0, 1, 1], [], []>} : vector<288x128xbf16>, vector<128x128xbf16>, vector<288x128xf32> -> vector<288x128xf32>
    %54 = vector.broadcast %50 : vector<1x128xf32> to vector<288x128xf32>
    %55 = arith.addf %54, %53 : vector<288x128xf32>
    %c256 = arith.constant 256 : index
    %c0_27 = arith.constant 0 : index
    %56 = vector.load %arg3[%c256, %c0_27] : memref<1664x128xbf16, #tpu.memory_space<vmem>>, vector<128x128xbf16>
    %c8_28 = arith.constant 8 : index
    %c0_29 = arith.constant 0 : index
    %57 = vector.load %arg7[%c8_28, %c0_29] : memref<304x128xbf16, #tpu.memory_space<vmem>>, vector<288x128xbf16>
    %cst_30 = arith.constant dense<0.000000e+00> : vector<288x128xf32>
    %58 = tpu.matmul %57, %56, %cst_30 {dimension_numbers = #tpu.dot_dimension_numbers<[1], [0], [0], [1], [0, 0, 1, 1], [], []>} : vector<288x128xbf16>, vector<128x128xbf16>, vector<288x128xf32> -> vector<288x128xf32>
    %59 = arith.addf %55, %58 : vector<288x128xf32>
    %c384 = arith.constant 384 : index
    %c0_31 = arith.constant 0 : index
    %60 = vector.load %arg3[%c384, %c0_31] : memref<1664x128xbf16, #tpu.memory_space<vmem>>, vector<128x128xbf16>
    %c9 = arith.constant 9 : index
    %c0_32 = arith.constant 0 : index
    %61 = vector.load %arg7[%c9, %c0_32] : memref<304x128xbf16, #tpu.memory_space<vmem>>, vector<288x128xbf16>
    %cst_33 = arith.constant dense<0.000000e+00> : vector<288x128xf32>
    %62 = tpu.matmul %61, %60, %cst_33 {dimension_numbers = #tpu.dot_dimension_numbers<[1], [0], [0], [1], [0, 0, 1, 1], [], []>} : vector<288x128xbf16>, vector<128x128xbf16>, vector<288x128xf32> -> vector<288x128xf32>
    %63 = arith.addf %59, %62 : vector<288x128xf32>
    %64 = arith.mulf %34, %63 : vector<288x128xf32>
    %65 = arith.addf %32, %64 : vector<288x128xf32>
    %cst_34 = arith.constant 0.000000e+00 : f32
    %66 = vector.broadcast %cst_34 : f32 to vector<288x128xf32>
    %67 = arith.cmpf oge, %65, %66 : vector<288x128xf32>
    %cst_35 = arith.constant 2.000000e-01 : f32
    %68 = vector.broadcast %cst_35 : f32 to vector<288x128xf32>
    %69 = arith.mulf %68, %65 : vector<288x128xf32>
    %70 = arith.select %67, %65, %69 : vector<288x128xi1>, vector<288x128xf32>
    %71 = arith.truncf %70 : vector<288x128xf32> to vector<288x128xbf16>
    %c8_36 = arith.constant 8 : index
    %c0_37 = arith.constant 0 : index
    %72 = vector.load %arg7[%c8_36, %c0_37] : memref<304x128xbf16, #tpu.memory_space<vmem>>, vector<288x128xbf16>
    tpu.vector_store %arg7[%c8_36, %c0_37], %71 {strides = array<i32>} : memref<304x128xbf16, #tpu.memory_space<vmem>>, vector<288x128xbf16>,
    %c2 = arith.constant 2 : index
    %c0_38 = arith.constant 0 : index
    %73 = vector.load %arg4[%c2, %c0_38] : memref<8x128xf32, #tpu.memory_space<vmem>>, vector<1x128xf32>
    %c512 = arith.constant 512 : index
    %c0_39 = arith.constant 0 : index
    %74 = vector.load %arg3[%c512, %c0_39] : memref<1664x128xbf16, #tpu.memory_space<vmem>>, vector<128x128xbf16>
    %c6 = arith.constant 6 : index
    %c0_40 = arith.constant 0 : index
    %75 = vector.load %arg7[%c6, %c0_40] : memref<304x128xbf16, #tpu.memory_space<vmem>>, vector<288x128xbf16>
    %cst_41 = arith.constant dense<0.000000e+00> : vector<288x128xf32>
    %76 = tpu.matmul %75, %74, %cst_41 {dimension_numbers = #tpu.dot_dimension_numbers<[1], [0], [0], [1], [0, 0, 1, 1], [], []>} : vector<288x128xbf16>, vector<128x128xbf16>, vector<288x128xf32> -> vector<288x128xf32>
    %77 = vector.broadcast %73 : vector<1x128xf32> to vector<288x128xf32>
    %78 = arith.addf %77, %76 : vector<288x128xf32>
    %c640 = arith.constant 640 : index
    %c0_42 = arith.constant 0 : index
    %79 = vector.load %arg3[%c640, %c0_42] : memref<1664x128xbf16, #tpu.memory_space<vmem>>, vector<128x128xbf16>
    %c8_43 = arith.constant 8 : index
    %c0_44 = arith.constant 0 : index
    %80 = vector.load %arg7[%c8_43, %c0_44] : memref<304x128xbf16, #tpu.memory_space<vmem>>, vector<288x128xbf16>
    %cst_45 = arith.constant dense<0.000000e+00> : vector<288x128xf32>
    %81 = tpu.matmul %80, %79, %cst_45 {dimension_numbers = #tpu.dot_dimension_numbers<[1], [0], [0], [1], [0, 0, 1, 1], [], []>} : vector<288x128xbf16>, vector<128x128xbf16>, vector<288x128xf32> -> vector<288x128xf32>
    %82 = arith.addf %78, %81 : vector<288x128xf32>
    %c768 = arith.constant 768 : index
    %c0_46 = arith.constant 0 : index
    %83 = vector.load %arg3[%c768, %c0_46] : memref<1664x128xbf16, #tpu.memory_space<vmem>>, vector<128x128xbf16>
    %c10 = arith.constant 10 : index
    %c0_47 = arith.constant 0 : index
    %84 = vector.load %arg7[%c10, %c0_47] : memref<304x128xbf16, #tpu.memory_space<vmem>>, vector<288x128xbf16>
    %cst_48 = arith.constant dense<0.000000e+00> : vector<288x128xf32>
    %85 = tpu.matmul %84, %83, %cst_48 {dimension_numbers = #tpu.dot_dimension_numbers<[1], [0], [0], [1], [0, 0, 1, 1], [], []>} : vector<288x128xbf16>, vector<128x128xbf16>, vector<288x128xf32> -> vector<288x128xf32>
    %86 = arith.addf %82, %85 : vector<288x128xf32>
    %87 = arith.addf %43, %86 : vector<288x128xf32>
    %88 = arith.mulf %34, %87 : vector<288x128xf32>
    %89 = arith.addf %32, %88 : vector<288x128xf32>
    %cst_49 = arith.constant 0.000000e+00 : f32
    %90 = vector.broadcast %cst_49 : f32 to vector<288x128xf32>
    %91 = arith.cmpf oge, %89, %90 : vector<288x128xf32>
    %cst_50 = arith.constant 2.000000e-01 : f32
    %92 = vector.broadcast %cst_50 : f32 to vector<288x128xf32>
    %93 = arith.mulf %92, %89 : vector<288x128xf32>
    %94 = arith.select %91, %89, %93 : vector<288x128xi1>, vector<288x128xf32>
    %95 = arith.truncf %94 : vector<288x128xf32> to vector<288x128xbf16>
    %c8_51 = arith.constant 8 : index
    %c0_52 = arith.constant 0 : index
    %96 = vector.load %arg7[%c8_51, %c0_52] : memref<304x128xbf16, #tpu.memory_space<vmem>>, vector<288x128xbf16>
    tpu.vector_store %arg7[%c8_51, %c0_52], %95 {strides = array<i32>} : memref<304x128xbf16, #tpu.memory_space<vmem>>, vector<288x128xbf16>,
    %c3 = arith.constant 3 : index
    %c0_53 = arith.constant 0 : index
    %97 = vector.load %arg4[%c3, %c0_53] : memref<8x128xf32, #tpu.memory_space<vmem>>, vector<1x128xf32>
    %c896 = arith.constant 896 : index
    %c0_54 = arith.constant 0 : index
    %98 = vector.load %arg3[%c896, %c0_54] : memref<1664x128xbf16, #tpu.memory_space<vmem>>, vector<128x128xbf16>
    %c4 = arith.constant 4 : index
    %c0_55 = arith.constant 0 : index
    %99 = vector.load %arg7[%c4, %c0_55] : memref<304x128xbf16, #tpu.memory_space<vmem>>, vector<288x128xbf16>
    %cst_56 = arith.constant dense<0.000000e+00> : vector<288x128xf32>
    %100 = tpu.matmul %99, %98, %cst_56 {dimension_numbers = #tpu.dot_dimension_numbers<[1], [0], [0], [1], [0, 0, 1, 1], [], []>} : vector<288x128xbf16>, vector<128x128xbf16>, vector<288x128xf32> -> vector<288x128xf32>
    %101 = vector.broadcast %97 : vector<1x128xf32> to vector<288x128xf32>
    %102 = arith.addf %101, %100 : vector<288x128xf32>
    %c1024 = arith.constant 1024 : index
    %c0_57 = arith.constant 0 : index
    %103 = vector.load %arg3[%c1024, %c0_57] : memref<1664x128xbf16, #tpu.memory_space<vmem>>, vector<128x128xbf16>
    %c8_58 = arith.constant 8 : index
    %c0_59 = arith.constant 0 : index
    %104 = vector.load %arg7[%c8_58, %c0_59] : memref<304x128xbf16, #tpu.memory_space<vmem>>, vector<288x128xbf16>
    %cst_60 = arith.constant dense<0.000000e+00> : vector<288x128xf32>
    %105 = tpu.matmul %104, %103, %cst_60 {dimension_numbers = #tpu.dot_dimension_numbers<[1], [0], [0], [1], [0, 0, 1, 1], [], []>} : vector<288x128xbf16>, vector<128x128xbf16>, vector<288x128xf32> -> vector<288x128xf32>
    %106 = arith.addf %102, %105 : vector<288x128xf32>
    %c1152 = arith.constant 1152 : index
    %c0_61 = arith.constant 0 : index
    %107 = vector.load %arg3[%c1152, %c0_61] : memref<1664x128xbf16, #tpu.memory_space<vmem>>, vector<128x128xbf16>
    %c12 = arith.constant 12 : index
    %c0_62 = arith.constant 0 : index
    %108 = vector.load %arg7[%c12, %c0_62] : memref<304x128xbf16, #tpu.memory_space<vmem>>, vector<288x128xbf16>
    %cst_63 = arith.constant dense<0.000000e+00> : vector<288x128xf32>
    %109 = tpu.matmul %108, %107, %cst_63 {dimension_numbers = #tpu.dot_dimension_numbers<[1], [0], [0], [1], [0, 0, 1, 1], [], []>} : vector<288x128xbf16>, vector<128x128xbf16>, vector<288x128xf32> -> vector<288x128xf32>
    %110 = arith.addf %106, %109 : vector<288x128xf32>
    %111 = arith.mulf %34, %110 : vector<288x128xf32>
    %112 = arith.addf %32, %111 : vector<288x128xf32>
    %cst_64 = arith.constant 0.000000e+00 : f32
    %113 = vector.broadcast %cst_64 : f32 to vector<288x128xf32>
    %114 = arith.cmpf oge, %112, %113 : vector<288x128xf32>
    %cst_65 = arith.constant 2.000000e-01 : f32
    %115 = vector.broadcast %cst_65 : f32 to vector<288x128xf32>
    %116 = arith.mulf %115, %112 : vector<288x128xf32>
    %117 = arith.select %114, %112, %116 : vector<288x128xi1>, vector<288x128xf32>
    %118 = arith.truncf %117 : vector<288x128xf32> to vector<288x128xbf16>
    %c8_66 = arith.constant 8 : index
    %c0_67 = arith.constant 0 : index
    %119 = vector.load %arg7[%c8_66, %c0_67] : memref<304x128xbf16, #tpu.memory_space<vmem>>, vector<288x128xbf16>
    tpu.vector_store %arg7[%c8_66, %c0_67], %118 {strides = array<i32>} : memref<304x128xbf16, #tpu.memory_space<vmem>>, vector<288x128xbf16>,
    %c4_68 = arith.constant 4 : index
    %c0_69 = arith.constant 0 : index
    %120 = vector.load %arg4[%c4_68, %c0_69] : memref<8x128xf32, #tpu.memory_space<vmem>>, vector<1x128xf32>
    %c1280 = arith.constant 1280 : index
    %c0_70 = arith.constant 0 : index
    %121 = vector.load %arg3[%c1280, %c0_70] : memref<1664x128xbf16, #tpu.memory_space<vmem>>, vector<128x128xbf16>
    %c0_71 = arith.constant 0 : index
    %c0_72 = arith.constant 0 : index
    %122 = vector.load %arg7[%c0_71, %c0_72] : memref<304x128xbf16, #tpu.memory_space<vmem>>, vector<288x128xbf16>
    %cst_73 = arith.constant dense<0.000000e+00> : vector<288x128xf32>
    %123 = tpu.matmul %122, %121, %cst_73 {dimension_numbers = #tpu.dot_dimension_numbers<[1], [0], [0], [1], [0, 0, 1, 1], [], []>} : vector<288x128xbf16>, vector<128x128xbf16>, vector<288x128xf32> -> vector<288x128xf32>
    %124 = vector.broadcast %120 : vector<1x128xf32> to vector<288x128xf32>
    %125 = arith.addf %124, %123 : vector<288x128xf32>
    %c1408 = arith.constant 1408 : index
    %c0_74 = arith.constant 0 : index
    %126 = vector.load %arg3[%c1408, %c0_74] : memref<1664x128xbf16, #tpu.memory_space<vmem>>, vector<128x128xbf16>
    %c8_75 = arith.constant 8 : index
    %c0_76 = arith.constant 0 : index
    %127 = vector.load %arg7[%c8_75, %c0_76] : memref<304x128xbf16, #tpu.memory_space<vmem>>, vector<288x128xbf16>
    %cst_77 = arith.constant dense<0.000000e+00> : vector<288x128xf32>
    %128 = tpu.matmul %127, %126, %cst_77 {dimension_numbers = #tpu.dot_dimension_numbers<[1], [0], [0], [1], [0, 0, 1, 1], [], []>} : vector<288x128xbf16>, vector<128x128xbf16>, vector<288x128xf32> -> vector<288x128xf32>
    %129 = arith.addf %125, %128 : vector<288x128xf32>
    %c1536 = arith.constant 1536 : index
    %c0_78 = arith.constant 0 : index
    %130 = vector.load %arg3[%c1536, %c0_78] : memref<1664x128xbf16, #tpu.memory_space<vmem>>, vector<128x128xbf16>
    %c16 = arith.constant 16 : index
    %c0_79 = arith.constant 0 : index
    %131 = vector.load %arg7[%c16, %c0_79] : memref<304x128xbf16, #tpu.memory_space<vmem>>, vector<288x128xbf16>
    %cst_80 = arith.constant dense<0.000000e+00> : vector<288x128xf32>
    %132 = tpu.matmul %131, %130, %cst_80 {dimension_numbers = #tpu.dot_dimension_numbers<[1], [0], [0], [1], [0, 0, 1, 1], [], []>} : vector<288x128xbf16>, vector<128x128xbf16>, vector<288x128xf32> -> vector<288x128xf32>
    %133 = arith.addf %129, %132 : vector<288x128xf32>
    %134 = arith.addf %87, %133 : vector<288x128xf32>
    %135 = vector.extract_strided_slice %134 {offsets = [16, 0], sizes = [256, 128], strides = [1, 1]} : vector<288x128xf32> to vector<256x128xf32>
    %136 = arith.truncf %135 : vector<256x128xf32> to vector<256x128xbf16>
    %c0_81 = arith.constant 0 : index
    %c0_82 = arith.constant 0 : index
    %c0_83 = arith.constant 0 : index
    %137 = vector.load %arg5[%c0_81, %c0_82, %c0_83] : memref<1x256x128xbf16, #tpu.memory_space<vmem>>, vector<1x256x128xbf16>
    %138 = vector.shape_cast %137 : vector<1x256x128xbf16> to vector<256x128xbf16>
    %139 = vector.shape_cast %136 : vector<256x128xbf16> to vector<1x256x128xbf16>
    tpu.vector_store %arg5[%c0_81, %c0_82, %c0_83], %139 {strides = array<i32>} : memref<1x256x128xbf16, #tpu.memory_space<vmem>>, vector<1x256x128xbf16>,
    return
  }
  func.func @transform_1(%arg0: i32, %arg1: i32) -> (i32, i32) {
    %c0_i32 = arith.constant 0 : i32
    %c0_i32_0 = arith.constant 0 : i32
    %c0_i32_1 = arith.constant 0 : i32
    return %c0_i32, %c0_i32_0 : i32, i32
  }
  func.func @transform_2(%arg0: i32, %arg1: i32) -> (i32, i32) {
    %c0_i32 = arith.constant 0 : i32
    %c0_i32_0 = arith.constant 0 : i32
    %c0_i32_1 = arith.constant 0 : i32
    return %c0_i32, %c0_i32_0 : i32, i32
  }
  func.func @transform_3(%arg0: i32, %arg1: i32) -> (i32, i32, i32) {
    %c0_i32 = arith.constant 0 : i32
    %c0_i32_0 = arith.constant 0 : i32
    return %arg0, %arg1, %c0_i32 : i32, i32, i32
  }
}

</mosaic_0001>

<bundles_post_ra>
// kernel: ublock_forward.1
= control target key start
LH: loop header
LB: loop body
LE: loop exit
PB: predicated region body
PF: predicated region fallthrough
CT: control target
= control target key end

     0   :  { %s8834_s12 = smov 0   ;;  %s8836_s13 = smov 0   ;;  %s11236_s0 = inlined_call_operand.vmem [shape: bf16[2,800,384], index: 0, kind: input, shape index: {}]   ;;  %s11237_s1 = inlined_call_operand.vmem [shape: bf16[1664,128], index: 1, kind: input, shape index: {}]   ;;  %s11238_s2 = inlined_call_operand.vmem [shape: f32[8,128], index: 2, kind: input, shape index: {}]   ;;  %s11239_s3 = inlined_call_operand.vmem [shape: bf16[2,768,128], index: 3, kind: output, shape index: {}]  }
   0x1   :  { %s8838_s14 = smov 0   ;;  %s8840_s15 = smov 0  }
   0x2   :  { %s8842_s16 = smov 0  }
   0x3 LB: > { %s22_s17 = sadd.s32 1, %s8803_s14  ;;  %s25_s18 = sadd.s32 1, %s8807_s15  ;;  %s8811_s16 = sphi %s8842_s16, %s13_s16   ;;  %s8807_s15 = sphi %s8840_s15, %s11702_s15   ;;  %s8803_s14 = sphi %s8838_s14, %s11701_s14   ;;  %s8799_s13 = sphi %s8836_s13, %s11700_s13   ;;  %s8795_s12 = sphi %s8834_s12, %s11699_s12  }
   0x4   : > { %p23_p0 = scmp.ge.s32.totalorder %s22_s17, 3  ;;  %p6482_p1 = scmp.ge.s32.totalorder %s8811_s16, 1 }
   0x5   : > { %p117_p2 = scmp.lt.s32.totalorder %s8811_s16, 7 }
   0x6   : > { %s11704_s17 = smov (%p23_p0, %s22_s17), 0  ;;  %s11706_s18 = smov (!%p23_p0, %s25_s18), %s8807_s15 }
   0x7   : > { %p118_p3 = pnand %p6482_p1, %p117_p2  ;;  %p27_p4 = scmp.ge.s32.totalorder %s11706_s18, 2 }
   0x9   : > { %s11708_s18 = smov (%p27_p4, %s11706_s18), 0  ;;  %121 = sbr.rel (%p118_p3) target bundleno = 1433 (0x599), region = 28 }
   0xe   : > { %s6483_s19 = sshll.u32 %s8795_s12, 5  ;;  %p139_p5 = scmp.lt.s32.totalorder %s8799_s13, 1 }
   0xf   : > { %p141_p6 = scmp.lt.s32.totalorder %s6483_s19, 95  ;;  %s149_s20 = smul.u32 3, %s8799_s13 }
  0x10   : > { %s140_s21 = scalar_select %p139_p5, %s8799_s13, 1 }
  0x11   : > { %s11710_s19 = smov (!%p141_p6, %s6483_s19), 95  ;;  %s8873_s23 = sadd.s32 %s8795_s12, %s149_s20 }
  0x12   : > { %s8684_s22 = smul.u32 96, %s140_s21  ;;  %p151_p7 = scmp.lt.s32.totalorder %s8873_s23, 0 }
  0x13   : > { %s152_s24 = ssub.s32 0, %s8873_s23  ;;  %p6488_p9 = scmp.ne.s32.totalorder %s8873_s23, 0 }
  0x14   : > { %s144_s25 = sadd.s32 %s8684_s22, %s11710_s19  ;;  %s6485_s26 = smin.u32 %s152_s24, %s8873_s23 }
  0x15   : > { %s6484_s27 = sshll.u32 %s144_s25, 2  ;;  %s154_s28 = sand.u32 1, %s6485_s26  }
  0x16   : > { %s8881_s4 = scalar_lea.vmem %s11239_s3, %s6484_s27  ;;  %s155_s5 = ssub.s32 0, %s154_s28 }
  0x17   : > { %s11712_s5 = smov (!%p151_p7, %s155_s5), %s154_s28  ;;  %166 = sbr.rel (%p6488_p9) target bundleno = 89 (0x59), region = 32 }
  0x18   : > { %p6487_p8 = scmp.lt.s32.totalorder %s11712_s5, 0  ;;  %s161_s6 = sadd.s32 2, %s11712_s5 }
  0x19   : > { %s6489_s7 = sshll.u32 (!%p6488_p9), %s8795_s12, 8  ;;  %s171_s8 = smul.u32 (!%p6488_p9), 300, %s8799_s13 }
  0x1a   : > { %s11714_s6 = smov (!%p6487_p8, %s161_s6), %s11712_s5  ;;  %s168_s9 = sshra.s32 (!%p6488_p9), %s6489_s7, 3 }
  0x1b   : > { %s7421_s10 = smul.u32 (!%p6488_p9), 432, %s11714_s6  ;;  %s178_s26 = scalar_lea.sflag (!%p6488_p9), [#allocation4], %s11714_s6 }
  0x1c   : > { %s170_s11 = smul.u32 3, %s168_s9 }
  0x1d   : > { %s8897_s25 = scalar_lea.vmem [#allocation2], %s7421_s10 }
  0x1e   : > { %s172_s19 = sadd.s32 %s171_s8, %s170_s11 }
  0x1f   : > { %s6490_s20 = sshll.u32 %s172_s19, 2 }
  0x20   : > { %s8892_s24 = scalar_lea.vmem %s11236_s0, %s6490_s20 }
  0x21   : > { %v189_v0 = vld [vmem:[%s8892_s24] sm:$0xff]  ;;  %v191_v1 = vld [vmem:[%s8892_s24 + $0x8] sm:$0xff]  ;;  %v193_v2 = vld [vmem:[%s8892_s24 + $0x10] sm:$0xff] }
  0x22   : > { %190 = vst [vmem:[%s8897_s25] sm:$0xff] %v189_v0  ;;  %v195_v3 = vld [vmem:[%s8892_s24 + $0x18] sm:$0xff]  ;;  %v197_v4 = vld [vmem:[%s8892_s24 + $0x20] sm:$0xff]  ;;  %v199_v5 = vld [vmem:[%s8892_s24 + $0x28] sm:$0xff] }
  0x23   : > { %192 = vst [vmem:[%s8897_s25 + $0x8] sm:$0xff] %v191_v1  ;;  %v201_v6 = vld [vmem:[%s8892_s24 + $0x30] sm:$0xff]  ;;  %v203_v7 = vld [vmem:[%s8892_s24 + $0x38] sm:$0xff]  ;;  %v205_v8 = vld [vmem:[%s8892_s24 + $0x40] sm:$0xff] }
  0x24   : > { %194 = vst [vmem:[%s8897_s25 + $0x10] sm:$0xff] %v193_v2  ;;  %v207_v9 = vld [vmem:[%s8892_s24 + $0x48] sm:$0xff]  ;;  %v209_v10 = vld [vmem:[%s8892_s24 + $0x50] sm:$0xff]  ;;  %v211_v11 = vld [vmem:[%s8892_s24 + $0x58] sm:$0xff] }
  0x25   : > { %196 = vst [vmem:[%s8897_s25 + $0x18] sm:$0xff] %v195_v3  ;;  %v213_v12 = vld [vmem:[%s8892_s24 + $0x60] sm:$0xff]  ;;  %v215_v13 = vld [vmem:[%s8892_s24 + $0x68] sm:$0xff]  ;;  %v217_v14 = vld [vmem:[%s8892_s24 + $0x70] sm:$0xff] }
  0x26   : > { %198 = vst [vmem:[%s8897_s25 + $0x20] sm:$0xff] %v197_v4  ;;  %v219_v15 = vld [vmem:[%s8892_s24 + $0x78] sm:$0xff]  ;;  %v221_v16 = vld [vmem:[%s8892_s24 + $0x80] sm:$0xff]  ;;  %v223_v17 = vld [vmem:[%s8892_s24 + $0x88] sm:$0xff] }
  0x27   : > { %200 = vst [vmem:[%s8897_s25 + $0x28] sm:$0xff] %v199_v5  ;;  %v225_v18 = vld [vmem:[%s8892_s24 + $0x90] sm:$0xff]  ;;  %v227_v19 = vld [vmem:[%s8892_s24 + $0x98] sm:$0xff]  ;;  %v229_v20 = vld [vmem:[%s8892_s24 + $0xa0] sm:$0xff] }
  0x28   : > { %202 = vst [vmem:[%s8897_s25 + $0x30] sm:$0xff] %v201_v6  ;;  %v231_v21 = vld [vmem:[%s8892_s24 + $0xa8] sm:$0xff]  ;;  %v233_v22 = vld [vmem:[%s8892_s24 + $0xb0] sm:$0xff]  ;;  %v235_v23 = vld [vmem:[%s8892_s24 + $0xb8] sm:$0xff] }
  0x29   : > { %204 = vst [vmem:[%s8897_s25 + $0x38] sm:$0xff] %v203_v7  ;;  %v237_v24 = vld [vmem:[%s8892_s24 + $0xc0] sm:$0xff]  ;;  %v239_v25 = vld [vmem:[%s8892_s24 + $0xc8] sm:$0xff]  ;;  %v241_v26 = vld [vmem:[%s8892_s24 + $0xd0] sm:$0xff] }
  0x2a   : > { %206 = vst [vmem:[%s8897_s25 + $0x40] sm:$0xff] %v205_v8  ;;  %v243_v27 = vld [vmem:[%s8892_s24 + $0xd8] sm:$0xff]  ;;  %v245_v28 = vld [vmem:[%s8892_s24 + $0xe0] sm:$0xff]  ;;  %v247_v29 = vld [vmem:[%s8892_s24 + $0xe8] sm:$0xff] }
  0x2b   : > { %208 = vst [vmem:[%s8897_s25 + $0x48] sm:$0xff] %v207_v9  ;;  %v249_v30 = vld [vmem:[%s8892_s24 + $0xf0] sm:$0xff]  ;;  %v251_v31 = vld [vmem:[%s8892_s24 + $0xf8] sm:$0xff]  ;;  %v253_v32 = vld [vmem:[%s8892_s24 + $0x100] sm:$0xff] }
  0x2c   : > { %210 = vst [vmem:[%s8897_s25 + $0x50] sm:$0xff] %v209_v10  ;;  %v255_v33 = vld [vmem:[%s8892_s24 + $0x108] sm:$0xff]  ;;  %v257_v34 = vld [vmem:[%s8892_s24 + $0x110] sm:$0xff]  ;;  %v259_v35 = vld [vmem:[%s8892_s24 + $0x118] sm:$0xff] }
  0x2d   : > { %212 = vst [vmem:[%s8897_s25 + $0x58] sm:$0xff] %v211_v11  ;;  %v261_v36 = vld [vmem:[%s8892_s24 + $0x120] sm:$0xff]  ;;  %v263_v37 = vld [vmem:[%s8892_s24 + $0x128] sm:$0xff]  ;;  %v265_v38 = vld [vmem:[%s8892_s24 + $0x130] sm:$0xff] }
  0x2e   : > { %214 = vst [vmem:[%s8897_s25 + $0x60] sm:$0xff] %v213_v12  ;;  %v267_v39 = vld [vmem:[%s8892_s24 + $0x138] sm:$0xff]  ;;  %v269_v40 = vld [vmem:[%s8892_s24 + $0x140] sm:$0xff]  ;;  %v271_v41 = vld [vmem:[%s8892_s24 + $0x148] sm:$0xff] }
  0x2f   : > { %216 = vst [vmem:[%s8897_s25 + $0x68] sm:$0xff] %v215_v13  ;;  %v273_v42 = vld [vmem:[%s8892_s24 + $0x150] sm:$0xff]  ;;  %v275_v43 = vld [vmem:[%s8892_s24 + $0x158] sm:$0xff]  ;;  %v277_v44 = vld [vmem:[%s8892_s24 + $0x160] sm:$0xff] }
  0x30   : > { %218 = vst [vmem:[%s8897_s25 + $0x70] sm:$0xff] %v217_v14  ;;  %v279_v45 = vld [vmem:[%s8892_s24 + $0x168] sm:$0xff]  ;;  %v281_v46 = vld [vmem:[%s8892_s24 + $0x170] sm:$0xff]  ;;  %v283_v47 = vld [vmem:[%s8892_s24 + $0x178] sm:$0xff] }
  0x31   : > { %220 = vst [vmem:[%s8897_s25 + $0x78] sm:$0xff] %v219_v15  ;;  %v285_v48 = vld [vmem:[%s8892_s24 + $0x180] sm:$0xff]  ;;  %v287_v49 = vld [vmem:[%s8892_s24 + $0x188] sm:$0xff]  ;;  %v289_v50 = vld [vmem:[%s8892_s24 + $0x190] sm:$0xff] }
  0x32   : > { %222 = vst [vmem:[%s8897_s25 + $0x80] sm:$0xff] %v221_v16  ;;  %v291_v51 = vld [vmem:[%s8892_s24 + $0x198] sm:$0xff]  ;;  %v293_v52 = vld [vmem:[%s8892_s24 + $0x1a0] sm:$0xff]  ;;  %v295_v53 = vld [vmem:[%s8892_s24 + $0x1a8] sm:$0xff] }
  0x33   : > { %224 = vst [vmem:[%s8897_s25 + $0x88] sm:$0xff] %v223_v17 }
  0x34   : > { %226 = vst [vmem:[%s8897_s25 + $0x90] sm:$0xff] %v225_v18 }
  0x35   : > { %228 = vst [vmem:[%s8897_s25 + $0x98] sm:$0xff] %v227_v19 }
  0x36   : > { %230 = vst [vmem:[%s8897_s25 + $0xa0] sm:$0xff] %v229_v20 }
  0x37   : > { %232 = vst [vmem:[%s8897_s25 + $0xa8] sm:$0xff] %v231_v21 }
  0x38   : > { %234 = vst [vmem:[%s8897_s25 + $0xb0] sm:$0xff] %v233_v22 }
  0x39   : > { %236 = vst [vmem:[%s8897_s25 + $0xb8] sm:$0xff] %v235_v23 }
  0x3a   : > { %238 = vst [vmem:[%s8897_s25 + $0xc0] sm:$0xff] %v237_v24 }
  0x3b   : > { %240 = vst [vmem:[%s8897_s25 + $0xc8] sm:$0xff] %v239_v25 }
  0x3c   : > { %242 = vst [vmem:[%s8897_s25 + $0xd0] sm:$0xff] %v241_v26 }
  0x3d   : > { %244 = vst [vmem:[%s8897_s25 + $0xd8] sm:$0xff] %v243_v27 }
  0x3e   : > { %246 = vst [vmem:[%s8897_s25 + $0xe0] sm:$0xff] %v245_v28 }
  0x3f   : > { %248 = vst [vmem:[%s8897_s25 + $0xe8] sm:$0xff] %v247_v29 }
  0x40   : > { %250 = vst [vmem:[%s8897_s25 + $0xf0] sm:$0xff] %v249_v30 }
  0x41   : > { %252 = vst [vmem:[%s8897_s25 + $0xf8] sm:$0xff] %v251_v31 }
  0x42   : > { %254 = vst [vmem:[%s8897_s25 + $0x100] sm:$0xff] %v253_v32 }
  0x43   : > { %256 = vst [vmem:[%s8897_s25 + $0x108] sm:$0xff] %v255_v33 }
  0x44   : > { %258 = vst [vmem:[%s8897_s25 + $0x110] sm:$0xff] %v257_v34 }
  0x45   : > { %260 = vst [vmem:[%s8897_s25 + $0x118] sm:$0xff] %v259_v35 }
  0x46   : > { %262 = vst [vmem:[%s8897_s25 + $0x120] sm:$0xff] %v261_v36 }
  0x47   : > { %264 = vst [vmem:[%s8897_s25 + $0x128] sm:$0xff] %v263_v37 }
  0x48   : > { %266 = vst [vmem:[%s8897_s25 + $0x130] sm:$0xff] %v265_v38 }
  0x49   : > { %268 = vst [vmem:[%s8897_s25 + $0x138] sm:$0xff] %v267_v39 }
  0x4a   : > { %270 = vst [vmem:[%s8897_s25 + $0x140] sm:$0xff] %v269_v40 }
  0x4b   : > { %272 = vst [vmem:[%s8897_s25 + $0x148] sm:$0xff] %v271_v41 }
  0x4c   : > { %274 = vst [vmem:[%s8897_s25 + $0x150] sm:$0xff] %v273_v42 }
  0x4d   : > { %276 = vst [vmem:[%s8897_s25 + $0x158] sm:$0xff] %v275_v43 }
  0x4e   : > { %278 = vst [vmem:[%s8897_s25 + $0x160] sm:$0xff] %v277_v44 }
  0x4f   : > { %280 = vst [vmem:[%s8897_s25 + $0x168] sm:$0xff] %v279_v45 }
  0x50   : > { %282 = vst [vmem:[%s8897_s25 + $0x170] sm:$0xff] %v281_v46 }
  0x51   : > { %284 = vst [vmem:[%s8897_s25 + $0x178] sm:$0xff] %v283_v47 }
  0x52   : > { %286 = vst [vmem:[%s8897_s25 + $0x180] sm:$0xff] %v285_v48 }
  0x53   : > { %288 = vst [vmem:[%s8897_s25 + $0x188] sm:$0xff] %v287_v49 }
  0x54   : > { %290 = vst [vmem:[%s8897_s25 + $0x190] sm:$0xff] %v289_v50 }
  0x55   : > { %292 = vst [vmem:[%s8897_s25 + $0x198] sm:$0xff] %v291_v51 }
  0x56   : > { %294 = vst [vmem:[%s8897_s25 + $0x1a0] sm:$0xff] %v293_v52 }
  0x57   : > { %296 = vst [vmem:[%s8897_s25 + $0x1a8] sm:$0xff] %v295_v53 }
  0x58   : > { %302 = vsyncadd %s178_s26, 6912 }
  0x59 PF: > { %s303_s27 = sadd.s32 1, %s8873_s23 }
  0x5a   : > { %p6492_p10 = scmp.ge.s32.totalorder %s303_s27, 6 }
  0x5b   : > { %s308_s28 = sadd.s32 (!%p6492_p10), 1, %s8795_s12  ;;  %s310_s29 = sadd.s32 (!%p6492_p10), 1, %s8799_s13 }
  0x5c   : > { %307 = sbr.rel (%p6492_p10) target bundleno = 161 (0xa1), region = 55  ;;  %p309_p11 = scmp.eq.s32.totalorder (!%p6492_p10), %s308_s28, 3 }
  0x5d   : > { %s313_s30 = ssub.s32 (!%p6492_p10), 1, %s11714_s6 }
  0x5e   : > { %s7422_s9 = smul.u32 (!%p6492_p10), 432, %s313_s30 }
  0x60   : > { %s9020_s12 = scalar_lea.vmem (!%p6492_p10), [#allocation2], %s7422_s9 }
  0x61   : > { %s11716_s29 = smov (!%p309_p11, %s310_s29), %s8799_s13  ;;  %s11718_s28 = smov (%p309_p11, %s308_s28), 0 }
  0x62   : > { %s6493_s5 = sshll.u32 %s11718_s28, 8  ;;  %s318_s7 = smul.u32 300, %s11716_s29 }
  0x63   : > { %s315_s8 = sshra.s32 %s6493_s5, 3  ;;  %s325_s13 = scalar_lea.sflag [#allocation4], %s313_s30 }
  0x64   : > { %s317_s10 = smul.u32 3, %s315_s8 }
  0x66   : > { %s319_s23 = sadd.s32 %s318_s7, %s317_s10 }
  0x67   : > { %s6494_s11 = sshll.u32 %s319_s23, 2 }
  0x68   : > { %s9015_s21 = scalar_lea.vmem %s11236_s0, %s6494_s11 }
  0x69   : > { %v336_v54 = vld [vmem:[%s9015_s21] sm:$0xff]  ;;  %v338_v55 = vld [vmem:[%s9015_s21 + $0x8] sm:$0xff]  ;;  %v340_v56 = vld [vmem:[%s9015_s21 + $0x10] sm:$0xff] }
  0x6a   : > { %337 = vst [vmem:[%s9020_s12] sm:$0xff] %v336_v54  ;;  %v342_v57 = vld [vmem:[%s9015_s21 + $0x18] sm:$0xff]  ;;  %v344_v58 = vld [vmem:[%s9015_s21 + $0x20] sm:$0xff]  ;;  %v346_v59 = vld [vmem:[%s9015_s21 + $0x28] sm:$0xff] }
  0x6b   : > { %339 = vst [vmem:[%s9020_s12 + $0x8] sm:$0xff] %v338_v55  ;;  %v348_v60 = vld [vmem:[%s9015_s21 + $0x30] sm:$0xff]  ;;  %v350_v61 = vld [vmem:[%s9015_s21 + $0x38] sm:$0xff]  ;;  %v352_v62 = vld [vmem:[%s9015_s21 + $0x40] sm:$0xff] }
  0x6c   : > { %341 = vst [vmem:[%s9020_s12 + $0x10] sm:$0xff] %v340_v56  ;;  %v354_v63 = vld [vmem:[%s9015_s21 + $0x48] sm:$0xff]  ;;  %v356_v0 = vld [vmem:[%s9015_s21 + $0x50] sm:$0xff]  ;;  %v358_v1 = vld [vmem:[%s9015_s21 + $0x58] sm:$0xff] }
  0x6d   : > { %343 = vst [vmem:[%s9020_s12 + $0x18] sm:$0xff] %v342_v57  ;;  %v360_v2 = vld [vmem:[%s9015_s21 + $0x60] sm:$0xff]  ;;  %v362_v3 = vld [vmem:[%s9015_s21 + $0x68] sm:$0xff]  ;;  %v364_v4 = vld [vmem:[%s9015_s21 + $0x70] sm:$0xff] }
  0x6e   : > { %345 = vst [vmem:[%s9020_s12 + $0x20] sm:$0xff] %v344_v58  ;;  %v366_v5 = vld [vmem:[%s9015_s21 + $0x78] sm:$0xff]  ;;  %v368_v6 = vld [vmem:[%s9015_s21 + $0x80] sm:$0xff]  ;;  %v370_v7 = vld [vmem:[%s9015_s21 + $0x88] sm:$0xff] }
  0x6f   : > { %347 = vst [vmem:[%s9020_s12 + $0x28] sm:$0xff] %v346_v59  ;;  %v372_v8 = vld [vmem:[%s9015_s21 + $0x90] sm:$0xff]  ;;  %v374_v9 = vld [vmem:[%s9015_s21 + $0x98] sm:$0xff]  ;;  %v376_v10 = vld [vmem:[%s9015_s21 + $0xa0] sm:$0xff] }
  0x70   : > { %349 = vst [vmem:[%s9020_s12 + $0x30] sm:$0xff] %v348_v60  ;;  %v378_v11 = vld [vmem:[%s9015_s21 + $0xa8] sm:$0xff]  ;;  %v380_v12 = vld [vmem:[%s9015_s21 + $0xb0] sm:$0xff]  ;;  %v382_v13 = vld [vmem:[%s9015_s21 + $0xb8] sm:$0xff] }
  0x71   : > { %351 = vst [vmem:[%s9020_s12 + $0x38] sm:$0xff] %v350_v61  ;;  %v384_v14 = vld [vmem:[%s9015_s21 + $0xc0] sm:$0xff]  ;;  %v386_v15 = vld [vmem:[%s9015_s21 + $0xc8] sm:$0xff]  ;;  %v388_v16 = vld [vmem:[%s9015_s21 + $0xd0] sm:$0xff] }
  0x72   : > { %353 = vst [vmem:[%s9020_s12 + $0x40] sm:$0xff] %v352_v62  ;;  %v390_v17 = vld [vmem:[%s9015_s21 + $0xd8] sm:$0xff]  ;;  %v392_v18 = vld [vmem:[%s9015_s21 + $0xe0] sm:$0xff]  ;;  %v394_v19 = vld [vmem:[%s9015_s21 + $0xe8] sm:$0xff] }
  0x73   : > { %355 = vst [vmem:[%s9020_s12 + $0x48] sm:$0xff] %v354_v63  ;;  %v396_v20 = vld [vmem:[%s9015_s21 + $0xf0] sm:$0xff]  ;;  %v398_v21 = vld [vmem:[%s9015_s21 + $0xf8] sm:$0xff]  ;;  %v400_v22 = vld [vmem:[%s9015_s21 + $0x100] sm:$0xff] }
  0x74   : > { %357 = vst [vmem:[%s9020_s12 + $0x50] sm:$0xff] %v356_v0  ;;  %v402_v23 = vld [vmem:[%s9015_s21 + $0x108] sm:$0xff]  ;;  %v404_v24 = vld [vmem:[%s9015_s21 + $0x110] sm:$0xff]  ;;  %v406_v25 = vld [vmem:[%s9015_s21 + $0x118] sm:$0xff] }
  0x75   : > { %359 = vst [vmem:[%s9020_s12 + $0x58] sm:$0xff] %v358_v1  ;;  %v408_v26 = vld [vmem:[%s9015_s21 + $0x120] sm:$0xff]  ;;  %v410_v27 = vld [vmem:[%s9015_s21 + $0x128] sm:$0xff]  ;;  %v412_v28 = vld [vmem:[%s9015_s21 + $0x130] sm:$0xff] }
  0x76   : > { %361 = vst [vmem:[%s9020_s12 + $0x60] sm:$0xff] %v360_v2  ;;  %v414_v29 = vld [vmem:[%s9015_s21 + $0x138] sm:$0xff]  ;;  %v416_v30 = vld [vmem:[%s9015_s21 + $0x140] sm:$0xff]  ;;  %v418_v31 = vld [vmem:[%s9015_s21 + $0x148] sm:$0xff] }
  0x77   : > { %363 = vst [vmem:[%s9020_s12 + $0x68] sm:$0xff] %v362_v3  ;;  %v420_v32 = vld [vmem:[%s9015_s21 + $0x150] sm:$0xff]  ;;  %v422_v33 = vld [vmem:[%s9015_s21 + $0x158] sm:$0xff]  ;;  %v424_v34 = vld [vmem:[%s9015_s21 + $0x160] sm:$0xff] }
  0x78   : > { %365 = vst [vmem:[%s9020_s12 + $0x70] sm:$0xff] %v364_v4  ;;  %v426_v35 = vld [vmem:[%s9015_s21 + $0x168] sm:$0xff]  ;;  %v428_v36 = vld [vmem:[%s9015_s21 + $0x170] sm:$0xff]  ;;  %v430_v37 = vld [vmem:[%s9015_s21 + $0x178] sm:$0xff] }
  0x79   : > { %367 = vst [vmem:[%s9020_s12 + $0x78] sm:$0xff] %v366_v5  ;;  %v432_v38 = vld [vmem:[%s9015_s21 + $0x180] sm:$0xff]  ;;  %v434_v39 = vld [vmem:[%s9015_s21 + $0x188] sm:$0xff]  ;;  %v436_v40 = vld [vmem:[%s9015_s21 + $0x190] sm:$0xff] }
  0x7a   : > { %369 = vst [vmem:[%s9020_s12 + $0x80] sm:$0xff] %v368_v6  ;;  %v438_v41 = vld [vmem:[%s9015_s21 + $0x198] sm:$0xff]  ;;  %v440_v42 = vld [vmem:[%s9015_s21 + $0x1a0] sm:$0xff]  ;;  %v442_v43 = vld [vmem:[%s9015_s21 + $0x1a8] sm:$0xff] }
  0x7b   : > { %371 = vst [vmem:[%s9020_s12 + $0x88] sm:$0xff] %v370_v7 }
  0x7c   : > { %373 = vst [vmem:[%s9020_s12 + $0x90] sm:$0xff] %v372_v8 }
  0x7d   : > { %375 = vst [vmem:[%s9020_s12 + $0x98] sm:$0xff] %v374_v9 }
  0x7e   : > { %377 = vst [vmem:[%s9020_s12 + $0xa0] sm:$0xff] %v376_v10 }
  0x7f   : > { %379 = vst [vmem:[%s9020_s12 + $0xa8] sm:$0xff] %v378_v11 }
  0x80   : > { %381 = vst [vmem:[%s9020_s12 + $0xb0] sm:$0xff] %v380_v12 }
  0x81   : > { %383 = vst [vmem:[%s9020_s12 + $0xb8] sm:$0xff] %v382_v13 }
  0x82   : > { %385 = vst [vmem:[%s9020_s12 + $0xc0] sm:$0xff] %v384_v14 }
  0x83   : > { %387 = vst [vmem:[%s9020_s12 + $0xc8] sm:$0xff] %v386_v15 }
  0x84   : > { %389 = vst [vmem:[%s9020_s12 + $0xd0] sm:$0xff] %v388_v16 }
  0x85   : > { %391 = vst [vmem:[%s9020_s12 + $0xd8] sm:$0xff] %v390_v17 }
  0x86   : > { %393 = vst [vmem:[%s9020_s12 + $0xe0] sm:$0xff] %v392_v18 }
  0x87   : > { %395 = vst [vmem:[%s9020_s12 + $0xe8] sm:$0xff] %v394_v19 }
  0x88   : > { %397 = vst [vmem:[%s9020_s12 + $0xf0] sm:$0xff] %v396_v20 }
  0x89   : > { %399 = vst [vmem:[%s9020_s12 + $0xf8] sm:$0xff] %v398_v21 }
  0x8a   : > { %401 = vst [vmem:[%s9020_s12 + $0x100] sm:$0xff] %v400_v22 }
  0x8b   : > { %403 = vst [vmem:[%s9020_s12 + $0x108] sm:$0xff] %v402_v23 }
  0x8c   : > { %405 = vst [vmem:[%s9020_s12 + $0x110] sm:$0xff] %v404_v24 }
  0x8d   : > { %407 = vst [vmem:[%s9020_s12 + $0x118] sm:$0xff] %v406_v25 }
  0x8e   : > { %409 = vst [vmem:[%s9020_s12 + $0x120] sm:$0xff] %v408_v26 }
  0x8f   : > { %411 = vst [vmem:[%s9020_s12 + $0x128] sm:$0xff] %v410_v27 }
  0x90   : > { %413 = vst [vmem:[%s9020_s12 + $0x130] sm:$0xff] %v412_v28 }
  0x91   : > { %415 = vst [vmem:[%s9020_s12 + $0x138] sm:$0xff] %v414_v29 }
  0x92   : > { %417 = vst [vmem:[%s9020_s12 + $0x140] sm:$0xff] %v416_v30 }
  0x93   : > { %419 = vst [vmem:[%s9020_s12 + $0x148] sm:$0xff] %v418_v31 }
  0x94   : > { %421 = vst [vmem:[%s9020_s12 + $0x150] sm:$0xff] %v420_v32 }
  0x95   : > { %423 = vst [vmem:[%s9020_s12 + $0x158] sm:$0xff] %v422_v33 }
  0x96   : > { %425 = vst [vmem:[%s9020_s12 + $0x160] sm:$0xff] %v424_v34 }
  0x97   : > { %427 = vst [vmem:[%s9020_s12 + $0x168] sm:$0xff] %v426_v35 }
  0x98   : > { %429 = vst [vmem:[%s9020_s12 + $0x170] sm:$0xff] %v428_v36 }
  0x99   : > { %431 = vst [vmem:[%s9020_s12 + $0x178] sm:$0xff] %v430_v37 }
  0x9a   : > { %433 = vst [vmem:[%s9020_s12 + $0x180] sm:$0xff] %v432_v38 }
  0x9b   : > { %435 = vst [vmem:[%s9020_s12 + $0x188] sm:$0xff] %v434_v39 }
  0x9c   : > { %437 = vst [vmem:[%s9020_s12 + $0x190] sm:$0xff] %v436_v40 }
  0x9d   : > { %439 = vst [vmem:[%s9020_s12 + $0x198] sm:$0xff] %v438_v41 }
  0x9e   : > { %441 = vst [vmem:[%s9020_s12 + $0x1a0] sm:$0xff] %v440_v42 }
  0x9f   : > { %443 = vst [vmem:[%s9020_s12 + $0x1a8] sm:$0xff] %v442_v43 }
  0xa0   : > { %449 = vsyncadd %s325_s13, 6912 }
  0xa1 PF: > { %s7423_s22 = smul.u32 432, %s11714_s6  ;;  %s454_s25 = scalar_lea.sflag [#allocation4], %s11714_s6 }
  0xa3   : > { %s9130_s24 = scalar_lea.vmem [#allocation2], %s7423_s22 }
  0xa4   : > { %8791 = dma.done.wait %s454_s25, 6912 }
  0xa5   : > { %8792 = vsyncadd %s454_s25, 4294960384  ;;  %v7449_v44 = vld [vmem:[%s11237_s1 + $0x38] sm:$0xff]  ;;  %v7448_v45 = vld [vmem:[%s11237_s1 + $0x30] sm:$0xff]  ;;  %vm2103_vm9 = vsmask.f32 7424 }
  0xa6   : > { %8660 = vmatpush.bf16.msra.mxu1 %v7449_v44  ;;  %8661 = vmatpush.bf16.msra.mxu2 %v7449_v44  ;;  %v7447_v46 = vld [vmem:[%s11237_s1 + $0x28] sm:$0xff]  ;;  %v7446_v47 = vld [vmem:[%s11237_s1 + $0x20] sm:$0xff]  ;;  %v7445_v48 = vld [vmem:[%s11237_s1 + $0x18] sm:$0xff] }
  0xa7   : > { %8662 = vmatpush.bf16.msra.mxu3 %v7449_v44  ;;  %851 = vmatpush.bf16.msra.mxu0 %v7449_v44  ;;  %v7444_v49 = vld [vmem:[%s11237_s1 + $0x10] sm:$0xff]  ;;  %v7443_v50 = vld [vmem:[%s11237_s1 + $0x8] sm:$0xff]  ;;  %v7442_v51 = vld [vmem:[%s11237_s1] sm:$0xff] }
  0xa8   : > { %v6519_v52 = vld [vmem:[%s9130_s24 + $0x78] sm:$0xf]  ;;  %v7429_v53 = vld [vmem:[%s9130_s24 + $0x80] sm:$0xf0]  ;;  %v6539_v54 = vld [vmem:[%s9130_s24 + $0xf0] sm:$0xf] }
  0xa9   : > { %v7434_v55 = vld [vmem:[%s9130_s24 + $0xf8] sm:$0xf0]  ;;  %v6520_v58 = vor.u32 %v7429_v53, %v6519_v52  ;;  %v6559_v60 = vld [vmem:[%s9130_s24 + $0x168] sm:$0xf]  ;;  %v7464_v61 = vld [vmem:[%s11237_s1 + $0xb0] sm:$0xff] }
  0xaa   : > { %8663 = vmatpush.bf16.msra.mxu1 %v7448_v45  ;;  %8664 = vmatpush.bf16.msra.mxu2 %v7448_v45  ;;  %v7465_v56 = vld [vmem:[%s11237_s1 + $0xb8] sm:$0xff]  ;;  %v6540_v59 = vor.u32 %v7434_v55, %v6539_v54  ;;  %v7456_v62 = vld [vmem:[%s11237_s1 + $0x70] sm:$0xff]  ;;  %v7463_v2 = vld [vmem:[%s11237_s1 + $0xa8] sm:$0xff] }
  0xab   : > { %8665 = vmatpush.bf16.msra.mxu3 %v7448_v45  ;;  %852 = vmatpush.bf16.msra.mxu0 %v7448_v45  ;;  %v7457_v57 = vld [vmem:[%s11237_s1 + $0x78] sm:$0xff]  ;;  %v7439_v63 = vld [vmem:[%s9130_s24 + $0x170] sm:$0xf0]  ;;  %v7455_v3 = vld [vmem:[%s11237_s1 + $0x68] sm:$0xff]  ;;  %v8813_v45 = vmov 0  }
  0xac   : > { %v6560_v0 = vor.u32 %v7439_v63, %v6559_v60  ;;  %v7473_v1 = vld [vmem:[%s11237_s1 + $0xf8] sm:$0xff]  ;;  %v7472_v4 = vld [vmem:[%s11237_s1 + $0xf0] sm:$0xff]  ;;  %v7462_v5 = vld [vmem:[%s11237_s1 + $0xa0] sm:$0xff]  ;;  %711 = vst [vmem:[#allocation3] sm:$0xf] %v8813_v45 }
  0xad   : > { %v7454_v6 = vld [vmem:[%s11237_s1 + $0x60] sm:$0xff]  ;;  %v7430_v8 = vld [vmem:[%s9130_s24 + $0x98] sm:$0xf0]  ;;  %v6543_v9 = vld [vmem:[%s9130_s24 + $0x108] sm:$0xf] }
  0xae   : > { %8666 = vmatpush.bf16.msra.mxu1 %v7447_v46  ;;  %8667 = vmatpush.bf16.msra.mxu2 %v7447_v46  ;;  %v6523_v7 = vld [vmem:[%s9130_s24 + $0x90] sm:$0xf]  ;;  %v7435_v10 = vld [vmem:[%s9130_s24 + $0x110] sm:$0xf0]  ;;  %v7461_v11 = vld [vmem:[%s11237_s1 + $0x98] sm:$0xff] }
  0xaf   : > { %8668 = vmatpush.bf16.msra.mxu3 %v7447_v46  ;;  %853 = vmatpush.bf16.msra.mxu0 %v7447_v46  ;;  %v7453_v12 = vld [vmem:[%s11237_s1 + $0x58] sm:$0xff]  ;;  %v6524_v13 = vor.u32 %v7430_v8, %v6523_v7  ;;  %v6544_v14 = vor.u32 %v7435_v10, %v6543_v9  ;;  %v6563_v15 = vld [vmem:[%s9130_s24 + $0x180] sm:$0xf]  ;;  %v7471_v19 = vld [vmem:[%s11237_s1 + $0xe8] sm:$0xff]  ;;  %712 = vst [vmem:[#allocation3 + $0x94] sm:$0xf] %v8813_v45 }
  0xb0   : > { %v7440_v16 = vld [vmem:[%s9130_s24 + $0x188] sm:$0xf0]  ;;  %v7460_v18 = vld [vmem:[%s11237_s1 + $0x90] sm:$0xff]  ;;  %v7470_v21 = vld [vmem:[%s11237_s1 + $0xe0] sm:$0xff] }
  0xb1   : > { %v6564_v17 = vor.u32 %v7440_v16, %v6563_v15  ;;  %v7452_v20 = vld [vmem:[%s11237_s1 + $0x50] sm:$0xff]  ;;  %v7459_v22 = vld [vmem:[%s11237_s1 + $0x88] sm:$0xff]  ;;  %v7458_v52 = vld [vmem:[%s11237_s1 + $0x80] sm:$0xff] }
  0xb2   : > { %8669 = vmatpush.bf16.msra.mxu1 %v7446_v47  ;;  %8670 = vmatpush.bf16.msra.mxu2 %v7446_v47  ;;  %v459_v23 = vld [vmem:[%s9130_s24] sm:$0xff]  ;;  %v6527_v25 = vld [vmem:[%s9130_s24 + $0xa8] sm:$0xf]  ;;  %v7431_v26 = vld [vmem:[%s9130_s24 + $0xb0] sm:$0xf0] }
  0xb3   : > { %8671 = vmatpush.bf16.msra.mxu3 %v7446_v47  ;;  %854 = vmatpush.bf16.msra.mxu0 %v7446_v47  ;;  %v950_v24 = vunpack.c.l.bf16 %v459_v23  ;;  %v461_v27 = vld [vmem:[%s9130_s24 + $0xc] sm:$0xff]  ;;  %v6547_v29 = vld [vmem:[%s9130_s24 + $0x120] sm:$0xf]  ;;  %v463_v31 = vld [vmem:[%s9130_s24 + $0x18] sm:$0xff]  ;;  %v6528_v36 = vor.u32 %v7431_v26, %v6527_v25 }
  0xb4   : > { %v7436_v30 = vld [vmem:[%s9130_s24 + $0x128] sm:$0xf0]  ;;  %v951_v32 = vunpack.c.l.bf16 %v461_v27  ;;  %v952_v33 = vunpack.c.l.bf16 %v463_v31  ;;  %v465_v35 = vld [vmem:[%s9130_s24 + $0x24] sm:$0xff]  ;;  %v6567_v42 = vld [vmem:[%s9130_s24 + $0x198] sm:$0xf] }
  0xb5   : > { %v1022_v28 = vmul.f32 0.20019531, %v950_v24  ;;  %vm986_vm0 = vcmp.ge.f32.partialorder %v950_v24, 0.0  ;;  %v953_v38 = vunpack.c.l.bf16 %v465_v35  ;;  %v6548_v39 = vor.u32 %v7436_v30, %v6547_v29  ;;  %v7441_v44 = vld [vmem:[%s9130_s24 + $0x1a0] sm:$0xf0]  ;;  %v7469_v47 = vld [vmem:[%s11237_s1 + $0xd8] sm:$0xff] }
  0xb6   : > { %8672 = vmatpush.bf16.msra.mxu1 %v7445_v48  ;;  %8673 = vmatpush.bf16.msra.mxu2 %v7445_v48  ;;  %v1023_v37 = vmul.f32 0.20019531, %v951_v32  ;;  %vm1094_vm1 = vmpackc.low %vm986_vm0, %vm986_vm0  ;;  %v1024_v40 = vmul.f32 0.20019531, %v952_v33  ;;  %vm987_vm2 = vcmp.ge.f32.partialorder %v951_v32, 0.0  ;;  %v6568_v46 = vor.u32 %v7441_v44, %v6567_v42  ;;  %v7468_v54 = vld [vmem:[%s11237_s1 + $0xd0] sm:$0xff]  ;;  %v7515_v16 = vld [vmem:[%s11237_s1 + $0x1b8] sm:$0xff] }
  0xb7   : > { %8674 = vmatpush.bf16.msra.mxu3 %v7445_v48  ;;  %855 = vmatpush.bf16.msra.mxu0 %v7445_v48  ;;  %v1058_v34 = vpack.c.bf16 %v1022_v28, %v1022_v28  ;;  %vm9233_vm3 = vcmp.ge.f32.partialorder %v952_v33, 0.0  ;;  %vm1095_vm4 = vmpackc.low %vm987_vm2, %vm987_vm2  ;;  %vm989_vm5 = vcmp.ge.f32.partialorder %v953_v38, 0.0  ;;  %v6531_v60 = vld [vmem:[%s9130_s24 + $0xc0] sm:$0xf]  ;;  %v6535_v26 = vld [vmem:[%s9130_s24 + $0xd8] sm:$0xf] }
  0xb8   : > { %v1059_v43 = vpack.c.bf16 %v1023_v37, %v1023_v37  ;;  %vm1096_vm6 = vmpackc.low %vm9233_vm3, %vm9233_vm3  ;;  %v1219_v24 = vld [vmem:[#allocation3] sm:$0x8]  ;;  %v471_v32 = vld [vmem:[%s9130_s24 + $0x48] sm:$0xff] }
  0xb9   : > { %v1130_v41 = vsel %vm1094_vm1, %v459_v23, %v1058_v34  ;;  %vm1097_vm7 = vmpackc.low %vm989_vm5, %vm989_vm5  ;;  %v1293_v28 = vunpack.c.l.b16 %v1219_v24  ;;  %v6555_v30 = vld [vmem:[%s9130_s24 + $0x150] sm:$0xf]  ;;  %v956_v33 = vunpack.c.l.bf16 %v471_v32  ;;  %v473_v34 = vld [vmem:[%s9130_s24 + $0x54] sm:$0xff]  ;;  %vm1349_vm1 = vsmask.f32 4352 }
  0xba   : > { %8675 = vmatpush.bf16.msra.mxu1 %v7444_v49  ;;  %8676 = vmatpush.bf16.msra.mxu2 %v7444_v49  ;;  %1166 = vst [vmem:[#allocation3 + $0x4] sm:$0xf] %v1130_v41  ;;  %v1131_v53 = vsel %vm1095_vm4, %v461_v27, %v1059_v43  ;;  %v7433_v27 = vld [vmem:[%s9130_s24 + $0xe0] sm:$0xf0]  ;;  %v957_v37 = vunpack.c.l.bf16 %v473_v34 }
  0xbb   : > { %8677 = vmatpush.bf16.msra.mxu3 %v7444_v49  ;;  %856 = vmatpush.bf16.msra.mxu0 %v7444_v49  ;;  %v1060_v49 = vpack.c.bf16 %v1024_v40, %v1024_v40  ;;  %1167 = vst [vmem:[#allocation3 + $0x8] sm:$0xf] %v1131_v53  ;;  %v1028_v41 = vmul.f32 0.20019531, %v956_v33  ;;  %vm992_vm13 = vcmp.ge.f32.partialorder %v956_v33, 0.0 }
  0xbc   : > { %vm1100_vm14 = vmpackc.low %vm992_vm13, %vm992_vm13  ;;  %vm993_vm15 = vcmp.ge.f32.partialorder %v957_v37, 0.0 }
  0xbd   : > { %v1064_v45 = vpack.c.bf16 %v1028_v41, %v1028_v41  ;;  %vm1101_vm0 = vmpackc.low %vm993_vm15, %vm993_vm15 }
  0xbe   : > { %8678 = vmatpush.bf16.msra.mxu1 %v7443_v50  ;;  %8679 = vmatpush.bf16.msra.mxu2 %v7443_v50 }
  0xbf   : > { %8680 = vmatpush.bf16.msra.mxu3 %v7443_v50  ;;  %857 = vmatpush.bf16.msra.mxu0 %v7443_v50  ;;  %v1025_v50 = vmul.f32 0.20019531, %v953_v38  ;;  %v6536_v38 = vor.u32 %v7433_v27, %v6535_v26 }
  0xc1   : > { %v1061_v55 = vpack.c.bf16 %v1025_v50, %v1025_v50  ;;  %v1220_v25 = vld [vmem:[#allocation3 + $0x4] sm:$0xf] }
  0xc2   : > { %8681 = vmatpush.bf16.msra.mxu1 %v7442_v51  ;;  %8682 = vmatpush.bf16.msra.mxu2 %v7442_v51  ;;  %v7474_v63 = vld [vmem:[#allocation3 + $0x4] sm:$0xff]  ;;  %v1294_v29 = vunpack.c.l.b16 %v1220_v25 }
  0xc3   : > { %8683 = vmatpush.bf16.msra.mxu3 %v7442_v51  ;;  %858 = vmatpush.bf16.msra.mxu0 %v7442_v51  ;;  %v7451_v51 = vld [vmem:[%s11237_s1 + $0x48] sm:$0xff] }
  0xc4   : > { %v1330_v40 = vpack.c.b16 %v1294_v29, %v1293_v28  ;;  %v479_v25 = vld [vmem:[%s9130_s24 + $0x78] sm:$0xff]  ;;  %v481_v28 = vld [vmem:[%s9130_s24 + $0x84] sm:$0xff] }
  0xc5   : > { %884 = vmatmul.bf16.vlgmr.msra.gmra.mxu1 %v6520_v58  ;;  %909 = vmatmul.bf16.vlgmr.msra.gmra.mxu2 %v6540_v59  ;;  %v1133_v58 = vsel %vm1097_vm7, %v465_v35, %v1061_v55  ;;  %v7467_v59 = vld [vmem:[%s11237_s1 + $0xc8] sm:$0xff]  ;;  %v960_v27 = vunpack.c.l.bf16 %v479_v25 }
  0xc6   : > { %1822 = vmatpush.bf16.msrb.mxu2 %v7465_v56  ;;  %1586 = vmatpush.bf16.msrb.mxu1 %v7457_v57  ;;  %v7450_v56 = vld [vmem:[%s11237_s1 + $0x40] sm:$0xff]  ;;  %v1132_v57 = vsel %vm1096_vm6, %v463_v31, %v1060_v49  ;;  %1169 = vst [vmem:[#allocation3 + $0x10] sm:$0xf] %v1133_v58  ;;  %v7438_v31 = vld [vmem:[%s9130_s24 + $0x158] sm:$0xf0]  ;;  %v1351_v48 = vshrl.u32 %v1330_v40, 16  ;;  %v1136_v49 = vsel %vm1100_vm14, %v471_v32, %v1064_v45 }
  0xc7   : > { %934 = vmatmul.bf16.vlgmr.msra.gmra.mxu3 %v6560_v0  ;;  %1168 = vst [vmem:[#allocation3 + $0xc] sm:$0xf] %v1132_v57  ;;  %v7437_v0 = vld [vmem:[%s9130_s24 + $0x140] sm:$0xf0]  ;;  %v1032_v33 = vmul.f32 0.20019531, %v960_v27  ;;  %vm996_vm6 = vcmp.ge.f32.partialorder %v960_v27, 0.0 }
  0xc8   : > { %2318 = vmatpush.bf16.msrb.mxu3 %v7473_v1  ;;  %v7466_v1 = vld [vmem:[%s11237_s1 + $0xc0] sm:$0xff]  ;;  %1172 = vst [vmem:[#allocation3 + $0x1c] sm:$0xf] %v1136_v49  ;;  %vm1104_vm7 = vmpackc.low %vm996_vm6, %vm996_vm6 }
  0xca   : > { %1823 = vmatpush.bf16.msrb.mxu2 %v7464_v61  ;;  %1587 = vmatpush.bf16.msrb.mxu1 %v7456_v62  ;;  %v7432_v61 = vld [vmem:[%s9130_s24 + $0xc8] sm:$0xf0]  ;;  %v6551_v62 = vld [vmem:[%s9130_s24 + $0x138] sm:$0xf] }
  0xcb   : > { %v6532_v8 = vor.u32 %v7432_v61, %v6531_v60  ;;  %v6552_v9 = vor.u32 %v7437_v0, %v6551_v62 }
  0xcc   : > { %2319 = vmatpush.bf16.msrb.mxu3 %v7472_v4 }
  0xce   : > { %1824 = vmatpush.bf16.msrb.mxu2 %v7463_v2  ;;  %1588 = vmatpush.bf16.msrb.mxu1 %v7455_v3  ;;  %v467_v2 = vld [vmem:[%s9130_s24 + $0x30] sm:$0xff]  ;;  %v2107_v3 = vshll.u32 %v7474_v63, 16  ;;  %v8193_v44 = vld [vmem:[#allocation3 + $0x8] sm:$0xff]  }
  0xcf   : > { %v954_v4 = vunpack.c.l.bf16 %v467_v2  ;;  %v7475_v10 = vld [vmem:[#allocation3 + $0xc] sm:$0xff]  ;;  %v1362_v53 = vshll.u32 %v8193_v44, 16  ;;  %v7656_v60 = vunpack.c.l.b16 %v8193_v44 }
  0xd0   : > { %2320 = vmatpush.bf16.msrb.mxu3 %v7471_v19  ;;  %v2112_v15 = vshll.u32 %v7475_v10, 16 }
  0xd1   : > { %vm990_vm8 = vcmp.ge.f32.partialorder %v954_v4, 0.0 }
  0xd2   : > { %1825 = vmatpush.bf16.msrb.mxu2 %v7462_v5  ;;  %1589 = vmatpush.bf16.msrb.mxu1 %v7454_v6  ;;  %v469_v5 = vld [vmem:[%s9130_s24 + $0x3c] sm:$0xff]  ;;  %v2105_v6 = vshrl.u32 %v7474_v63, 16  ;;  %vm1098_vm10 = vmpackc.low %vm990_vm8, %vm990_vm8 }
  0xd3   : > { %v955_v7 = vunpack.c.l.bf16 %v469_v5  ;;  %v475_v63 = vld [vmem:[%s9130_s24 + $0x60] sm:$0xff] }
  0xd4   : > { %2321 = vmatpush.bf16.msrb.mxu3 %v7470_v21 }
  0xd5   : > { %889 = vmatmul.bf16.gmra.mxu1 %v6524_v13  ;;  %914 = vmatmul.bf16.gmra.mxu2 %v6544_v14  ;;  %v1027_v13 = vmul.f32 0.20019531, %v955_v7  ;;  %vm991_vm11 = vcmp.ge.f32.partialorder %v955_v7, 0.0 }
  0xd6   : > { %1826 = vmatpush.bf16.msrb.mxu2 %v7461_v11  ;;  %1590 = vmatpush.bf16.msrb.mxu1 %v7453_v12  ;;  %v2109_v11 = vrot.slane %v2107_v3, 1  ;;  %v1026_v12 = vmul.f32 0.20019531, %v954_v4  ;;  %vm1099_vm12 = vmpackc.low %vm991_vm11, %vm991_vm11 }
  0xd7   : > { %939 = vmatmul.bf16.gmra.mxu3 %v6564_v17  ;;  %v7507_v17 = vld [vmem:[%s11237_s1 + $0x178] sm:$0xff]  ;;  %v1063_v19 = vpack.c.bf16 %v1027_v13, %v1027_v13 }
  0xd8   : > { %2322 = vmatpush.bf16.msrb.mxu3 %v7469_v47  ;;  %v2110_v14 = vor.u32 %v2109_v11, %v2105_v6 }
  0xda   : > { %1827 = vmatpush.bf16.msrb.mxu2 %v7460_v18  ;;  %1591 = vmatpush.bf16.msrb.mxu1 %v7452_v20  ;;  %v1062_v18 = vpack.c.bf16 %v1026_v12, %v1026_v12  ;;  %v2114_v20 = vrot.slane %v2112_v15, 1  ;;  %v7514_v15 = vld [vmem:[%s11237_s1 + $0x1b0] sm:$0xff] }
  0xdc   : > { %2323 = vmatpush.bf16.msrb.mxu3 %v7468_v54  ;;  %v1134_v21 = vsel %vm1098_vm10, %v467_v2, %v1062_v18  ;;  %v2115_v23 = vsel %vm2103_vm9, %v2110_v14, %v2114_v20  ;;  %v477_v2 = vld [vmem:[%s9130_s24 + $0x6c] sm:$0xff] }
  0xdd   : > { %1170 = vst [vmem:[#allocation3 + $0x14] sm:$0xf] %v1134_v21  ;;  %v959_v4 = vunpack.c.l.bf16 %v477_v2 }
  0xde   : > { %1828 = vmatpush.bf16.msrb.mxu2 %v7459_v22  ;;  %1592 = vmatpush.bf16.msrb.mxu1 %v7451_v51  ;;  %v1135_v22 = vsel %vm1099_vm12, %v469_v5, %v1063_v19  ;;  %v1354_v51 = vshll.u32 %v1330_v40, 16  ;;  %v1738_v5 = vpack.c.b16 %v7656_v60, %v1294_v29 }
  0xdf   : > { %1171 = vst [vmem:[#allocation3 + $0x18] sm:$0xf] %v1135_v22  ;;  %vm995_vm4 = vcmp.ge.f32.partialorder %v959_v4, 0.0 }
  0xe0   : > { %2324 = vmatpush.bf16.msrb.mxu3 %v7467_v59  ;;  %v1356_v57 = vrot.slane %v1354_v51, 4  ;;  %v1364_v59 = vrot.slane %v1362_v53, 4  ;;  %vm1103_vm5 = vmpackc.low %vm995_vm4, %vm995_vm4 }
  0xe2   : > { %1829 = vmatpush.bf16.msrb.mxu2 %v7458_v52  ;;  %1593 = vmatpush.bf16.msrb.mxu1 %v7450_v56  ;;  %v1359_v52 = vshrl.u32 %v8193_v44, 16  ;;  %v1353_v56 = vrot.slane %v1351_v48, 3 }
  0xe4   : > { %2325 = vmatpush.bf16.msrb.mxu3 %v7466_v1  ;;  %v1361_v58 = vrot.slane %v1359_v52, 3  ;;  %v1357_v61 = vor.u32 %v1356_v57, %v1353_v56  ;;  %v958_v1 = vunpack.c.l.bf16 %v475_v63  ;;  %v8194_v11 = vld [vmem:[#allocation3 + $0x10] sm:$0xff]  }
  0xe5   : > { %894 = vmatmul.bf16.gmra.mxu1 %v6528_v36  ;;  %919 = vmatmul.bf16.gmra.mxu2 %v6548_v39  ;;  %v2116_v36 = vshrl.u32 %v7475_v10, 16  ;;  %v6556_v39 = vor.u32 %v7438_v31, %v6555_v30  ;;  %v1031_v10 = vmul.f32 0.20019531, %v959_v4  ;;  %v1368_v18 = vshrl.u32 %v8194_v11, 16  ;;  %v8562_v31 = vld [vmem:[#allocation3 + $0xc] sm:$0xff]  }
  0xe6   : > { %3580 = vmatpush.bf16.msra.mxu2 %v7515_v16  ;;  %3195 = vmatpush.bf16.msra.mxu1 %v7507_v17  ;;  %v7476_v35 = vld [vmem:[#allocation3 + $0x14] sm:$0xff]  ;;  %v1365_v62 = vor.u32 %v1364_v59, %v1361_v58  ;;  %v1030_v7 = vmul.f32 0.20019531, %v958_v1  ;;  %vm994_vm2 = vcmp.ge.f32.partialorder %v958_v1, 0.0  ;;  %v1371_v19 = vshll.u32 %v8194_v11, 16  ;;  %v485_v52 = vld [vmem:[%s9130_s24 + $0x9c] sm:$0xff] }
  0xe7   : > { %944 = vmatmul.bf16.gmra.mxu3 %v6568_v46  ;;  %v2118_v42 = vor.u32 %v2116_v36, %v2114_v20  ;;  %v2120_v43 = vshll.u32 %v7476_v35, 16  ;;  %v1029_v46 = vmul.f32 0.20019531, %v957_v37  ;;  %v2124_v3 = vshrl.u32 %v7476_v35, 16  ;;  %vm1102_vm3 = vmpackc.low %vm994_vm2, %vm994_vm2  ;;  %v7506_v16 = vld [vmem:[%s11237_s1 + $0x170] sm:$0xff]  ;;  %v8195_v37 = vld [vmem:[#allocation3 + $0x18] sm:$0xff]  }
  0xe8   : > { %v1066_v13 = vpack.c.bf16 %v1030_v7, %v1030_v7  ;;  %v1067_v14 = vpack.c.bf16 %v1031_v10, %v1031_v10  ;;  %v1370_v22 = vrot.slane %v1368_v18, 3  ;;  %v961_v30 = vunpack.c.l.bf16 %v481_v28  ;;  %v487_v10 = vld [vmem:[%s9130_s24 + $0xa8] sm:$0xff] }
  0xe9   : > { %v2122_v47 = vrot.slane %v2120_v43, 1  ;;  %v1065_v50 = vpack.c.bf16 %v1029_v46, %v1029_v46  ;;  %v1380_v43 = vshll.u32 %v8195_v37, 16  ;;  %v963_v57 = vunpack.c.l.bf16 %v485_v52 }
  0xea   : > { %v1138_v17 = vsel %vm1102_vm3, %v475_v63, %v1066_v13  ;;  %3581 = vmatpush.bf16.msra.mxu2 %v7514_v15  ;;  %3196 = vmatpush.bf16.msra.mxu1 %v7506_v16  ;;  %v1139_v21 = vsel %vm1103_vm5, %v477_v2, %v1067_v14  ;;  %v1033_v36 = vmul.f32 0.20019531, %v961_v30  ;;  %vm997_vm8 = vcmp.ge.f32.partialorder %v961_v30, 0.0  ;;  %v489_v13 = vld [vmem:[%s9130_s24 + $0xb4] sm:$0xff] }
  0xeb   : > { %v2123_v54 = vsel %vm2103_vm9, %v2118_v42, %v2122_v47  ;;  %v1137_v55 = vsel %vm1101_vm0, %v473_v34, %v1065_v50  ;;  %1174 = vst [vmem:[#allocation3 + $0x24] sm:$0xf] %v1138_v17  ;;  %vm1105_vm10 = vmpackc.low %vm997_vm8, %vm997_vm8  ;;  %v1377_v42 = vshrl.u32 %v8195_v37, 16  ;;  %v483_v50 = vld [vmem:[%s9130_s24 + $0x90] sm:$0xff]  ;;  %v1035_v63 = vmul.f32 0.20019531, %v963_v57  ;;  %v7505_v17 = vld [vmem:[%s11237_s1 + $0x168] sm:$0xff] }
  0xec   : > { %1173 = vst [vmem:[#allocation3 + $0x20] sm:$0xf] %v1137_v55  ;;  %v1069_v40 = vpack.c.bf16 %v1033_v36, %v1033_v36  ;;  %v962_v51 = vunpack.c.l.bf16 %v483_v50  ;;  %v8564_v55 = vld [vmem:[#allocation3 + $0x14] sm:$0xff]   ;;  %vm999_vm13 = vcmp.ge.f32.partialorder %v963_v57, 0.0  ;;  %v965_v15 = vunpack.c.l.bf16 %v489_v13 }
  0xed   : > { %1175 = vst [vmem:[#allocation3 + $0x28] sm:$0xf] %v1139_v21  ;;  %v1379_v46 = vrot.slane %v1377_v42, 3  ;;  %v1071_v1 = vpack.c.bf16 %v1035_v63, %v1035_v63  ;;  %vm1107_vm14 = vmpackc.low %vm999_vm13, %vm999_vm13  ;;  %v7499_v63 = vld [vmem:[%s11237_s1 + $0x138] sm:$0xff] }
  0xee   : > { %v1141_v45 = vsel %vm1105_vm10, %v481_v28, %v1069_v40  ;;  %v1034_v56 = vmul.f32 0.20019531, %v962_v51  ;;  %vm998_vm11 = vcmp.ge.f32.partialorder %v962_v51, 0.0  ;;  %3197 = vmatpush.bf16.msra.mxu1 %v7505_v17  ;;  %vm1001_vm2 = vcmp.ge.f32.partialorder %v965_v15, 0.0  ;;  %2956 = vmatpush.bf16.msrb.mxu0 %v7499_v63 }
  0xef   : > { %1177 = vst [vmem:[#allocation3 + $0x30] sm:$0xf] %v1141_v45  ;;  %vm1106_vm12 = vmpackc.low %vm998_vm11, %vm998_vm11  ;;  %v493_v45 = vld [vmem:[%s9130_s24 + $0xcc] sm:$0xff] }
  0xf0   : > { %vm1109_vm3 = vmpackc.low %vm1001_vm2, %vm1001_vm2  ;;  %v967_v51 = vunpack.c.l.bf16 %v493_v45 }
  0xf2   : > { %vm9325_vm6 = vcmp.ge.f32.partialorder %v967_v51, 0.0 }
  0xf3   : > { %v7477_v0 = vld [vmem:[#allocation3 + $0x1c] sm:$0xff] }
  0xf4   : > { %v2128_v6 = vshll.u32 %v7477_v0, 16  ;;  %v7478_v26 = vld [vmem:[#allocation3 + $0x24] sm:$0xff]  ;;  %v2132_v29 = vshrl.u32 %v7477_v0, 16  ;;  %v8566_v16 = vld [vmem:[#allocation3 + $0x1c] sm:$0xff]  }
  0xf5   : > { %899 = vmatmul.bf16.gmra.mxu1 %v6532_v8  ;;  %924 = vmatmul.bf16.gmra.mxu2 %v6552_v9  ;;  %v1366_v8 = vsel %vm1349_vm1, %v1357_v61, %v1365_v62  ;;  %v2126_v9 = vor.u32 %v2124_v3, %v2122_v47  ;;  %v2136_v32 = vshll.u32 %v7478_v26, 16  ;;  %v1382_v47 = vrot.slane %v1380_v43, 4  ;;  %v8196_v61 = vld [vmem:[#allocation3 + $0x20] sm:$0xff]  }
  0xf6   : > { %v2130_v12 = vrot.slane %v2128_v6, 1  ;;  %v2140_v53 = vshrl.u32 %v7478_v26, 16  ;;  %v1386_v2 = vshrl.u32 %v8196_v61, 16  ;;  %v1389_v3 = vshll.u32 %v8196_v61, 16  ;;  %v491_v43 = vld [vmem:[%s9130_s24 + $0xc0] sm:$0xff] }
  0xf7   : > { %2326 = vmatmul.bf16.vlgmr.msrb.gmra.mxu3 %v2115_v23  ;;  %v1373_v23 = vrot.slane %v1371_v19, 4  ;;  %v1383_v48 = vor.u32 %v1382_v47, %v1379_v46 }
  0xf8   : > { %v2131_v20 = vsel %vm2103_vm9, %v2126_v9, %v2130_v12  ;;  %v2134_v35 = vor.u32 %v2132_v29, %v2130_v12  ;;  %v1388_v6 = vrot.slane %v1386_v2, 3  ;;  %v1391_v7 = vrot.slane %v1389_v3, 4  ;;  %v6503_v3 = vld [vmem:[%s9130_s24 + $0x18] sm:$0xf] }
  0xf9   : > { %v1374_v24 = vor.u32 %v1373_v23, %v1370_v22  ;;  %v964_v12 = vunpack.c.l.bf16 %v487_v10 }
  0xfa   : > { %v1392_v9 = vor.u32 %v1391_v7, %v1388_v6 }
  0xfb   : > { %v1375_v34 = vsel %vm1349_vm1, %v1365_v62, %v1374_v24  ;;  %v1384_v58 = vsel %vm1349_vm1, %v1374_v24, %v1383_v48  ;;  %v1070_v62 = vpack.c.bf16 %v1034_v56, %v1034_v56  ;;  %v1036_v19 = vmul.f32 0.20019531, %v964_v12 }
  0xfc   : > { %v1393_v21 = vsel %vm1349_vm1, %v1383_v48, %v1392_v9  ;;  %v1037_v24 = vmul.f32 0.20019531, %v965_v15  ;;  %vm1000_vm15 = vcmp.ge.f32.partialorder %v964_v12, 0.0 }
  0xfd   : > { %v1142_v0 = vsel %vm1106_vm12, %v483_v50, %v1070_v62  ;;  %v1072_v26 = vpack.c.bf16 %v1036_v19, %v1036_v19  ;;  %vm1108_vm0 = vmpackc.low %vm1000_vm15, %vm1000_vm15 }
  0xfe   : > { %1178 = vst [vmem:[#allocation3 + $0x34] sm:$0xf] %v1142_v0  ;;  %v1073_v27 = vpack.c.bf16 %v1037_v24, %v1037_v24 }
  0xff   : > { %v1144_v30 = vsel %vm1108_vm0, %v487_v10, %v1072_v26 }
 0x100   : > { %1180 = vst [vmem:[#allocation3 + $0x3c] sm:$0xf] %v1144_v30 }
 0x105   : > { %904 = vmatmul.bf16.gmra.mxu1 %v6536_v38  ;;  %929 = vmatmul.bf16.gmra.mxu2 %v6556_v39  ;;  %v2138_v38 = vrot.slane %v2136_v32, 1  ;;  %v1068_v39 = vpack.c.bf16 %v1032_v33, %v1032_v33  ;;  %v6499_v32 = vld [vmem:[%s9130_s24] sm:$0xf]  ;;  %v7424_v33 = vld [vmem:[%s9130_s24 + $0x8] sm:$0xf0] }
 0x107   : > { %2331 = vmatmul.bf16.gmra.mxu3 %v2123_v54  ;;  %v1140_v41 = vsel %vm1104_vm7, %v479_v25, %v1068_v39  ;;  %v2139_v44 = vsel %vm2103_vm9, %v2134_v35, %v2138_v38  ;;  %v2142_v59 = vor.u32 %v2140_v53, %v2138_v38  ;;  %v6500_v35 = vor.u32 %v7424_v33, %v6499_v32  ;;  %vm1111_vm7 = vmpackc.low %vm9325_vm6, %vm9325_vm6 }
 0x108   : > { %1176 = vst [vmem:[#allocation3 + $0x2c] sm:$0xf] %v1140_v41 }
 0x109   : > { %859 = vmatmul.bf16.vlgmr.msra.gmra.mxu0 %v6500_v35 }
 0x10f   : > { %v7479_v49 = vld [vmem:[#allocation3 + $0x2c] sm:$0xff] }
 0x110   : > { %v2144_v54 = vshll.u32 %v7479_v49, 16  ;;  %v2148_v14 = vshrl.u32 %v7479_v49, 16  ;;  %v8197_v22 = vld [vmem:[#allocation3 + $0x28] sm:$0xff]  }
 0x111   : > { %v1395_v28 = vshrl.u32 %v8197_v22, 16  ;;  %v1398_v29 = vshll.u32 %v8197_v22, 16  ;;  %v8568_v49 = vld [vmem:[#allocation3 + $0x24] sm:$0xff]   ;;  %v7498_v22 = vld [vmem:[%s11237_s1 + $0x130] sm:$0xff] }
 0x112   : > { %v2146_v60 = vrot.slane %v2144_v54, 1  ;;  %v8198_v54 = vld [vmem:[#allocation3 + $0x30] sm:$0xff]   ;;  %2957 = vmatpush.bf16.msrb.mxu0 %v7498_v22 }
 0x113   : > { %v1397_v38 = vrot.slane %v1395_v28, 3  ;;  %v1400_v39 = vrot.slane %v1398_v29, 4  ;;  %v1404_v61 = vshrl.u32 %v8198_v54, 16  ;;  %v1407_v62 = vshll.u32 %v8198_v54, 16  ;;  %v7497_v54 = vld [vmem:[%s11237_s1 + $0x128] sm:$0xff] }
 0x114   : > { %v2147_v4 = vsel %vm2103_vm9, %v2142_v59, %v2146_v60  ;;  %v2150_v23 = vor.u32 %v2148_v14, %v2146_v60  ;;  %v1039_v59 = vmul.f32 0.20019531, %v967_v51  ;;  %v501_v60 = vld [vmem:[%s9130_s24 + $0xfc] sm:$0xff] }
 0x115   : > { %1594 = vmatmul.bf16.vlgmr.msrb.gmra.mxu1 %v1366_v8  ;;  %1830 = vmatmul.bf16.vlgmr.msrb.gmra.mxu2 %v1738_v5  ;;  %v1143_v5 = vsel %vm1107_vm14, %v485_v52, %v1071_v1  ;;  %v7513_v8 = vld [vmem:[%s11237_s1 + $0x1a8] sm:$0xff]  ;;  %v1401_v41 = vor.u32 %v1400_v39, %v1397_v38  ;;  %v1409_v10 = vrot.slane %v1407_v62, 4  ;;  %v7504_v39 = vld [vmem:[%s11237_s1 + $0x160] sm:$0xff] }
 0x116   : > { %1179 = vst [vmem:[#allocation3 + $0x38] sm:$0xf] %v1143_v5  ;;  %3582 = vmatpush.bf16.msra.mxu2 %v7513_v8  ;;  %v1075_v1 = vpack.c.bf16 %v1039_v59, %v1039_v59  ;;  %3198 = vmatpush.bf16.msra.mxu1 %v7504_v39 }
 0x117   : > { %2336 = vmatmul.bf16.gmra.mxu3 %v2131_v20  ;;  %v1402_v53 = vsel %vm1349_vm1, %v1392_v9, %v1401_v41  ;;  %v1406_v9 = vrot.slane %v1404_v61, 3  ;;  %2958 = vmatpush.bf16.msrb.mxu0 %v7497_v54 }
 0x118   : > { %v1147_v6 = vsel %vm1111_vm7, %v493_v45, %v1075_v1 }
 0x119   : > { %1183 = vst [vmem:[#allocation3 + $0x48] sm:$0xf] %v1147_v6  ;;  %v9344_v12 = vor.u32 %v1409_v10, %v1406_v9 }
 0x11d   : > { %v7480_v11 = vld [vmem:[#allocation3 + $0x34] sm:$0xff] }
 0x11e   : > { %v2152_v18 = vshll.u32 %v7480_v11, 16  ;;  %v2156_v47 = vshrl.u32 %v7480_v11, 16  ;;  %v8199_v28 = vld [vmem:[#allocation3 + $0x38] sm:$0xff]  }
 0x11f   : > { %v1413_v35 = vshrl.u32 %v8199_v28, 16  ;;  %v1416_v38 = vshll.u32 %v8199_v28, 16 }
 0x120   : > { %v2154_v25 = vrot.slane %v2152_v18, 1 }
 0x121   : > { %v1418_v51 = vrot.slane %v1416_v38, 4 }
 0x125   : > { %1599 = vmatmul.bf16.gmra.mxu1 %v1375_v34  ;;  %1835 = vmatmul.bf16.gmra.mxu2 %v8562_v31  ;;  %v2155_v31 = vsel %vm2103_vm9, %v2150_v23, %v2154_v25  ;;  %v1145_v34 = vsel %vm1109_vm3, %v489_v13, %v1073_v27  ;;  %v495_v13 = vld [vmem:[%s9130_s24 + $0xd8] sm:$0xff]  ;;  %v7512_v23 = vld [vmem:[%s11237_s1 + $0x1a0] sm:$0xff]  ;;  %v1411_v27 = vsel %vm1349_vm1, %v1401_v41, %v9344_v12 }
 0x126   : > { %1181 = vst [vmem:[#allocation3 + $0x40] sm:$0xf] %v1145_v34  ;;  %v968_v15 = vunpack.c.l.bf16 %v495_v13  ;;  %3583 = vmatpush.bf16.msra.mxu2 %v7512_v23  ;;  %v6511_v23 = vld [vmem:[%s9130_s24 + $0x48] sm:$0xf] }
 0x127   : > { %2341 = vmatmul.bf16.gmra.mxu3 %v2139_v44  ;;  %v966_v44 = vunpack.c.l.bf16 %v491_v43 }
 0x128   : > { %vm1004_vm8 = vcmp.ge.f32.partialorder %v968_v15, 0.0 }
 0x129   : > { %v1038_v50 = vmul.f32 0.20019531, %v966_v44  ;;  %vm1002_vm4 = vcmp.ge.f32.partialorder %v966_v44, 0.0  ;;  %vm1112_vm10 = vmpackc.low %vm1004_vm8, %vm1004_vm8  ;;  %v7426_v44 = vld [vmem:[%s9130_s24 + $0x38] sm:$0xf0] }
 0x12a   : > { %vm1110_vm5 = vmpackc.low %vm1002_vm4, %vm1002_vm4 }
 0x12d   : > { %v7481_v42 = vld [vmem:[#allocation3 + $0x3c] sm:$0xff] }
 0x12e   : > { %v2160_v48 = vshll.u32 %v7481_v42, 16  ;;  %v2164_v18 = vshrl.u32 %v7481_v42, 16 }
 0x130   : > { %v2162_v56 = vrot.slane %v2160_v48, 1 }
 0x132   : > { %v2166_v29 = vor.u32 %v2164_v18, %v2162_v56 }
 0x135   : > { %1604 = vmatmul.bf16.gmra.mxu1 %v1384_v58  ;;  %1840 = vmatmul.bf16.gmra.mxu2 %v8564_v55  ;;  %v2158_v55 = vor.u32 %v2156_v47, %v2154_v25  ;;  %v1074_v58 = vpack.c.bf16 %v1038_v50, %v1038_v50  ;;  %v1040_v25 = vmul.f32 0.20019531, %v968_v15  ;;  %v1415_v50 = vrot.slane %v1413_v35, 3  ;;  %v503_v35 = vld [vmem:[%s9130_s24 + $0x108] sm:$0xff] }
 0x136   : > { %v972_v39 = vunpack.c.l.bf16 %v503_v35 }
 0x137   : > { %2346 = vmatmul.bf16.gmra.mxu3 %v2147_v4  ;;  %v1146_v0 = vsel %vm1110_vm5, %v491_v43, %v1074_v58  ;;  %v2163_v2 = vsel %vm2103_vm9, %v2158_v55, %v2162_v56  ;;  %v7425_v4 = vld [vmem:[%s9130_s24 + $0x20] sm:$0xf0]  ;;  %v1076_v33 = vpack.c.bf16 %v1040_v25, %v1040_v25  ;;  %v6507_v43 = vld [vmem:[%s9130_s24 + $0x30] sm:$0xf]  ;;  %v1419_v55 = vor.u32 %v1418_v51, %v1415_v50 }
 0x138   : > { %1182 = vst [vmem:[#allocation3 + $0x44] sm:$0xf] %v1146_v0  ;;  %v6504_v5 = vor.u32 %v7425_v4, %v6503_v3  ;;  %v6508_v47 = vor.u32 %v7426_v44, %v6507_v43  ;;  %v499_v58 = vld [vmem:[%s9130_s24 + $0xf0] sm:$0xff]  ;;  %v1044_v50 = vmul.f32 0.20019531, %v972_v39  ;;  %vm1008_vm2 = vcmp.ge.f32.partialorder %v972_v39, 0.0 }
 0x139   : > { %v1148_v41 = vsel %vm1112_vm10, %v495_v13, %v1076_v33  ;;  %v970_v59 = vunpack.c.l.bf16 %v499_v58  ;;  %v8572_v0 = vld [vmem:[#allocation3 + $0x34] sm:$0xff]   ;;  %v1420_v4 = vsel %vm1349_vm1, %v9344_v12, %v1419_v55  ;;  %v7496_v12 = vld [vmem:[%s11237_s1 + $0x120] sm:$0xff]  ;;  %vm1116_vm4 = vmpackc.low %vm1008_vm2, %vm1008_vm2 }
 0x13a   : > { %864 = vmatmul.bf16.gmra.mxu0 %v6504_v5  ;;  %1184 = vst [vmem:[#allocation3 + $0x4c] sm:$0xf] %v1148_v41  ;;  %v505_v41 = vld [vmem:[%s9130_s24 + $0x114] sm:$0xff] }
 0x13b   : > { %v1042_v1 = vmul.f32 0.20019531, %v970_v59  ;;  %vm1006_vm13 = vcmp.ge.f32.partialorder %v970_v59, 0.0  ;;  %2959 = vmatpush.bf16.msrb.mxu0 %v7496_v12  ;;  %v973_v44 = vunpack.c.l.bf16 %v505_v41 }
 0x13c   : > { %vm1114_vm14 = vmpackc.low %vm1006_vm13, %vm1006_vm13 }
 0x13d   : > { %v1078_v13 = vpack.c.bf16 %v1042_v1, %v1042_v1  ;;  %vm9425_vm3 = vcmp.ge.f32.partialorder %v973_v44, 0.0 }
 0x13e   : > { %vm1117_vm5 = vmpackc.low %vm9425_vm3, %vm9425_vm3  ;;  %vm2852_vm3 = vcmask 1044480  }
 0x13f   : > { %v9347_v14 = vld [vmem:[#allocation3 + $0x44] sm:$0xff] }
 0x140   : > { %v2168_v24 = vshll.u32 %v9347_v14, 16  ;;  %v2172_v62 = vshrl.u32 %v9347_v14, 16  ;;  %v8200_v5 = vld [vmem:[#allocation3 + $0x40] sm:$0xff]  }
 0x141   : > { %v1425_v18 = vshll.u32 %v8200_v5, 16 }
 0x142   : > { %v9304_v20 = vpop.f32.mrf.mxu1  ;;  %v2170_v32 = vrot.slane %v2168_v24, 1  ;;  %v7427_v24 = vld [vmem:[%s9130_s24 + $0x50] sm:$0xf0] }
 0x143   : > { %11387 = vst [vmem:[#allocation8_spill] sm:$0xff] %v9304_v20  ;;  %v6512_v25 = vor.u32 %v7427_v24, %v6511_v23  ;;  %v7494_v23 = vld [vmem:[%s11237_s1 + $0x110] sm:$0xff] }
 0x144   : > { %v2171_v42 = vsel %vm2103_vm9, %v2166_v29, %v2170_v32  ;;  %v2174_v6 = vor.u32 %v2172_v62, %v2170_v32  ;;  %v1427_v32 = vrot.slane %v1425_v18, 4 }
 0x145   : > { %1609 = vmatmul.bf16.gmra.mxu1 %v1393_v21  ;;  %1845 = vmatmul.bf16.gmra.mxu2 %v8566_v16  ;;  %v497_v16 = vld [vmem:[%s9130_s24 + $0xe4] sm:$0xff]  ;;  %v8570_v21 = vld [vmem:[#allocation3 + $0x2c] sm:$0xff]  }
 0x146   : > { %v969_v19 = vunpack.c.l.bf16 %v497_v16 }
 0x147   : > { %2351 = vmatmul.bf16.gmra.mxu3 %v2155_v31 }
 0x148   : > { %v9310_v36 = vpop.f32.mrf.mxu2  ;;  %v1041_v30 = vmul.f32 0.20019531, %v969_v19  ;;  %vm1005_vm11 = vcmp.ge.f32.partialorder %v969_v19, 0.0  ;;  %v1150_v19 = vsel %vm1114_vm14, %v499_v58, %v1078_v13  ;;  %v8201_v58 = vld [vmem:[#allocation3 + $0x48] sm:$0xff]  }
 0x149   : > { %11388 = vst [vmem:[#allocation9_spill] sm:$0xff] %v9310_v36  ;;  %vm1113_vm12 = vmpackc.low %vm1005_vm11, %vm1005_vm11  ;;  %v1431_v1 = vshrl.u32 %v8201_v58, 16 }
 0x14a   : > { %v9312_v37 = vpop.f32.mrf.mxu1  ;;  %v9314_v40 = vpop.f32.mrf.mxu3  ;;  %v1077_v34 = vpack.c.bf16 %v1041_v30, %v1041_v30  ;;  %869 = vmatmul.bf16.gmra.mxu0 %v6508_v47  ;;  %1186 = vst [vmem:[#allocation3 + $0x54] sm:$0xf] %v1150_v19 }
 0x14b   : > { %11389 = vst [vmem:[#allocation10_spill] sm:$0xff] %v9312_v37  ;;  %v1433_v12 = vrot.slane %v1431_v1, 3  ;;  %v7492_v1 = vld [vmem:[%s11237_s1 + $0x100] sm:$0xff] }
 0x14c   : > { %11390 = vst [vmem:[#allocation11_spill] sm:$0xff] %v9314_v40  ;;  %v1149_v45 = vsel %vm1113_vm12, %v497_v16, %v1077_v34  ;;  %v1422_v16 = vshrl.u32 %v8200_v5, 16 }
 0x14d   : > { %1185 = vst [vmem:[#allocation3 + $0x50] sm:$0xf] %v1149_v45  ;;  %v8574_v45 = vld [vmem:[#allocation3 + $0x3c] sm:$0xff]  }
 0x14e   : > { %v1424_v30 = vrot.slane %v1422_v16, 3 }
 0x150   : > { %v9318_v46 = vpop.f32.mrf.mxu2  ;;  %v9410_v34 = vor.u32 %v1427_v32, %v1424_v30  ;;  %v509_v30 = vld [vmem:[%s9130_s24 + $0x12c] sm:$0xff] }
 0x151   : > { %11391 = vst [vmem:[#allocation12_spill] sm:$0xff] %v9318_v46 }
 0x152   : > { %v9320_v52 = vpop.f32.mrf.mxu1  ;;  %v9323_v57 = vpop.f32.mrf.mxu3  ;;  %v1429_v54 = vsel %vm1349_vm1, %v1419_v55, %v9410_v34  ;;  %v1434_v55 = vshll.u32 %v8201_v58, 16 }
 0x153   : > { %11392 = vst [vmem:[#allocation13_spill] sm:$0xff] %v9320_v52 }
 0x154   : > { %11393 = vst [vmem:[#allocation14_spill] sm:$0xff] %v9323_v57  ;;  %v7483_v56 = vld [vmem:[#allocation3 + $0x4c] sm:$0xff]  ;;  %v1436_v19 = vrot.slane %v1434_v55, 4  ;;  %v462_v55 = vld [vmem:[%s9130_s24 + $0x14] sm:$0xf] }
 0x155   : > { %1614 = vmatmul.bf16.gmra.mxu1 %v1402_v53  ;;  %1850 = vmatmul.bf16.gmra.mxu2 %v8568_v49  ;;  %v2176_v63 = vshll.u32 %v7483_v56, 16  ;;  %v2180_v43 = vshrl.u32 %v7483_v56, 16  ;;  %v1080_v56 = vpack.c.bf16 %v1044_v50, %v1044_v50  ;;  %v8202_v58 = vld [vmem:[#allocation3 + $0x50] sm:$0xff]  }
 0x156   : > { %v9450_v24 = vor.u32 %v1436_v19, %v1433_v12 }
 0x157   : > { %2356 = vmatmul.bf16.gmra.mxu3 %v2163_v2  ;;  %v971_v2 = vunpack.c.l.bf16 %v501_v60  ;;  %v2178_v9 = vrot.slane %v2176_v63, 1  ;;  %v1152_v13 = vsel %vm1116_vm4, %v503_v35, %v1080_v56  ;;  %v7493_v35 = vld [vmem:[%s11237_s1 + $0x108] sm:$0xff] }
 0x158   : > { %v9338_v7 = vpop.f32.mrf.mxu2  ;;  %1188 = vst [vmem:[#allocation3 + $0x5c] sm:$0xf] %v1152_v13 }
 0x159   : > { %11396 = vst [vmem:[#allocation15_spill] sm:$0xff] %v9338_v7  ;;  %v1043_v15 = vmul.f32 0.20019531, %v971_v2  ;;  %vm9391_vm15 = vcmp.ge.f32.partialorder %v971_v2, 0.0  ;;  %v2179_v22 = vsel %vm2103_vm9, %v2174_v6, %v2178_v9  ;;  %v2182_v59 = vor.u32 %v2180_v43, %v2178_v9  ;;  %v6515_v6 = vld [vmem:[%s9130_s24 + $0x60] sm:$0xf] }
 0x15a   : > { %v9340_v8 = vpop.f32.mrf.mxu1  ;;  %v9342_v11 = vpop.f32.mrf.mxu3  ;;  %vm1115_vm0 = vmpackc.low %vm9391_vm15, %vm9391_vm15  ;;  %874 = vmatmul.bf16.gmra.mxu0 %v6512_v25  ;;  %v7428_v9 = vld [vmem:[%s9130_s24 + $0x68] sm:$0xf0]  ;;  %v507_v25 = vld [vmem:[%s9130_s24 + $0x120] sm:$0xff]  ;;  %v975_v43 = vunpack.c.l.bf16 %v509_v30 }
 0x15b   : > { %11397 = vst [vmem:[#allocation16_spill] sm:$0xff] %v9340_v8 }
 0x15c   : > { %11398 = vst [vmem:[#allocation17_spill] sm:$0xff] %v9342_v11  ;;  %vm9476_vm7 = vcmp.ge.f32.partialorder %v975_v43, 0.0  ;;  %v517_v11 = vld [vmem:[%s9130_s24 + $0x15c] sm:$0xff] }
 0x15d   : > { %vm1119_vm10 = vmpackc.low %vm9476_vm7, %vm9476_vm7 }
 0x160   : > { %v9350_v17 = vpop.f32.mrf.mxu2 }
 0x161   : > { %11399 = vst [vmem:[#allocation18_spill] sm:$0xff] %v9350_v17 }
 0x162   : > { %v9359_v26 = vpop.f32.mrf.mxu1  ;;  %v9363_v31 = vpop.f32.mrf.mxu3 }
 0x163   : > { %11400 = vst [vmem:[#allocation19_spill] sm:$0xff] %v9359_v26 }
 0x164   : > { %11401 = vst [vmem:[#allocation20_spill] sm:$0xff] %v9363_v31 }
 0x165   : > { %1619 = vmatmul.bf16.gmra.mxu1 %v1411_v27  ;;  %1855 = vmatmul.bf16.gmra.mxu2 %v8570_v21  ;;  %v1079_v21 = vpack.c.bf16 %v1043_v15, %v1043_v15  ;;  %v6516_v15 = vor.u32 %v7428_v9, %v6515_v6  ;;  %v460_v6 = vld [vmem:[%s9130_s24 + $0x8] sm:$0xf] }
 0x166   : > { %v7503_v9 = vld [vmem:[%s11237_s1 + $0x158] sm:$0xff] }
 0x167   : > { %2361 = vmatmul.bf16.gmra.mxu3 %v2171_v42  ;;  %v1151_v27 = vsel %vm1115_vm0, %v501_v60, %v1079_v21  ;;  %v1045_v60 = vmul.f32 0.20019531, %v973_v44  ;;  %v7511_v21 = vld [vmem:[%s11237_s1 + $0x198] sm:$0xff]  ;;  %v9465_v44 = vld [vmem:[%s11238_s2 + $0x1] ss:$0 sm:$0xff]  ;;  %3199 = vmatpush.bf16.msra.mxu1 %v7503_v9 }
 0x168   : > { %v9371_v48 = vpop.f32.mrf.mxu2  ;;  %1187 = vst [vmem:[#allocation3 + $0x58] sm:$0xf] %v1151_v27  ;;  %3584 = vmatpush.bf16.msra.mxu2 %v7511_v21  ;;  %v974_v27 = vunpack.c.l.bf16 %v507_v25 }
 0x169   : > { %11402 = vst [vmem:[#allocation21_spill] sm:$0xff] %v9371_v48  ;;  %v1081_v2 = vpack.c.bf16 %v1045_v60, %v1045_v60 }
 0x16a   : > { %v9373_v49 = vpop.f32.mrf.mxu1  ;;  %v9375_v53 = vpop.f32.mrf.mxu3  ;;  %879 = vmatmul.bf16.gmra.mxu0 %v6516_v15  ;;  %vm1010_vm6 = vcmp.ge.f32.partialorder %v974_v27, 0.0 }
 0x16b   : > { %11403 = vst [vmem:[#allocation22_spill] sm:$0xff] %v9373_v49  ;;  %v1153_v16 = vsel %vm1117_vm5, %v505_v41, %v1081_v2  ;;  %vm1118_vm8 = vmpackc.low %vm1010_vm6, %vm1010_vm6 }
 0x16c   : > { %11404 = vst [vmem:[#allocation23_spill] sm:$0xff] %v9375_v53 }
 0x16d   : > { %1189 = vst [vmem:[#allocation3 + $0x60] sm:$0xf] %v1153_v16  ;;  %v8731_v16 = vld [vmem:[%s9130_s24] sm:$0xff] }
 0x16e   : > { %v567_v12 = vrot.slane %v8731_v16, 4 }
 0x16f   : > { %v9413_v38 = vld [vmem:[#allocation3 + $0x54] sm:$0xff] }
 0x170   : > { %v9382_v61 = vpop.f32.mrf.mxu2  ;;  %v2184_v47 = vshll.u32 %v9413_v38, 16  ;;  %v2188_v41 = vshrl.u32 %v9413_v38, 16  ;;  %v1047_v38 = vmul.f32 0.20019531, %v975_v43  ;;  %v9492_v43 = vunpack.c.l.bf16 %v567_v12  ;;  %v8203_v9 = vld [vmem:[#allocation3 + $0x58] sm:$0xff]  }
 0x171   : > { %11405 = vst [vmem:[#allocation24_spill] sm:$0xff] %v9382_v61 }
 0x172   : > { %v9385_v3 = vpop.f32.mrf.mxu1  ;;  %v9389_v10 = vpop.f32.mrf.mxu3  ;;  %v2186_v62 = vrot.slane %v2184_v47, 1  ;;  %v1046_v47 = vmul.f32 0.20019531, %v974_v27  ;;  %v9490_v27 = vunpack.c.l.bf16 %v460_v6 }
 0x173   : > { %11406 = vst [vmem:[#allocation25_spill] sm:$0xff] %v9385_v3 }
 0x174   : > { %11407 = vst [vmem:[#allocation26_spill] sm:$0xff] %v9389_v10  ;;  %v2187_v5 = vsel %vm2103_vm9, %v2182_v59, %v2186_v62  ;;  %v9459_v39 = vld [vmem:[#allocation3 + $0x5c] sm:$0xff]  ;;  %v2190_v59 = vor.u32 %v2188_v41, %v2186_v62  ;;  %v1082_v2 = vpack.c.bf16 %v1046_v47, %v1046_v47  ;;  %v1440_v62 = vshrl.u32 %v8202_v58, 16 }
 0x175   : > { %1624 = vmatmul.bf16.gmra.mxu1 %v1420_v4  ;;  %1860 = vmatmul.bf16.gmra.mxu2 %v8572_v0  ;;  %v7495_v4 = vld [vmem:[%s11237_s1 + $0x118] sm:$0xff]  ;;  %v2192_v60 = vshll.u32 %v9459_v39, 16 }
 0x176   : > { %2960 = vmatpush.bf16.msrb.mxu0 %v7495_v4  ;;  %v1443_v4 = vshll.u32 %v8202_v58, 16  ;;  %v1154_v15 = vsel %vm1118_vm8, %v507_v25, %v1082_v2 }
 0x177   : > { %2366 = vmatmul.bf16.gmra.mxu3 %v2179_v22  ;;  %v2194_v0 = vrot.slane %v2192_v60, 1  ;;  %1190 = vst [vmem:[#allocation3 + $0x64] sm:$0xf] %v1154_v15 }
 0x178   : > { %v9404_v28 = vpop.f32.mrf.mxu2  ;;  %v1445_v41 = vrot.slane %v1443_v4, 4 }
 0x179   : > { %11410 = vst [vmem:[#allocation27_spill] sm:$0xff] %v9404_v28  ;;  %v2195_v13 = vsel %vm2103_vm9, %v2190_v59, %v2194_v0 }
 0x17a   : > { %v9406_v29 = vpop.f32.mrf.mxu1  ;;  %v9408_v33 = vpop.f32.mrf.mxu3  ;;  %2961 = vmatpush.bf16.msrb.mxu0 %v7494_v23 }
 0x17b   : > { %11411 = vst [vmem:[#allocation28_spill] sm:$0xff] %v9406_v29 }
 0x17e   : > { %2962 = vmatpush.bf16.msrb.mxu0 %v7493_v35  ;;  %v1442_v35 = vrot.slane %v1440_v62, 3 }
 0x180   : > { %v9416_v42 = vpop.f32.mrf.mxu2 }
 0x181   : > { %11412 = vst [vmem:[#allocation29_spill] sm:$0xff] %v9416_v42 }
 0x182   : > { %v9419_v51 = vpop.f32.mrf.mxu1  ;;  %v9423_v63 = vpop.f32.mrf.mxu3  ;;  %2963 = vmatpush.bf16.msrb.mxu0 %v7492_v1  ;;  %v513_v1 = vld [vmem:[%s9130_s24 + $0x144] sm:$0xff] }
 0x183   : > { %11413 = vst [vmem:[#allocation30_spill] sm:$0xff] %v9419_v51  ;;  %v977_v12 = vunpack.c.l.bf16 %v513_v1 }
 0x185   : > { %1629 = vmatmul.bf16.gmra.mxu1 %v1429_v54  ;;  %1865 = vmatmul.bf16.gmra.mxu2 %v8574_v45  ;;  %v8576_v45 = vld [vmem:[#allocation3 + $0x44] sm:$0xff]   ;;  %v1438_v54 = vsel %vm1349_vm1, %v9410_v34, %v9450_v24  ;;  %vm9524_vm14 = vcmp.ge.f32.partialorder %v977_v12, 0.0 }
 0x186   : > { %vm1121_vm15 = vmpackc.low %vm9524_vm14, %vm9524_vm14 }
 0x187   : > { %2371 = vmatmul.bf16.gmra.mxu3 %v2187_v5  ;;  %v1083_v5 = vpack.c.bf16 %v1047_v38, %v1047_v38 }
 0x188   : > { %v9438_v14 = vpop.f32.mrf.mxu2 }
 0x189   : > { %11416 = vst [vmem:[#allocation31_spill] sm:$0xff] %v9438_v14  ;;  %v1155_v19 = vsel %vm1119_vm10, %v509_v30, %v1083_v5  ;;  %v8578_v5 = vld [vmem:[#allocation3 + $0x4c] sm:$0xff]  }
 0x18a   : > { %v9440_v18 = vpop.f32.mrf.mxu1  ;;  %v9445_v22 = vpop.f32.mrf.mxu3  ;;  %1191 = vst [vmem:[#allocation3 + $0x68] sm:$0xf] %v1155_v19 }
 0x18b   : > { %11417 = vst [vmem:[#allocation32_spill] sm:$0xff] %v9440_v18 }
 0x190   : > { %v9454_v32 = vpop.f32.mrf.mxu2 }
 0x191   : > { %11418 = vst [vmem:[#allocation33_spill] sm:$0xff] %v9454_v32  ;;  %v9503_v60 = vld [vmem:[#allocation3 + $0x64] sm:$0xff] }
 0x192   : > { %v1595_v50 = vpop.f32.mrf.mxu1  ;;  %v9471_v56 = vpop.f32.mrf.mxu3  ;;  %v2200_v15 = vshll.u32 %v9503_v60, 16 }
 0x193   : > { %v1686_v34 = vadd.f32 %v9465_v44, %v1595_v50  ;;  %v9498_v50 = vor.u32 %v1445_v41, %v1442_v35 }
 0x195   : > { %1634 = vmatmul.bf16.gmra.mxu1 %v1438_v54  ;;  %1870 = vmatmul.bf16.gmra.mxu2 %v8576_v45  ;;  %v511_v54 = vld [vmem:[%s9130_s24 + $0x138] sm:$0xff]  ;;  %v1447_v4 = vsel %vm1349_vm1, %v9450_v24, %v9498_v50  ;;  %v9518_v24 = vrot.slane %v2200_v15, 1 }
 0x196   : > { %v976_v38 = vunpack.c.l.bf16 %v511_v54 }
 0x197   : > { %2376 = vmatmul.bf16.gmra.mxu3 %v2195_v13 }
 0x198   : > { %v1831_v21 = vpop.f32.mrf.mxu2  ;;  %v1048_v16 = vmul.f32 0.20019531, %v976_v38  ;;  %vm1012_vm12 = vcmp.ge.f32.partialorder %v976_v38, 0.0 }
 0x199   : > { %v1921_v23 = vadd.f32 %v1831_v21, %v1686_v34  ;;  %v8732_v21 = vld [vmem:[%s9130_s24 + $0xc] sm:$0xff]  ;;  %vm1120_vm13 = vmpackc.low %vm1012_vm12, %vm1012_vm12 }
 0x19a   : > { %v1597_v25 = vpop.f32.mrf.mxu1  ;;  %v9495_v47 = vpop.f32.mrf.mxu3 }
 0x19b   : > { %v2417_v45 = vadd.f32 %v9408_v33, %v1921_v23  ;;  %v1687_v59 = vadd.f32 %v9465_v44, %v1597_v25  ;;  %v2196_v33 = vshrl.u32 %v9459_v39, 16  ;;  %v568_v23 = vrot.slane %v8732_v21, 4 }
 0x19c   : > { %v9513_v39 = vunpack.c.l.bf16 %v462_v55  ;;  %v1049_v55 = vmul.f32 0.20019531, %v977_v12 }
 0x19d   : > { %v2453_v30 = vmul.f32 %v2417_v45, %v9490_v27  ;;  %v2198_v13 = vor.u32 %v2196_v33, %v2194_v0  ;;  %v464_v0 = vld [vmem:[%s9130_s24 + $0x20] sm:$0xf]  ;;  %v9528_v33 = vunpack.c.l.bf16 %v568_v23 }
 0x19f   : > { %v2489_v58 = vadd.f32 %v2453_v30, %v9492_v43  ;;  %v1449_v30 = vshrl.u32 %v8203_v9, 16 }
 0x1a0   : > { %v1833_v2 = vpop.f32.mrf.mxu2 }
 0x1a1   : > { %vm2525_vm11 = vcmp.ge.f32.partialorder %v2489_v58, 0.0  ;;  %v2561_v34 = vmul.f32 0.2, %v2489_v58  ;;  %v1922_v62 = vadd.f32 %v1833_v2, %v1687_v59  ;;  %v1452_v59 = vshll.u32 %v8203_v9, 16 }
 0x1a2   : > { %v1600_v6 = vpop.f32.mrf.mxu1  ;;  %v9516_v25 = vpop.f32.mrf.mxu3  ;;  %v2203_v2 = vsel %vm2103_vm9, %v2198_v13, %v9518_v24  ;;  %v9535_v13 = vunpack.c.l.bf16 %v464_v0 }
 0x1a3   : > { %v2597_v19 = vsel %vm2525_vm11, %v2489_v58, %v2561_v34  ;;  %v2418_v35 = vadd.f32 %v9423_v63, %v1922_v62  ;;  %v1688_v45 = vadd.f32 %v9465_v44, %v1600_v6  ;;  %v1084_v58 = vpack.c.bf16 %v1048_v16, %v1048_v16  ;;  %v8733_v62 = vld [vmem:[%s9130_s24 + $0x18] sm:$0xff] }
 0x1a4   : > { %v2633_v41 = vpack.c.bf16 %v2597_v19, %v2597_v19  ;;  %v1085_v6 = vpack.c.bf16 %v1049_v55, %v1049_v55  ;;  %v1451_v16 = vrot.slane %v1449_v30, 3  ;;  %v1454_v12 = vrot.slane %v1452_v59, 4  ;;  %v515_v55 = vld [vmem:[%s9130_s24 + $0x150] sm:$0xff] }
 0x1a5   : > { %1639 = vmatmul.bf16.gmra.mxu1 %v1447_v4  ;;  %1875 = vmatmul.bf16.gmra.mxu2 %v8578_v5  ;;  %v2454_v34 = vmul.f32 %v2418_v35, %v9513_v39  ;;  %v569_v4 = vrot.slane %v8733_v62, 4  ;;  %v1156_v5 = vsel %vm1120_vm13, %v511_v54, %v1084_v58  ;;  %v2722_v35 = vld [vmem:[#allocation3] sm:$0x8]  ;;  %v8734_v58 = vld [vmem:[%s9130_s24 + $0x24] sm:$0xff] }
 0x1a6   : > { %2669 = vst [vmem:[#allocation3 + $0x4] sm:$0xf] %v2633_v41  ;;  %v1157_v19 = vsel %vm1121_vm15, %v513_v1, %v1085_v6  ;;  %v7541_v41 = vld [vmem:[%s11237_s1 + $0x1f8] sm:$0xff]  ;;  %v9551_v59 = vor.u32 %v1454_v12, %v1451_v16  ;;  %v8204_v16 = vld [vmem:[#allocation3 + $0x60] sm:$0xff]  }
 0x1a7   : > { %1192 = vst [vmem:[#allocation3 + $0x6c] sm:$0xf] %v1156_v5  ;;  %2381 = vmatmul.bf16.gmra.mxu3 %v2203_v2  ;;  %v2490_v21 = vadd.f32 %v2454_v34, %v9528_v33  ;;  %v9538_v23 = vunpack.c.l.bf16 %v569_v4  ;;  %v2796_v2 = vunpack.c.l.b16 %v2722_v35  ;;  %v466_v5 = vld [vmem:[%s9130_s24 + $0x2c] sm:$0xf] }
 0x1a8   : > { %v1836_v38 = vpop.f32.mrf.mxu2  ;;  %1193 = vst [vmem:[#allocation3 + $0x70] sm:$0xf] %v1157_v19  ;;  %4254 = vmatpush.bf16.msra.mxu3 %v7541_v41  ;;  %v8580_v41 = vld [vmem:[#allocation3 + $0x54] sm:$0xff]  }
 0x1a9   : > { %v1923_v9 = vadd.f32 %v1836_v38, %v1688_v45  ;;  %v7549_v45 = vld [vmem:[%s11237_s1 + $0x238] sm:$0xff]  ;;  %v2562_v34 = vmul.f32 0.2, %v2490_v21  ;;  %v978_v38 = vunpack.c.l.bf16 %v515_v55  ;;  %vm2526_vm0 = vcmp.ge.f32.partialorder %v2490_v21, 0.0 }
 0x1aa   : > { %v1602_v15 = vpop.f32.mrf.mxu1  ;;  %v9547_v0 = vpop.f32.mrf.mxu3  ;;  %4493 = vmatpush.bf16.msra.mxu0 %v7549_v45  ;;  %v9560_v45 = vunpack.c.l.bf16 %v466_v5 }
 0x1ab   : > { %v2419_v54 = vadd.f32 %v9445_v22, %v1923_v9  ;;  %v570_v22 = vrot.slane %v8734_v58, 4  ;;  %v1689_v4 = vadd.f32 %v9465_v44, %v1602_v15  ;;  %v2204_v9 = vshrl.u32 %v9503_v60, 16 }
 0x1ac   : > { %v1050_v12 = vmul.f32 0.20019531, %v978_v38  ;;  %v1456_v15 = vsel %vm1349_vm1, %v9498_v50, %v9551_v59  ;;  %v2598_v60 = vsel %vm2526_vm0, %v2490_v21, %v2562_v34  ;;  %v468_v21 = vld [vmem:[%s9130_s24 + $0x38] sm:$0xf]  ;;  %vm1014_vm4 = vcmp.ge.f32.partialorder %v978_v38, 0.0 }
 0x1ad   : > { %v2455_v1 = vmul.f32 %v2419_v54, %v9535_v13  ;;  %v2723_v30 = vld [vmem:[#allocation3 + $0x4] sm:$0xf]  ;;  %v9558_v35 = vunpack.c.l.bf16 %v570_v22  ;;  %v1458_v22 = vshrl.u32 %v8204_v16, 16  ;;  %v2206_v5 = vor.u32 %v2204_v9, %v9518_v24  ;;  %v7510_v24 = vld [vmem:[%s11237_s1 + $0x190] sm:$0xff]  ;;  %vm1122_vm5 = vmpackc.low %vm1014_vm4, %vm1014_vm4 }
 0x1ae   : > { %v2797_v63 = vunpack.c.l.b16 %v2723_v30  ;;  %v7502_v9 = vld [vmem:[%s11237_s1 + $0x150] sm:$0xff]  ;;  %3585 = vmatpush.bf16.msra.mxu2 %v7510_v24  ;;  %v9597_v57 = vunpack.c.l.bf16 %v468_v21  ;;  %v8205_v32 = vld [vmem:[#allocation3 + $0x68] sm:$0xff]  }
 0x1af   : > { %v2491_v62 = vadd.f32 %v2455_v1, %v9538_v23  ;;  %v9565_v58 = vld [vmem:[#allocation3 + $0x6c] sm:$0xff]  ;;  %3200 = vmatpush.bf16.msra.mxu1 %v7502_v9 }
 0x1b0   : > { %v1838_v6 = vpop.f32.mrf.mxu2  ;;  %v2833_v30 = vpack.c.b16 %v2797_v63, %v2796_v2  ;;  %v2208_v31 = vshll.u32 %v9565_v58, 16  ;;  %v1461_v2 = vshll.u32 %v8204_v16, 16 }
 0x1b1   : > { %vm2527_vm2 = vcmp.ge.f32.partialorder %v2491_v62, 0.0  ;;  %v2563_v19 = vmul.f32 0.2, %v2491_v62  ;;  %v1924_v54 = vadd.f32 %v1838_v6, %v1689_v4 }
 0x1b2   : > { %v1605_v1 = vpop.f32.mrf.mxu1  ;;  %v9570_v53 = vpop.f32.mrf.mxu3  ;;  %v2853_v34 = vrot.slane %v2833_v30, 3 }
 0x1b3   : > { %v2599_v10 = vsel %vm2527_vm2, %v2491_v62, %v2563_v19  ;;  %v2420_v4 = vadd.f32 %v9471_v56, %v1924_v54  ;;  %v1690_v50 = vadd.f32 %v9465_v44, %v1605_v1  ;;  %v1086_v56 = vpack.c.bf16 %v1050_v12, %v1050_v12  ;;  %v8735_v54 = vld [vmem:[%s9130_s24 + $0x30] sm:$0xff] }
 0x1b4   : > { %v9568_v6 = vpack.c.bf16 %v2599_v10, %v2598_v60  ;;  %v9586_v19 = vrot.slane %v2208_v31, 1  ;;  %v979_v12 = vunpack.c.l.bf16 %v517_v11 }
 0x1b5   : > { %1644 = vmatmul.bf16.gmra.mxu1 %v1456_v15  ;;  %1880 = vmatmul.bf16.gmra.mxu2 %v8580_v41  ;;  %v2456_v38 = vmul.f32 %v2420_v4, %v9560_v45  ;;  %v571_v41 = vrot.slane %v8735_v54, 4  ;;  %v1158_v16 = vsel %vm1122_vm5, %v515_v55, %v1086_v56  ;;  %v1460_v4 = vrot.slane %v1458_v22, 3  ;;  %v519_v22 = vld [vmem:[%s9130_s24 + $0x168] sm:$0xff] }
 0x1b6   : > { %8290 = vst [vmem:[#allocation3 + $0x8] sm:$0xff] %v9568_v6   ;;  %v7809_v10 = vunpack.c.l.b16 %v9568_v6  ;;  %v11240_v62 = vrot.slane %v9568_v6, 3  ;;  %v2211_v31 = vsel %vm2103_vm9, %v2206_v5, %v9586_v19  ;;  %vm1015_vm6 = vcmp.ge.f32.partialorder %v979_v12, 0.0 }
 0x1b7   : > { %1194 = vst [vmem:[#allocation3 + $0x74] sm:$0xf] %v1158_v16  ;;  %2386 = vmatmul.bf16.gmra.mxu3 %v2211_v31  ;;  %v1463_v56 = vrot.slane %v1461_v2, 4  ;;  %v1051_v54 = vmul.f32 0.20019531, %v979_v12  ;;  %vm1123_vm7 = vmpackc.low %vm1015_vm6, %vm1015_vm6 }
 0x1b8   : > { %v1841_v1 = vpop.f32.mrf.mxu2  ;;  %v2855_v15 = vsel %vm2852_vm3, %v2853_v34, %v11240_v62  ;;  %v9593_v30 = vpack.c.b16 %v7809_v10, %v2797_v63  ;;  %v2492_v63 = vadd.f32 %v2456_v38, %v9558_v35  ;;  %v9600_v10 = vunpack.c.l.bf16 %v571_v41 }
 0x1b9   : > { %v1925_v60 = vadd.f32 %v1841_v1, %v1690_v50  ;;  %2964 = vmatmul.bf16.vlgmr.msrb.gmra.mxu0 %v2855_v15  ;;  %v1087_v50 = vpack.c.bf16 %v1051_v54, %v1051_v54  ;;  %v9606_v24 = vor.u32 %v1463_v56, %v1460_v4  ;;  %v980_v41 = vunpack.c.l.bf16 %v519_v22  ;;  %v470_v1 = vld [vmem:[%s9130_s24 + $0x44] sm:$0xf]  ;;  %v8582_v4 = vld [vmem:[#allocation3 + $0x5c] sm:$0xff]  }
 0x1ba   : > { %v1607_v55 = vpop.f32.mrf.mxu1  ;;  %v9603_v5 = vpop.f32.mrf.mxu3  ;;  %v2564_v2 = vmul.f32 0.2, %v2492_v63  ;;  %vm2528_vm8 = vcmp.ge.f32.partialorder %v2492_v63, 0.0  ;;  %v9617_v62 = vunpack.c.l.bf16 %v470_v1 }
 0x1bb   : > { %v2421_v34 = vadd.f32 %v9495_v47, %v1925_v60  ;;  %v1159_v9 = vsel %vm1123_vm7, %v517_v11, %v1087_v50  ;;  %v1691_v38 = vadd.f32 %v9465_v44, %v1607_v55  ;;  %v521_v47 = vld [vmem:[%s9130_s24 + $0x174] sm:$0xff]  ;;  %v1052_v56 = vmul.f32 0.20019531, %v980_v41  ;;  %v8736_v11 = vld [vmem:[%s9130_s24 + $0x3c] sm:$0xff] }
 0x1bc   : > { %1195 = vst [vmem:[#allocation3 + $0x78] sm:$0xf] %v1159_v9  ;;  %v981_v15 = vunpack.c.l.bf16 %v521_v47  ;;  %v572_v54 = vrot.slane %v8736_v11, 4  ;;  %v1465_v55 = vsel %vm1349_vm1, %v9551_v59, %v9606_v24  ;;  %vm9625_vm11 = vcmp.ge.f32.partialorder %v980_v41, 0.0 }
 0x1bd   : > { %v2457_v21 = vmul.f32 %v2421_v34, %v9597_v57  ;;  %vm1124_vm12 = vmpackc.low %vm9625_vm11, %vm9625_vm11  ;;  %v1470_v41 = vshll.u32 %v8205_v32, 16 }
 0x1be   : > { %v1053_v50 = vmul.f32 0.20019531, %v981_v15  ;;  %vm9634_vm13 = vcmp.ge.f32.partialorder %v981_v15, 0.0 }
 0x1bf   : > { %v2493_v16 = vadd.f32 %v2457_v21, %v9600_v10  ;;  %v2600_v21 = vsel %vm2528_vm8, %v2492_v63, %v2564_v2  ;;  %v472_v63 = vld [vmem:[%s9130_s24 + $0x50] sm:$0xf]  ;;  %v1088_v2 = vpack.c.bf16 %v1052_v56, %v1052_v56  ;;  %vm1125_vm14 = vmpackc.low %vm9634_vm13, %vm9634_vm13 }
 0x1c0   : > { %v1843_v12 = vpop.f32.mrf.mxu2 }
 0x1c1   : > { %vm2529_vm10 = vcmp.ge.f32.partialorder %v2493_v16, 0.0  ;;  %v2565_v31 = vmul.f32 0.2, %v2493_v16  ;;  %v1926_v60 = vadd.f32 %v1843_v12, %v1691_v38  ;;  %v2212_v12 = vshrl.u32 %v9565_v58, 16 }
 0x1c2   : > { %v1610_v34 = vpop.f32.mrf.mxu1  ;;  %v9622_v38 = vpop.f32.mrf.mxu3 }
 0x1c3   : > { %v2601_v9 = vsel %vm2529_vm10, %v2493_v16, %v2565_v31  ;;  %v2422_v40 = vadd.f32 %v9516_v25, %v1926_v60  ;;  %v1692_v59 = vadd.f32 %v9465_v44, %v1610_v34  ;;  %v1467_v16 = vshrl.u32 %v8205_v32, 16  ;;  %v9640_v1 = vld [vmem:[#allocation3 + $0x74] sm:$0xff] }
 0x1c4   : > { %v9620_v14 = vpack.c.bf16 %v2601_v9, %v2600_v21  ;;  %v1089_v31 = vpack.c.bf16 %v1053_v50, %v1053_v50  ;;  %v9645_v60 = vunpack.c.l.bf16 %v572_v54  ;;  %v1160_v34 = vsel %vm1124_vm12, %v519_v22, %v1088_v2 }
 0x1c5   : > { %1649 = vmatmul.bf16.gmra.mxu1 %v1465_v55  ;;  %1885 = vmatmul.bf16.gmra.mxu2 %v8582_v4  ;;  %v2458_v15 = vmul.f32 %v2422_v40, %v9617_v62  ;;  %v8737_v4 = vld [vmem:[%s9130_s24 + $0x48] sm:$0xff]  ;;  %v11427_v21 = vrot.slane %v9568_v6, 3  ;;  %v2214_v50 = vor.u32 %v2212_v12, %v9586_v19  ;;  %v2216_v9 = vshll.u32 %v9640_v1, 16  ;;  %1196 = vst [vmem:[#allocation3 + $0x7c] sm:$0xf] %v1160_v34 }
 0x1c6   : > { %8291 = vst [vmem:[#allocation3 + $0x10] sm:$0xff] %v9620_v14   ;;  %v11241_v58 = vrot.slane %v9620_v14, 3  ;;  %v573_v56 = vrot.slane %v8737_v4, 4  ;;  %v1161_v11 = vsel %vm1125_vm14, %v521_v47, %v1089_v31  ;;  %v9656_v25 = vunpack.c.l.bf16 %v472_v63  ;;  %v7540_v47 = vld [vmem:[%s11237_s1 + $0x1f0] sm:$0xff] }
 0x1c7   : > { %1197 = vst [vmem:[#allocation3 + $0x80] sm:$0xf] %v1161_v11  ;;  %v1469_v22 = vrot.slane %v1467_v16, 3  ;;  %v1472_v2 = vrot.slane %v1470_v41, 4  ;;  %v2218_v4 = vrot.slane %v2216_v9, 1  ;;  %v2494_v6 = vadd.f32 %v2458_v15, %v9645_v60  ;;  %4255 = vmatpush.bf16.msra.mxu3 %v7540_v47  ;;  %v523_v41 = vld [vmem:[%s9130_s24 + $0x180] sm:$0xff] }
 0x1c8   : > { %v1846_v55 = vpop.f32.mrf.mxu2  ;;  %v2857_v32 = vsel %vm2852_vm3, %v11427_v21, %v11241_v58  ;;  %v9659_v21 = vunpack.c.l.bf16 %v573_v56  ;;  %v474_v56 = vld [vmem:[%s9130_s24 + $0x5c] sm:$0xf]  ;;  %v9679_v9 = vld [vmem:[%s9130_s24 + $0x18c] sm:$0xff] }
 0x1c9   : > { %v1927_v54 = vadd.f32 %v1846_v55, %v1692_v59  ;;  %2969 = vmatmul.bf16.gmra.mxu0 %v2857_v32  ;;  %v2219_v12 = vsel %vm2103_vm9, %v2214_v50, %v2218_v4  ;;  %v9669_v16 = vor.u32 %v1472_v2, %v1469_v22  ;;  %v2566_v31 = vmul.f32 0.2, %v2494_v6  ;;  %v8738_v55 = vld [vmem:[%s9130_s24 + $0x54] sm:$0xff] }
 0x1ca   : > { %v1612_v40 = vpop.f32.mrf.mxu1  ;;  %v9666_v59 = vpop.f32.mrf.mxu3  ;;  %2391 = vmatmul.bf16.gmra.mxu3 %v2219_v12  ;;  %vm2530_vm15 = vcmp.ge.f32.partialorder %v2494_v6, 0.0  ;;  %v574_v32 = vrot.slane %v8738_v55, 4  ;;  %v8584_v22 = vld [vmem:[#allocation3 + $0x64] sm:$0xff]   ;;  %v8206_v2 = vld [vmem:[#allocation3 + $0x70] sm:$0xff]   ;;  %v9681_v47 = vunpack.c.l.bf16 %v474_v56  ;;  %v2220_v55 = vshrl.u32 %v9640_v1, 16 }
 0x1cb   : > { %v2423_v19 = vadd.f32 %v9547_v0, %v1927_v54  ;;  %v1693_v0 = vadd.f32 %v9465_v44, %v1612_v40  ;;  %v1474_v40 = vsel %vm1349_vm1, %v9606_v24, %v9669_v16  ;;  %v2602_v58 = vsel %vm2530_vm15, %v2494_v6, %v2566_v31  ;;  %v476_v1 = vld [vmem:[%s9130_s24 + $0x68] sm:$0xf]  ;;  %v7548_v31 = vld [vmem:[%s11237_s1 + $0x230] sm:$0xff] }
 0x1cc   : > { %v9694_v56 = vunpack.c.l.bf16 %v574_v32  ;;  %v1476_v61 = vshrl.u32 %v8206_v2, 16  ;;  %v1479_v6 = vshll.u32 %v8206_v2, 16  ;;  %v2222_v32 = vor.u32 %v2220_v55, %v2218_v4  ;;  %v8739_v2 = vld [vmem:[%s9130_s24 + $0x60] sm:$0xff]  ;;  %4494 = vmatpush.bf16.msra.mxu0 %v7548_v31 }
 0x1cd   : > { %v2459_v63 = vmul.f32 %v2423_v19, %v9656_v25  ;;  %v982_v19 = vunpack.c.l.bf16 %v523_v41  ;;  %v11433_v4 = vrot.slane %v9620_v14, 3 }
 0x1ce   : > { %v9676_v50 = vld [vmem:[#allocation3 + $0x7c] sm:$0xff] }
 0x1cf   : > { %v2495_v15 = vadd.f32 %v2459_v63, %v9659_v21  ;;  %v9686_v63 = vpop.f32.mrf.mxu0  ;;  %v2224_v24 = vshll.u32 %v9676_v50, 16  ;;  %vm9701_vm2 = vcmp.ge.f32.partialorder %v982_v19, 0.0 }
 0x1d0   : > { %v1848_v34 = vpop.f32.mrf.mxu2  ;;  %vm1126_vm4 = vmpackc.low %vm9701_vm2, %vm9701_vm2 }
 0x1d1   : > { %vm2531_vm0 = vcmp.ge.f32.partialorder %v2495_v15, 0.0  ;;  %v2567_v11 = vmul.f32 0.2, %v2495_v15  ;;  %v1928_v54 = vadd.f32 %v1848_v34, %v1693_v0  ;;  %v983_v34 = vunpack.c.l.bf16 %v9679_v9 }
 0x1d2   : > { %v1615_v12 = vpop.f32.mrf.mxu1  ;;  %v9696_v48 = vpop.f32.mrf.mxu3 }
 0x1d3   : > { %v2603_v42 = vsel %vm2531_vm0, %v2495_v15, %v2567_v11  ;;  %v2424_v0 = vadd.f32 %v9570_v53, %v1928_v54  ;;  %v1694_v17 = vadd.f32 %v9465_v44, %v1615_v12  ;;  %v7509_v15 = vld [vmem:[%s11237_s1 + $0x188] sm:$0xff]  ;;  %v9713_v11 = vrot.slane %v2224_v24, 1 }
 0x1d4   : > { %v9692_v28 = vpack.c.bf16 %v2603_v42, %v2602_v58  ;;  %v1054_v42 = vmul.f32 0.20019531, %v982_v19  ;;  %vm9718_vm5 = vcmp.ge.f32.partialorder %v983_v34, 0.0  ;;  %v575_v19 = vrot.slane %v8739_v2, 4  ;;  %3586 = vmatpush.bf16.msra.mxu2 %v7509_v15  ;;  %v478_v2 = vld [vmem:[%s9130_s24 + $0x74] sm:$0xf] }
 0x1d5   : > { %1654 = vmatmul.bf16.gmra.mxu1 %v1474_v40  ;;  %1890 = vmatmul.bf16.gmra.mxu2 %v8584_v22  ;;  %v2460_v22 = vmul.f32 %v2424_v0, %v9681_v47  ;;  %v1055_v40 = vmul.f32 0.20019531, %v983_v34  ;;  %v9729_v53 = vunpack.c.l.bf16 %v476_v1  ;;  %vm1127_vm6 = vmpackc.low %vm9718_vm5, %vm9718_vm5  ;;  %v1478_v34 = vrot.slane %v1476_v61, 3  ;;  %v7501_v1 = vld [vmem:[%s11237_s1 + $0x148] sm:$0xff] }
 0x1d6   : > { %8292 = vst [vmem:[#allocation3 + $0x18] sm:$0xff] %v9692_v28   ;;  %v1090_v12 = vpack.c.bf16 %v1054_v42, %v1054_v42  ;;  %v11432_v7 = vrot.slane %v9692_v28, 3  ;;  %v1481_v42 = vrot.slane %v1479_v6, 4  ;;  %v2227_v14 = vsel %vm2103_vm9, %v2222_v32, %v9713_v11  ;;  %3201 = vmatpush.bf16.msra.mxu1 %v7501_v1 }
 0x1d7   : > { %v2496_v31 = vadd.f32 %v2460_v22, %v9694_v56  ;;  %v9743_v61 = vpop.f32.mrf.mxu0 }
 0x1d8   : > { %v1851_v58 = vpop.f32.mrf.mxu2  ;;  %v2859_v55 = vsel %vm2852_vm3, %v11433_v4, %v11432_v7  ;;  %v1162_v46 = vsel %vm1126_vm4, %v523_v41, %v1090_v12  ;;  %v1091_v7 = vpack.c.bf16 %v1055_v40, %v1055_v40  ;;  %v9749_v15 = vor.u32 %v1481_v42, %v1478_v34  ;;  %v8740_v12 = vld [vmem:[%s9130_s24 + $0x6c] sm:$0xff]  ;;  %v529_v4 = vld [vmem:[%s9130_s24 + $0x1a4] sm:$0xff] }
 0x1d9   : > { %v1929_v24 = vadd.f32 %v1851_v58, %v1694_v17  ;;  %2974 = vmatmul.bf16.gmra.mxu0 %v2859_v55  ;;  %1198 = vst [vmem:[#allocation3 + $0x84] sm:$0xf] %v1162_v46  ;;  %v9737_v17 = vunpack.c.l.bf16 %v575_v19  ;;  %v2568_v32 = vmul.f32 0.2, %v2496_v31  ;;  %vm2532_vm7 = vcmp.ge.f32.partialorder %v2496_v31, 0.0 }
 0x1da   : > { %v1617_v0 = vpop.f32.mrf.mxu1  ;;  %v9745_v6 = vpop.f32.mrf.mxu3  ;;  %v1163_v46 = vsel %vm1127_vm6, %v9679_v9, %v1091_v7  ;;  %2396 = vmatmul.bf16.gmra.mxu3 %v2227_v14  ;;  %v576_v40 = vrot.slane %v8740_v12, 4  ;;  %v8207_v14 = vld [vmem:[#allocation3 + $0x78] sm:$0xff]   ;;  %v9757_v34 = vunpack.c.l.bf16 %v478_v2  ;;  %v985_v12 = vunpack.c.l.bf16 %v529_v4 }
 0x1db   : > { %v2425_v41 = vadd.f32 %v9603_v5, %v1929_v24  ;;  %1199 = vst [vmem:[#allocation3 + $0x88] sm:$0xf] %v1163_v46  ;;  %v527_v5 = vld [vmem:[%s9130_s24 + $0x198] sm:$0xff]  ;;  %v1695_v22 = vadd.f32 %v9465_v44, %v1617_v0  ;;  %v2228_v0 = vshrl.u32 %v9676_v50, 16  ;;  %v2604_v1 = vsel %vm2532_vm7, %v2496_v31, %v2568_v32  ;;  %v480_v32 = vld [vmem:[%s9130_s24 + $0x80] sm:$0xf] }
 0x1dc   : > { %v8586_v24 = vld [vmem:[#allocation3 + $0x6c] sm:$0xff]   ;;  %v984_v7 = vunpack.c.l.bf16 %v527_v5  ;;  %11434 = vst [vmem:[#allocation34_spill] sm:$0xff] %v9757_v34  ;;  %v1488_v50 = vshll.u32 %v8207_v14, 16  ;;  %vm9787_vm12 = vcmp.ge.f32.partialorder %v985_v12, 0.0  ;;  %v9798_v29 = vunpack.c.l.bf16 %v480_v32 }
 0x1dd   : > { %v2461_v58 = vmul.f32 %v2425_v41, %v9729_v53  ;;  %v1483_v41 = vsel %vm1349_vm1, %v9669_v16, %v9749_v15  ;;  %vm1129_vm13 = vmpackc.low %vm9787_vm12, %vm9787_vm12 }
 0x1de   : > { %vm9773_vm10 = vcmp.ge.f32.partialorder %v984_v7, 0.0  ;;  %11441 = vst [vmem:[#allocation36_spill] sm:$0xff] %v9798_v29 }
 0x1df   : > { %v2497_v54 = vadd.f32 %v2461_v58, %v9737_v17  ;;  %vm1128_vm11 = vmpackc.low %vm9773_vm10, %vm9773_vm10 }
 0x1e0   : > { %v1853_v19 = vpop.f32.mrf.mxu2 }
 0x1e1   : > { %vm2533_vm8 = vcmp.ge.f32.partialorder %v2497_v54, 0.0  ;;  %v2569_v9 = vmul.f32 0.2, %v2497_v54  ;;  %v1930_v55 = vadd.f32 %v1853_v19, %v1695_v22  ;;  %v9766_v22 = vunpack.c.l.bf16 %v576_v40  ;;  %v9780_v40 = vpop.f32.mrf.mxu0 }
 0x1e2   : > { %v1620_v42 = vpop.f32.mrf.mxu1  ;;  %v1485_v19 = vshrl.u32 %v8207_v14, 16  ;;  %v9768_v2 = vpop.f32.mrf.mxu3  ;;  %v9770_v18 = vld [vmem:[#allocation3 + $0x84] sm:$0xff] }
 0x1e3   : > { %v2605_v46 = vsel %vm2533_vm8, %v2497_v54, %v2569_v9  ;;  %v2426_v58 = vadd.f32 %v9622_v38, %v1930_v55  ;;  %11435 = vst [vmem:[#allocation35_spill] sm:$0xff] %v9766_v22  ;;  %v1696_v16 = vadd.f32 %v9465_v44, %v1620_v42  ;;  %v1056_v38 = vmul.f32 0.20019531, %v984_v7  ;;  %v8741_v7 = vld [vmem:[%s9130_s24 + $0x78] sm:$0xff] }
 0x1e4   : > { %v9764_v36 = vpack.c.bf16 %v2605_v46, %v2604_v1  ;;  %v2230_v9 = vor.u32 %v2228_v0, %v9713_v11  ;;  %v2232_v55 = vshll.u32 %v9770_v18, 16  ;;  %v577_v42 = vrot.slane %v8741_v7, 4 }
 0x1e5   : > { %1659 = vmatmul.bf16.gmra.mxu1 %v1483_v41  ;;  %1895 = vmatmul.bf16.gmra.mxu2 %v8586_v24  ;;  %v2462_v14 = vmul.f32 %v2426_v58, %v9757_v34  ;;  %v1092_v41 = vpack.c.bf16 %v1056_v38, %v1056_v38  ;;  %v1057_v1 = vmul.f32 0.20019531, %v985_v12  ;;  %v11440_v11 = vrot.slane %v9692_v28, 3 }
 0x1e6   : > { %8293 = vst [vmem:[#allocation3 + $0x20] sm:$0xff] %v9764_v36   ;;  %v11242_v54 = vrot.slane %v9764_v36, 3  ;;  %v2234_v31 = vrot.slane %v2232_v55, 1  ;;  %v1487_v38 = vrot.slane %v1485_v19, 3  ;;  %v1490_v12 = vrot.slane %v1488_v50, 4 }
 0x1e7   : > { %v1164_v3 = vsel %vm1128_vm11, %v527_v5, %v1092_v41  ;;  %v1093_v28 = vpack.c.bf16 %v1057_v1, %v1057_v1  ;;  %v9805_v55 = vunpack.c.l.bf16 %v577_v42  ;;  %v482_v42 = vld [vmem:[%s9130_s24 + $0x8c] sm:$0xf]  ;;  %v8742_v1 = vld [vmem:[%s9130_s24 + $0x84] sm:$0xff]  ;;  %vm3476_vm8 = vcmask 1046528  }
 0x1e8   : > { %v1856_v46 = vpop.f32.mrf.mxu2  ;;  %v2861_v0 = vsel %vm2852_vm3, %v11440_v11, %v11242_v54  ;;  %v2235_v7 = vsel %vm2103_vm9, %v2230_v9, %v2234_v31  ;;  %1200 = vst [vmem:[#allocation3 + $0x8c] sm:$0xf] %v1164_v3  ;;  %v2498_v11 = vadd.f32 %v2462_v14, %v9766_v22  ;;  %v9811_v19 = vor.u32 %v1490_v12, %v1487_v38  ;;  %v8208_v12 = vld [vmem:[#allocation3 + $0x80] sm:$0xff]  }
 0x1e9   : > { %v1931_v51 = vadd.f32 %v1856_v46, %v1696_v16  ;;  %2979 = vmatmul.bf16.gmra.mxu0 %v2861_v0  ;;  %11442 = vst [vmem:[#allocation37_spill] sm:$0xff] %v9805_v55  ;;  %v1165_v5 = vsel %vm1129_vm13, %v529_v4, %v1093_v28  ;;  %v9816_v41 = vpop.f32.mrf.mxu0  ;;  %v8588_v4 = vld [vmem:[#allocation3 + $0x74] sm:$0xff]   ;;  %v578_v46 = vrot.slane %v8742_v1, 4  ;;  %v1494_v54 = vshrl.u32 %v8208_v12, 16 }
 0x1ea   : > { %v1622_v58 = vpop.f32.mrf.mxu1  ;;  %v9808_v32 = vpop.f32.mrf.mxu3  ;;  %2401 = vmatmul.bf16.gmra.mxu3 %v2235_v7  ;;  %1201 = vst [vmem:[#allocation3 + $0x90] sm:$0xf] %v1165_v5  ;;  %v2570_v50 = vmul.f32 0.2, %v2498_v11  ;;  %vm2534_vm14 = vcmp.ge.f32.partialorder %v2498_v11, 0.0  ;;  %v1492_v38 = vsel %vm1349_vm1, %v9749_v15, %v9811_v19 }
 0x1eb   : > { %v2427_v16 = vadd.f32 %v9666_v59, %v1931_v51  ;;  %v1697_v9 = vadd.f32 %v9465_v44, %v1622_v58  ;;  %v2236_v58 = vshrl.u32 %v9770_v18, 16  ;;  %v484_v15 = vld [vmem:[%s9130_s24 + $0x98] sm:$0xf] }
 0x1ec   : > { %v2606_v7 = vsel %vm2534_vm14, %v2498_v11, %v2570_v50  ;;  %v1497_v11 = vshll.u32 %v8208_v12, 16  ;;  %v7547_v50 = vld [vmem:[%s11237_s1 + $0x228] sm:$0xff]  ;;  %v11445_v12 = vrot.slane %v9764_v36, 3 }
 0x1ed   : > { %v2463_v24 = vmul.f32 %v2427_v16, %v9798_v29  ;;  %v9823_v16 = vunpack.c.l.bf16 %v482_v42  ;;  %4495 = vmatpush.bf16.msra.mxu0 %v7547_v50 }
 0x1ee   : > { %v1499_v26 = vrot.slane %v1497_v11, 4 }
 0x1ef   : > { %v2499_v3 = vadd.f32 %v2463_v24, %v9805_v55  ;;  %11443 = vst [vmem:[#allocation38_spill] sm:$0xff] %v9823_v16 }
 0x1f0   : > { %v1858_v14 = vpop.f32.mrf.mxu2 }
 0x1f1   : > { %vm2535_vm15 = vcmp.ge.f32.partialorder %v2499_v3, 0.0  ;;  %v2571_v51 = vmul.f32 0.2, %v2499_v3  ;;  %v1932_v59 = vadd.f32 %v1858_v14, %v1697_v9  ;;  %v9830_v14 = vld [vmem:[#allocation3 + $0x8c] sm:$0xff] }
 0x1f2   : > { %v1625_v0 = vpop.f32.mrf.mxu1  ;;  %v9828_v9 = vpop.f32.mrf.mxu3  ;;  %v2240_v42 = vshll.u32 %v9830_v14, 16 }
 0x1f3   : > { %v2607_v28 = vsel %vm2535_vm15, %v2499_v3, %v2571_v51  ;;  %v2428_v5 = vadd.f32 %v9696_v48, %v1932_v59  ;;  %v1698_v1 = vadd.f32 %v9465_v44, %v1625_v0  ;;  %v7539_v48 = vld [vmem:[%s11237_s1 + $0x1e8] sm:$0xff]  ;;  %v2238_v3 = vor.u32 %v2236_v58, %v2234_v31 }
 0x1f4   : > { %v9826_v24 = vpack.c.bf16 %v2607_v28, %v2606_v7  ;;  %v9843_v51 = vunpack.c.l.bf16 %v578_v46  ;;  %4256 = vmatpush.bf16.msra.mxu3 %v7539_v48  ;;  %v2242_v28 = vrot.slane %v2240_v42, 1  ;;  %v9852_v31 = vunpack.c.l.bf16 %v484_v15  ;;  %v2009_v15 = vld [vmem:[#allocation3 + $0x94] sm:$0x1] }
 0x1f5   : > { %1664 = vmatmul.bf16.gmra.mxu1 %v1492_v38  ;;  %1900 = vmatmul.bf16.gmra.mxu2 %v8588_v4  ;;  %v2464_v59 = vmul.f32 %v2428_v5, %v9823_v16  ;;  %v8743_v4 = vld [vmem:[%s9130_s24 + $0x90] sm:$0xff]  ;;  %v1496_v58 = vrot.slane %v1494_v54, 3  ;;  %v9854_v5 = vpop.f32.mrf.mxu0  ;;  %v2083_v48 = vunpack.c.l.b16 %v2009_v15 }
 0x1f6   : > { %8294 = vst [vmem:[#allocation3 + $0x28] sm:$0xff] %v9826_v24   ;;  %v11243_v18 = vrot.slane %v9826_v24, 3  ;;  %v579_v0 = vrot.slane %v8743_v4, 4  ;;  %v2243_v4 = vsel %vm2103_vm9, %v2238_v3, %v2242_v28  ;;  %v7500_v54 = vld [vmem:[%s11237_s1 + $0x140] sm:$0xff] }
 0x1f7   : > { %11444 = vst [vmem:[#allocation39_spill] sm:$0xff] %v9843_v51  ;;  %v2500_v8 = vadd.f32 %v2464_v59, %v9843_v51  ;;  %v9870_v3 = vor.u32 %v1499_v26, %v1496_v58  ;;  %3202 = vmatpush.bf16.msra.mxu1 %v7500_v54  ;;  %v8590_v15 = vld [vmem:[#allocation3 + $0x7c] sm:$0xff]   ;;  %v9879_v58 = vld [vmem:[#allocation3 + $0x88] sm:$0xff]  }
 0x1f8   : > { %v1861_v38 = vpop.f32.mrf.mxu2  ;;  %v2863_v7 = vsel %vm2852_vm3, %v11445_v12, %v11243_v18  ;;  %11446 = vst [vmem:[#allocation40_spill] sm:$0xff] %v9852_v31  ;;  %v9858_v52 = vunpack.c.l.bf16 %v579_v0 }
 0x1f9   : > { %v1933_v49 = vadd.f32 %v1861_v38, %v1698_v1  ;;  %2984 = vmatmul.bf16.gmra.mxu0 %v2863_v7  ;;  %v7508_v1 = vld [vmem:[%s11237_s1 + $0x180] sm:$0xff]  ;;  %vm2536_vm0 = vcmp.ge.f32.partialorder %v2500_v8, 0.0  ;;  %v1501_v26 = vsel %vm1349_vm1, %v9811_v19, %v9870_v3 }
 0x1fa   : > { %v1627_v46 = vpop.f32.mrf.mxu1  ;;  %11447 = vst [vmem:[#allocation41_spill] sm:$0xff] %v9858_v52  ;;  %v9867_v11 = vpop.f32.mrf.mxu3  ;;  %3587 = vmatpush.bf16.msra.mxu2 %v7508_v1  ;;  %2406 = vmatmul.bf16.gmra.mxu3 %v2243_v4  ;;  %v486_v38 = vld [vmem:[%s9130_s24 + $0xa4] sm:$0xf]  ;;  %v2244_v4 = vshrl.u32 %v9830_v14, 16  ;;  %v1503_v14 = vshrl.u32 %v9879_v58, 16 }
 0x1fb   : > { %v2429_v36 = vadd.f32 %v9745_v6, %v1933_v49  ;;  %v2102_v49 = vpack.c.b16 %v2083_v48, %v2083_v48  ;;  %v2572_v6 = vmul.f32 0.2, %v2500_v8  ;;  %v1699_v59 = vadd.f32 %v9465_v44, %v1627_v46 }
 0x1fd   : > { %v2465_v50 = vmul.f32 %v2429_v36, %v9852_v31  ;;  %v8744_v36 = vld [vmem:[%s9130_s24 + $0x9c] sm:$0xff]  ;;  %v2248_v46 = vshll.u32 %v2102_v49, 16  ;;  %v2608_v54 = vsel %vm2536_vm0, %v2500_v8, %v2572_v6  ;;  %v488_v8 = vld [vmem:[%s9130_s24 + $0xb0] sm:$0xf]  ;;  %v2246_v6 = vor.u32 %v2244_v4, %v2242_v28 }
 0x1fe   : > { %v580_v18 = vrot.slane %v8744_v36, 4  ;;  %v9887_v36 = vpop.f32.mrf.mxu0  ;;  %v1505_v28 = vrot.slane %v1503_v14, 3 }
 0x1ff   : > { %v2501_v42 = vadd.f32 %v2465_v50, %v9858_v52  ;;  %v9882_v50 = vunpack.c.l.bf16 %v486_v38 }
 0x200   : > { %v1863_v0 = vpop.f32.mrf.mxu2  ;;  %v9897_v38 = vunpack.c.l.bf16 %v580_v18 }
 0x201   : > { %vm2537_vm2 = vcmp.ge.f32.partialorder %v2501_v42, 0.0  ;;  %v2573_v12 = vmul.f32 0.2, %v2501_v42  ;;  %v1934_v7 = vadd.f32 %v1863_v0, %v1699_v59  ;;  %11448 = vst [vmem:[#allocation42_spill] sm:$0xff] %v9882_v50 }
 0x202   : > { %v1630_v1 = vpop.f32.mrf.mxu1  ;;  %v9889_v52 = vpop.f32.mrf.mxu3  ;;  %11449 = vst [vmem:[#allocation43_spill] sm:$0xff] %v9897_v38 }
 0x203   : > { %v2609_v48 = vsel %vm2537_vm2, %v2501_v42, %v2573_v12  ;;  %v2430_v59 = vadd.f32 %v9768_v2, %v1934_v7  ;;  %v1700_v19 = vadd.f32 %v9465_v44, %v1630_v1  ;;  %v1506_v2 = vshll.u32 %v9879_v58, 16  ;;  %v8745_v7 = vld [vmem:[%s9130_s24 + $0xa8] sm:$0xff] }
 0x204   : > { %v9885_v0 = vpack.c.bf16 %v2609_v48, %v2608_v54  ;;  %v2250_v42 = vrot.slane %v2248_v46, 1  ;;  %v581_v54 = vrot.slane %v8745_v7, 4  ;;  %v9906_v48 = vunpack.c.l.bf16 %v488_v8 }
 0x205   : > { %1669 = vmatmul.bf16.gmra.mxu1 %v1501_v26  ;;  %1905 = vmatmul.bf16.gmra.mxu2 %v8590_v15  ;;  %v2466_v12 = vmul.f32 %v2430_v59, %v9882_v50  ;;  %v11450_v15 = vrot.slane %v9826_v24, 3  ;;  %v1508_v4 = vrot.slane %v1506_v2, 4  ;;  %v1255_v50 = vld [vmem:[#allocation3 + $0x90] sm:$0xf] }
 0x206   : > { %8295 = vst [vmem:[#allocation3 + $0x30] sm:$0xff] %v9885_v0   ;;  %v11250_v49 = vrot.slane %v9885_v0, 3  ;;  %v2251_v18 = vsel %vm2103_vm9, %v2246_v6, %v2250_v42  ;;  %v9910_v59 = vunpack.c.l.bf16 %v581_v54  ;;  %v9918_v14 = vpop.f32.mrf.mxu0  ;;  %v9920_v2 = vunpack.c.l.b16 %v1255_v50  ;;  %v8747_v50 = vld [vmem:[%s9130_s24 + $0xb4] sm:$0xff] }
 0x207   : > { %11451 = vst [vmem:[#allocation44_spill] sm:$0xff] %v9906_v48  ;;  %v2502_v46 = vadd.f32 %v2466_v12, %v9897_v38  ;;  %v9916_v8 = vor.u32 %v1508_v4, %v1505_v28  ;;  %v582_v28 = vrot.slane %v8747_v50, 4 }
 0x208   : > { %v1866_v44 = vpop.f32.mrf.mxu2  ;;  %v2865_v1 = vsel %vm2852_vm3, %v11450_v15, %v11250_v49  ;;  %11452 = vst [vmem:[#allocation45_spill] sm:$0xff] %v9910_v59 }
 0x209   : > { %v1935_v26 = vadd.f32 %v1866_v44, %v1700_v19  ;;  %2989 = vmatmul.bf16.gmra.mxu0 %v2865_v1  ;;  %v2574_v6 = vmul.f32 0.2, %v2502_v46  ;;  %vm2538_vm9 = vcmp.ge.f32.partialorder %v2502_v46, 0.0  ;;  %v490_v44 = vld [vmem:[%s9130_s24 + $0xbc] sm:$0xf] }
 0x20a   : > { %v1632_v31 = vpop.f32.mrf.mxu1  ;;  %v9913_v24 = vpop.f32.mrf.mxu3  ;;  %2411 = vmatmul.bf16.gmra.mxu3 %v2251_v18  ;;  %v1510_v18 = vsel %vm1349_vm1, %v9870_v3, %v9916_v8  ;;  %v9936_v49 = vunpack.c.l.bf16 %v490_v44 }
 0x20b   : > { %v2431_v7 = vadd.f32 %v9808_v32, %v1935_v26  ;;  %v9926_v32 = vld [vmem:[%s11238_s2 + $0x1] ss:$0 sm:$0xff]  ;;  %v8591_v26 = vld [vmem:[#allocation3 + $0x84] sm:$0xff]  }
 0x20c   : > { %v1701_v12 = vadd.f32 %v9926_v32, %v1632_v31  ;;  %11453 = vst [vmem:[#allocation46_spill] sm:$0xff] %v9936_v49 }
 0x20d   : > { %v2467_v19 = vmul.f32 %v2431_v7, %v9906_v48  ;;  %v1348_v7 = vpack.c.b16 %v9920_v2, %v9920_v2  ;;  %v492_v48 = vld [vmem:[%s9130_s24 + $0xc8] sm:$0xf] }
 0x20f   : > { %v2503_v42 = vadd.f32 %v2467_v19, %v9910_v59  ;;  %v2610_v19 = vsel %vm2538_vm9, %v2502_v46, %v2574_v6  ;;  %v1512_v46 = vshrl.u32 %v1348_v7, 16  ;;  %v1515_v6 = vshll.u32 %v1348_v7, 16 }
 0x210   : > { %v1868_v54 = vpop.f32.mrf.mxu2  ;;  %v9959_v7 = vunpack.c.l.bf16 %v492_v48 }
 0x211   : > { %vm2539_vm4 = vcmp.ge.f32.partialorder %v2503_v42, 0.0  ;;  %v2575_v15 = vmul.f32 0.2, %v2503_v42  ;;  %v1936_v1 = vadd.f32 %v1868_v54, %v1701_v12  ;;  %v1514_v38 = vrot.slane %v1512_v46, 3 }
 0x212   : > { %v1635_v4 = vpop.f32.mrf.mxu1  ;;  %v9941_v54 = vpop.f32.mrf.mxu3  ;;  %11456 = vst [vmem:[#allocation48_spill] sm:$0xff] %v9959_v7 }
 0x213   : > { %v2611_v31 = vsel %vm2539_vm4, %v2503_v42, %v2575_v15  ;;  %v2432_v59 = vadd.f32 %v9828_v9, %v1936_v1  ;;  %v1702_v50 = vadd.f32 %v9926_v32, %v1635_v4  ;;  %v7538_v42 = vld [vmem:[%s11237_s1 + $0x1e0] sm:$0xff]  ;;  %v9950_v9 = vunpack.c.l.bf16 %v582_v28 }
 0x214   : > { %v9939_v12 = vpack.c.bf16 %v2611_v31, %v2610_v19  ;;  %v8748_v15 = vld [vmem:[%s9130_s24 + $0xc0] sm:$0xff]  ;;  %v9957_v19 = vpop.f32.mrf.mxu0  ;;  %4257 = vmatpush.bf16.msra.mxu3 %v7538_v42  ;;  %v1517_v28 = vrot.slane %v1515_v6, 4 }
 0x215   : > { %1674 = vmatmul.bf16.gmra.mxu1 %v1510_v18  ;;  %1910 = vmatmul.bf16.gmra.mxu2 %v8591_v26  ;;  %11454 = vst [vmem:[#allocation47_spill] sm:$0xff] %v9950_v9  ;;  %v2468_v44 = vmul.f32 %v2432_v59, %v9936_v49  ;;  %v583_v1 = vrot.slane %v8748_v15, 4  ;;  %v11455_v26 = vrot.slane %v9885_v0, 3  ;;  %v7546_v0 = vld [vmem:[%s11237_s1 + $0x220] sm:$0xff] }
 0x216   : > { %8296 = vst [vmem:[#allocation3 + $0x38] sm:$0xff] %v9939_v12   ;;  %v2866_v3 = vrot.slane %v9939_v12, 3  ;;  %4496 = vmatpush.bf16.msra.mxu0 %v7546_v0  ;;  %v1518_v46 = vor.u32 %v1517_v28, %v1514_v38 }
 0x217   : > { %v2504_v59 = vadd.f32 %v2468_v44, %v9950_v9  ;;  %v9962_v49 = vunpack.c.l.bf16 %v583_v1  ;;  %v8749_v9 = vld [vmem:[%s9130_s24 + $0xcc] sm:$0xff] }
 0x218   : > { %v1871_v4 = vpop.f32.mrf.mxu2  ;;  %v2867_v18 = vsel %vm2852_vm3, %v11455_v26, %v2866_v3 }
 0x219   : > { %v1937_v31 = vadd.f32 %v1871_v4, %v1702_v50  ;;  %2994 = vmatmul.bf16.gmra.mxu0 %v2867_v18  ;;  %11457 = vst [vmem:[#allocation49_spill] sm:$0xff] %v9962_v49  ;;  %v7721_v50 = vunpack.c.h.b16 %v9879_v58  ;;  %v2576_v6 = vmul.f32 0.2, %v2504_v59  ;;  %vm2540_vm5 = vcmp.ge.f32.partialorder %v2504_v59, 0.0  ;;  %v494_v4 = vld [vmem:[%s9130_s24 + $0xd4] sm:$0xf] }
 0x21a   : > { %v1637_v12 = vpop.f32.mrf.mxu1  ;;  %v9968_v42 = vpop.f32.mrf.mxu3  ;;  %v1519_v58 = vsel %vm1349_vm1, %v9916_v8, %v1518_v46  ;;  %v9981_v0 = vunpack.c.l.bf16 %v494_v4  ;;  %v8750_v46 = vld [vmem:[%s9130_s24 + $0xd8] sm:$0xff] }
 0x21b   : > { %v2433_v15 = vadd.f32 %v9867_v11, %v1937_v31  ;;  %v1703_v1 = vadd.f32 %v9926_v32, %v1637_v12  ;;  %v1755_v31 = vpack.c.b16 %v9920_v2, %v7721_v50  ;;  %v2612_v28 = vsel %vm2540_vm5, %v2504_v59, %v2576_v6  ;;  %v496_v2 = vld [vmem:[%s9130_s24 + $0xe0] sm:$0xf] }
 0x21c   : > { %v9979_v38 = vpop.f32.mrf.mxu0  ;;  %11458 = vst [vmem:[#allocation50_spill] sm:$0xff] %v9981_v0  ;;  %v585_v6 = vrot.slane %v8750_v46, 4  ;;  %v10000_v4 = vunpack.c.l.bf16 %v496_v2  ;;  %v498_v46 = vld [vmem:[%s9130_s24 + $0xec] sm:$0xf] }
 0x21d   : > { %v2469_v48 = vmul.f32 %v2433_v15, %v9959_v7  ;;  %v584_v15 = vrot.slane %v8749_v9, 4  ;;  %v7557_v9 = vld [vmem:[%s11237_s1 + $0x278] sm:$0xff] }
 0x21e   : > { %4877 = vmatpush.bf16.msrb.mxu1 %v7557_v9  ;;  %11460 = vst [vmem:[#allocation52_spill] sm:$0xff] %v10000_v4 }
 0x21f   : > { %v2505_v44 = vadd.f32 %v2469_v48, %v9962_v49  ;;  %v9995_v50 = vunpack.c.l.bf16 %v584_v15  ;;  %v7516_v15 = vld [vmem:[#allocation3 + $0x4] sm:$0xf0] }
 0x220   : > { %v1873_v11 = vpop.f32.mrf.mxu2 }
 0x221   : > { %vm2541_vm6 = vcmp.ge.f32.partialorder %v2505_v44, 0.0  ;;  %v2577_v26 = vmul.f32 0.2, %v2505_v44  ;;  %v1938_v18 = vadd.f32 %v1873_v11, %v1703_v1  ;;  %11459 = vst [vmem:[#allocation51_spill] sm:$0xff] %v9995_v50 }
 0x222   : > { %v1640_v7 = vpop.f32.mrf.mxu1  ;;  %v9993_v59 = vpop.f32.mrf.mxu3 }
 0x223   : > { %v2613_v12 = vsel %vm2541_vm6, %v2505_v44, %v2577_v26  ;;  %v2434_v48 = vadd.f32 %v9889_v52, %v1938_v18  ;;  %v1704_v1 = vadd.f32 %v9926_v32, %v1640_v7  ;;  %v10003_v18 = vunpack.c.l.bf16 %v585_v6 }
 0x224   : > { %v9984_v49 = vpack.c.bf16 %v2613_v12, %v2612_v28  ;;  %v10008_v28 = vld [vmem:[#allocation3 + $0xc] sm:$0xff]  ;;  %v6835_v12 = vld [vmem:[#allocation3 + $0x4] sm:$0xe] }
 0x225   : > { %1679 = vmatmul.bf16.gmra.mxu1 %v1519_v58  ;;  %1915 = vmatmul.bf16.gmra.mxu2 %v1755_v31  ;;  %v2470_v52 = vmul.f32 %v2434_v48, %v9981_v0  ;;  %11461 = vst [vmem:[#allocation53_spill] sm:$0xff] %v10003_v18  ;;  %v10006_v58 = vpop.f32.mrf.mxu0  ;;  %v6836_v48 = vor.u32 %v7516_v15, %v6835_v12 }
 0x226   : > { %8297 = vst [vmem:[#allocation3 + $0x40] sm:$0xff] %v9984_v49   ;;  %v2868_v8 = vrot.slane %v9984_v49, 3 }
 0x227   : > { %v2506_v26 = vadd.f32 %v2470_v52, %v9995_v50  ;;  %v3477_v12 = vrot.slane %v6836_v48, 1  ;;  %v500_v48 = vld [vmem:[%s9130_s24 + $0xf8] sm:$0xf] }
 0x228   : > { %v1876_v7 = vpop.f32.mrf.mxu2  ;;  %v2869_v44 = vsel %vm2852_vm3, %v2866_v3, %v2868_v8 }
 0x229   : > { %v1939_v11 = vadd.f32 %v1876_v7, %v1704_v1  ;;  %2999 = vmatmul.bf16.gmra.mxu0 %v2869_v44  ;;  %v2578_v1 = vmul.f32 0.2, %v2506_v26  ;;  %vm2542_vm1 = vcmp.ge.f32.partialorder %v2506_v26, 0.0 }
 0x22a   : > { %v1642_v49 = vpop.f32.mrf.mxu1  ;;  %v10015_v6 = vpop.f32.mrf.mxu3 }
 0x22b   : > { %v2435_v31 = vadd.f32 %v9913_v24, %v1939_v11  ;;  %v1705_v9 = vadd.f32 %v9926_v32, %v1642_v49  ;;  %v11273_v24 = vrot.slane %v10008_v28, 1  ;;  %v8751_v11 = vld [vmem:[%s9130_s24 + $0xe4] sm:$0xff]  ;;  %v10018_v49 = vunpack.c.l.bf16 %v498_v46 }
 0x22d   : > { %v2471_v3 = vmul.f32 %v2435_v31, %v10000_v4  ;;  %v586_v31 = vrot.slane %v8751_v11, 4  ;;  %11462 = vst [vmem:[#allocation54_spill] sm:$0xff] %v10018_v49  ;;  %v3479_v0 = vsel %vm3476_vm8, %v3477_v12, %v11273_v24  ;;  %v10038_v11 = vunpack.c.l.bf16 %v500_v48  ;;  %v10052_v12 = vld [vmem:[#allocation3 + $0x14] sm:$0xff]  ;;  %v8753_v24 = vld [vmem:[%s9130_s24 + $0xfc] sm:$0xff] }
 0x22f   : > { %v2507_v2 = vadd.f32 %v2471_v3, %v10003_v18  ;;  %v2614_v3 = vsel %vm2542_vm1, %v2506_v26, %v2578_v1  ;;  %11464 = vst [vmem:[#allocation56_spill] sm:$0xff] %v10038_v11 }
 0x230   : > { %v1878_v52 = vpop.f32.mrf.mxu2 }
 0x231   : > { %vm2543_vm7 = vcmp.ge.f32.partialorder %v2507_v2, 0.0  ;;  %v2579_v7 = vmul.f32 0.2, %v2507_v2  ;;  %v1940_v44 = vadd.f32 %v1878_v52, %v1705_v9 }
 0x232   : > { %v1645_v15 = vpop.f32.mrf.mxu1 }
 0x233   : > { %v2615_v18 = vsel %vm2543_vm7, %v2507_v2, %v2579_v7  ;;  %v2436_v4 = vadd.f32 %v9941_v54, %v1940_v44  ;;  %v1706_v9 = vadd.f32 %v9926_v32, %v1645_v15  ;;  %v10033_v2 = vunpack.c.l.bf16 %v586_v31 }
 0x234   : > { %v10021_v50 = vpack.c.bf16 %v2615_v18, %v2614_v3  ;;  %v8752_v18 = vld [vmem:[%s9130_s24 + $0xf0] sm:$0xff] }
 0x235   : > { %3203 = vmatmul.bf16.vlgmr.msra.gmra.mxu1 %v9593_v30  ;;  %3588 = vmatmul.bf16.vlgmr.msra.gmra.mxu2 %v3479_v0  ;;  %11463 = vst [vmem:[#allocation55_spill] sm:$0xff] %v10033_v2  ;;  %v2472_v54 = vmul.f32 %v2436_v4, %v10018_v49  ;;  %v587_v52 = vrot.slane %v8752_v18, 4  ;;  %v10040_v0 = vpop.f32.mrf.mxu3  ;;  %v7537_v4 = vld [vmem:[%s11237_s1 + $0x1d8] sm:$0xff]  ;;  %v11467_v49 = vrot.slane %v10008_v28, 1 }
 0x236   : > { %8298 = vst [vmem:[#allocation3 + $0x48] sm:$0xff] %v10021_v50   ;;  %v10030_v26 = vpop.f32.mrf.mxu0  ;;  %v2870_v1 = vrot.slane %v10021_v50, 3  ;;  %4258 = vmatpush.bf16.msra.mxu3 %v7537_v4  ;;  %v8754_v28 = vld [vmem:[%s9130_s24 + $0x108] sm:$0xff] }
 0x237   : > { %v2508_v15 = vadd.f32 %v2472_v54, %v10033_v2  ;;  %v10043_v50 = vunpack.c.l.bf16 %v587_v52  ;;  %v502_v52 = vld [vmem:[%s9130_s24 + $0x104] sm:$0xf] }
 0x238   : > { %v1881_v46 = vpop.f32.mrf.mxu2  ;;  %v2871_v7 = vsel %vm2852_vm3, %v2868_v8, %v2870_v1  ;;  %v7545_v8 = vld [vmem:[%s11237_s1 + $0x218] sm:$0xff]  ;;  %v10062_v2 = vunpack.c.l.bf16 %v502_v52 }
 0x239   : > { %v1941_v44 = vadd.f32 %v1881_v46, %v1706_v9  ;;  %3004 = vmatmul.bf16.gmra.mxu0 %v2871_v7  ;;  %11465 = vst [vmem:[#allocation57_spill] sm:$0xff] %v10043_v50  ;;  %v2580_v48 = vmul.f32 0.2, %v2508_v15  ;;  %vm2544_vm10 = vcmp.ge.f32.partialorder %v2508_v15, 0.0  ;;  %v3480_v46 = vrot.slane %v10052_v12, 1 }
 0x23a   : > { %v1647_v30 = vpop.f32.mrf.mxu1  ;;  %4497 = vmatpush.bf16.msra.mxu0 %v7545_v8  ;;  %11466 = vst [vmem:[#allocation58_spill] sm:$0xff] %v10062_v2 }
 0x23b   : > { %v2437_v31 = vadd.f32 %v9968_v42, %v1941_v44  ;;  %v1707_v54 = vadd.f32 %v9926_v32, %v1647_v30  ;;  %v2616_v8 = vsel %vm2544_vm10, %v2508_v15, %v2580_v48  ;;  %v8594_v30 = vld [vmem:[#allocation3 + $0xc] sm:$0xff]   ;;  %v3481_v12 = vsel %vm3476_vm8, %v11467_v49, %v3480_v46 }
 0x23d   : > { %v2473_v3 = vmul.f32 %v2437_v31, %v10038_v11  ;;  %v588_v31 = vrot.slane %v8753_v24, 4  ;;  %v10070_v51 = vpop.f32.mrf.mxu3  ;;  %v504_v24 = vld [vmem:[%s9130_s24 + $0x110] sm:$0xf] }
 0x23e   : > { %v10055_v9 = vpop.f32.mrf.mxu0 }
 0x23f   : > { %v2509_v42 = vadd.f32 %v2473_v3, %v10043_v50  ;;  %v10078_v48 = vunpack.c.l.bf16 %v588_v31  ;;  %v7556_v31 = vld [vmem:[%s11237_s1 + $0x270] sm:$0xff] }
 0x240   : > { %v1883_v18 = vpop.f32.mrf.mxu2  ;;  %4878 = vmatpush.bf16.msrb.mxu1 %v7556_v31 }
 0x241   : > { %vm2545_vm11 = vcmp.ge.f32.partialorder %v2509_v42, 0.0  ;;  %v2581_v7 = vmul.f32 0.2, %v2509_v42  ;;  %v1942_v44 = vadd.f32 %v1883_v18, %v1707_v54  ;;  %11468 = vst [vmem:[#allocation59_spill] sm:$0xff] %v10078_v48 }
 0x242   : > { %v1650_v4 = vpop.f32.mrf.mxu1 }
 0x243   : > { %v2617_v11 = vsel %vm2545_vm11, %v2509_v42, %v2581_v7  ;;  %v2438_v3 = vadd.f32 %v9993_v59, %v1942_v44  ;;  %v1708_v54 = vadd.f32 %v9926_v32, %v1650_v4  ;;  %v589_v42 = vrot.slane %v8754_v28, 4  ;;  %v506_v28 = vld [vmem:[%s9130_s24 + $0x11c] sm:$0xf] }
 0x244   : > { %v10065_v50 = vpack.c.bf16 %v2617_v11, %v2616_v8  ;;  %v10083_v7 = vunpack.c.l.bf16 %v504_v24 }
 0x245   : > { %3208 = vmatmul.bf16.gmra.mxu1 %v8594_v30  ;;  %3593 = vmatmul.bf16.gmra.mxu2 %v3481_v12  ;;  %v2474_v11 = vmul.f32 %v2438_v3, %v10062_v2  ;;  %v10086_v8 = vunpack.c.l.bf16 %v589_v42  ;;  %v10092_v3 = vld [vmem:[#allocation3 + $0x1c] sm:$0xff]  ;;  %v10097_v12 = vpop.f32.mrf.mxu3  ;;  %v10104_v2 = vunpack.c.l.bf16 %v506_v28 }
 0x246   : > { %8299 = vst [vmem:[#allocation3 + $0x50] sm:$0xff] %v10065_v50   ;;  %v10075_v15 = vpop.f32.mrf.mxu0  ;;  %v2872_v59 = vrot.slane %v10065_v50, 3  ;;  %v3482_v42 = vrot.slane %v10092_v3, 1 }
 0x247   : > { %11469 = vst [vmem:[#allocation60_spill] sm:$0xff] %v10083_v7  ;;  %v2510_v4 = vadd.f32 %v2474_v11, %v10078_v48 }
 0x248   : > { %v1886_v49 = vpop.f32.mrf.mxu2  ;;  %v2873_v18 = vsel %vm2852_vm3, %v2870_v1, %v2872_v59  ;;  %11470 = vst [vmem:[#allocation61_spill] sm:$0xff] %v10086_v8  ;;  %v3483_v16 = vsel %vm3476_vm8, %v3480_v46, %v3482_v42 }
 0x249   : > { %v1943_v52 = vadd.f32 %v1886_v49, %v1708_v54  ;;  %3009 = vmatmul.bf16.gmra.mxu0 %v2873_v18  ;;  %v2582_v54 = vmul.f32 0.2, %v2510_v4  ;;  %vm2546_vm12 = vcmp.ge.f32.partialorder %v2510_v4, 0.0  ;;  %11471 = vst [vmem:[#allocation62_spill] sm:$0xff] %v10104_v2 }
 0x24a   : > { %v1652_v44 = vpop.f32.mrf.mxu1 }
 0x24b   : > { %v2439_v50 = vadd.f32 %v10015_v6, %v1943_v52  ;;  %v1709_v11 = vadd.f32 %v9926_v32, %v1652_v44  ;;  %v8755_v52 = vld [vmem:[%s9130_s24 + $0x114] sm:$0xff] }
 0x24c   : > { %v8596_v44 = vld [vmem:[#allocation3 + $0x14] sm:$0xff]  }
 0x24d   : > { %v2475_v1 = vmul.f32 %v2439_v50, %v10083_v7  ;;  %v590_v50 = vrot.slane %v8755_v52, 4  ;;  %v2618_v7 = vsel %vm2546_vm12, %v2510_v4, %v2582_v54  ;;  %v2392_v28 = vpop.f32.mrf.mxu3 }
 0x24e   : > { %v10095_v30 = vpop.f32.mrf.mxu0 }
 0x24f   : > { %v2511_v24 = vadd.f32 %v2475_v1, %v10086_v8  ;;  %v10116_v54 = vunpack.c.l.bf16 %v590_v50  ;;  %v7536_v50 = vld [vmem:[%s11237_s1 + $0x1d0] sm:$0xff] }
 0x250   : > { %v1888_v6 = vpop.f32.mrf.mxu2  ;;  %4259 = vmatpush.bf16.msra.mxu3 %v7536_v50 }
 0x251   : > { %vm2547_vm13 = vcmp.ge.f32.partialorder %v2511_v24, 0.0  ;;  %v2583_v49 = vmul.f32 0.2, %v2511_v24  ;;  %v1944_v18 = vadd.f32 %v1888_v6, %v1709_v11  ;;  %v508_v11 = vld [vmem:[%s9130_s24 + $0x128] sm:$0xf]  ;;  %11472 = vst [vmem:[#allocation63_spill] sm:$0xff] %v10116_v54 }
 0x252   : > { %v1655_v31 = vpop.f32.mrf.mxu1 }
 0x253   : > { %v2619_v48 = vsel %vm2547_vm13, %v2511_v24, %v2583_v49  ;;  %v2440_v1 = vadd.f32 %v10040_v0, %v1944_v18  ;;  %v1710_v3 = vadd.f32 %v9926_v32, %v1655_v31  ;;  %v8756_v24 = vld [vmem:[%s9130_s24 + $0x120] sm:$0xff]  ;;  %v10121_v18 = vunpack.c.l.bf16 %v508_v11 }
 0x254   : > { %v10107_v8 = vpack.c.bf16 %v2619_v48, %v2618_v7  ;;  %v591_v48 = vrot.slane %v8756_v24, 4 }
 0x255   : > { %3213 = vmatmul.bf16.gmra.mxu1 %v8596_v44  ;;  %3598 = vmatmul.bf16.gmra.mxu2 %v3483_v16  ;;  %v2476_v0 = vmul.f32 %v2440_v1, %v10104_v2  ;;  %11473 = vst [vmem:[#allocation64_spill] sm:$0xff] %v10121_v18  ;;  %v10130_v1 = vld [vmem:[#allocation3 + $0x24] sm:$0xff]  ;;  %v2394_v50 = vpop.f32.mrf.mxu3 }
 0x256   : > { %8300 = vst [vmem:[#allocation3 + $0x58] sm:$0xff] %v10107_v8   ;;  %v10113_v6 = vpop.f32.mrf.mxu0  ;;  %v2874_v4 = vrot.slane %v10107_v8, 3  ;;  %v10124_v31 = vunpack.c.l.bf16 %v591_v48  ;;  %v11304_v48 = vrot.slane %v10130_v1, 1  ;;  %v11480_v29 = vrot.slane %v10130_v1, 1 }
 0x257   : > { %v2512_v52 = vadd.f32 %v2476_v0, %v10116_v54 }
 0x258   : > { %v1891_v7 = vpop.f32.mrf.mxu2  ;;  %v2875_v46 = vsel %vm2852_vm3, %v2872_v59, %v2874_v4  ;;  %11474 = vst [vmem:[#allocation65_spill] sm:$0xff] %v10124_v31  ;;  %v3485_v55 = vsel %vm3476_vm8, %v3482_v42, %v11304_v48  ;;  %v8758_v42 = vld [vmem:[%s9130_s24 + $0x138] sm:$0xff]  ;;  %v8759_v48 = vld [vmem:[%s9130_s24 + $0x144] sm:$0xff] }
 0x259   : > { %v1945_v49 = vadd.f32 %v1891_v7, %v1710_v3  ;;  %3014 = vmatmul.bf16.gmra.mxu0 %v2875_v46  ;;  %v2584_v3 = vmul.f32 0.2, %v2512_v52  ;;  %vm2548_vm14 = vcmp.ge.f32.partialorder %v2512_v52, 0.0 }
 0x25a   : > { %v1657_v16 = vpop.f32.mrf.mxu1 }
 0x25b   : > { %v2441_v8 = vadd.f32 %v10070_v51, %v1945_v49  ;;  %v1711_v0 = vadd.f32 %v9926_v32, %v1657_v16  ;;  %v510_v51 = vld [vmem:[%s9130_s24 + $0x134] sm:$0xf]  ;;  %v8757_v49 = vld [vmem:[%s9130_s24 + $0x12c] sm:$0xff] }
 0x25c   : > { %v592_v54 = vrot.slane %v8757_v49, 4  ;;  %v10140_v37 = vunpack.c.l.bf16 %v510_v51 }
 0x25d   : > { %v2477_v59 = vmul.f32 %v2441_v8, %v10121_v18  ;;  %v2620_v18 = vsel %vm2548_vm14, %v2512_v52, %v2584_v3  ;;  %v512_v52 = vld [vmem:[%s9130_s24 + $0x140] sm:$0xf] }
 0x25e   : > { %v10133_v44 = vpop.f32.mrf.mxu0  ;;  %11475 = vst [vmem:[#allocation66_spill] sm:$0xff] %v10140_v37 }
 0x25f   : > { %v2513_v11 = vadd.f32 %v2477_v59, %v10124_v31  ;;  %v8598_v59 = vld [vmem:[#allocation3 + $0x1c] sm:$0xff]  }
 0x260   : > { %v1893_v24 = vpop.f32.mrf.mxu2 }
 0x261   : > { %vm2549_vm15 = vcmp.ge.f32.partialorder %v2513_v11, 0.0  ;;  %v2585_v7 = vmul.f32 0.2, %v2513_v11  ;;  %v1946_v46 = vadd.f32 %v1893_v24, %v1711_v0  ;;  %v593_v24 = vrot.slane %v8758_v42, 4 }
 0x262   : > { %v1660_v8 = vpop.f32.mrf.mxu1 }
 0x263   : > { %v2621_v2 = vsel %vm2549_vm15, %v2513_v11, %v2585_v7  ;;  %v2442_v16 = vadd.f32 %v10097_v12, %v1946_v46  ;;  %v1712_v0 = vadd.f32 %v9926_v32, %v1660_v8  ;;  %v10157_v12 = vunpack.c.l.bf16 %v592_v54 }
 0x264   : > { %v10143_v31 = vpack.c.bf16 %v2621_v2, %v2620_v18  ;;  %v7544_v2 = vld [vmem:[%s11237_s1 + $0x210] sm:$0xff]  ;;  %v10162_v46 = vunpack.c.l.bf16 %v512_v52  ;;  %v10165_v8 = vunpack.c.l.bf16 %v593_v24  ;;  %v514_v24 = vld [vmem:[%s9130_s24 + $0x14c] sm:$0xf]  ;;  %vm4150_vm15 = vcmask 1045504  }
 0x265   : > { %3218 = vmatmul.bf16.gmra.mxu1 %v8598_v59  ;;  %3603 = vmatmul.bf16.gmra.mxu2 %v3485_v55  ;;  %11476 = vst [vmem:[#allocation67_spill] sm:$0xff] %v10157_v12  ;;  %v2478_v18 = vmul.f32 %v2442_v16, %v10140_v37  ;;  %v7555_v16 = vld [vmem:[%s11237_s1 + $0x268] sm:$0xff]  ;;  %v10180_v37 = vunpack.c.l.bf16 %v514_v24 }
 0x266   : > { %8301 = vst [vmem:[#allocation3 + $0x60] sm:$0xff] %v10143_v31   ;;  %v10151_v3 = vpop.f32.mrf.mxu0  ;;  %v2876_v11 = vrot.slane %v10143_v31, 3  ;;  %4498 = vmatpush.bf16.msra.mxu0 %v7544_v2  ;;  %v10170_v59 = vld [vmem:[#allocation3 + $0x2c] sm:$0xff]  ;;  %4879 = vmatpush.bf16.msrb.mxu1 %v7555_v16 }
 0x267   : > { %11477 = vst [vmem:[#allocation68_spill] sm:$0xff] %v10162_v46  ;;  %v2514_v49 = vadd.f32 %v2478_v18, %v10157_v12  ;;  %v594_v12 = vrot.slane %v8759_v48, 4  ;;  %v516_v48 = vld [vmem:[%s9130_s24 + $0x158] sm:$0xf] }
 0x268   : > { %v1896_v51 = vpop.f32.mrf.mxu2  ;;  %v2877_v55 = vsel %vm2852_vm3, %v2874_v4, %v2876_v11  ;;  %11478 = vst [vmem:[#allocation69_spill] sm:$0xff] %v10165_v8  ;;  %v2397_v4 = vpop.f32.mrf.mxu3  ;;  %v10198_v24 = vunpack.c.l.bf16 %v516_v48 }
 0x269   : > { %v1947_v7 = vadd.f32 %v1896_v51, %v1712_v0  ;;  %3019 = vmatmul.bf16.gmra.mxu0 %v2877_v55  ;;  %v2586_v2 = vmul.f32 0.2, %v2514_v49  ;;  %vm2550_vm0 = vcmp.ge.f32.partialorder %v2514_v49, 0.0  ;;  %v3486_v51 = vrot.slane %v10170_v59, 1  ;;  %11479 = vst [vmem:[#allocation70_spill] sm:$0xff] %v10180_v37 }
 0x26a   : > { %v1662_v31 = vpop.f32.mrf.mxu1  ;;  %11482 = vst [vmem:[#allocation72_spill] sm:$0xff] %v10198_v24 }
 0x26b   : > { %v2443_v54 = vadd.f32 %v2392_v28, %v1947_v7  ;;  %v1713_v18 = vadd.f32 %v9926_v32, %v1662_v31  ;;  %v2622_v16 = vsel %vm2550_vm0, %v2514_v49, %v2586_v2  ;;  %v3487_v59 = vsel %vm3476_vm8, %v11480_v29, %v3486_v51 }
 0x26d   : > { %v2479_v0 = vmul.f32 %v2443_v54, %v10162_v46 }
 0x26e   : > { %v10173_v52 = vpop.f32.mrf.mxu0 }
 0x26f   : > { %v2515_v42 = vadd.f32 %v2479_v0, %v10165_v8  ;;  %v8600_v8 = vld [vmem:[#allocation3 + $0x24] sm:$0xff]  }
 0x270   : > { %v1898_v28 = vpop.f32.mrf.mxu2  ;;  %v2399_v2 = vpop.f32.mrf.mxu3 }
 0x271   : > { %vm2551_vm2 = vcmp.ge.f32.partialorder %v2515_v42, 0.0  ;;  %v2587_v55 = vmul.f32 0.2, %v2515_v42  ;;  %v1948_v7 = vadd.f32 %v1898_v28, %v1713_v18  ;;  %v8760_v18 = vld [vmem:[%s9130_s24 + $0x150] sm:$0xff] }
 0x272   : > { %v1665_v54 = vpop.f32.mrf.mxu1  ;;  %v595_v1 = vrot.slane %v8760_v18, 4  ;;  %v518_v18 = vld [vmem:[%s9130_s24 + $0x164] sm:$0xf] }
 0x273   : > { %v2623_v46 = vsel %vm2551_vm2, %v2515_v42, %v2587_v55  ;;  %v2444_v0 = vadd.f32 %v2394_v50, %v1948_v7  ;;  %v1714_v22 = vadd.f32 %v9926_v32, %v1665_v54  ;;  %v10193_v50 = vunpack.c.l.bf16 %v594_v12 }
 0x274   : > { %v10182_v31 = vpack.c.bf16 %v2623_v46, %v2622_v16  ;;  %v10201_v54 = vunpack.c.l.bf16 %v595_v1  ;;  %v10203_v16 = vld [vmem:[#allocation3 + $0x34] sm:$0xff] }
 0x275   : > { %3223 = vmatmul.bf16.gmra.mxu1 %v8600_v8  ;;  %3608 = vmatmul.bf16.gmra.mxu2 %v3487_v59  ;;  %11481 = vst [vmem:[#allocation71_spill] sm:$0xff] %v10193_v50  ;;  %v2480_v46 = vmul.f32 %v2444_v0, %v10180_v37  ;;  %v10213_v37 = vunpack.c.l.bf16 %v518_v18 }
 0x276   : > { %8302 = vst [vmem:[#allocation3 + $0x68] sm:$0xff] %v10182_v31   ;;  %v10190_v49 = vpop.f32.mrf.mxu0  ;;  %v2878_v42 = vrot.slane %v10182_v31, 3 }
 0x277   : > { %v2516_v7 = vadd.f32 %v2480_v46, %v10193_v50  ;;  %11483 = vst [vmem:[#allocation73_spill] sm:$0xff] %v10201_v54  ;;  %v11327_v46 = vrot.slane %v10203_v16, 1 }
 0x278   : > { %v1901_v28 = vpop.f32.mrf.mxu2  ;;  %v2879_v29 = vsel %vm2852_vm3, %v2876_v11, %v2878_v42  ;;  %v2402_v1 = vpop.f32.mrf.mxu3  ;;  %11484 = vst [vmem:[#allocation74_spill] sm:$0xff] %v10213_v37 }
 0x279   : > { %v1949_v8 = vadd.f32 %v1901_v28, %v1714_v22  ;;  %3024 = vmatmul.bf16.gmra.mxu0 %v2879_v29  ;;  %v2588_v59 = vmul.f32 0.2, %v2516_v7  ;;  %vm2552_vm9 = vcmp.ge.f32.partialorder %v2516_v7, 0.0  ;;  %v8761_v29 = vld [vmem:[%s9130_s24 + $0x15c] sm:$0xff]  ;;  %v3489_v20 = vsel %vm3476_vm8, %v3486_v51, %v11327_v46 }
 0x27a   : > { %v1667_v55 = vpop.f32.mrf.mxu1 }
 0x27b   : > { %v2445_v12 = vadd.f32 %v2397_v4, %v1949_v8  ;;  %v1715_v22 = vadd.f32 %v9926_v32, %v1667_v55  ;;  %v596_v8 = vrot.slane %v8761_v29, 4  ;;  %v8602_v55 = vld [vmem:[#allocation3 + $0x2c] sm:$0xff]  }
 0x27d   : > { %v2481_v0 = vmul.f32 %v2445_v12, %v10198_v24  ;;  %v2624_v24 = vsel %vm2552_vm9, %v2516_v7, %v2588_v59  ;;  %v10232_v51 = vunpack.c.l.bf16 %v596_v8 }
 0x27e   : > { %v10206_v31 = vpop.f32.mrf.mxu0 }
 0x27f   : > { %v2517_v11 = vadd.f32 %v2481_v0, %v10201_v54  ;;  %11485 = vst [vmem:[#allocation75_spill] sm:$0xff] %v10232_v51 }
 0x280   : > { %v1903_v48 = vpop.f32.mrf.mxu2  ;;  %v2404_v29 = vpop.f32.mrf.mxu3 }
 0x281   : > { %vm2553_vm4 = vcmp.ge.f32.partialorder %v2517_v11, 0.0  ;;  %v2589_v28 = vmul.f32 0.2, %v2517_v11  ;;  %v1950_v4 = vadd.f32 %v1903_v48, %v1715_v22  ;;  %v520_v22 = vld [vmem:[%s9130_s24 + $0x170] sm:$0xf] }
 0x282   : > { %v1670_v12 = vpop.f32.mrf.mxu1 }
 0x283   : > { %v2625_v50 = vsel %vm2553_vm4, %v2517_v11, %v2589_v28  ;;  %v2446_v0 = vadd.f32 %v2399_v2, %v1950_v4  ;;  %v1716_v34 = vadd.f32 %v9926_v32, %v1670_v12  ;;  %v7535_v2 = vld [vmem:[%s11237_s1 + $0x1c8] sm:$0xff]  ;;  %v10237_v28 = vunpack.c.l.bf16 %v520_v22 }
 0x284   : > { %v10215_v54 = vpack.c.bf16 %v2625_v50, %v2624_v24  ;;  %v7543_v50 = vld [vmem:[%s11237_s1 + $0x208] sm:$0xff]  ;;  %4260 = vmatpush.bf16.msra.mxu3 %v7535_v2 }
 0x285   : > { %3228 = vmatmul.bf16.gmra.mxu1 %v8602_v55  ;;  %3613 = vmatmul.bf16.gmra.mxu2 %v3489_v20  ;;  %v2482_v24 = vmul.f32 %v2446_v0, %v10213_v37  ;;  %v8762_v20 = vld [vmem:[%s9130_s24 + $0x168] sm:$0xff]  ;;  %11486 = vst [vmem:[#allocation76_spill] sm:$0xff] %v10237_v28  ;;  %v11490_v37 = vrot.slane %v10203_v16, 1  ;;  %v8764_v16 = vld [vmem:[%s9130_s24 + $0x180] sm:$0xff] }
 0x286   : > { %8303 = vst [vmem:[#allocation3 + $0x70] sm:$0xff] %v10215_v54   ;;  %v10223_v7 = vpop.f32.mrf.mxu0  ;;  %v2880_v59 = vrot.slane %v10215_v54, 3  ;;  %v597_v11 = vrot.slane %v8762_v20, 4  ;;  %4499 = vmatpush.bf16.msra.mxu0 %v7543_v50  ;;  %v10242_v55 = vld [vmem:[#allocation3 + $0x3c] sm:$0xff] }
 0x287   : > { %v2518_v12 = vadd.f32 %v2482_v24, %v10232_v51  ;;  %v3490_v24 = vrot.slane %v10242_v55, 1 }
 0x288   : > { %v1906_v48 = vpop.f32.mrf.mxu2  ;;  %v2881_v18 = vsel %vm2852_vm3, %v2878_v42, %v2880_v59  ;;  %v10240_v8 = vunpack.c.l.bf16 %v597_v11 }
 0x289   : > { %v1951_v54 = vadd.f32 %v1906_v48, %v1716_v34  ;;  %3029 = vmatmul.bf16.gmra.mxu0 %v2881_v18  ;;  %v2590_v2 = vmul.f32 0.2, %v2518_v12  ;;  %vm2554_vm5 = vcmp.ge.f32.partialorder %v2518_v12, 0.0  ;;  %v522_v48 = vld [vmem:[%s9130_s24 + $0x17c] sm:$0xf]  ;;  %v3491_v55 = vsel %vm3476_vm8, %v11490_v37, %v3490_v24 }
 0x28a   : > { %v1672_v4 = vpop.f32.mrf.mxu1  ;;  %11487 = vst [vmem:[#allocation77_spill] sm:$0xff] %v10240_v8  ;;  %v10252_v51 = vunpack.c.l.bf16 %v522_v48 }
 0x28b   : > { %v2447_v0 = vadd.f32 %v2402_v1, %v1951_v54  ;;  %v1717_v22 = vadd.f32 %v9926_v32, %v1672_v4  ;;  %v8763_v1 = vld [vmem:[%s9130_s24 + $0x174] sm:$0xff] }
 0x28c   : > { %v598_v54 = vrot.slane %v8763_v1, 4  ;;  %11489 = vst [vmem:[#allocation79_spill] sm:$0xff] %v10252_v51 }
 0x28d   : > { %v2483_v20 = vmul.f32 %v2447_v0, %v10237_v28  ;;  %v2626_v0 = vsel %vm2554_vm5, %v2518_v12, %v2590_v2  ;;  %v524_v12 = vld [vmem:[%s9130_s24 + $0x188] sm:$0xf] }
 0x28e   : > { %v10245_v42 = vpop.f32.mrf.mxu0 }
 0x28f   : > { %11488 = vst [vmem:[#allocation78_spill] sm:$0xff] %v10245_v42  ;;  %v2519_v34 = vadd.f32 %v2483_v20, %v10240_v8  ;;  %v8604_v8 = vld [vmem:[#allocation3 + $0x34] sm:$0xff]   ;;  %v2407_v42 = vpop.f32.mrf.mxu3 }
 0x290   : > { %v1908_v50 = vpop.f32.mrf.mxu2 }
 0x291   : > { %vm2555_vm6 = vcmp.ge.f32.partialorder %v2519_v34, 0.0  ;;  %v2591_v11 = vmul.f32 0.2, %v2519_v34  ;;  %v1952_v18 = vadd.f32 %v1908_v50, %v1717_v22  ;;  %v599_v50 = vrot.slane %v8764_v16, 4 }
 0x292   : > { %v1675_v46 = vpop.f32.mrf.mxu1 }
 0x293   : > { %v2627_v28 = vsel %vm2555_vm6, %v2519_v34, %v2591_v11  ;;  %v2448_v20 = vadd.f32 %v2404_v29, %v1952_v18  ;;  %v1718_v22 = vadd.f32 %v9926_v32, %v1675_v46  ;;  %v10268_v29 = vunpack.c.l.bf16 %v598_v54 }
 0x294   : > { %v10254_v4 = vpack.c.bf16 %v2627_v28, %v2626_v0  ;;  %v7554_v28 = vld [vmem:[%s11237_s1 + $0x260] sm:$0xff]  ;;  %v10273_v11 = vunpack.c.l.bf16 %v524_v12  ;;  %v10276_v0 = vunpack.c.l.bf16 %v599_v50 }
 0x295   : > { %3233 = vmatmul.bf16.gmra.mxu1 %v8604_v8  ;;  %3618 = vmatmul.bf16.gmra.mxu2 %v3491_v55  ;;  %11492 = vst [vmem:[#allocation81_spill] sm:$0xff] %v10268_v29  ;;  %v2484_v37 = vmul.f32 %v2448_v20, %v10252_v51 }
 0x296   : > { %8304 = vst [vmem:[#allocation3 + $0x78] sm:$0xff] %v10254_v4   ;;  %v10262_v2 = vpop.f32.mrf.mxu0  ;;  %v2882_v34 = vrot.slane %v10254_v4, 3  ;;  %4880 = vmatpush.bf16.msrb.mxu1 %v7554_v28  ;;  %v10278_v4 = vld [vmem:[#allocation3 + $0x44] sm:$0xff] }
 0x297   : > { %11491 = vst [vmem:[#allocation80_spill] sm:$0xff] %v10262_v2  ;;  %v2520_v1 = vadd.f32 %v2484_v37, %v10268_v29  ;;  %v2409_v55 = vpop.f32.mrf.mxu3  ;;  %v11344_v37 = vrot.slane %v10278_v4, 1 }
 0x298   : > { %v1911_v46 = vpop.f32.mrf.mxu2  ;;  %v2883_v8 = vsel %vm2852_vm3, %v2880_v59, %v2882_v34  ;;  %11493 = vst [vmem:[#allocation82_spill] sm:$0xff] %v10273_v11 }
 0x299   : > { %v1953_v48 = vadd.f32 %v1911_v46, %v1718_v22  ;;  %3034 = vmatmul.bf16.gmra.mxu0 %v2883_v8  ;;  %11494 = vst [vmem:[#allocation83_spill] sm:$0xff] %v10276_v0  ;;  %v2592_v59 = vmul.f32 0.2, %v2520_v1  ;;  %vm2556_vm1 = vcmp.ge.f32.partialorder %v2520_v1, 0.0  ;;  %v526_v46 = vld [vmem:[%s9130_s24 + $0x194] sm:$0xf] }
 0x29a   : > { %v1677_v18 = vpop.f32.mrf.mxu1  ;;  %v8765_v8 = vld [vmem:[%s9130_s24 + $0x18c] sm:$0xff]  ;;  %v10288_v51 = vunpack.c.l.bf16 %v526_v46 }
 0x29b   : > { %v2449_v54 = vadd.f32 %v2407_v42, %v1953_v48  ;;  %v1719_v12 = vadd.f32 %v9926_v32, %v1677_v18  ;;  %v600_v48 = vrot.slane %v8765_v8, 4 }
 0x29c   : > { %11496 = vst [vmem:[#allocation85_spill] sm:$0xff] %v10288_v51 }
 0x29d   : > { %v2485_v20 = vmul.f32 %v2449_v54, %v10273_v11  ;;  %v2628_v11 = vsel %vm2556_vm1, %v2520_v1, %v2592_v59 }
 0x29e   : > { %v10281_v16 = vpop.f32.mrf.mxu0 }
 0x29f   : > { %11495 = vst [vmem:[#allocation84_spill] sm:$0xff] %v10281_v16  ;;  %v2521_v22 = vadd.f32 %v2485_v20, %v10276_v0  ;;  %v8606_v0 = vld [vmem:[#allocation3 + $0x3c] sm:$0xff]   ;;  %v3493_v16 = vsel %vm3476_vm8, %v3490_v24, %v11344_v37 }
 0x2a0   : > { %v1913_v28 = vpop.f32.mrf.mxu2  ;;  %v8766_v24 = vld [vmem:[%s9130_s24 + $0x198] sm:$0xff] }
 0x2a1   : > { %vm2557_vm7 = vcmp.ge.f32.partialorder %v2521_v22, 0.0  ;;  %v2593_v50 = vmul.f32 0.2, %v2521_v22  ;;  %v1954_v42 = vadd.f32 %v1913_v28, %v1719_v12  ;;  %v528_v12 = vld [vmem:[%s9130_s24 + $0x1a0] sm:$0xf] }
 0x2a2   : > { %v1680_v54 = vpop.f32.mrf.mxu1 }
 0x2a3   : > { %v2629_v29 = vsel %vm2557_vm7, %v2521_v22, %v2593_v50  ;;  %v2450_v20 = vadd.f32 %v2409_v55, %v1954_v42  ;;  %v1720_v2 = vadd.f32 %v9926_v32, %v1680_v54  ;;  %v601_v22 = vrot.slane %v8766_v24, 4 }
 0x2a4   : > { %v10290_v18 = vpack.c.bf16 %v2629_v29, %v2628_v11  ;;  %v7534_v29 = vld [vmem:[%s11237_s1 + $0x1c0] sm:$0xff]  ;;  %v10304_v11 = vunpack.c.l.bf16 %v600_v48  ;;  %v10309_v50 = vunpack.c.l.bf16 %v528_v12 }
 0x2a5   : > { %3238 = vmatmul.bf16.gmra.mxu1 %v8606_v0  ;;  %3623 = vmatmul.bf16.gmra.mxu2 %v3493_v16  ;;  %v2486_v55 = vmul.f32 %v2450_v20, %v10288_v51  ;;  %v2412_v16 = vpop.f32.mrf.mxu3  ;;  %v10312_v48 = vunpack.c.l.bf16 %v601_v22  ;;  %v7542_v20 = vld [vmem:[%s11237_s1 + $0x200] sm:$0xff] }
 0x2a6   : > { %8305 = vst [vmem:[#allocation3 + $0x80] sm:$0xff] %v10290_v18   ;;  %v10298_v1 = vpop.f32.mrf.mxu0  ;;  %v2884_v59 = vrot.slane %v10290_v18, 3  ;;  %4261 = vmatpush.bf16.msra.mxu3 %v7534_v29  ;;  %v10317_v18 = vld [vmem:[#allocation3 + $0x4c] sm:$0xff]  ;;  %4500 = vmatpush.bf16.msra.mxu0 %v7542_v20  ;;  %v8767_v22 = vld [vmem:[%s9130_s24 + $0x1a4] sm:$0xff] }
 0x2a7   : > { %11497 = vst [vmem:[#allocation86_spill] sm:$0xff] %v10298_v1  ;;  %v2522_v8 = vadd.f32 %v2486_v55, %v10304_v11 }
 0x2a8   : > { %11498 = vst [vmem:[#allocation87_spill] sm:$0xff] %v10304_v11  ;;  %v1916_v0 = vpop.f32.mrf.mxu2  ;;  %v2885_v28 = vsel %vm2852_vm3, %v2882_v34, %v2884_v59  ;;  %v8608_v11 = vld [vmem:[#allocation3 + $0x44] sm:$0xff]  }
 0x2a9   : > { %v1955_v46 = vadd.f32 %v1916_v0, %v1720_v2  ;;  %11499 = vst [vmem:[#allocation88_spill] sm:$0xff] %v10309_v50  ;;  %3039 = vmatmul.bf16.gmra.mxu0 %v2885_v28  ;;  %v530_v2 = vld [vmem:[%s9130_s24 + $0x1ac] sm:$0xf]  ;;  %v2594_v12 = vmul.f32 0.2, %v2522_v8  ;;  %v602_v0 = vrot.slane %v8767_v22, 4 }
 0x2aa   : > { %v1682_v42 = vpop.f32.mrf.mxu1  ;;  %11500 = vst [vmem:[#allocation89_spill] sm:$0xff] %v10312_v48  ;;  %vm2558_vm10 = vcmp.ge.f32.partialorder %v2522_v8, 0.0  ;;  %v3494_v28 = vrot.slane %v10317_v18, 1  ;;  %v10332_v37 = vunpack.c.l.bf16 %v530_v2  ;;  %v11502_v18 = vrot.slane %v10278_v4, 1  ;;  %v10354_v4 = vld [vmem:[%s11238_s2] ss:$0 sm:$0xff] }
 0x2ab   : > { %v2451_v54 = vadd.f32 %v2412_v16, %v1955_v46  ;;  %v1721_v55 = vadd.f32 %v9926_v32, %v1682_v42  ;;  %v10330_v46 = vld [vmem:[%s11238_s2 + $0x2] ss:$0 sm:$0xff]  ;;  %v10334_v42 = vunpack.c.l.bf16 %v602_v0 }
 0x2ac   : > { %v3056_v1 = vadd.f32 %v10330_v46, %v10030_v26 }
 0x2ad   : > { %v2487_v34 = vmul.f32 %v2451_v54, %v10309_v50  ;;  %v2414_v50 = vpop.f32.mrf.mxu3 }
 0x2ae   : > { %v10321_v29 = vpop.f32.mrf.mxu0 }
 0x2af   : > { %11501 = vst [vmem:[#allocation90_spill] sm:$0xff] %v10321_v29  ;;  %v2523_v24 = vadd.f32 %v2487_v34, %v10312_v48  ;;  %v2630_v48 = vsel %vm2558_vm10, %v2522_v8, %v2594_v12  ;;  %v3495_v29 = vsel %vm3476_vm8, %v11502_v18, %v3494_v28 }
 0x2b0   : > { %v1918_v16 = vpop.f32.mrf.mxu2 }
 0x2b1   : > { %vm2559_vm11 = vcmp.ge.f32.partialorder %v2523_v24, 0.0  ;;  %v2595_v54 = vmul.f32 0.2, %v2523_v24  ;;  %v1956_v20 = vadd.f32 %v1918_v16, %v1721_v55 }
 0x2b2   : > { %v3204_v34 = vpop.f32.mrf.mxu1 }
 0x2b3   : > { %v2631_v32 = vsel %vm2559_vm11, %v2523_v24, %v2595_v54  ;;  %v2452_v22 = vadd.f32 %v2414_v50, %v1956_v20  ;;  %v3294_v12 = vadd.f32 %v3204_v34, %v3056_v1  ;;  %v861_v24 = vadd.f32 %v10354_v4, %v9686_v63 }
 0x2b4   : > { %v10336_v51 = vpack.c.bf16 %v2631_v32, %v2630_v48  ;;  %v7553_v48 = vld [vmem:[%s11237_s1 + $0x258] sm:$0xff]  ;;  %v3057_v1 = vadd.f32 %v10330_v46, %v10055_v9 }
 0x2b5   : > { %v2488_v2 = vmul.f32 %v2452_v22, %v10332_v37  ;;  %3243 = vmatmul.bf16.gmra.mxu1 %v8608_v11  ;;  %3628 = vmatmul.bf16.gmra.mxu2 %v3495_v29  ;;  %v10360_v32 = vld [vmem:[#allocation3 + $0x54] sm:$0xff] }
 0x2b6   : > { %8306 = vst [vmem:[#allocation3 + $0x88] sm:$0xff] %v10336_v51   ;;  %v10345_v8 = vpop.f32.mrf.mxu0  ;;  %v2886_v50 = vrot.slane %v10336_v51, 3  ;;  %4881 = vmatpush.bf16.msrb.mxu1 %v7553_v48  ;;  %v863_v48 = vadd.f32 %v10354_v4, %v9743_v61 }
 0x2b7   : > { %v2524_v26 = vadd.f32 %v2488_v2, %v10334_v42  ;;  %v3496_v2 = vrot.slane %v10360_v32, 1 }
 0x2b8   : > { %v3589_v11 = vpop.f32.mrf.mxu2  ;;  %v2887_v29 = vsel %vm2852_vm3, %v2884_v59, %v2886_v50 }
 0x2b9   : > { %vm2560_vm12 = vcmp.ge.f32.partialorder %v2524_v26, 0.0  ;;  %v2596_v51 = vmul.f32 0.2, %v2524_v26  ;;  %v3679_v55 = vadd.f32 %v3589_v11, %v3294_v12  ;;  %3044 = vmatmul.bf16.gmra.mxu0 %v2887_v29 }
 0x2ba   : > { %v3206_v0 = vpop.f32.mrf.mxu1 }
 0x2bb   : > { %v2632_v16 = vsel %vm2560_vm12, %v2524_v26, %v2596_v51  ;;  %v3715_v54 = vadd.f32 %v3679_v55, %v861_v24  ;;  %v3295_v22 = vadd.f32 %v3206_v0, %v3057_v1  ;;  %v8610_v24 = vld [vmem:[#allocation3 + $0x4c] sm:$0xff]   ;;  %v3497_v55 = vsel %vm3476_vm8, %v3494_v28, %v3496_v2 }
 0x2bc   : > { %v2668_v20 = vpack.c.bf16 %v2632_v16, %v2632_v16  ;;  %v3058_v16 = vadd.f32 %v10330_v46, %v10075_v15 }
 0x2bd   : > { %v3751_v34 = vmul.f32 %v3715_v54, %v9490_v27 }
 0x2be   : > { %2704 = vst [vmem:[#allocation3 + $0x90] sm:$0xf] %v2668_v20  ;;  %v10365_v59 = vpop.f32.mrf.mxu0 }
 0x2bf   : > { %v3787_v63 = vadd.f32 %v3751_v34, %v9492_v43 }
 0x2c0   : > { %v3591_v18 = vpop.f32.mrf.mxu2 }
 0x2c1   : > { %vm3823_vm13 = vcmp.ge.f32.partialorder %v3787_v63, 0.0  ;;  %v3859_v26 = vmul.f32 0.2, %v3787_v63  ;;  %v3680_v12 = vadd.f32 %v3591_v18, %v3295_v22 }
 0x2c2   : > { %v3209_v11 = vpop.f32.mrf.mxu1 }
 0x2c3   : > { %v3895_v29 = vsel %vm3823_vm13, %v3787_v63, %v3859_v26  ;;  %v3716_v9 = vadd.f32 %v3680_v12, %v863_v48  ;;  %v3296_v32 = vadd.f32 %v3209_v11, %v3058_v16  ;;  %v866_v63 = vadd.f32 %v10354_v4, %v9780_v40  ;;  %v4020_v48 = vld [vmem:[#allocation3] sm:$0xc]  ;;  %v7583_v12 = vld [vmem:[%s11237_s1 + $0x2b8] sm:$0xff] }
 0x2c4   : > { %v3931_v51 = vpack.c.bf16 %v3895_v29, %v3895_v29  ;;  %v7609_v11 = vld [vmem:[%s11237_s1 + $0x2f8] sm:$0xff]  ;;  %5473 = vmatpush.bf16.msrb.mxu2 %v7583_v12 }
 0x2c5   : > { %3248 = vmatmul.bf16.gmra.mxu1 %v8610_v24  ;;  %3633 = vmatmul.bf16.gmra.mxu2 %v3497_v55  ;;  %v2758_v0 = vld [vmem:[#allocation3 + $0x90] sm:$0x7]  ;;  %v3752_v20 = vmul.f32 %v3716_v9, %v9513_v39  ;;  %v7635_v40 = vld [vmem:[%s11237_s1 + $0x338] sm:$0xff]  ;;  %v3059_v24 = vadd.f32 %v10330_v46, %v10095_v30 }
 0x2c6   : > { %3967 = vst [vmem:[#allocation3 + $0x4] sm:$0xf] %v3931_v51  ;;  %v10374_v54 = vpop.f32.mrf.mxu0  ;;  %v2832_v61 = vunpack.c.l.b16 %v2758_v0  ;;  %v10392_v9 = vld [vmem:[#allocation3 + $0x5c] sm:$0xff]  ;;  %v4094_v0 = vunpack.c.l.b16 %v4020_v48  ;;  %5809 = vmatpush.bf16.msrb.mxu3 %v7609_v11  ;;  %6144 = vmatpush.bf16.msrb.mxu0 %v7635_v40  ;;  %v8612_v40 = vld [vmem:[#allocation3 + $0x54] sm:$0xff]  }
 0x2c7   : > { %v3788_v15 = vadd.f32 %v3752_v20, %v9528_v33  ;;  %v3498_v30 = vrot.slane %v10392_v9, 1 }
 0x2c8   : > { %v3594_v1 = vpop.f32.mrf.mxu2  ;;  %v2851_v34 = vpack.c.b16 %v2832_v61, %v2832_v61 }
 0x2c9   : > { %v3681_v22 = vadd.f32 %v3594_v1, %v3296_v32  ;;  %v3860_v20 = vmul.f32 0.2, %v3788_v15 }
 0x2ca   : > { %v3211_v28 = vpop.f32.mrf.mxu1  ;;  %v2888_v18 = vrot.slane %v2851_v34, 3  ;;  %v868_v34 = vadd.f32 %v10354_v4, %v9816_v41 }
 0x2cb   : > { %v10380_v26 = vadd.f32 %v3681_v22, %v866_v63  ;;  %v3297_v32 = vadd.f32 %v3211_v28, %v3059_v24  ;;  %v3499_v28 = vsel %vm3476_vm8, %v3496_v2, %v3498_v30  ;;  %v3060_v24 = vadd.f32 %v10330_v46, %v10113_v6 }
 0x2cc   : > { %v2889_v29 = vsel %vm2852_vm3, %v2886_v50, %v2888_v18  ;;  %vm3824_vm3 = vcmp.ge.f32.partialorder %v3788_v15, 0.0  ;;  %v871_v2 = vadd.f32 %v10354_v4, %v9854_v5 }
 0x2cd   : > { %11503 = vst [vmem:[#allocation91_spill] sm:$0xff] %v10380_v26  ;;  %v3753_v51 = vmul.f32 %v10380_v26, %v9535_v13  ;;  %3049 = vmatmul.bf16.gmra.mxu0 %v2889_v29  ;;  %v4021_v55 = vld [vmem:[#allocation3 + $0x4] sm:$0xf]  ;;  %v3896_v48 = vsel %vm3824_vm3, %v3788_v15, %v3860_v20 }
 0x2ce   : > { %v10398_v16 = vpop.f32.mrf.mxu0  ;;  %v4095_v61 = vunpack.c.l.b16 %v4021_v55 }
 0x2cf   : > { %v3789_v50 = vadd.f32 %v3753_v51, %v9538_v23 }
 0x2d0   : > { %v3596_v1 = vpop.f32.mrf.mxu2  ;;  %v4131_v12 = vpack.c.b16 %v4095_v61, %v4094_v0 }
 0x2d1   : > { %vm3825_vm14 = vcmp.ge.f32.partialorder %v3789_v50, 0.0  ;;  %v3861_v63 = vmul.f32 0.2, %v3789_v50  ;;  %v3682_v22 = vadd.f32 %v3596_v1, %v3297_v32 }
 0x2d2   : > { %v3214_v18 = vpop.f32.mrf.mxu1  ;;  %v4151_v9 = vrot.slane %v4131_v12, 2  ;;  %v7552_v12 = vld [vmem:[%s11237_s1 + $0x250] sm:$0xff] }
 0x2d3   : > { %v3897_v29 = vsel %vm3825_vm14, %v3789_v50, %v3861_v63  ;;  %v10404_v11 = vadd.f32 %v3682_v22, %v868_v34  ;;  %v3298_v0 = vadd.f32 %v3214_v18, %v3060_v24  ;;  %v10422_v18 = vld [vmem:[#allocation3 + $0x64] sm:$0xff]  ;;  %4882 = vmatpush.bf16.msrb.mxu1 %v7552_v12 }
 0x2d4   : > { %v7878_v55 = vpack.c.bf16 %v3897_v29, %v3896_v48  ;;  %v3061_v48 = vadd.f32 %v10330_v46, %v10133_v44  ;;  %v3500_v24 = vrot.slane %v10422_v18, 1 }
 0x2d5   : > { %11504 = vst [vmem:[#allocation92_spill] sm:$0xff] %v10404_v11  ;;  %3253 = vmatmul.bf16.gmra.mxu1 %v8612_v40  ;;  %3638 = vmatmul.bf16.gmra.mxu2 %v3499_v28  ;;  %v3754_v15 = vmul.f32 %v10404_v11, %v9560_v45 }
 0x2d6   : > { %8409 = vst [vmem:[#allocation3 + $0x8] sm:$0xff] %v7878_v55   ;;  %v10409_v41 = vpop.f32.mrf.mxu0  ;;  %v4152_v51 = vrot.slane %v7878_v55, 2  ;;  %v7962_v20 = vunpack.c.l.b16 %v7878_v55 }
 0x2d7   : > { %v3790_v34 = vadd.f32 %v3754_v15, %v9558_v35 }
 0x2d8   : > { %v3599_v50 = vpop.f32.mrf.mxu2  ;;  %v4153_v32 = vsel %vm4150_vm15, %v4151_v9, %v4152_v51  ;;  %v4409_v22 = vpack.c.b16 %v7962_v20, %v4095_v61  ;;  %v873_v9 = vadd.f32 %v10354_v4, %v9887_v36 }
 0x2d9   : > { %v3683_v6 = vadd.f32 %v3599_v50, %v3298_v0  ;;  %4262 = vmatmul.bf16.vlgmr.msra.gmra.mxu3 %v4153_v32  ;;  %v3862_v40 = vmul.f32 0.2, %v3790_v34  ;;  %vm3826_vm0 = vcmp.ge.f32.partialorder %v3790_v34, 0.0 }
 0x2da   : > { %v3216_v1 = vpop.f32.mrf.mxu1 }
 0x2db   : > { %v10417_v63 = vadd.f32 %v3683_v6, %v871_v2  ;;  %v3299_v61 = vadd.f32 %v3216_v1, %v3061_v48  ;;  %v3898_v20 = vsel %vm3826_vm0, %v3790_v34, %v3862_v40  ;;  %v8614_v2 = vld [vmem:[#allocation3 + $0x5c] sm:$0xff]   ;;  %v3062_v1 = vadd.f32 %v10330_v46, %v10151_v3 }
 0x2dc   : > { %v876_v40 = vadd.f32 %v10354_v4, %v9918_v14  ;;  %v3063_v14 = vadd.f32 %v10330_v46, %v10173_v52  ;;  %v878_v52 = vadd.f32 %v10354_v4, %v9957_v19 }
 0x2dd   : > { %11505 = vst [vmem:[#allocation93_spill] sm:$0xff] %v10417_v63  ;;  %v3755_v5 = vmul.f32 %v10417_v63, %v9597_v57  ;;  %4501 = vmatmul.bf16.vlgmr.msra.gmra.mxu0 %v4409_v22  ;;  %v3501_v22 = vsel %vm3476_vm8, %v3498_v30, %v3500_v24 }
 0x2de   : > { %v10428_v29 = vpop.f32.mrf.mxu0 }
 0x2df   : > { %v3791_v55 = vadd.f32 %v3755_v5, %v9600_v10 }
 0x2e0   : > { %v3601_v28 = vpop.f32.mrf.mxu2 }
 0x2e1   : > { %vm3827_vm2 = vcmp.ge.f32.partialorder %v3791_v55, 0.0  ;;  %v3863_v44 = vmul.f32 0.2, %v3791_v55  ;;  %v3684_v15 = vadd.f32 %v3601_v28, %v3299_v61  ;;  %v7582_v28 = vld [vmem:[%s11237_s1 + $0x2b0] sm:$0xff] }
 0x2e2   : > { %v3219_v0 = vpop.f32.mrf.mxu1  ;;  %5474 = vmatpush.bf16.msrb.mxu2 %v7582_v28 }
 0x2e3   : > { %v3899_v50 = vsel %vm3827_vm2, %v3791_v55, %v3863_v44  ;;  %v10434_v32 = vadd.f32 %v3684_v15, %v873_v9  ;;  %v3300_v34 = vadd.f32 %v3219_v0, %v3062_v1  ;;  %v7608_v9 = vld [vmem:[%s11237_s1 + $0x2f0] sm:$0xff] }
 0x2e4   : > { %v7883_v6 = vpack.c.bf16 %v3899_v50, %v3898_v20  ;;  %v10455_v44 = vld [vmem:[#allocation3 + $0x6c] sm:$0xff]  ;;  %5810 = vmatpush.bf16.msrb.mxu3 %v7608_v9  ;;  %v3064_v9 = vadd.f32 %v10330_v46, %v10190_v49  ;;  %v881_v49 = vadd.f32 %v10354_v4, %v9979_v38 }
 0x2e5   : > { %11506 = vst [vmem:[#allocation94_spill] sm:$0xff] %v10434_v32  ;;  %3258 = vmatmul.bf16.gmra.mxu1 %v8614_v2  ;;  %3643 = vmatmul.bf16.gmra.mxu2 %v3501_v22  ;;  %v3756_v18 = vmul.f32 %v10434_v32, %v9617_v62  ;;  %v3502_v22 = vrot.slane %v10455_v44, 1 }
 0x2e6   : > { %8410 = vst [vmem:[#allocation3 + $0x10] sm:$0xff] %v7883_v6   ;;  %v10439_v12 = vpop.f32.mrf.mxu0  ;;  %v4154_v36 = vrot.slane %v7883_v6, 2 }
 0x2e7   : > { %v3792_v3 = vadd.f32 %v3756_v18, %v9645_v60 }
 0x2e8   : > { %v3604_v48 = vpop.f32.mrf.mxu2  ;;  %v4155_v5 = vsel %vm4150_vm15, %v4152_v51, %v4154_v36 }
 0x2e9   : > { %v3685_v30 = vadd.f32 %v3604_v48, %v3300_v34  ;;  %4267 = vmatmul.bf16.gmra.mxu3 %v4155_v5  ;;  %v3864_v20 = vmul.f32 0.2, %v3792_v3  ;;  %vm3828_vm9 = vcmp.ge.f32.partialorder %v3792_v3, 0.0 }
 0x2ea   : > { %v3221_v55 = vpop.f32.mrf.mxu1 }
 0x2eb   : > { %v10447_v61 = vadd.f32 %v3685_v30, %v876_v40  ;;  %v3301_v2 = vadd.f32 %v3221_v55, %v3063_v14  ;;  %v3900_v48 = vsel %vm3828_vm9, %v3792_v3, %v3864_v20  ;;  %v8616_v30 = vld [vmem:[#allocation3 + $0x64] sm:$0xff]   ;;  %v3503_v55 = vsel %vm3476_vm8, %v3500_v24, %v3502_v22  ;;  %v7634_v3 = vld [vmem:[%s11237_s1 + $0x330] sm:$0xff] }
 0x2ec   : > { %6145 = vmatpush.bf16.msrb.mxu0 %v7634_v3 }
 0x2ed   : > { %11507 = vst [vmem:[#allocation95_spill] sm:$0xff] %v10447_v61  ;;  %v3757_v51 = vmul.f32 %v10447_v61, %v9656_v25  ;;  %v8628_v15 = vld [vmem:[#allocation3 + $0xc] sm:$0xff]   ;;  %v8620_v61 = vld [vmem:[#allocation3 + $0x74] sm:$0xff]  }
 0x2ee   : > { %v10461_v0 = vpop.f32.mrf.mxu0  ;;  %4506 = vmatmul.bf16.gmra.mxu0 %v8628_v15 }
 0x2ef   : > { %v3793_v50 = vadd.f32 %v3757_v51, %v9659_v21 }
 0x2f0   : > { %v3606_v6 = vpop.f32.mrf.mxu2 }
 0x2f1   : > { %vm3829_vm4 = vcmp.ge.f32.partialorder %v3793_v50, 0.0  ;;  %v3865_v1 = vmul.f32 0.2, %v3793_v50  ;;  %v3686_v18 = vadd.f32 %v3606_v6, %v3301_v2 }
 0x2f2   : > { %v3224_v34 = vpop.f32.mrf.mxu1 }
 0x2f3   : > { %v3901_v5 = vsel %vm3829_vm4, %v3793_v50, %v3865_v1  ;;  %v10467_v40 = vadd.f32 %v3686_v18, %v878_v52  ;;  %v3302_v51 = vadd.f32 %v3224_v34, %v3064_v9  ;;  %v7551_v52 = vld [vmem:[%s11237_s1 + $0x248] sm:$0xff]  ;;  %v10488_v1 = vld [vmem:[#allocation3 + $0x74] sm:$0xff]  ;;  %v883_v9 = vadd.f32 %v10354_v4, %v10006_v58 }
 0x2f4   : > { %v7888_v28 = vpack.c.bf16 %v3901_v5, %v3900_v48  ;;  %4883 = vmatpush.bf16.msrb.mxu1 %v7551_v52  ;;  %v3066_v52 = vadd.f32 %v10330_v46, %v10223_v7  ;;  %v11513_v7 = vld [vmem:[#allocation35_spill] sm:$0xff] }
 0x2f5   : > { %11508 = vst [vmem:[#allocation96_spill] sm:$0xff] %v10467_v40  ;;  %3263 = vmatmul.bf16.gmra.mxu1 %v8616_v30  ;;  %3648 = vmatmul.bf16.gmra.mxu2 %v3503_v55  ;;  %v3758_v14 = vmul.f32 %v10467_v40, %v9681_v47  ;;  %v3504_v55 = vrot.slane %v10488_v1, 1 }
 0x2f6   : > { %8411 = vst [vmem:[#allocation3 + $0x18] sm:$0xff] %v7888_v28   ;;  %v10472_v44 = vpop.f32.mrf.mxu0  ;;  %v4156_v19 = vrot.slane %v7888_v28, 2 }
 0x2f7   : > { %v3794_v2 = vadd.f32 %v3758_v14, %v9694_v56 }
 0x2f8   : > { %v3609_v15 = vpop.f32.mrf.mxu2  ;;  %v4157_v24 = vsel %vm4150_vm15, %v4154_v36, %v4156_v19  ;;  %v3065_v36 = vadd.f32 %v10330_v46, %v10206_v31 }
 0x2f9   : > { %v3687_v20 = vadd.f32 %v3609_v15, %v3302_v51  ;;  %4272 = vmatmul.bf16.gmra.mxu3 %v4157_v24  ;;  %v3866_v48 = vmul.f32 0.2, %v3794_v2  ;;  %vm3830_vm5 = vcmp.ge.f32.partialorder %v3794_v2, 0.0 }
 0x2fa   : > { %v3226_v50 = vpop.f32.mrf.mxu1 }
 0x2fb   : > { %v10483_v6 = vadd.f32 %v3687_v20, %v881_v49  ;;  %v3303_v30 = vadd.f32 %v3226_v50, %v3065_v36  ;;  %v3902_v51 = vsel %vm3830_vm5, %v3794_v2, %v3866_v48  ;;  %v8618_v49 = vld [vmem:[#allocation3 + $0x6c] sm:$0xff]   ;;  %v3505_v50 = vsel %vm3476_vm8, %v3502_v22, %v3504_v55 }
 0x2fc   : > { %v11511_v36 = vld [vmem:[#allocation34_spill] sm:$0xff] }
 0x2fd   : > { %11509 = vst [vmem:[#allocation97_spill] sm:$0xff] %v10483_v6  ;;  %v3759_v18 = vmul.f32 %v10483_v6, %v9729_v53  ;;  %v8630_v38 = vld [vmem:[#allocation3 + $0x14] sm:$0xff]  }
 0x2fe   : > { %v10494_v34 = vpop.f32.mrf.mxu0  ;;  %4511 = vmatmul.bf16.gmra.mxu0 %v8630_v38 }
 0x2ff   : > { %v3795_v5 = vadd.f32 %v3759_v18, %v9737_v17 }
 0x300   : > { %v3611_v28 = vpop.f32.mrf.mxu2 }
 0x301   : > { %vm3831_vm6 = vcmp.ge.f32.partialorder %v3795_v5, 0.0  ;;  %v3867_v31 = vmul.f32 0.2, %v3795_v5  ;;  %v3688_v3 = vadd.f32 %v3611_v28, %v3303_v30 }
 0x302   : > { %v3229_v14 = vpop.f32.mrf.mxu1 }
 0x303   : > { %v3903_v15 = vsel %vm3831_vm6, %v3795_v5, %v3867_v31  ;;  %v10500_v24 = vadd.f32 %v3688_v3, %v883_v9  ;;  %v3304_v2 = vadd.f32 %v3229_v14, %v3066_v52  ;;  %v11512_v5 = vld [vmem:[#allocation8_spill] sm:$0xff]  ;;  %v11517_v52 = vld [vmem:[#allocation37_spill] sm:$0xff] }
 0x304   : > { %v7893_v20 = vpack.c.bf16 %v3903_v15, %v3902_v51  ;;  %v886_v30 = vadd.f32 %v10354_v4, %v11512_v5  ;;  %v10515_v3 = vld [vmem:[#allocation3 + $0x7c] sm:$0xff]  ;;  %v11515_v51 = vld [vmem:[#allocation78_spill] sm:$0xff] }
 0x305   : > { %11510 = vst [vmem:[#allocation98_spill] sm:$0xff] %v10500_v24  ;;  %3268 = vmatmul.bf16.gmra.mxu1 %v8618_v49  ;;  %3653 = vmatmul.bf16.gmra.mxu2 %v3505_v50  ;;  %v3760_v18 = vmul.f32 %v10500_v24, %v11511_v36  ;;  %v3067_v15 = vadd.f32 %v10330_v46, %v11515_v51  ;;  %v11516_v49 = vld [vmem:[#allocation36_spill] sm:$0xff]  ;;  %v11518_v5 = vld [vmem:[#allocation10_spill] sm:$0xff] }
 0x306   : > { %8412 = vst [vmem:[#allocation3 + $0x20] sm:$0xff] %v7893_v20   ;;  %v10505_v1 = vpop.f32.mrf.mxu0  ;;  %v4158_v58 = vrot.slane %v7893_v20, 2 }
 0x307   : > { %v3796_v9 = vadd.f32 %v3760_v18, %v11513_v7 }
 0x308   : > { %v3614_v38 = vpop.f32.mrf.mxu2  ;;  %v4159_v48 = vsel %vm4150_vm15, %v4156_v19, %v4158_v58 }
 0x309   : > { %v3689_v22 = vadd.f32 %v3614_v38, %v3304_v2  ;;  %4277 = vmatmul.bf16.gmra.mxu3 %v4159_v48  ;;  %v3868_v50 = vmul.f32 0.2, %v3796_v9  ;;  %vm3832_vm1 = vcmp.ge.f32.partialorder %v3796_v9, 0.0  ;;  %v3506_v48 = vrot.slane %v10515_v3, 1 }
 0x30a   : > { %v3231_v28 = vpop.f32.mrf.mxu1 }
 0x30b   : > { %v10513_v31 = vadd.f32 %v3689_v22, %v886_v30  ;;  %v3305_v38 = vadd.f32 %v3231_v28, %v3067_v15  ;;  %v888_v30 = vadd.f32 %v10354_v4, %v11518_v5  ;;  %v3507_v28 = vsel %vm3476_vm8, %v3504_v55, %v3506_v48  ;;  %v11520_v15 = vld [vmem:[#allocation80_spill] sm:$0xff]  ;;  %v11521_v55 = vld [vmem:[#allocation38_spill] sm:$0xff] }
 0x30d   : > { %11514 = vst [vmem:[#allocation34_spill] sm:$0xff] %v10513_v31  ;;  %v3761_v14 = vmul.f32 %v10513_v31, %v11516_v49  ;;  %v8632_v20 = vld [vmem:[#allocation3 + $0x1c] sm:$0xff]   ;;  %v3904_v31 = vsel %vm3832_vm1, %v3796_v9, %v3868_v50  ;;  %v7581_v9 = vld [vmem:[%s11237_s1 + $0x2a8] sm:$0xff] }
 0x30e   : > { %v10521_v19 = vpop.f32.mrf.mxu0  ;;  %4516 = vmatmul.bf16.gmra.mxu0 %v8632_v20  ;;  %v7607_v50 = vld [vmem:[%s11237_s1 + $0x2e8] sm:$0xff]  ;;  %5475 = vmatpush.bf16.msrb.mxu2 %v7581_v9 }
 0x30f   : > { %v3797_v2 = vadd.f32 %v3761_v14, %v11517_v52  ;;  %v3068_v14 = vadd.f32 %v10330_v46, %v11520_v15  ;;  %5811 = vmatpush.bf16.msrb.mxu3 %v7607_v50  ;;  %v10551_v15 = vld [vmem:[#allocation3 + $0x84] sm:$0xff] }
 0x310   : > { %v3616_v18 = vpop.f32.mrf.mxu2  ;;  %v8624_v52 = vld [vmem:[#allocation3 + $0x84] sm:$0xff]  }
 0x311   : > { %vm3833_vm7 = vcmp.ge.f32.partialorder %v3797_v2, 0.0  ;;  %v3869_v22 = vmul.f32 0.2, %v3797_v2  ;;  %v3690_v51 = vadd.f32 %v3616_v18, %v3305_v38 }
 0x312   : > { %v3234_v24 = vpop.f32.mrf.mxu1 }
 0x313   : > { %v3905_v6 = vsel %vm3833_vm7, %v3797_v2, %v3869_v22  ;;  %v10527_v40 = vadd.f32 %v3690_v51, %v888_v30  ;;  %v11523_v22 = vld [vmem:[#allocation39_spill] sm:$0xff] }
 0x314   : > { %v7898_v32 = vpack.c.bf16 %v3905_v6, %v3904_v31  ;;  %v7633_v6 = vld [vmem:[%s11237_s1 + $0x328] sm:$0xff]  ;;  %v3306_v31 = vadd.f32 %v3234_v24, %v3068_v14  ;;  %v11526_v14 = vld [vmem:[#allocation40_spill] sm:$0xff] }
 0x315   : > { %11519 = vst [vmem:[#allocation8_spill] sm:$0xff] %v10527_v40  ;;  %3273 = vmatmul.bf16.gmra.mxu1 %v8620_v61  ;;  %3658 = vmatmul.bf16.gmra.mxu2 %v3507_v28  ;;  %v3762_v61 = vmul.f32 %v10527_v40, %v11521_v55  ;;  %v11525_v40 = vld [vmem:[#allocation84_spill] sm:$0xff] }
 0x316   : > { %8413 = vst [vmem:[#allocation3 + $0x28] sm:$0xff] %v7898_v32   ;;  %v10532_v3 = vpop.f32.mrf.mxu0  ;;  %v4160_v20 = vrot.slane %v7898_v32, 2  ;;  %v11522_v32 = vld [vmem:[#allocation13_spill] sm:$0xff]  ;;  %6146 = vmatpush.bf16.msrb.mxu0 %v7633_v6  ;;  %v3069_v24 = vadd.f32 %v10330_v46, %v11525_v40 }
 0x317   : > { %v891_v18 = vadd.f32 %v10354_v4, %v11522_v32  ;;  %v3798_v51 = vadd.f32 %v3762_v61, %v11523_v22  ;;  %v8622_v22 = vld [vmem:[#allocation3 + $0x7c] sm:$0xff]  }
 0x318   : > { %v3619_v2 = vpop.f32.mrf.mxu2  ;;  %v4161_v38 = vsel %vm4150_vm15, %v4158_v58, %v4160_v20 }
 0x319   : > { %v3691_v5 = vadd.f32 %v3619_v2, %v3306_v31  ;;  %4282 = vmatmul.bf16.gmra.mxu3 %v4161_v38  ;;  %v3870_v32 = vmul.f32 0.2, %v3798_v51  ;;  %v11527_v31 = vld [vmem:[#allocation41_spill] sm:$0xff]  ;;  %vm3834_vm10 = vcmp.ge.f32.partialorder %v3798_v51, 0.0  ;;  %v3508_v38 = vrot.slane %v10551_v15, 1 }
 0x31a   : > { %v3236_v30 = vpop.f32.mrf.mxu1 }
 0x31b   : > { %v10549_v28 = vadd.f32 %v3691_v5, %v891_v18  ;;  %v3307_v6 = vadd.f32 %v3236_v30, %v3069_v24  ;;  %v11528_v18 = vld [vmem:[#allocation16_spill] sm:$0xff]  ;;  %v3509_v30 = vsel %vm3476_vm8, %v3506_v48, %v3508_v38  ;;  %v11530_v24 = vld [vmem:[#allocation86_spill] sm:$0xff] }
 0x31c   : > { %v893_v5 = vadd.f32 %v10354_v4, %v11528_v18  ;;  %v11533_v18 = vld [vmem:[#allocation43_spill] sm:$0xff] }
 0x31d   : > { %11524 = vst [vmem:[#allocation35_spill] sm:$0xff] %v10549_v28  ;;  %v3763_v58 = vmul.f32 %v10549_v28, %v11526_v14  ;;  %v8634_v9 = vld [vmem:[#allocation3 + $0x24] sm:$0xff]   ;;  %v3906_v28 = vsel %vm3834_vm10, %v3798_v51, %v3870_v32 }
 0x31e   : > { %v10557_v50 = vpop.f32.mrf.mxu0  ;;  %4521 = vmatmul.bf16.gmra.mxu0 %v8634_v9  ;;  %v7550_v51 = vld [vmem:[%s11237_s1 + $0x240] sm:$0xff]  ;;  %v11531_v32 = vld [vmem:[#allocation42_spill] sm:$0xff] }
 0x31f   : > { %v3799_v2 = vadd.f32 %v3763_v58, %v11527_v31  ;;  %v3070_v58 = vadd.f32 %v10330_v46, %v11530_v24  ;;  %4884 = vmatpush.bf16.msrb.mxu1 %v7550_v51 }
 0x320   : > { %v3621_v61 = vpop.f32.mrf.mxu2 }
 0x321   : > { %vm3835_vm11 = vcmp.ge.f32.partialorder %v3799_v2, 0.0  ;;  %v3871_v40 = vmul.f32 0.2, %v3799_v2  ;;  %v3692_v63 = vadd.f32 %v3621_v61, %v3307_v6 }
 0x322   : > { %v3239_v11 = vpop.f32.mrf.mxu1 }
 0x323   : > { %v3907_v26 = vsel %vm3835_vm11, %v3799_v2, %v3871_v40  ;;  %v10563_v14 = vadd.f32 %v3692_v63, %v893_v5  ;;  %v3308_v2 = vadd.f32 %v3239_v11, %v3070_v58  ;;  %v10581_v40 = vld [vmem:[#allocation3 + $0x8c] sm:$0xff]  ;;  %v11536_v11 = vld [vmem:[#allocation44_spill] sm:$0xff] }
 0x324   : > { %v7903_v55 = vpack.c.bf16 %v3907_v26, %v3906_v28  ;;  %v11532_v28 = vld [vmem:[#allocation19_spill] sm:$0xff] }
 0x325   : > { %11529 = vst [vmem:[#allocation78_spill] sm:$0xff] %v10563_v14  ;;  %3278 = vmatmul.bf16.gmra.mxu1 %v8622_v22  ;;  %3663 = vmatmul.bf16.gmra.mxu2 %v3509_v30  ;;  %v3764_v63 = vmul.f32 %v10563_v14, %v11531_v32  ;;  %v896_v22 = vadd.f32 %v10354_v4, %v11532_v28  ;;  %v11535_v30 = vld [vmem:[#allocation90_spill] sm:$0xff]  ;;  %v11537_v28 = vld [vmem:[#allocation45_spill] sm:$0xff] }
 0x326   : > { %8414 = vst [vmem:[#allocation3 + $0x30] sm:$0xff] %v7903_v55   ;;  %v10568_v15 = vpop.f32.mrf.mxu0  ;;  %v4162_v9 = vrot.slane %v7903_v55, 2  ;;  %v3071_v24 = vadd.f32 %v10330_v46, %v11535_v30 }
 0x327   : > { %v3800_v55 = vadd.f32 %v3764_v63, %v11533_v18 }
 0x328   : > { %v3624_v26 = vpop.f32.mrf.mxu2  ;;  %v4163_v48 = vsel %vm4150_vm15, %v4160_v20, %v4162_v9 }
 0x329   : > { %v3693_v6 = vadd.f32 %v3624_v26, %v3308_v2  ;;  %4287 = vmatmul.bf16.gmra.mxu3 %v4163_v48  ;;  %v3872_v14 = vmul.f32 0.2, %v3800_v55  ;;  %vm3836_vm12 = vcmp.ge.f32.partialorder %v3800_v55, 0.0  ;;  %v3510_v48 = vrot.slane %v10581_v40, 1  ;;  %v3382_v40 = vld [vmem:[#allocation3 + $0x94] sm:$0x1] }
 0x32a   : > { %v3241_v61 = vpop.f32.mrf.mxu1 }
 0x32b   : > { %v10579_v5 = vadd.f32 %v3693_v6, %v896_v22  ;;  %v3309_v26 = vadd.f32 %v3241_v61, %v3071_v24  ;;  %v11538_v22 = vld [vmem:[#allocation22_spill] sm:$0xff]  ;;  %v3511_v61 = vsel %vm3476_vm8, %v3508_v38, %v3510_v48  ;;  %v3072_v24 = vadd.f32 %v10330_v46, %v10345_v8 }
 0x32c   : > { %v898_v6 = vadd.f32 %v10354_v4, %v11538_v22  ;;  %v11542_v22 = vld [vmem:[#allocation47_spill] sm:$0xff] }
 0x32d   : > { %11534 = vst [vmem:[#allocation10_spill] sm:$0xff] %v10579_v5  ;;  %v3765_v58 = vmul.f32 %v10579_v5, %v11536_v11  ;;  %v8636_v20 = vld [vmem:[#allocation3 + $0x2c] sm:$0xff]   ;;  %v3908_v5 = vsel %vm3836_vm12, %v3800_v55, %v3872_v14  ;;  %v7606_v14 = vld [vmem:[%s11237_s1 + $0x2e0] sm:$0xff] }
 0x32e   : > { %v10587_v51 = vpop.f32.mrf.mxu0  ;;  %4526 = vmatmul.bf16.gmra.mxu0 %v8636_v20  ;;  %v7580_v20 = vld [vmem:[%s11237_s1 + $0x2a0] sm:$0xff]  ;;  %5812 = vmatpush.bf16.msrb.mxu3 %v7606_v14 }
 0x32f   : > { %v3801_v2 = vadd.f32 %v3765_v58, %v11537_v28  ;;  %5476 = vmatpush.bf16.msrb.mxu2 %v7580_v20 }
 0x330   : > { %v3626_v63 = vpop.f32.mrf.mxu2 }
 0x331   : > { %vm3837_vm13 = vcmp.ge.f32.partialorder %v3801_v2, 0.0  ;;  %v3873_v30 = vmul.f32 0.2, %v3801_v2  ;;  %v3694_v18 = vadd.f32 %v3626_v63, %v3309_v26 }
 0x332   : > { %v3244_v32 = vpop.f32.mrf.mxu1 }
 0x333   : > { %v3909_v11 = vsel %vm3837_vm13, %v3801_v2, %v3873_v30  ;;  %v10593_v31 = vadd.f32 %v3694_v18, %v898_v6  ;;  %v11540_v18 = vld [vmem:[#allocation46_spill] sm:$0xff]  ;;  %v3310_v38 = vadd.f32 %v3244_v32, %v3072_v24  ;;  %v7632_v32 = vld [vmem:[%s11237_s1 + $0x320] sm:$0xff]  ;;  %v11544_v24 = vld [vmem:[#allocation48_spill] sm:$0xff] }
 0x334   : > { %v7908_v49 = vpack.c.bf16 %v3909_v11, %v3908_v5  ;;  %6147 = vmatpush.bf16.msrb.mxu0 %v7632_v32 }
 0x335   : > { %11539 = vst [vmem:[#allocation80_spill] sm:$0xff] %v10593_v31  ;;  %3283 = vmatmul.bf16.gmra.mxu1 %v8624_v52  ;;  %3668 = vmatmul.bf16.gmra.mxu2 %v3511_v61  ;;  %v3766_v55 = vmul.f32 %v10593_v31, %v11540_v18  ;;  %v3456_v52 = vunpack.c.l.b16 %v3382_v40  ;;  %v8625_v18 = vld [vmem:[#allocation3 + $0x8c] sm:$0xff] }
 0x336   : > { %8415 = vst [vmem:[#allocation3 + $0x38] sm:$0xff] %v7908_v49   ;;  %v4164_v58 = vrot.slane %v7908_v49, 2  ;;  %v10606_v11 = vpop.f32.mrf.mxu0  ;;  %v11541_v49 = vld [vmem:[#allocation25_spill] sm:$0xff] }
 0x337   : > { %v901_v2 = vadd.f32 %v10354_v4, %v11541_v49  ;;  %v3802_v6 = vadd.f32 %v3766_v55, %v11542_v22  ;;  %v3475_v61 = vpack.c.b16 %v3456_v52, %v3456_v52 }
 0x338   : > { %v3629_v5 = vpop.f32.mrf.mxu2  ;;  %v4165_v8 = vsel %vm4150_vm15, %v4162_v9, %v4164_v58  ;;  %v3073_v9 = vadd.f32 %v10330_v46, %v10365_v59 }
 0x339   : > { %v3695_v26 = vadd.f32 %v3629_v5, %v3310_v38  ;;  %4292 = vmatmul.bf16.gmra.mxu3 %v4165_v8  ;;  %v3874_v14 = vmul.f32 0.2, %v3802_v6  ;;  %v11545_v38 = vld [vmem:[#allocation49_spill] sm:$0xff]  ;;  %vm3838_vm3 = vcmp.ge.f32.partialorder %v3802_v6, 0.0  ;;  %v3512_v49 = vrot.slane %v3475_v61, 1 }
 0x33a   : > { %v3246_v63 = vpop.f32.mrf.mxu1  ;;  %v3074_v61 = vadd.f32 %v10330_v46, %v10374_v54  ;;  %v11550_v54 = vld [vmem:[#allocation51_spill] sm:$0xff] }
 0x33b   : > { %v10612_v30 = vadd.f32 %v3695_v26, %v901_v2  ;;  %v3311_v8 = vadd.f32 %v3246_v63, %v3073_v9  ;;  %v11546_v2 = vld [vmem:[#allocation28_spill] sm:$0xff]  ;;  %v3513_v63 = vsel %vm3476_vm8, %v3510_v48, %v3512_v49  ;;  %v7558_v49 = vld [vmem:[#allocation3 + $0x4] sm:$0xf0] }
 0x33c   : > { %v903_v26 = vadd.f32 %v10354_v4, %v11546_v2 }
 0x33d   : > { %11543 = vst [vmem:[#allocation13_spill] sm:$0xff] %v10612_v30  ;;  %v3767_v40 = vmul.f32 %v10612_v30, %v11544_v24  ;;  %v8638_v20 = vld [vmem:[#allocation3 + $0x34] sm:$0xff]   ;;  %v3910_v30 = vsel %vm3838_vm3, %v3802_v6, %v3874_v14 }
 0x33e   : > { %4531 = vmatmul.bf16.gmra.mxu0 %v8638_v20  ;;  %v10624_v22 = vpop.f32.mrf.mxu0  ;;  %v11548_v20 = vld [vmem:[#allocation50_spill] sm:$0xff] }
 0x33f   : > { %v3803_v5 = vadd.f32 %v3767_v40, %v11545_v38 }
 0x340   : > { %v3631_v55 = vpop.f32.mrf.mxu2 }
 0x341   : > { %vm3839_vm14 = vcmp.ge.f32.partialorder %v3803_v5, 0.0  ;;  %v3875_v52 = vmul.f32 0.2, %v3803_v5  ;;  %v3696_v31 = vadd.f32 %v3631_v55, %v3311_v8 }
 0x342   : > { %v3249_v59 = vpop.f32.mrf.mxu1 }
 0x343   : > { %v3911_v24 = vsel %vm3839_vm14, %v3803_v5, %v3875_v52  ;;  %v10626_v32 = vadd.f32 %v3696_v31, %v903_v26  ;;  %v3312_v55 = vadd.f32 %v3249_v59, %v3074_v61  ;;  %v11549_v31 = vld [vmem:[#allocation30_spill] sm:$0xff]  ;;  %v3075_v52 = vadd.f32 %v10330_v46, %v10398_v16  ;;  %v11552_v59 = vld [vmem:[#allocation52_spill] sm:$0xff] }
 0x344   : > { %v7913_v40 = vpack.c.bf16 %v3911_v24, %v3910_v30  ;;  %v906_v14 = vadd.f32 %v10354_v4, %v11549_v31  ;;  %v10641_v26 = vld [vmem:[#allocation3 + $0xc] sm:$0xff] }
 0x345   : > { %11547 = vst [vmem:[#allocation84_spill] sm:$0xff] %v10626_v32  ;;  %3288 = vmatmul.bf16.gmra.mxu1 %v8625_v18  ;;  %3673 = vmatmul.bf16.gmra.mxu2 %v3513_v63  ;;  %v3768_v8 = vmul.f32 %v10626_v32, %v11548_v20  ;;  %v7003_v63 = vld [vmem:[#allocation3 + $0x4] sm:$0xc] }
 0x346   : > { %8416 = vst [vmem:[#allocation3 + $0x40] sm:$0xff] %v7913_v40   ;;  %v4166_v9 = vrot.slane %v7913_v40, 2  ;;  %v7004_v61 = vor.u32 %v7558_v49, %v7003_v63 }
 0x347   : > { %v3804_v18 = vadd.f32 %v3768_v8, %v11550_v54 }
 0x348   : > { %v3634_v2 = vpop.f32.mrf.mxu2  ;;  %v4167_v6 = vsel %vm4150_vm15, %v4164_v58, %v4166_v9 }
 0x349   : > { %v3697_v30 = vadd.f32 %v3634_v2, %v3312_v55  ;;  %4297 = vmatmul.bf16.gmra.mxu3 %v4167_v6  ;;  %v3876_v55 = vmul.f32 0.2, %v3804_v18  ;;  %v11553_v2 = vld [vmem:[#allocation53_spill] sm:$0xff]  ;;  %vm3840_vm8 = vcmp.ge.f32.partialorder %v3804_v18, 0.0 }
 0x34a   : > { %v3251_v48 = vpop.f32.mrf.mxu1  ;;  %v10636_v24 = vpop.f32.mrf.mxu0 }
 0x34b   : > { %v10639_v5 = vadd.f32 %v3697_v30, %v906_v14  ;;  %v3313_v31 = vadd.f32 %v3251_v48, %v3075_v52  ;;  %v4775_v14 = vrot.slane %v10641_v26, 2  ;;  %v11554_v30 = vld [vmem:[#allocation32_spill] sm:$0xff]  ;;  %v3912_v49 = vsel %vm3840_vm8, %v3804_v18, %v3876_v55  ;;  %v11557_v18 = vld [vmem:[#allocation9_spill] sm:$0xff] }
 0x34c   : > { %v908_v32 = vadd.f32 %v10354_v4, %v11554_v30  ;;  %v3076_v26 = vadd.f32 %v10330_v46, %v10409_v41 }
 0x34d   : > { %11551 = vst [vmem:[#allocation16_spill] sm:$0xff] %v10639_v5  ;;  %v3769_v58 = vmul.f32 %v10639_v5, %v11552_v59  ;;  %v8640_v40 = vld [vmem:[#allocation3 + $0x3c] sm:$0xff]   ;;  %v4774_v5 = vrot.slane %v7004_v61, 2 }
 0x34e   : > { %4536 = vmatmul.bf16.gmra.mxu0 %v8640_v40  ;;  %v11556_v40 = vld [vmem:[#allocation54_spill] sm:$0xff] }
 0x34f   : > { %v3805_v6 = vadd.f32 %v3769_v58, %v11553_v2  ;;  %v4776_v52 = vsel %vm4150_vm15, %v4774_v5, %v4775_v14  ;;  %v10666_v5 = vld [vmem:[%s11238_s2 + $0x3] ss:$0 sm:$0xff]  ;;  %v11562_v2 = vld [vmem:[#allocation12_spill] sm:$0xff] }
 0x350   : > { %v3636_v8 = vpop.f32.mrf.mxu2 }
 0x351   : > { %vm3841_vm0 = vcmp.ge.f32.partialorder %v3805_v6, 0.0  ;;  %v3877_v16 = vmul.f32 0.2, %v3805_v6  ;;  %v3698_v54 = vadd.f32 %v3636_v8, %v3313_v31 }
 0x352   : > { %v3254_v20 = vpop.f32.mrf.mxu1  ;;  %v10651_v59 = vpop.f32.mrf.mxu0 }
 0x353   : > { %v3913_v63 = vsel %vm3841_vm0, %v3805_v6, %v3877_v16  ;;  %v10653_v38 = vadd.f32 %v3698_v54, %v908_v32  ;;  %v3314_v8 = vadd.f32 %v3254_v20, %v3076_v26  ;;  %v911_v32 = vadd.f32 %v10354_v4, %v11557_v18  ;;  %v11558_v6 = vld [vmem:[#allocation55_spill] sm:$0xff]  ;;  %v7605_v20 = vld [vmem:[%s11237_s1 + $0x2d8] sm:$0xff] }
 0x354   : > { %v7918_v48 = vpack.c.bf16 %v3913_v63, %v3912_v49  ;;  %v7631_v63 = vld [vmem:[%s11237_s1 + $0x318] sm:$0xff]  ;;  %v3077_v26 = vadd.f32 %v10330_v46, %v10428_v29  ;;  %5813 = vmatpush.bf16.msrb.mxu3 %v7605_v20 }
 0x355   : > { %11555 = vst [vmem:[#allocation86_spill] sm:$0xff] %v10653_v38  ;;  %4885 = vmatmul.bf16.vlgmr.msrb.gmra.mxu1 %v4776_v52  ;;  %v3770_v31 = vmul.f32 %v10653_v38, %v11556_v40  ;;  %v10680_v52 = vld [vmem:[#allocation3 + $0x14] sm:$0xff]  ;;  %6148 = vmatpush.bf16.msrb.mxu0 %v7631_v63 }
 0x356   : > { %8417 = vst [vmem:[#allocation3 + $0x48] sm:$0xff] %v7918_v48   ;;  %v4168_v58 = vrot.slane %v7918_v48, 2  ;;  %v4777_v29 = vrot.slane %v10680_v52, 2 }
 0x357   : > { %v3806_v16 = vadd.f32 %v3770_v31, %v11558_v6  ;;  %v11560_v31 = vld [vmem:[#allocation56_spill] sm:$0xff] }
 0x358   : > { %v3639_v61 = vpop.f32.mrf.mxu2  ;;  %v4169_v30 = vsel %vm4150_vm15, %v4166_v9, %v4168_v58  ;;  %v7579_v9 = vld [vmem:[%s11237_s1 + $0x298] sm:$0xff] }
 0x359   : > { %v3699_v54 = vadd.f32 %v3639_v61, %v3314_v8  ;;  %4302 = vmatmul.bf16.gmra.mxu3 %v4169_v30  ;;  %5477 = vmatpush.bf16.msrb.mxu2 %v7579_v9  ;;  %v3878_v18 = vmul.f32 0.2, %v3806_v16  ;;  %vm3842_vm2 = vcmp.ge.f32.partialorder %v3806_v16, 0.0 }
 0x35a   : > { %v3256_v41 = vpop.f32.mrf.mxu1  ;;  %v4502_v55 = vpop.f32.mrf.mxu0 }
 0x35b   : > { %v10669_v49 = vadd.f32 %v3699_v54, %v911_v32  ;;  %v11561_v32 = vld [vmem:[#allocation57_spill] sm:$0xff]  ;;  %v3315_v38 = vadd.f32 %v3256_v41, %v3077_v26  ;;  %v3914_v20 = vsel %vm3842_vm2, %v3806_v16, %v3878_v18  ;;  %v4778_v41 = vsel %vm4150_vm15, %v4775_v14, %v4777_v29  ;;  %v11565_v14 = vld [vmem:[#allocation15_spill] sm:$0xff] }
 0x35c   : > { %v4263_v48 = vpop.f32.mrf.mxu3  ;;  %v916_v18 = vadd.f32 %v10354_v4, %v11565_v14 }
 0x35d   : > { %11559 = vst [vmem:[#allocation19_spill] sm:$0xff] %v10669_v49  ;;  %v3771_v8 = vmul.f32 %v10669_v49, %v11560_v31  ;;  %v8642_v61 = vld [vmem:[#allocation3 + $0x44] sm:$0xff]   ;;  %v4354_v30 = vadd.f32 %v10666_v5, %v4263_v48  ;;  %v913_v49 = vadd.f32 %v10354_v4, %v11562_v2 }
 0x35e   : > { %4541 = vmatmul.bf16.gmra.mxu0 %v8642_v61  ;;  %v3078_v61 = vadd.f32 %v10330_v46, %v10439_v12  ;;  %v11566_v12 = vld [vmem:[#allocation59_spill] sm:$0xff] }
 0x35f   : > { %v3807_v54 = vadd.f32 %v3771_v8, %v11561_v32  ;;  %v10688_v6 = vadd.f32 %v4502_v55, %v4354_v30  ;;  %v11564_v30 = vld [vmem:[#allocation58_spill] sm:$0xff] }
 0x360   : > { %v3641_v40 = vpop.f32.mrf.mxu2 }
 0x361   : > { %vm3843_vm9 = vcmp.ge.f32.partialorder %v3807_v54, 0.0  ;;  %v3879_v31 = vmul.f32 0.2, %v3807_v54  ;;  %v3700_v48 = vadd.f32 %v3641_v40, %v3315_v38 }
 0x362   : > { %v3259_v9 = vpop.f32.mrf.mxu1  ;;  %v4504_v55 = vpop.f32.mrf.mxu0 }
 0x363   : > { %v3915_v63 = vsel %vm3843_vm9, %v3807_v54, %v3879_v31  ;;  %v10693_v28 = vadd.f32 %v3700_v48, %v913_v49  ;;  %v3316_v40 = vadd.f32 %v3259_v9, %v3078_v61  ;;  %v10714_v9 = vld [vmem:[%s11238_s2 + $0x2] ss:$0 sm:$0xff] }
 0x364   : > { %v7923_v8 = vpack.c.bf16 %v3915_v63, %v3914_v20  ;;  %v4265_v26 = vpop.f32.mrf.mxu3 }
 0x365   : > { %11563 = vst [vmem:[#allocation90_spill] sm:$0xff] %v10693_v28  ;;  %4890 = vmatmul.bf16.gmra.mxu1 %v4778_v41  ;;  %v4355_v52 = vadd.f32 %v10666_v5, %v4265_v26  ;;  %v3772_v38 = vmul.f32 %v10693_v28, %v11564_v30  ;;  %v10709_v41 = vld [vmem:[#allocation3 + $0x1c] sm:$0xff]  ;;  %v11570_v28 = vld [vmem:[#allocation18_spill] sm:$0xff] }
 0x366   : > { %8418 = vst [vmem:[#allocation3 + $0x50] sm:$0xff] %v7923_v8   ;;  %v4170_v2 = vrot.slane %v7923_v8, 2 }
 0x367   : > { %v10701_v16 = vadd.f32 %v4504_v55, %v4355_v52  ;;  %v3808_v48 = vadd.f32 %v3772_v38, %v11566_v12  ;;  %v11568_v55 = vld [vmem:[#allocation60_spill] sm:$0xff] }
 0x368   : > { %v3644_v49 = vpop.f32.mrf.mxu2  ;;  %v4171_v31 = vsel %vm4150_vm15, %v4168_v58, %v4170_v2  ;;  %v3079_v58 = vadd.f32 %v10714_v9, %v10461_v0  ;;  %v918_v0 = vadd.f32 %v10354_v4, %v11570_v28 }
 0x369   : > { %v3701_v54 = vadd.f32 %v3644_v49, %v3316_v40  ;;  %4307 = vmatmul.bf16.gmra.mxu3 %v4171_v31  ;;  %v3880_v38 = vmul.f32 0.2, %v3808_v48  ;;  %v11569_v40 = vld [vmem:[#allocation61_spill] sm:$0xff]  ;;  %vm3844_vm4 = vcmp.ge.f32.partialorder %v3808_v48, 0.0 }
 0x36a   : > { %v3261_v46 = vpop.f32.mrf.mxu1 }
 0x36b   : > { %v10707_v20 = vadd.f32 %v3701_v54, %v916_v18  ;;  %v4507_v63 = vpop.f32.mrf.mxu0  ;;  %v3317_v31 = vadd.f32 %v3261_v46, %v3079_v58  ;;  %v4779_v54 = vrot.slane %v10709_v41, 2  ;;  %v3916_v30 = vsel %vm3844_vm4, %v3808_v48, %v3880_v38  ;;  %v11572_v48 = vld [vmem:[#allocation62_spill] sm:$0xff] }
 0x36c   : > { %v4268_v8 = vpop.f32.mrf.mxu3  ;;  %v3080_v41 = vadd.f32 %v10714_v9, %v10472_v44  ;;  %v10745_v44 = vld [vmem:[%s11238_s2] ss:$0 sm:$0xff] }
 0x36d   : > { %11567 = vst [vmem:[#allocation22_spill] sm:$0xff] %v10707_v20  ;;  %v3773_v26 = vmul.f32 %v10707_v20, %v11568_v55  ;;  %v8644_v61 = vld [vmem:[#allocation3 + $0x4c] sm:$0xff]   ;;  %v4356_v52 = vadd.f32 %v10666_v5, %v4268_v8  ;;  %v4780_v46 = vsel %vm4150_vm15, %v4777_v29, %v4779_v54 }
 0x36e   : > { %4546 = vmatmul.bf16.gmra.mxu0 %v8644_v61 }
 0x36f   : > { %v3809_v49 = vadd.f32 %v3773_v26, %v11569_v40  ;;  %v10722_v14 = vadd.f32 %v4507_v63, %v4356_v52  ;;  %v11573_v52 = vld [vmem:[#allocation21_spill] sm:$0xff] }
 0x370   : > { %v3646_v18 = vpop.f32.mrf.mxu2  ;;  %v921_v38 = vadd.f32 %v10745_v44, %v11573_v52 }
 0x371   : > { %vm3845_vm5 = vcmp.ge.f32.partialorder %v3809_v49, 0.0  ;;  %v3881_v12 = vmul.f32 0.2, %v3809_v49  ;;  %v3702_v20 = vadd.f32 %v3646_v18, %v3317_v31  ;;  %v11574_v18 = vld [vmem:[#allocation63_spill] sm:$0xff] }
 0x372   : > { %v3264_v55 = vpop.f32.mrf.mxu1 }
 0x373   : > { %v3917_v8 = vsel %vm3845_vm5, %v3809_v49, %v3881_v12  ;;  %v10727_v32 = vadd.f32 %v3702_v20, %v918_v0  ;;  %v4509_v63 = vpop.f32.mrf.mxu0  ;;  %v3318_v20 = vadd.f32 %v3264_v55, %v3080_v41  ;;  %v7578_v55 = vld [vmem:[%s11237_s1 + $0x290] sm:$0xff]  ;;  %v11576_v41 = vld [vmem:[#allocation64_spill] sm:$0xff] }
 0x374   : > { %v10729_v26 = vpack.c.bf16 %v3917_v8, %v3916_v30  ;;  %v4270_v58 = vpop.f32.mrf.mxu3  ;;  %5478 = vmatpush.bf16.msrb.mxu2 %v7578_v55 }
 0x375   : > { %11571 = vst [vmem:[#allocation25_spill] sm:$0xff] %v10727_v32  ;;  %4895 = vmatmul.bf16.gmra.mxu1 %v4780_v46  ;;  %v4357_v4 = vadd.f32 %v10666_v5, %v4270_v58  ;;  %v3774_v12 = vmul.f32 %v10727_v32, %v11572_v48  ;;  %v3081_v58 = vadd.f32 %v10714_v9, %v10494_v34  ;;  %v11578_v34 = vld [vmem:[#allocation24_spill] sm:$0xff] }
 0x376   : > { %8419 = vst [vmem:[#allocation3 + $0x58] sm:$0xff] %v10729_v26   ;;  %v4172_v28 = vrot.slane %v10729_v26, 2  ;;  %v923_v48 = vadd.f32 %v10745_v44, %v11578_v34 }
 0x377   : > { %v10739_v30 = vadd.f32 %v4509_v63, %v4357_v4  ;;  %v3810_v0 = vadd.f32 %v3774_v12, %v11574_v18  ;;  %v10758_v63 = vld [vmem:[#allocation3 + $0x24] sm:$0xff] }
 0x378   : > { %v3649_v61 = vpop.f32.mrf.mxu2  ;;  %v4173_v29 = vsel %vm4150_vm15, %v4170_v2, %v4172_v28  ;;  %v7604_v2 = vld [vmem:[%s11237_s1 + $0x2d0] sm:$0xff]  ;;  %v4781_v18 = vrot.slane %v10758_v63, 2 }
 0x379   : > { %v3703_v49 = vadd.f32 %v3649_v61, %v3318_v20  ;;  %4312 = vmatmul.bf16.gmra.mxu3 %v4173_v29  ;;  %v3882_v61 = vmul.f32 0.2, %v3810_v0  ;;  %v11577_v29 = vld [vmem:[#allocation65_spill] sm:$0xff]  ;;  %vm3846_vm6 = vcmp.ge.f32.partialorder %v3810_v0, 0.0 }
 0x37a   : > { %v3266_v31 = vpop.f32.mrf.mxu1  ;;  %5814 = vmatpush.bf16.msrb.mxu3 %v7604_v2 }
 0x37b   : > { %v10750_v8 = vadd.f32 %v3703_v49, %v921_v38  ;;  %v4512_v26 = vpop.f32.mrf.mxu0  ;;  %v3319_v38 = vadd.f32 %v3266_v31, %v3081_v58  ;;  %v3918_v55 = vsel %vm3846_vm6, %v3810_v0, %v3882_v61  ;;  %v4782_v31 = vsel %vm4150_vm15, %v4779_v54, %v4781_v18  ;;  %v11580_v0 = vld [vmem:[#allocation66_spill] sm:$0xff] }
 0x37c   : > { %v4273_v46 = vpop.f32.mrf.mxu3 }
 0x37d   : > { %11575 = vst [vmem:[#allocation28_spill] sm:$0xff] %v10750_v8  ;;  %v3775_v4 = vmul.f32 %v10750_v8, %v11576_v41  ;;  %v8646_v12 = vld [vmem:[#allocation3 + $0x54] sm:$0xff]   ;;  %v4358_v20 = vadd.f32 %v10666_v5, %v4273_v46 }
 0x37e   : > { %4551 = vmatmul.bf16.gmra.mxu0 %v8646_v12  ;;  %v3082_v12 = vadd.f32 %v10714_v9, %v10505_v1  ;;  %v11581_v1 = vld [vmem:[#allocation27_spill] sm:$0xff] }
 0x37f   : > { %v3811_v52 = vadd.f32 %v3775_v4, %v11577_v29  ;;  %v10766_v49 = vadd.f32 %v4512_v26, %v4358_v20 }
 0x380   : > { %v3651_v32 = vpop.f32.mrf.mxu2 }
 0x381   : > { %vm3847_vm1 = vcmp.ge.f32.partialorder %v3811_v52, 0.0  ;;  %v3883_v8 = vmul.f32 0.2, %v3811_v52  ;;  %v3704_v41 = vadd.f32 %v3651_v32, %v3319_v38  ;;  %v7630_v32 = vld [vmem:[%s11237_s1 + $0x310] sm:$0xff] }
 0x382   : > { %v3269_v46 = vpop.f32.mrf.mxu1  ;;  %6149 = vmatpush.bf16.msrb.mxu0 %v7630_v32 }
 0x383   : > { %v3919_v2 = vsel %vm3847_vm1, %v3811_v52, %v3883_v8  ;;  %v10771_v40 = vadd.f32 %v3704_v41, %v923_v48  ;;  %v4514_v26 = vpop.f32.mrf.mxu0  ;;  %v3320_v8 = vadd.f32 %v3269_v46, %v3082_v12  ;;  %v926_v52 = vadd.f32 %v10745_v44, %v11581_v1 }
 0x384   : > { %v7933_v4 = vpack.c.bf16 %v3919_v2, %v3918_v55  ;;  %v4275_v58 = vpop.f32.mrf.mxu3  ;;  %v11582_v55 = vld [vmem:[#allocation67_spill] sm:$0xff]  ;;  %v3083_v46 = vadd.f32 %v10714_v9, %v10521_v19 }
 0x385   : > { %11579 = vst [vmem:[#allocation30_spill] sm:$0xff] %v10771_v40  ;;  %4900 = vmatmul.bf16.gmra.mxu1 %v4782_v31  ;;  %v4359_v63 = vadd.f32 %v10666_v5, %v4275_v58  ;;  %v3776_v48 = vmul.f32 %v10771_v40, %v11580_v0  ;;  %v10790_v40 = vld [vmem:[#allocation3 + $0x2c] sm:$0xff] }
 0x386   : > { %8420 = vst [vmem:[#allocation3 + $0x60] sm:$0xff] %v7933_v4   ;;  %v4174_v20 = vrot.slane %v7933_v4, 2 }
 0x387   : > { %v10782_v41 = vadd.f32 %v4514_v26, %v4359_v63  ;;  %v3812_v2 = vadd.f32 %v3776_v48, %v11582_v55  ;;  %v11584_v26 = vld [vmem:[#allocation68_spill] sm:$0xff] }
 0x388   : > { %v3654_v54 = vpop.f32.mrf.mxu2  ;;  %v4175_v61 = vsel %vm4150_vm15, %v4172_v28, %v4174_v20 }
 0x389   : > { %v3705_v38 = vadd.f32 %v3654_v54, %v3320_v8  ;;  %4317 = vmatmul.bf16.gmra.mxu3 %v4175_v61  ;;  %v3884_v32 = vmul.f32 0.2, %v3812_v2  ;;  %v11585_v8 = vld [vmem:[#allocation69_spill] sm:$0xff]  ;;  %vm3848_vm7 = vcmp.ge.f32.partialorder %v3812_v2, 0.0 }
 0x38a   : > { %v3271_v34 = vpop.f32.mrf.mxu1 }
 0x38b   : > { %v10788_v4 = vadd.f32 %v3705_v38, %v926_v52  ;;  %v4517_v31 = vpop.f32.mrf.mxu0  ;;  %v3321_v61 = vadd.f32 %v3271_v34, %v3083_v46  ;;  %v4783_v52 = vrot.slane %v10790_v40, 2  ;;  %v11586_v38 = vld [vmem:[#allocation29_spill] sm:$0xff]  ;;  %v3920_v0 = vsel %vm3848_vm7, %v3812_v2, %v3884_v32 }
 0x38c   : > { %v4278_v58 = vpop.f32.mrf.mxu3  ;;  %v928_v19 = vadd.f32 %v10745_v44, %v11586_v38  ;;  %v11588_v38 = vld [vmem:[#allocation70_spill] sm:$0xff] }
 0x38d   : > { %11583 = vst [vmem:[#allocation32_spill] sm:$0xff] %v10788_v4  ;;  %v3777_v28 = vmul.f32 %v10788_v4, %v11584_v26  ;;  %v8648_v12 = vld [vmem:[#allocation3 + $0x5c] sm:$0xff]   ;;  %v4360_v63 = vadd.f32 %v10666_v5, %v4278_v58  ;;  %v4784_v34 = vsel %vm4150_vm15, %v4781_v18, %v4783_v52  ;;  %v11589_v18 = vld [vmem:[#allocation31_spill] sm:$0xff] }
 0x38e   : > { %4556 = vmatmul.bf16.gmra.mxu0 %v8648_v12  ;;  %v3084_v12 = vadd.f32 %v10714_v9, %v10532_v3  ;;  %v931_v32 = vadd.f32 %v10745_v44, %v11589_v18 }
 0x38f   : > { %v3813_v54 = vadd.f32 %v3777_v28, %v11585_v8  ;;  %v10798_v48 = vadd.f32 %v4517_v31, %v4360_v63 }
 0x390   : > { %v3656_v1 = vpop.f32.mrf.mxu2 }
 0x391   : > { %vm3849_vm10 = vcmp.ge.f32.partialorder %v3813_v54, 0.0  ;;  %v3885_v55 = vmul.f32 0.2, %v3813_v54  ;;  %v3706_v4 = vadd.f32 %v3656_v1, %v3321_v61  ;;  %v11590_v1 = vld [vmem:[#allocation71_spill] sm:$0xff] }
 0x392   : > { %v3274_v26 = vpop.f32.mrf.mxu1 }
 0x393   : > { %v3921_v58 = vsel %vm3849_vm10, %v3813_v54, %v3885_v55  ;;  %v10803_v29 = vadd.f32 %v3706_v4, %v928_v19  ;;  %v4519_v31 = vpop.f32.mrf.mxu0  ;;  %v3322_v2 = vadd.f32 %v3274_v26, %v3084_v12  ;;  %v3085_v26 = vadd.f32 %v10714_v9, %v10557_v50 }
 0x394   : > { %v7938_v28 = vpack.c.bf16 %v3921_v58, %v3920_v0  ;;  %v4280_v46 = vpop.f32.mrf.mxu3 }
 0x395   : > { %11587 = vst [vmem:[#allocation9_spill] sm:$0xff] %v10803_v29  ;;  %4905 = vmatmul.bf16.gmra.mxu1 %v4784_v34  ;;  %v4361_v40 = vadd.f32 %v10666_v5, %v4280_v46  ;;  %v3778_v61 = vmul.f32 %v10803_v29, %v11588_v38  ;;  %v10819_v46 = vld [vmem:[#allocation3 + $0x34] sm:$0xff]  ;;  %v11594_v29 = vld [vmem:[#allocation33_spill] sm:$0xff] }
 0x396   : > { %8421 = vst [vmem:[#allocation3 + $0x68] sm:$0xff] %v7938_v28   ;;  %v4176_v63 = vrot.slane %v7938_v28, 2  ;;  %v933_v50 = vadd.f32 %v10745_v44, %v11594_v29 }
 0x397   : > { %v10811_v55 = vadd.f32 %v4519_v31, %v4361_v40  ;;  %v3814_v19 = vadd.f32 %v3778_v61, %v11590_v1  ;;  %v11592_v31 = vld [vmem:[#allocation72_spill] sm:$0xff] }
 0x398   : > { %v3659_v4 = vpop.f32.mrf.mxu2  ;;  %v4177_v0 = vsel %vm4150_vm15, %v4174_v20, %v4176_v63 }
 0x399   : > { %v3707_v54 = vadd.f32 %v3659_v4, %v3322_v2  ;;  %4322 = vmatmul.bf16.gmra.mxu3 %v4177_v0  ;;  %v3886_v2 = vmul.f32 0.2, %v3814_v19  ;;  %v11593_v4 = vld [vmem:[#allocation73_spill] sm:$0xff]  ;;  %vm3850_vm11 = vcmp.ge.f32.partialorder %v3814_v19, 0.0 }
 0x39a   : > { %v3276_v3 = vpop.f32.mrf.mxu1 }
 0x39b   : > { %v10817_v58 = vadd.f32 %v3707_v54, %v931_v32  ;;  %v4522_v28 = vpop.f32.mrf.mxu0  ;;  %v3323_v18 = vadd.f32 %v3276_v3, %v3085_v26  ;;  %v4785_v54 = vrot.slane %v10819_v46, 2  ;;  %v3922_v38 = vsel %vm3850_vm11, %v3814_v19, %v3886_v2 }
 0x39c   : > { %v4283_v34 = vpop.f32.mrf.mxu3  ;;  %v3086_v46 = vadd.f32 %v10714_v9, %v10568_v15  ;;  %v11596_v15 = vld [vmem:[#allocation74_spill] sm:$0xff] }
 0x39d   : > { %11591 = vst [vmem:[#allocation12_spill] sm:$0xff] %v10817_v58  ;;  %v3779_v20 = vmul.f32 %v10817_v58, %v11592_v31  ;;  %v8650_v12 = vld [vmem:[#allocation3 + $0x64] sm:$0xff]   ;;  %v4362_v40 = vadd.f32 %v10666_v5, %v4283_v34  ;;  %v4786_v3 = vsel %vm4150_vm15, %v4783_v52, %v4785_v54 }
 0x39e   : > { %4561 = vmatmul.bf16.gmra.mxu0 %v8650_v12  ;;  %v7603_v52 = vld [vmem:[%s11237_s1 + $0x2c8] sm:$0xff] }
 0x39f   : > { %v3815_v0 = vadd.f32 %v3779_v20, %v11593_v4  ;;  %v10827_v61 = vadd.f32 %v4522_v28, %v4362_v40  ;;  %5815 = vmatpush.bf16.msrb.mxu3 %v7603_v52 }
 0x3a0   : > { %v3661_v32 = vpop.f32.mrf.mxu2 }
 0x3a1   : > { %vm3851_vm12 = vcmp.ge.f32.partialorder %v3815_v0, 0.0  ;;  %v3887_v1 = vmul.f32 0.2, %v3815_v0  ;;  %v3708_v58 = vadd.f32 %v3661_v32, %v3323_v18  ;;  %v11597_v18 = vld [vmem:[#allocation11_spill] sm:$0xff] }
 0x3a2   : > { %v3279_v31 = vpop.f32.mrf.mxu1  ;;  %v936_v32 = vadd.f32 %v10745_v44, %v11597_v18 }
 0x3a3   : > { %v3923_v34 = vsel %vm3851_vm12, %v3815_v0, %v3887_v1  ;;  %v10832_v8 = vadd.f32 %v3708_v58, %v933_v50  ;;  %v4524_v28 = vpop.f32.mrf.mxu0  ;;  %v7577_v1 = vld [vmem:[%s11237_s1 + $0x288] sm:$0xff]  ;;  %v3324_v58 = vadd.f32 %v3279_v31, %v3086_v46  ;;  %v11600_v46 = vld [vmem:[#allocation76_spill] sm:$0xff] }
 0x3a4   : > { %v10834_v20 = vpack.c.bf16 %v3923_v34, %v3922_v38  ;;  %v4285_v26 = vpop.f32.mrf.mxu3  ;;  %v7629_v38 = vld [vmem:[%s11237_s1 + $0x308] sm:$0xff]  ;;  %5479 = vmatpush.bf16.msrb.mxu2 %v7577_v1 }
 0x3a5   : > { %11595 = vst [vmem:[#allocation15_spill] sm:$0xff] %v10832_v8  ;;  %4910 = vmatmul.bf16.gmra.mxu1 %v4786_v3  ;;  %v4363_v29 = vadd.f32 %v10666_v5, %v4285_v26  ;;  %v3780_v19 = vmul.f32 %v10832_v8, %v11596_v15  ;;  %6150 = vmatpush.bf16.msrb.mxu0 %v7629_v38  ;;  %v11601_v38 = vld [vmem:[#allocation77_spill] sm:$0xff] }
 0x3a6   : > { %8422 = vst [vmem:[#allocation3 + $0x70] sm:$0xff] %v10834_v20   ;;  %v4178_v12 = vrot.slane %v10834_v20, 2  ;;  %v11598_v20 = vld [vmem:[#allocation75_spill] sm:$0xff] }
 0x3a7   : > { %v10853_v40 = vadd.f32 %v4524_v28, %v4363_v29  ;;  %v3816_v3 = vadd.f32 %v3780_v19, %v11598_v20  ;;  %v10861_v28 = vld [vmem:[#allocation3 + $0x3c] sm:$0xff] }
 0x3a8   : > { %v3664_v2 = vpop.f32.mrf.mxu2  ;;  %v4179_v0 = vsel %vm4150_vm15, %v4176_v63, %v4178_v12  ;;  %v3087_v63 = vadd.f32 %v10714_v9, %v10587_v51 }
 0x3a9   : > { %v3709_v50 = vadd.f32 %v3664_v2, %v3324_v58  ;;  %4327 = vmatmul.bf16.gmra.mxu3 %v4179_v0  ;;  %v3888_v58 = vmul.f32 0.2, %v3816_v3  ;;  %vm3852_vm13 = vcmp.ge.f32.partialorder %v3816_v3, 0.0 }
 0x3aa   : > { %v3281_v34 = vpop.f32.mrf.mxu1 }
 0x3ab   : > { %v10859_v26 = vadd.f32 %v3709_v50, %v936_v32  ;;  %v4527_v8 = vpop.f32.mrf.mxu0  ;;  %v3325_v0 = vadd.f32 %v3281_v34, %v3087_v63  ;;  %v4787_v32 = vrot.slane %v10861_v28, 2  ;;  %v11602_v50 = vld [vmem:[#allocation14_spill] sm:$0xff]  ;;  %v3924_v15 = vsel %vm3852_vm13, %v3816_v3, %v3888_v58 }
 0x3ac   : > { %v4288_v31 = vpop.f32.mrf.mxu3  ;;  %v938_v51 = vadd.f32 %v10745_v44, %v11602_v50  ;;  %v11604_v50 = vld [vmem:[#allocation79_spill] sm:$0xff] }
 0x3ad   : > { %11599 = vst [vmem:[#allocation18_spill] sm:$0xff] %v10859_v26  ;;  %v3781_v29 = vmul.f32 %v10859_v26, %v11600_v46  ;;  %v8652_v1 = vld [vmem:[#allocation3 + $0x6c] sm:$0xff]   ;;  %v4364_v52 = vadd.f32 %v10666_v5, %v4288_v31  ;;  %v4788_v34 = vsel %vm4150_vm15, %v4785_v54, %v4787_v32  ;;  %v11605_v54 = vld [vmem:[#allocation17_spill] sm:$0xff] }
 0x3ae   : > { %4566 = vmatmul.bf16.gmra.mxu0 %v8652_v1  ;;  %v3088_v1 = vadd.f32 %v10714_v9, %v10606_v11  ;;  %v941_v58 = vadd.f32 %v10745_v44, %v11605_v54 }
 0x3af   : > { %v3817_v2 = vadd.f32 %v3781_v29, %v11601_v38  ;;  %v10869_v19 = vadd.f32 %v4527_v8, %v4364_v52 }
 0x3b0   : > { %v3666_v18 = vpop.f32.mrf.mxu2 }
 0x3b1   : > { %vm3853_vm3 = vcmp.ge.f32.partialorder %v3817_v2, 0.0  ;;  %v3889_v20 = vmul.f32 0.2, %v3817_v2  ;;  %v3710_v26 = vadd.f32 %v3666_v18, %v3325_v0  ;;  %v11606_v18 = vld [vmem:[#allocation81_spill] sm:$0xff] }
 0x3b2   : > { %v3284_v46 = vpop.f32.mrf.mxu1 }
 0x3b3   : > { %v3925_v31 = vsel %vm3853_vm3, %v3817_v2, %v3889_v20  ;;  %v10874_v4 = vadd.f32 %v3710_v26, %v938_v51  ;;  %v4529_v8 = vpop.f32.mrf.mxu0  ;;  %v3326_v3 = vadd.f32 %v3284_v46, %v3088_v1  ;;  %v3089_v46 = vadd.f32 %v10714_v9, %v10624_v22 }
 0x3b4   : > { %v7948_v29 = vpack.c.bf16 %v3925_v31, %v3924_v15  ;;  %v4290_v63 = vpop.f32.mrf.mxu3 }
 0x3b5   : > { %11603 = vst [vmem:[#allocation21_spill] sm:$0xff] %v10874_v4  ;;  %4915 = vmatmul.bf16.gmra.mxu1 %v4788_v34  ;;  %v4365_v28 = vadd.f32 %v10666_v5, %v4290_v63  ;;  %v3782_v0 = vmul.f32 %v10874_v4, %v11604_v50  ;;  %v10890_v63 = vld [vmem:[#allocation3 + $0x44] sm:$0xff]  ;;  %v11610_v4 = vld [vmem:[#allocation20_spill] sm:$0xff] }
 0x3b6   : > { %8423 = vst [vmem:[#allocation3 + $0x78] sm:$0xff] %v7948_v29   ;;  %v4180_v52 = vrot.slane %v7948_v29, 2  ;;  %v943_v22 = vadd.f32 %v10745_v44, %v11610_v4 }
 0x3b7   : > { %v10882_v20 = vadd.f32 %v4529_v8, %v4365_v28  ;;  %v3818_v51 = vadd.f32 %v3782_v0, %v11606_v18  ;;  %v11608_v8 = vld [vmem:[#allocation82_spill] sm:$0xff] }
 0x3b8   : > { %v3669_v26 = vpop.f32.mrf.mxu2  ;;  %v4181_v15 = vsel %vm4150_vm15, %v4178_v12, %v4180_v52 }
 0x3b9   : > { %v3711_v2 = vadd.f32 %v3669_v26, %v3326_v3  ;;  %4332 = vmatmul.bf16.gmra.mxu3 %v4181_v15  ;;  %v3890_v3 = vmul.f32 0.2, %v3818_v51  ;;  %v11609_v26 = vld [vmem:[#allocation83_spill] sm:$0xff]  ;;  %vm3854_vm14 = vcmp.ge.f32.partialorder %v3818_v51, 0.0 }
 0x3ba   : > { %v3286_v11 = vpop.f32.mrf.mxu1 }
 0x3bb   : > { %v10888_v31 = vadd.f32 %v3711_v2, %v941_v58  ;;  %v4532_v29 = vpop.f32.mrf.mxu0  ;;  %v3327_v54 = vadd.f32 %v3286_v11, %v3089_v46  ;;  %v4789_v2 = vrot.slane %v10890_v63, 2  ;;  %v3926_v50 = vsel %vm3854_vm14, %v3818_v51, %v3890_v3  ;;  %v7576_v11 = vld [vmem:[%s11237_s1 + $0x280] sm:$0xff] }
 0x3bc   : > { %v4293_v34 = vpop.f32.mrf.mxu3  ;;  %v3090_v51 = vadd.f32 %v10714_v9, %v10636_v24  ;;  %5480 = vmatpush.bf16.msrb.mxu2 %v7576_v11 }
 0x3bd   : > { %11607 = vst [vmem:[#allocation24_spill] sm:$0xff] %v10888_v31  ;;  %v3783_v12 = vmul.f32 %v10888_v31, %v11608_v8  ;;  %v8654_v1 = vld [vmem:[#allocation3 + $0x74] sm:$0xff]   ;;  %v4366_v28 = vadd.f32 %v10666_v5, %v4293_v34  ;;  %v4790_v4 = vsel %vm4150_vm15, %v4787_v32, %v4789_v2 }
 0x3be   : > { %4571 = vmatmul.bf16.gmra.mxu0 %v8654_v1  ;;  %v11612_v1 = vld [vmem:[#allocation85_spill] sm:$0xff] }
 0x3bf   : > { %v3819_v15 = vadd.f32 %v3783_v12, %v11609_v26  ;;  %v10898_v0 = vadd.f32 %v4532_v29, %v4366_v28  ;;  %v7602_v29 = vld [vmem:[%s11237_s1 + $0x2c0] sm:$0xff] }
 0x3c0   : > { %v3671_v58 = vpop.f32.mrf.mxu2  ;;  %5816 = vmatpush.bf16.msrb.mxu3 %v7602_v29 }
 0x3c1   : > { %vm3855_vm8 = vcmp.ge.f32.partialorder %v3819_v15, 0.0  ;;  %v3891_v18 = vmul.f32 0.2, %v3819_v15  ;;  %v3712_v31 = vadd.f32 %v3671_v58, %v3327_v54  ;;  %v11613_v54 = vld [vmem:[#allocation23_spill] sm:$0xff] }
 0x3c2   : > { %v3289_v8 = vpop.f32.mrf.mxu1  ;;  %v946_v24 = vadd.f32 %v10745_v44, %v11613_v54 }
 0x3c3   : > { %v3927_v34 = vsel %vm3855_vm8, %v3819_v15, %v3891_v18  ;;  %v10903_v38 = vadd.f32 %v3712_v31, %v943_v22  ;;  %v4534_v46 = vpop.f32.mrf.mxu0  ;;  %v3328_v28 = vadd.f32 %v3289_v8, %v3090_v51  ;;  %v3091_v8 = vadd.f32 %v10714_v9, %v10651_v59  ;;  %v11617_v9 = vld [vmem:[#allocation26_spill] sm:$0xff] }
 0x3c4   : > { %v10911_v63 = vpack.c.bf16 %v3927_v34, %v3926_v50  ;;  %v4295_v12 = vpop.f32.mrf.mxu3  ;;  %v11614_v34 = vld [vmem:[#allocation87_spill] sm:$0xff] }
 0x3c5   : > { %11611 = vst [vmem:[#allocation27_spill] sm:$0xff] %v10903_v38  ;;  %4920 = vmatmul.bf16.gmra.mxu1 %v4790_v4  ;;  %v4367_v18 = vadd.f32 %v10666_v5, %v4295_v12  ;;  %v3784_v50 = vmul.f32 %v10903_v38, %v11612_v1  ;;  %v10927_v12 = vld [vmem:[#allocation3 + $0x4c] sm:$0xff] }
 0x3c6   : > { %8424 = vst [vmem:[#allocation3 + $0x80] sm:$0xff] %v10911_v63   ;;  %v4182_v31 = vrot.slane %v10911_v63, 2  ;;  %v4791_v59 = vrot.slane %v10927_v12, 2 }
 0x3c7   : > { %v10921_v3 = vadd.f32 %v4534_v46, %v4367_v18  ;;  %v3820_v11 = vadd.f32 %v3784_v50, %v11614_v34  ;;  %v11615_v46 = vld [vmem:[#allocation88_spill] sm:$0xff] }
 0x3c8   : > { %v3674_v32 = vpop.f32.mrf.mxu2  ;;  %v4183_v15 = vsel %vm4150_vm15, %v4180_v52, %v4182_v31 }
 0x3c9   : > { %v3713_v58 = vadd.f32 %v3674_v32, %v3328_v28  ;;  %4337 = vmatmul.bf16.gmra.mxu3 %v4183_v15  ;;  %v7628_v28 = vld [vmem:[%s11237_s1 + $0x300] sm:$0xff]  ;;  %v3892_v32 = vmul.f32 0.2, %v3820_v11  ;;  %vm3856_vm0 = vcmp.ge.f32.partialorder %v3820_v11, 0.0 }
 0x3ca   : > { %v3291_v22 = vpop.f32.mrf.mxu1  ;;  %v11616_v15 = vld [vmem:[#allocation89_spill] sm:$0xff]  ;;  %6151 = vmatpush.bf16.msrb.mxu0 %v7628_v28 }
 0x3cb   : > { %v3749_v4 = vadd.f32 %v3713_v58, %v946_v24  ;;  %v4537_v63 = vpop.f32.mrf.mxu0  ;;  %v3329_v54 = vadd.f32 %v3291_v22, %v3091_v8  ;;  %v3928_v34 = vsel %vm3856_vm0, %v3820_v11, %v3892_v32 }
 0x3cc   : > { %v4298_v29 = vpop.f32.mrf.mxu3 }
 0x3cd   : > { %v3785_v51 = vmul.f32 %v3749_v4, %v11615_v46  ;;  %v8656_v18 = vld [vmem:[#allocation3 + $0x7c] sm:$0xff]   ;;  %v4368_v52 = vadd.f32 %v10666_v5, %v4298_v29  ;;  %v948_v4 = vadd.f32 %v10745_v44, %v11617_v9 }
 0x3ce   : > { %4576 = vmatmul.bf16.gmra.mxu0 %v8656_v18 }
 0x3cf   : > { %v3821_v50 = vadd.f32 %v3785_v51, %v11616_v15  ;;  %v10937_v24 = vadd.f32 %v4537_v63, %v4368_v52  ;;  %v4792_v63 = vsel %vm4150_vm15, %v4789_v2, %v4791_v59 }
 0x3d0   : > { %v3676_v58 = vpop.f32.mrf.mxu2 }
 0x3d1   : > { %vm3857_vm2 = vcmp.ge.f32.partialorder %v3821_v50, 0.0  ;;  %v3893_v29 = vmul.f32 0.2, %v3821_v50  ;;  %v3714_v38 = vadd.f32 %v3676_v58, %v3329_v54 }
 0x3d2   : > { %v4886_v46 = vpop.f32.mrf.mxu1 }
 0x3d3   : > { %v3929_v1 = vsel %vm3857_vm2, %v3821_v50, %v3893_v29  ;;  %v3750_v26 = vadd.f32 %v3714_v38, %v948_v4  ;;  %v4976_v22 = vadd.f32 %v4886_v46, %v10688_v6  ;;  %v4539_v51 = vpop.f32.mrf.mxu0  ;;  %v7568_v4 = vld [vmem:[#allocation3 + $0x54] sm:$0xff] }
 0x3d4   : > { %v10943_v8 = vpack.c.bf16 %v3929_v1, %v3928_v34  ;;  %v4300_v18 = vpop.f32.mrf.mxu3 }
 0x3d5   : > { %v3786_v12 = vmul.f32 %v3750_v26, %v10332_v37  ;;  %v5012_v52 = vmul.f32 %v4976_v22, %v9490_v27  ;;  %4925 = vmatmul.bf16.gmra.mxu1 %v4792_v63  ;;  %v4369_v44 = vadd.f32 %v10666_v5, %v4300_v18 }
 0x3d6   : > { %8425 = vst [vmem:[#allocation3 + $0x88] sm:$0xff] %v10943_v8   ;;  %v4184_v11 = vrot.slane %v10943_v8, 2  ;;  %v4793_v8 = vrot.slane %v7568_v4, 2  ;;  %v7569_v4 = vld [vmem:[#allocation3 + $0x5c] sm:$0xff] }
 0x3d7   : > { %v3822_v38 = vadd.f32 %v3786_v12, %v10334_v42  ;;  %v5048_v6 = vadd.f32 %v5012_v52, %v9492_v43  ;;  %v10953_v1 = vadd.f32 %v4539_v51, %v4369_v44 }
 0x3d8   : > { %v4185_v2 = vsel %vm4150_vm15, %v4182_v31, %v4184_v11  ;;  %v4794_v18 = vsel %vm4150_vm15, %v4791_v59, %v4793_v8 }
 0x3d9   : > { %vm3858_vm9 = vcmp.ge.f32.partialorder %v3822_v38, 0.0  ;;  %v3894_v34 = vmul.f32 0.2, %v3822_v38  ;;  %vm5084_vm4 = vcmp.ge.f32.partialorder %v5048_v6, 0.0  ;;  %v5120_v26 = vmul.f32 0.2, %v5048_v6  ;;  %4342 = vmatmul.bf16.gmra.mxu3 %v4185_v2 }
 0x3da   : > { %v4888_v27 = vpop.f32.mrf.mxu1 }
 0x3db   : > { %v3930_v46 = vsel %vm3858_vm9, %v3822_v38, %v3894_v34  ;;  %v5156_v28 = vsel %vm5084_vm4, %v5048_v6, %v5120_v26  ;;  %v4977_v32 = vadd.f32 %v4888_v27, %v10701_v16  ;;  %v4542_v58 = vpop.f32.mrf.mxu0 }
 0x3dc   : > { %v3966_v50 = vpack.c.bf16 %v3930_v46, %v3930_v46  ;;  %v5192_v54 = vpack.c.bf16 %v5156_v28, %v5156_v28  ;;  %v4303_v9 = vpop.f32.mrf.mxu3 }
 0x3dd   : > { %v8658_v43 = vld [vmem:[#allocation3 + $0x84] sm:$0xff]   ;;  %v4370_v29 = vadd.f32 %v10666_v5, %v4303_v9  ;;  %v5013_v31 = vmul.f32 %v4977_v32, %v9513_v39 }
 0x3de   : > { %4002 = vst [vmem:[#allocation3 + $0x90] sm:$0xf] %v3966_v50  ;;  %4581 = vmatmul.bf16.gmra.mxu0 %v8658_v43 }
 0x3df   : > { %5228 = vst [vmem:[#allocation3 + $0x4] sm:$0xf] %v5192_v54  ;;  %v10959_v22 = vadd.f32 %v4542_v58, %v4370_v29  ;;  %v5049_v51 = vadd.f32 %v5013_v31, %v9528_v33 }
 0x3e1   : > { %v5121_v34 = vmul.f32 0.2, %v5049_v51  ;;  %vm5085_vm5 = vcmp.ge.f32.partialorder %v5049_v51, 0.0 }
 0x3e2   : > { %v4891_v63 = vpop.f32.mrf.mxu1 }
 0x3e3   : > { %v4978_v16 = vadd.f32 %v4891_v63, %v10722_v14  ;;  %v4544_v12 = vpop.f32.mrf.mxu0  ;;  %v5157_v28 = vsel %vm5085_vm5, %v5049_v51, %v5121_v34  ;;  %v4795_v63 = vrot.slane %v7569_v4, 2 }
 0x3e4   : > { %v4305_v52 = vpop.f32.mrf.mxu3 }
 0x3e5   : > { %v5014_v44 = vmul.f32 %v4978_v16, %v9535_v13  ;;  %4930 = vmatmul.bf16.gmra.mxu1 %v4794_v18  ;;  %v4371_v38 = vadd.f32 %v10666_v5, %v4305_v52  ;;  %v4056_v6 = vld [vmem:[#allocation3 + $0x90] sm:$0x3] }
 0x3e6   : > { %v7584_v39 = vld [vmem:[#allocation3] sm:$0xff]  ;;  %v4130_v2 = vunpack.c.l.b16 %v4056_v6 }
 0x3e7   : > { %v5050_v26 = vadd.f32 %v5014_v44, %v9538_v23  ;;  %v10967_v27 = vadd.f32 %v4544_v12, %v4371_v38  ;;  %5481 = vmatmul.bf16.vlgmr.msrb.gmra.mxu2 %v7584_v39  ;;  %v8659_v23 = vld [vmem:[#allocation3 + $0x8c] sm:$0xff] }
 0x3e8   : > { %v4149_v33 = vpack.c.b16 %v4130_v2, %v4130_v2 }
 0x3e9   : > { %vm5086_vm6 = vcmp.ge.f32.partialorder %v5050_v26, 0.0  ;;  %v5122_v14 = vmul.f32 0.2, %v5050_v26 }
 0x3ea   : > { %v4893_v59 = vpop.f32.mrf.mxu1  ;;  %v4186_v46 = vrot.slane %v4149_v33, 2 }
 0x3eb   : > { %v5158_v13 = vsel %vm5086_vm6, %v5050_v26, %v5122_v14  ;;  %v4979_v32 = vadd.f32 %v4893_v59, %v10739_v30  ;;  %v4547_v54 = vpop.f32.mrf.mxu0  ;;  %v7570_v59 = vld [vmem:[#allocation3 + $0x64] sm:$0xff] }
 0x3ec   : > { %v8031_v50 = vpack.c.bf16 %v5158_v13, %v5157_v28  ;;  %v4187_v58 = vsel %vm4150_vm15, %v4184_v11, %v4186_v46  ;;  %v4308_v9 = vpop.f32.mrf.mxu3  ;;  %v4796_v11 = vsel %vm4150_vm15, %v4793_v8, %v4795_v63 }
 0x3ed   : > { %4347 = vmatmul.bf16.gmra.mxu3 %v4187_v58  ;;  %v4372_v43 = vadd.f32 %v10666_v5, %v4308_v9  ;;  %v5015_v29 = vmul.f32 %v4979_v32, %v9560_v45  ;;  %v4797_v32 = vrot.slane %v7570_v59, 2 }
 0x3ee   : > { %8528 = vst [vmem:[#allocation3 + $0x8] sm:$0xff] %v8031_v50   ;;  %4586 = vmatmul.bf16.gmra.mxu0 %v8659_v23 }
 0x3ef   : > { %v10973_v31 = vadd.f32 %v4547_v54, %v4372_v43  ;;  %v5051_v30 = vadd.f32 %v5015_v29, %v9558_v35  ;;  %v4798_v58 = vsel %vm4150_vm15, %v4795_v63, %v4797_v32 }
 0x3f1   : > { %v5123_v45 = vmul.f32 0.2, %v5051_v30  ;;  %vm5087_vm1 = vcmp.ge.f32.partialorder %v5051_v30, 0.0 }
 0x3f2   : > { %v4896_v51 = vpop.f32.mrf.mxu1 }
 0x3f3   : > { %v4980_v16 = vadd.f32 %v4896_v51, %v10766_v49  ;;  %v4549_v18 = vpop.f32.mrf.mxu0  ;;  %v5159_v2 = vsel %vm5087_vm1, %v5051_v30, %v5123_v45 }
 0x3f4   : > { %v4310_v12 = vpop.f32.mrf.mxu3 }
 0x3f5   : > { %v5016_v52 = vmul.f32 %v4980_v16, %v9597_v57  ;;  %4935 = vmatmul.bf16.gmra.mxu1 %v4796_v11  ;;  %v7585_v44 = vld [vmem:[#allocation3 + $0x8] sm:$0xff]  ;;  %v4373_v38 = vadd.f32 %v10666_v5, %v4310_v12 }
 0x3f6   : > { %v7610_v26 = vld [vmem:[#allocation3 + $0x4] sm:$0xff] }
 0x3f7   : > { %v5052_v6 = vadd.f32 %v5016_v52, %v9600_v10  ;;  %v10981_v39 = vadd.f32 %v4549_v18, %v4373_v38  ;;  %5484 = vmatmul.bf16.gmra.mxu2 %v7585_v44  ;;  %v7636_v46 = vld [vmem:[#allocation3 + $0x8] sm:$0xff] }
 0x3f8   : > { %v7571_v44 = vld [vmem:[#allocation3 + $0x6c] sm:$0xff] }
 0x3f9   : > { %vm5088_vm7 = vcmp.ge.f32.partialorder %v5052_v6, 0.0  ;;  %v5124_v35 = vmul.f32 0.2, %v5052_v6 }
 0x3fa   : > { %v4898_v49 = vpop.f32.mrf.mxu1 }
 0x3fb   : > { %v5160_v8 = vsel %vm5088_vm7, %v5052_v6, %v5124_v35  ;;  %v4981_v34 = vadd.f32 %v4898_v49, %v10782_v41  ;;  %v4552_v33 = vpop.f32.mrf.mxu0  ;;  %v4799_v35 = vrot.slane %v7571_v44, 2 }
 0x3fc   : > { %v8036_v57 = vpack.c.bf16 %v5160_v8, %v5159_v2  ;;  %v4313_v14 = vpop.f32.mrf.mxu3 }
 0x3fd   : > { %5817 = vmatmul.bf16.vlgmr.msrb.gmra.mxu3 %v7610_v26  ;;  %v4374_v10 = vadd.f32 %v10666_v5, %v4313_v14  ;;  %v5017_v28 = vmul.f32 %v4981_v34, %v9617_v62  ;;  %v4800_v8 = vsel %vm4150_vm15, %v4797_v32, %v4799_v35 }
 0x3fe   : > { %8529 = vst [vmem:[#allocation3 + $0x10] sm:$0xff] %v8036_v57   ;;  %6152 = vmatmul.bf16.vlgmr.msrb.gmra.mxu0 %v7636_v46 }
 0x3ff   : > { %v10986_v13 = vadd.f32 %v4552_v33, %v4374_v10  ;;  %v5053_v54 = vadd.f32 %v5017_v28, %v9645_v60 }
 0x401   : > { %v5125_v62 = vmul.f32 0.2, %v5053_v54  ;;  %vm5089_vm10 = vcmp.ge.f32.partialorder %v5053_v54, 0.0 }
 0x402   : > { %v4901_v50 = vpop.f32.mrf.mxu1 }
 0x403   : > { %v4982_v41 = vadd.f32 %v4901_v50, %v10798_v48  ;;  %v4554_v9 = vpop.f32.mrf.mxu0  ;;  %v5161_v16 = vsel %vm5089_vm10, %v5053_v54, %v5125_v62 }
 0x404   : > { %v4315_v4 = vpop.f32.mrf.mxu3 }
 0x405   : > { %v5018_v23 = vmul.f32 %v4982_v41, %v9656_v25  ;;  %4940 = vmatmul.bf16.gmra.mxu1 %v4798_v58  ;;  %v7586_v43 = vld [vmem:[#allocation3 + $0x10] sm:$0xff]  ;;  %v4375_v29 = vadd.f32 %v10666_v5, %v4315_v4 }
 0x406   : > { %v7611_v18 = vld [vmem:[#allocation3 + $0xc] sm:$0xff]  ;;  %v7572_v58 = vld [vmem:[#allocation3 + $0x74] sm:$0xff] }
 0x407   : > { %v5054_v51 = vadd.f32 %v5018_v23, %v9659_v21  ;;  %v10994_v30 = vadd.f32 %v4554_v9, %v4375_v29  ;;  %5489 = vmatmul.bf16.gmra.mxu2 %v7586_v43  ;;  %v7637_v38 = vld [vmem:[#allocation3 + $0x10] sm:$0xff] }
 0x409   : > { %vm5090_vm11 = vcmp.ge.f32.partialorder %v5054_v51, 0.0  ;;  %v5126_v60 = vmul.f32 0.2, %v5054_v51 }
 0x40a   : > { %v4903_v48 = vpop.f32.mrf.mxu1 }
 0x40b   : > { %v5162_v63 = vsel %vm5090_vm11, %v5054_v51, %v5126_v60  ;;  %v4983_v11 = vadd.f32 %v4903_v48, %v10811_v55  ;;  %v4557_v12 = vpop.f32.mrf.mxu0 }
 0x40c   : > { %v8041_v25 = vpack.c.bf16 %v5162_v63, %v5161_v16  ;;  %v4318_v52 = vpop.f32.mrf.mxu3  ;;  %v11618_v16 = vld [vmem:[#allocation36_spill] sm:$0xff] }
 0x40d   : > { %5820 = vmatmul.bf16.gmra.mxu3 %v7611_v18  ;;  %v4376_v21 = vadd.f32 %v10666_v5, %v4318_v52  ;;  %v5019_v45 = vmul.f32 %v4983_v11, %v9681_v47 }
 0x40e   : > { %8530 = vst [vmem:[#allocation3 + $0x18] sm:$0xff] %v8041_v25   ;;  %6155 = vmatmul.bf16.gmra.mxu0 %v7637_v38  ;;  %v11619_v25 = vld [vmem:[#allocation37_spill] sm:$0xff] }
 0x40f   : > { %v10999_v6 = vadd.f32 %v4557_v12, %v4376_v21  ;;  %v5055_v2 = vadd.f32 %v5019_v45, %v9694_v56 }
 0x411   : > { %v5127_v47 = vmul.f32 0.2, %v5055_v2  ;;  %vm5091_vm12 = vcmp.ge.f32.partialorder %v5055_v2, 0.0 }
 0x412   : > { %v4906_v49 = vpop.f32.mrf.mxu1 }
 0x413   : > { %v4984_v55 = vadd.f32 %v4906_v49, %v10827_v61  ;;  %v4559_v34 = vpop.f32.mrf.mxu0  ;;  %v5163_v10 = vsel %vm5091_vm12, %v5055_v2, %v5127_v47 }
 0x414   : > { %v4320_v26 = vpop.f32.mrf.mxu3 }
 0x415   : > { %v5020_v57 = vmul.f32 %v4984_v55, %v9729_v53  ;;  %4945 = vmatmul.bf16.gmra.mxu1 %v4800_v8  ;;  %v7587_v33 = vld [vmem:[#allocation3 + $0x18] sm:$0xff]  ;;  %v4377_v14 = vadd.f32 %v10666_v5, %v4320_v26  ;;  %v11620_v26 = vld [vmem:[#allocation38_spill] sm:$0xff] }
 0x416   : > { %v7612_v50 = vld [vmem:[#allocation3 + $0x14] sm:$0xff]  ;;  %v7573_v55 = vld [vmem:[#allocation3 + $0x7c] sm:$0xff] }
 0x417   : > { %v5056_v59 = vadd.f32 %v5020_v57, %v9737_v17  ;;  %v11007_v46 = vadd.f32 %v4559_v34, %v4377_v14  ;;  %5494 = vmatmul.bf16.gmra.mxu2 %v7587_v33  ;;  %v7638_v5 = vld [vmem:[#allocation3 + $0x18] sm:$0xff]  ;;  %v11013_v17 = vld [vmem:[%s11238_s2 + $0x3] ss:$0 sm:$0xff]  ;;  %v4803_v14 = vrot.slane %v7573_v55, 2 }
 0x419   : > { %vm5092_vm13 = vcmp.ge.f32.partialorder %v5056_v59, 0.0  ;;  %v5128_v56 = vmul.f32 0.2, %v5056_v59 }
 0x41a   : > { %v4908_v61 = vpop.f32.mrf.mxu1 }
 0x41b   : > { %v5164_v28 = vsel %vm5092_vm13, %v5056_v59, %v5128_v56  ;;  %v4985_v32 = vadd.f32 %v4908_v61, %v10853_v40  ;;  %v4562_v54 = vpop.f32.mrf.mxu0  ;;  %v4801_v40 = vrot.slane %v7572_v58, 2  ;;  %v11621_v59 = vld [vmem:[#allocation39_spill] sm:$0xff]  ;;  %v11623_v58 = vld [vmem:[#allocation41_spill] sm:$0xff] }
 0x41c   : > { %v8046_v53 = vpack.c.bf16 %v5164_v28, %v5163_v10  ;;  %v4323_v41 = vpop.f32.mrf.mxu3 }
 0x41d   : > { %5825 = vmatmul.bf16.gmra.mxu3 %v7612_v50  ;;  %v4378_v9 = vadd.f32 %v11013_v17, %v4323_v41  ;;  %v5021_v4 = vmul.f32 %v4985_v32, %v11511_v36  ;;  %v4802_v51 = vsel %vm4150_vm15, %v4799_v35, %v4801_v40  ;;  %v4804_v61 = vsel %vm4150_vm15, %v4801_v40, %v4803_v14  ;;  %v11622_v32 = vld [vmem:[#allocation40_spill] sm:$0xff] }
 0x41e   : > { %8531 = vst [vmem:[#allocation3 + $0x20] sm:$0xff] %v8046_v53   ;;  %6160 = vmatmul.bf16.gmra.mxu0 %v7638_v5 }
 0x41f   : > { %v11017_v23 = vadd.f32 %v4562_v54, %v4378_v9  ;;  %v5057_v29 = vadd.f32 %v5021_v4, %v11513_v7 }
 0x421   : > { %v5129_v36 = vmul.f32 0.2, %v5057_v29  ;;  %vm5093_vm3 = vcmp.ge.f32.partialorder %v5057_v29, 0.0 }
 0x422   : > { %v4911_v43 = vpop.f32.mrf.mxu1 }
 0x423   : > { %v4986_v62 = vadd.f32 %v4911_v43, %v10869_v19  ;;  %v4564_v60 = vpop.f32.mrf.mxu0  ;;  %v5165_v44 = vsel %vm5093_vm3, %v5057_v29, %v5129_v36 }
 0x424   : > { %v4325_v48 = vpop.f32.mrf.mxu3 }
 0x425   : > { %v5022_v63 = vmul.f32 %v4986_v62, %v11618_v16  ;;  %4950 = vmatmul.bf16.gmra.mxu1 %v4802_v51  ;;  %v7588_v11 = vld [vmem:[#allocation3 + $0x20] sm:$0xff]  ;;  %v4379_v18 = vadd.f32 %v11013_v17, %v4325_v48 }
 0x426   : > { %v7613_v45 = vld [vmem:[#allocation3 + $0x1c] sm:$0xff]  ;;  %v7574_v16 = vld [vmem:[#allocation3 + $0x84] sm:$0xff] }
 0x427   : > { %v5058_v12 = vadd.f32 %v5022_v63, %v11619_v25  ;;  %v11025_v52 = vadd.f32 %v4564_v60, %v4379_v18  ;;  %5499 = vmatmul.bf16.gmra.mxu2 %v7588_v11  ;;  %v7639_v8 = vld [vmem:[#allocation3 + $0x20] sm:$0xff]  ;;  %v11624_v18 = vld [vmem:[#allocation42_spill] sm:$0xff] }
 0x429   : > { %vm5094_vm14 = vcmp.ge.f32.partialorder %v5058_v12, 0.0  ;;  %v5130_v7 = vmul.f32 0.2, %v5058_v12 }
 0x42a   : > { %v4913_v19 = vpop.f32.mrf.mxu1 }
 0x42b   : > { %v5166_v38 = vsel %vm5094_vm14, %v5058_v12, %v5130_v7  ;;  %v4987_v21 = vadd.f32 %v4913_v19, %v10882_v20  ;;  %v4567_v49 = vpop.f32.mrf.mxu0  ;;  %v4805_v12 = vrot.slane %v7574_v16, 2  ;;  %v11625_v19 = vld [vmem:[#allocation43_spill] sm:$0xff] }
 0x42c   : > { %v8051_v35 = vpack.c.bf16 %v5166_v38, %v5165_v44  ;;  %v4328_v2 = vpop.f32.mrf.mxu3 }
 0x42d   : > { %5830 = vmatmul.bf16.gmra.mxu3 %v7613_v45  ;;  %v4380_v34 = vadd.f32 %v11013_v17, %v4328_v2  ;;  %v5023_v57 = vmul.f32 %v4987_v21, %v11620_v26  ;;  %v4806_v38 = vsel %vm4150_vm15, %v4803_v14, %v4805_v12 }
 0x42e   : > { %8532 = vst [vmem:[#allocation3 + $0x28] sm:$0xff] %v8051_v35   ;;  %6165 = vmatmul.bf16.gmra.mxu0 %v7639_v8  ;;  %v11626_v35 = vld [vmem:[#allocation44_spill] sm:$0xff] }
 0x42f   : > { %v11030_v33 = vadd.f32 %v4567_v49, %v4380_v34  ;;  %v5059_v56 = vadd.f32 %v5023_v57, %v11621_v59  ;;  %v11627_v34 = vld [vmem:[#allocation45_spill] sm:$0xff] }
 0x431   : > { %v5131_v41 = vmul.f32 0.2, %v5059_v56  ;;  %vm5095_vm8 = vcmp.ge.f32.partialorder %v5059_v56, 0.0 }
 0x432   : > { %v4916_v47 = vpop.f32.mrf.mxu1 }
 0x433   : > { %v4988_v20 = vadd.f32 %v4916_v47, %v10898_v0  ;;  %v4569_v10 = vpop.f32.mrf.mxu0  ;;  %v5167_v43 = vsel %vm5095_vm8, %v5059_v56, %v5131_v41 }
 0x434   : > { %v4330_v28 = vpop.f32.mrf.mxu3 }
 0x435   : > { %v5024_v50 = vmul.f32 %v4988_v20, %v11622_v32  ;;  %4955 = vmatmul.bf16.gmra.mxu1 %v4804_v61  ;;  %v7589_v53 = vld [vmem:[#allocation3 + $0x28] sm:$0xff]  ;;  %v4381_v54 = vadd.f32 %v11013_v17, %v4330_v28 }
 0x436   : > { %v7614_v62 = vld [vmem:[#allocation3 + $0x24] sm:$0xff]  ;;  %v7575_v32 = vld [vmem:[#allocation3 + $0x8c] sm:$0xff] }
 0x437   : > { %v5060_v5 = vadd.f32 %v5024_v50, %v11623_v58  ;;  %v11038_v9 = vadd.f32 %v4569_v10, %v4381_v54  ;;  %5504 = vmatmul.bf16.gmra.mxu2 %v7589_v53  ;;  %v7640_v63 = vld [vmem:[#allocation3 + $0x28] sm:$0xff] }
 0x438   : > { %v11628_v54 = vld [vmem:[#allocation46_spill] sm:$0xff] }
 0x439   : > { %vm5096_vm0 = vcmp.ge.f32.partialorder %v5060_v5, 0.0  ;;  %v5132_v4 = vmul.f32 0.2, %v5060_v5 }
 0x43a   : > { %v4918_v0 = vpop.f32.mrf.mxu1 }
 0x43b   : > { %v5168_v40 = vsel %vm5096_vm0, %v5060_v5, %v5132_v4  ;;  %v4989_v29 = vadd.f32 %v4918_v0, %v10921_v3  ;;  %v4572_v60 = vpop.f32.mrf.mxu0  ;;  %v4807_v5 = vrot.slane %v7575_v32, 2  ;;  %v11629_v0 = vld [vmem:[#allocation47_spill] sm:$0xff] }
 0x43c   : > { %v8056_v51 = vpack.c.bf16 %v5168_v40, %v5167_v43  ;;  %v4333_v48 = vpop.f32.mrf.mxu3 }
 0x43d   : > { %5835 = vmatmul.bf16.gmra.mxu3 %v7614_v62  ;;  %v4382_v11 = vadd.f32 %v11013_v17, %v4333_v48  ;;  %v5025_v36 = vmul.f32 %v4989_v29, %v11624_v18  ;;  %v4808_v40 = vsel %vm4150_vm15, %v4805_v12, %v4807_v5  ;;  %v11631_v18 = vld [vmem:[#allocation49_spill] sm:$0xff] }
 0x43e   : > { %8533 = vst [vmem:[#allocation3 + $0x30] sm:$0xff] %v8056_v51   ;;  %6170 = vmatmul.bf16.gmra.mxu0 %v7640_v63  ;;  %v11630_v51 = vld [vmem:[#allocation48_spill] sm:$0xff]  ;;  %v4680_v63 = vld [vmem:[#allocation3 + $0x94] sm:$0x3] }
 0x43f   : > { %v11043_v25 = vadd.f32 %v4572_v60, %v4382_v11  ;;  %v5061_v44 = vadd.f32 %v5025_v36, %v11625_v19  ;;  %v4754_v19 = vunpack.c.l.b16 %v4680_v63 }
 0x441   : > { %v5133_v8 = vmul.f32 0.2, %v5061_v44  ;;  %vm5097_vm2 = vcmp.ge.f32.partialorder %v5061_v44, 0.0 }
 0x442   : > { %v4921_v7 = vpop.f32.mrf.mxu1 }
 0x443   : > { %v4990_v3 = vadd.f32 %v4921_v7, %v10937_v24  ;;  %v4574_v21 = vpop.f32.mrf.mxu0  ;;  %v5169_v59 = vsel %vm5097_vm2, %v5061_v44, %v5133_v8 }
 0x444   : > { %v4335_v45 = vpop.f32.mrf.mxu3 }
 0x445   : > { %v5026_v49 = vmul.f32 %v4990_v3, %v11626_v35  ;;  %4960 = vmatmul.bf16.gmra.mxu1 %v4806_v38  ;;  %v7590_v2 = vld [vmem:[#allocation3 + $0x30] sm:$0xff]  ;;  %v4383_v55 = vadd.f32 %v11013_v17, %v4335_v45 }
 0x446   : > { %v7615_v20 = vld [vmem:[#allocation3 + $0x2c] sm:$0xff] }
 0x447   : > { %v5062_v26 = vadd.f32 %v5026_v49, %v11627_v34  ;;  %v11051_v57 = vadd.f32 %v4574_v21, %v4383_v55  ;;  %5509 = vmatmul.bf16.gmra.mxu2 %v7590_v2  ;;  %v7641_v50 = vld [vmem:[#allocation3 + $0x30] sm:$0xff]  ;;  %v4773_v2 = vpack.c.b16 %v4754_v19, %v4754_v19  ;;  %v11632_v34 = vld [vmem:[#allocation50_spill] sm:$0xff] }
 0x448   : > { %v11637_v19 = vld [vmem:[#allocation55_spill] sm:$0xff] }
 0x449   : > { %vm5098_vm9 = vcmp.ge.f32.partialorder %v5062_v26, 0.0  ;;  %v5134_v47 = vmul.f32 0.2, %v5062_v26 }
 0x44a   : > { %v4923_v24 = vpop.f32.mrf.mxu1 }
 0x44b   : > { %v5170_v14 = vsel %vm5098_vm9, %v5062_v26, %v5134_v47  ;;  %v4991_v56 = vadd.f32 %v4923_v24, %v10953_v1  ;;  %v4577_v10 = vpop.f32.mrf.mxu0  ;;  %v4809_v24 = vrot.slane %v4773_v2, 2 }
 0x44c   : > { %v8061_v61 = vpack.c.bf16 %v5170_v14, %v5169_v59  ;;  %v4338_v28 = vpop.f32.mrf.mxu3  ;;  %v11633_v14 = vld [vmem:[#allocation51_spill] sm:$0xff] }
 0x44d   : > { %5840 = vmatmul.bf16.gmra.mxu3 %v7615_v20  ;;  %v4384_v53 = vadd.f32 %v11013_v17, %v4338_v28  ;;  %v5027_v41 = vmul.f32 %v4991_v56, %v11628_v54  ;;  %v4810_v20 = vsel %vm4150_vm15, %v4807_v5, %v4809_v24  ;;  %v11634_v28 = vld [vmem:[#allocation52_spill] sm:$0xff] }
 0x44e   : > { %8534 = vst [vmem:[#allocation3 + $0x38] sm:$0xff] %v8061_v61   ;;  %6175 = vmatmul.bf16.gmra.mxu0 %v7641_v50 }
 0x44f   : > { %v11056_v58 = vadd.f32 %v4577_v10, %v4384_v53  ;;  %v5063_v43 = vadd.f32 %v5027_v41, %v11629_v0  ;;  %v11635_v41 = vld [vmem:[#allocation53_spill] sm:$0xff] }
 0x451   : > { %v5135_v11 = vmul.f32 0.2, %v5063_v43  ;;  %vm5099_vm4 = vcmp.ge.f32.partialorder %v5063_v43, 0.0 }
 0x452   : > { %v4926_v4 = vpop.f32.mrf.mxu1 }
 0x453   : > { %v4992_v1 = vadd.f32 %v4926_v4, %v10959_v22  ;;  %v4579_v29 = vpop.f32.mrf.mxu0  ;;  %v5171_v44 = vsel %vm5099_vm4, %v5063_v43, %v5135_v11 }
 0x454   : > { %v4340_v62 = vpop.f32.mrf.mxu3 }
 0x455   : > { %v5028_v60 = vmul.f32 %v4992_v1, %v11630_v51  ;;  %4965 = vmatmul.bf16.gmra.mxu1 %v4808_v40  ;;  %v7591_v48 = vld [vmem:[#allocation3 + $0x38] sm:$0xff]  ;;  %v4385_v16 = vadd.f32 %v11013_v17, %v4340_v62 }
 0x456   : > { %v7616_v21 = vld [vmem:[#allocation3 + $0x34] sm:$0xff] }
 0x457   : > { %v5064_v36 = vadd.f32 %v5028_v60, %v11631_v18  ;;  %v11064_v7 = vadd.f32 %v4579_v29, %v4385_v16  ;;  %5514 = vmatmul.bf16.gmra.mxu2 %v7591_v48  ;;  %v7642_v55 = vld [vmem:[#allocation3 + $0x38] sm:$0xff]  ;;  %v11636_v16 = vld [vmem:[#allocation54_spill] sm:$0xff] }
 0x459   : > { %vm5100_vm5 = vcmp.ge.f32.partialorder %v5064_v36, 0.0  ;;  %v5136_v22 = vmul.f32 0.2, %v5064_v36 }
 0x45a   : > { %v4928_v12 = vpop.f32.mrf.mxu1 }
 0x45b   : > { %v5172_v3 = vsel %vm5100_vm5, %v5064_v36, %v5136_v22  ;;  %v4993_v38 = vadd.f32 %v4928_v12, %v10967_v27  ;;  %v4582_v35 = vpop.f32.mrf.mxu0 }
 0x45c   : > { %v8066_v45 = vpack.c.bf16 %v5172_v3, %v5171_v44  ;;  %v4343_v49 = vpop.f32.mrf.mxu3 }
 0x45d   : > { %5845 = vmatmul.bf16.gmra.mxu3 %v7616_v21  ;;  %v4386_v8 = vadd.f32 %v11013_v17, %v4343_v49  ;;  %v5029_v26 = vmul.f32 %v4993_v38, %v11632_v34  ;;  %v11638_v38 = vld [vmem:[#allocation56_spill] sm:$0xff]  ;;  %v11639_v49 = vld [vmem:[#allocation57_spill] sm:$0xff] }
 0x45e   : > { %8535 = vst [vmem:[#allocation3 + $0x40] sm:$0xff] %v8066_v45   ;;  %6180 = vmatmul.bf16.gmra.mxu0 %v7642_v55 }
 0x45f   : > { %v11069_v47 = vadd.f32 %v4582_v35, %v4386_v8  ;;  %v5065_v56 = vadd.f32 %v5029_v26, %v11633_v14 }
 0x461   : > { %v5137_v54 = vmul.f32 0.2, %v5065_v56  ;;  %vm5101_vm6 = vcmp.ge.f32.partialorder %v5065_v56, 0.0 }
 0x462   : > { %v4931_v59 = vpop.f32.mrf.mxu1 }
 0x463   : > { %v4994_v27 = vadd.f32 %v4931_v59, %v10973_v31  ;;  %v4584_v61 = vpop.f32.mrf.mxu0  ;;  %v5173_v1 = vsel %vm5101_vm6, %v5065_v56, %v5137_v54 }
 0x464   : > { %v4345_v10 = vpop.f32.mrf.mxu3 }
 0x465   : > { %v5030_v32 = vmul.f32 %v4994_v27, %v11634_v28  ;;  %4970 = vmatmul.bf16.gmra.mxu1 %v4810_v20  ;;  %v7592_v50 = vld [vmem:[#allocation3 + $0x40] sm:$0xff]  ;;  %v4387_v53 = vadd.f32 %v11013_v17, %v4345_v10  ;;  %v11640_v28 = vld [vmem:[#allocation58_spill] sm:$0xff] }
 0x466   : > { %v7617_v62 = vld [vmem:[#allocation3 + $0x3c] sm:$0xff] }
 0x467   : > { %v5066_v4 = vadd.f32 %v5030_v32, %v11635_v41  ;;  %v11077_v0 = vadd.f32 %v4584_v61, %v4387_v53  ;;  %5519 = vmatmul.bf16.gmra.mxu2 %v7592_v50  ;;  %v7643_v48 = vld [vmem:[#allocation3 + $0x40] sm:$0xff] }
 0x469   : > { %vm5102_vm1 = vcmp.ge.f32.partialorder %v5066_v4, 0.0  ;;  %v5138_v43 = vmul.f32 0.2, %v5066_v4 }
 0x46a   : > { %v4933_v31 = vpop.f32.mrf.mxu1  ;;  %v5482_v29 = vpop.f32.mrf.mxu2 }
 0x46b   : > { %v5174_v5 = vsel %vm5102_vm1, %v5066_v4, %v5138_v43  ;;  %v4995_v40 = vadd.f32 %v4933_v31, %v10981_v39  ;;  %v4587_v60 = vpop.f32.mrf.mxu0  ;;  %v11642_v43 = vld [vmem:[#allocation60_spill] sm:$0xff] }
 0x46c   : > { %v8071_v51 = vpack.c.bf16 %v5174_v5, %v5173_v1 }
 0x46d   : > { %5850 = vmatmul.bf16.gmra.mxu3 %v7617_v62  ;;  %v5031_v63 = vmul.f32 %v4995_v40, %v11636_v16  ;;  %v11643_v40 = vld [vmem:[#allocation61_spill] sm:$0xff] }
 0x46e   : > { %8536 = vst [vmem:[#allocation3 + $0x48] sm:$0xff] %v8071_v51   ;;  %6185 = vmatmul.bf16.gmra.mxu0 %v7643_v48 }
 0x46f   : > { %v5067_v22 = vadd.f32 %v5031_v63, %v11637_v19 }
 0x470   : > { %v4348_v11 = vpop.f32.mrf.mxu3 }
 0x471   : > { %v4388_v18 = vadd.f32 %v11013_v17, %v4348_v11  ;;  %v5139_v35 = vmul.f32 0.2, %v5067_v22  ;;  %vm5103_vm15 = vcmp.ge.f32.partialorder %v5067_v22, 0.0 }
 0x472   : > { %v4936_v36 = vpop.f32.mrf.mxu1  ;;  %v5483_v44 = vpop.f32.mrf.mxu2 }
 0x473   : > { %v4996_v12 = vadd.f32 %v4936_v36, %v10986_v13  ;;  %v11084_v39 = vadd.f32 %v4587_v60, %v4388_v18  ;;  %v4589_v3 = vpop.f32.mrf.mxu0  ;;  %v5175_v24 = vsel %vm5103_vm15, %v5067_v22, %v5139_v35  ;;  %v11101_v22 = vld [vmem:[%s11238_s2 + $0x4] ss:$0 sm:$0xff] }
 0x475   : > { %v5032_v21 = vmul.f32 %v4996_v12, %v11638_v38  ;;  %v7593_v45 = vld [vmem:[#allocation3 + $0x48] sm:$0xff] }
 0x476   : > { %v7618_v56 = vld [vmem:[#allocation3 + $0x44] sm:$0xff] }
 0x477   : > { %v5068_v2 = vadd.f32 %v5032_v21, %v11639_v49  ;;  %5524 = vmatmul.bf16.gmra.mxu2 %v7593_v45  ;;  %v7644_v10 = vld [vmem:[#allocation3 + $0x48] sm:$0xff] }
 0x478   : > { %v4350_v55 = vpop.f32.mrf.mxu3  ;;  %v11644_v12 = vld [vmem:[#allocation62_spill] sm:$0xff] }
 0x479   : > { %vm5104_vm7 = vcmp.ge.f32.partialorder %v5068_v2, 0.0  ;;  %v5140_v8 = vmul.f32 0.2, %v5068_v2  ;;  %v4389_v34 = vadd.f32 %v11013_v17, %v4350_v55  ;;  %v11641_v17 = vld [vmem:[#allocation59_spill] sm:$0xff]  ;;  %v11646_v55 = vld [vmem:[#allocation64_spill] sm:$0xff] }
 0x47a   : > { %v4938_v26 = vpop.f32.mrf.mxu1  ;;  %v5485_v14 = vpop.f32.mrf.mxu2 }
 0x47b   : > { %v5176_v13 = vsel %vm5104_vm7, %v5068_v2, %v5140_v8  ;;  %v4997_v59 = vadd.f32 %v4938_v26, %v10994_v30  ;;  %v11090_v27 = vadd.f32 %v4589_v3, %v4389_v34  ;;  %v6153_v61 = vpop.f32.mrf.mxu0  ;;  %v5569_v21 = vadd.f32 %v11101_v22, %v5485_v14 }
 0x47c   : > { %v8076_v20 = vpack.c.bf16 %v5176_v13, %v5175_v24 }
 0x47d   : > { %5855 = vmatmul.bf16.gmra.mxu3 %v7618_v56  ;;  %v5033_v32 = vmul.f32 %v4997_v59, %v11640_v28  ;;  %v11647_v59 = vld [vmem:[#allocation65_spill] sm:$0xff] }
 0x47e   : > { %8537 = vst [vmem:[#allocation3 + $0x50] sm:$0xff] %v8076_v20   ;;  %6190 = vmatmul.bf16.gmra.mxu0 %v7644_v10 }
 0x47f   : > { %v5069_v54 = vadd.f32 %v5033_v32, %v11641_v17 }
 0x480   : > { %v5818_v50 = vpop.f32.mrf.mxu3 }
 0x481   : > { %v5141_v5 = vmul.f32 0.2, %v5069_v54  ;;  %vm5105_vm10 = vcmp.ge.f32.partialorder %v5069_v54, 0.0 }
 0x482   : > { %v4941_v53 = vpop.f32.mrf.mxu1  ;;  %v5487_v4 = vpop.f32.mrf.mxu2 }
 0x483   : > { %v4998_v41 = vadd.f32 %v4941_v53, %v10999_v6  ;;  %v6154_v30 = vpop.f32.mrf.mxu0  ;;  %v5177_v48 = vsel %vm5105_vm10, %v5069_v54, %v5141_v5  ;;  %v5570_v24 = vadd.f32 %v11101_v22, %v5487_v4 }
 0x484   : > { %v11648_v30 = vld [vmem:[#allocation91_spill] sm:$0xff] }
 0x485   : > { %v5034_v31 = vmul.f32 %v4998_v41, %v11642_v43  ;;  %v7594_v1 = vld [vmem:[#allocation3 + $0x50] sm:$0xff] }
 0x486   : > { %v7619_v6 = vld [vmem:[#allocation3 + $0x4c] sm:$0xff] }
 0x487   : > { %v5070_v29 = vadd.f32 %v5034_v31, %v11643_v40  ;;  %5529 = vmatmul.bf16.gmra.mxu2 %v7594_v1  ;;  %v7645_v19 = vld [vmem:[#allocation3 + $0x50] sm:$0xff]  ;;  %v11649_v31 = vld [vmem:[#allocation92_spill] sm:$0xff]  ;;  %v11650_v40 = vld [vmem:[#allocation66_spill] sm:$0xff] }
 0x488   : > { %v5819_v62 = vpop.f32.mrf.mxu3 }
 0x489   : > { %vm5106_vm11 = vcmp.ge.f32.partialorder %v5070_v29, 0.0  ;;  %v5142_v51 = vmul.f32 0.2, %v5070_v29 }
 0x48a   : > { %v4943_v60 = vpop.f32.mrf.mxu1  ;;  %v5490_v11 = vpop.f32.mrf.mxu2 }
 0x48b   : > { %v5178_v16 = vsel %vm5106_vm11, %v5070_v29, %v5142_v51  ;;  %v4999_v63 = vadd.f32 %v4943_v60, %v11007_v46  ;;  %v6156_v36 = vpop.f32.mrf.mxu0  ;;  %v11645_v46 = vld [vmem:[#allocation63_spill] sm:$0xff] }
 0x48c   : > { %v8081_v18 = vpack.c.bf16 %v5178_v16, %v5177_v48  ;;  %v11651_v48 = vld [vmem:[#allocation67_spill] sm:$0xff] }
 0x48d   : > { %5860 = vmatmul.bf16.gmra.mxu3 %v7619_v6  ;;  %v5035_v44 = vmul.f32 %v4999_v63, %v11644_v12 }
 0x48e   : > { %8538 = vst [vmem:[#allocation3 + $0x58] sm:$0xff] %v8081_v18   ;;  %6195 = vmatmul.bf16.gmra.mxu0 %v7645_v19 }
 0x48f   : > { %v5071_v45 = vadd.f32 %v5035_v44, %v11645_v46 }
 0x490   : > { %v5821_v3 = vpop.f32.mrf.mxu3 }
 0x491   : > { %v5904_v34 = vadd.f32 %v5821_v3, %v5569_v21  ;;  %v5143_v13 = vmul.f32 0.2, %v5071_v45  ;;  %vm5107_vm12 = vcmp.ge.f32.partialorder %v5071_v45, 0.0  ;;  %v11653_v21 = vld [vmem:[#allocation69_spill] sm:$0xff] }
 0x492   : > { %v4946_v38 = vpop.f32.mrf.mxu1  ;;  %v5492_v49 = vpop.f32.mrf.mxu2 }
 0x493   : > { %v5000_v35 = vadd.f32 %v4946_v38, %v11017_v23  ;;  %v6158_v2 = vpop.f32.mrf.mxu0  ;;  %v6239_v61 = vadd.f32 %v6156_v36, %v5904_v34  ;;  %v5179_v23 = vsel %vm5107_vm12, %v5071_v45, %v5143_v13  ;;  %v11652_v36 = vld [vmem:[#allocation68_spill] sm:$0xff]  ;;  %v5572_v3 = vadd.f32 %v11101_v22, %v5492_v49 }
 0x495   : > { %v5036_v8 = vmul.f32 %v5000_v35, %v11646_v55  ;;  %v7595_v26 = vld [vmem:[#allocation3 + $0x58] sm:$0xff]  ;;  %v6271_v43 = vadd.f32 %v6239_v61, %v11648_v30 }
 0x496   : > { %v7620_v54 = vld [vmem:[#allocation3 + $0x54] sm:$0xff] }
 0x497   : > { %v5072_v56 = vadd.f32 %v5036_v8, %v11647_v59  ;;  %5534 = vmatmul.bf16.gmra.mxu2 %v7595_v26  ;;  %v7646_v5 = vld [vmem:[#allocation3 + $0x58] sm:$0xff] }
 0x498   : > { %v5823_v20 = vpop.f32.mrf.mxu3 }
 0x499   : > { %vm5108_vm13 = vcmp.ge.f32.partialorder %v5072_v56, 0.0  ;;  %v5144_v14 = vmul.f32 0.2, %v5072_v56  ;;  %v5905_v10 = vadd.f32 %v5823_v20, %v5570_v24 }
 0x49a   : > { %v4948_v28 = vpop.f32.mrf.mxu1  ;;  %v5495_v53 = vpop.f32.mrf.mxu2 }
 0x49b   : > { %v5180_v32 = vsel %vm5108_vm13, %v5072_v56, %v5144_v14  ;;  %v5001_v50 = vadd.f32 %v4948_v28, %v11025_v52  ;;  %v6240_v17 = vadd.f32 %v6158_v2, %v5905_v10  ;;  %v6161_v4 = vpop.f32.mrf.mxu0  ;;  %v5571_v52 = vadd.f32 %v11101_v22, %v5490_v11  ;;  %v11654_v56 = vld [vmem:[#allocation93_spill] sm:$0xff]  ;;  %v11655_v14 = vld [vmem:[#allocation94_spill] sm:$0xff] }
 0x49c   : > { %v8086_v41 = vpack.c.bf16 %v5180_v32, %v5179_v23  ;;  %v11656_v28 = vld [vmem:[#allocation70_spill] sm:$0xff] }
 0x49d   : > { %v6272_v1 = vadd.f32 %v6240_v17, %v11649_v31  ;;  %5865 = vmatmul.bf16.gmra.mxu3 %v7620_v54  ;;  %v5037_v29 = vmul.f32 %v5001_v50, %v11650_v40  ;;  %v11657_v54 = vld [vmem:[#allocation71_spill] sm:$0xff]  ;;  %v11658_v31 = vld [vmem:[#allocation72_spill] sm:$0xff] }
 0x49e   : > { %8539 = vst [vmem:[#allocation3 + $0x60] sm:$0xff] %v8086_v41   ;;  %6200 = vmatmul.bf16.gmra.mxu0 %v7646_v5 }
 0x49f   : > { %v8116_v62 = vpack.c.bf16 %v6272_v1, %v6271_v43  ;;  %v5073_v16 = vadd.f32 %v5037_v29, %v11651_v48 }
 0x4a0   : > { %v5826_v51 = vpop.f32.mrf.mxu3 }
 0x4a1   : > { %8117 = vst [vmem:[%s8881_s4] sm:$0xff] %v8116_v62   ;;  %v5906_v12 = vadd.f32 %v5826_v51, %v5571_v52  ;;  %v5145_v38 = vmul.f32 0.2, %v5073_v16  ;;  %vm5109_vm3 = vcmp.ge.f32.partialorder %v5073_v16, 0.0  ;;  %v11659_v51 = vld [vmem:[#allocation73_spill] sm:$0xff] }
 0x4a2   : > { %v4951_v60 = vpop.f32.mrf.mxu1  ;;  %v5497_v6 = vpop.f32.mrf.mxu2 }
 0x4a3   : > { %v5002_v63 = vadd.f32 %v4951_v60, %v11030_v33  ;;  %v6163_v18 = vpop.f32.mrf.mxu0  ;;  %v6241_v35 = vadd.f32 %v6161_v4, %v5906_v12  ;;  %v5181_v33 = vsel %vm5109_vm3, %v5073_v16, %v5145_v38  ;;  %v5574_v29 = vadd.f32 %v11101_v22, %v5497_v6  ;;  %v11660_v38 = vld [vmem:[#allocation95_spill] sm:$0xff] }
 0x4a5   : > { %v5038_v19 = vmul.f32 %v5002_v63, %v11652_v36  ;;  %v7596_v44 = vld [vmem:[#allocation3 + $0x60] sm:$0xff]  ;;  %v6273_v20 = vadd.f32 %v6241_v35, %v11654_v56  ;;  %v11662_v35 = vld [vmem:[#allocation74_spill] sm:$0xff]  ;;  %v11664_v56 = vld [vmem:[#allocation76_spill] sm:$0xff] }
 0x4a6   : > { %v7621_v13 = vld [vmem:[#allocation3 + $0x5c] sm:$0xff] }
 0x4a7   : > { %v5074_v46 = vadd.f32 %v5038_v19, %v11653_v21  ;;  %5539 = vmatmul.bf16.gmra.mxu2 %v7596_v44  ;;  %v7647_v10 = vld [vmem:[#allocation3 + $0x60] sm:$0xff] }
 0x4a8   : > { %v5828_v45 = vpop.f32.mrf.mxu3 }
 0x4a9   : > { %vm5110_vm14 = vcmp.ge.f32.partialorder %v5074_v46, 0.0  ;;  %v5146_v11 = vmul.f32 0.2, %v5074_v46  ;;  %v5907_v2 = vadd.f32 %v5828_v45, %v5572_v3 }
 0x4aa   : > { %v4953_v55 = vpop.f32.mrf.mxu1  ;;  %v5500_v26 = vpop.f32.mrf.mxu2 }
 0x4ab   : > { %v5182_v8 = vsel %vm5110_vm14, %v5074_v46, %v5146_v11  ;;  %v5003_v34 = vadd.f32 %v4953_v55, %v11038_v9  ;;  %v6242_v24 = vadd.f32 %v6163_v18, %v5907_v2  ;;  %v6166_v59 = vpop.f32.mrf.mxu0  ;;  %v5573_v9 = vadd.f32 %v11101_v22, %v5495_v53  ;;  %v11661_v46 = vld [vmem:[#allocation96_spill] sm:$0xff] }
 0x4ac   : > { %v8091_v49 = vpack.c.bf16 %v5182_v8, %v5181_v33 }
 0x4ad   : > { %v6274_v61 = vadd.f32 %v6242_v24, %v11655_v14  ;;  %5870 = vmatmul.bf16.gmra.mxu3 %v7621_v13  ;;  %v5039_v23 = vmul.f32 %v5003_v34, %v11656_v28  ;;  %v11663_v34 = vld [vmem:[#allocation75_spill] sm:$0xff] }
 0x4ae   : > { %8540 = vst [vmem:[#allocation3 + $0x68] sm:$0xff] %v8091_v49   ;;  %6205 = vmatmul.bf16.gmra.mxu0 %v7647_v10 }
 0x4af   : > { %v8121_v32 = vpack.c.bf16 %v6274_v61, %v6273_v20  ;;  %v5075_v41 = vadd.f32 %v5039_v23, %v11657_v54  ;;  %v11665_v23 = vld [vmem:[#allocation77_spill] sm:$0xff] }
 0x4b0   : > { %v5831_v50 = vpop.f32.mrf.mxu3 }
 0x4b1   : > { %8545 = vst [vmem:[%s8881_s4 + $0x8] sm:$0xff] %v8121_v32   ;;  %v5908_v5 = vadd.f32 %v5831_v50, %v5573_v9  ;;  %v5147_v62 = vmul.f32 0.2, %v5075_v41  ;;  %vm5111_vm8 = vcmp.ge.f32.partialorder %v5075_v41, 0.0 }
 0x4b2   : > { %v4956_v17 = vpop.f32.mrf.mxu1  ;;  %v5502_v30 = vpop.f32.mrf.mxu2 }
 0x4b3   : > { %v5004_v4 = vadd.f32 %v4956_v17, %v11043_v25  ;;  %v6168_v43 = vpop.f32.mrf.mxu0  ;;  %v6243_v48 = vadd.f32 %v6166_v59, %v5908_v5  ;;  %v5183_v25 = vsel %vm5111_vm8, %v5075_v41, %v5147_v62  ;;  %v5576_v10 = vadd.f32 %v11101_v22, %v5502_v30  ;;  %v11667_v62 = vld [vmem:[#allocation98_spill] sm:$0xff] }
 0x4b5   : > { %v5040_v1 = vmul.f32 %v5004_v4, %v11658_v31  ;;  %v7597_v40 = vld [vmem:[#allocation3 + $0x68] sm:$0xff]  ;;  %v6275_v21 = vadd.f32 %v6243_v48, %v11660_v38 }
 0x4b6   : > { %v7622_v44 = vld [vmem:[#allocation3 + $0x64] sm:$0xff] }
 0x4b7   : > { %v5076_v60 = vadd.f32 %v5040_v1, %v11659_v51  ;;  %5544 = vmatmul.bf16.gmra.mxu2 %v7597_v40  ;;  %v7648_v11 = vld [vmem:[#allocation3 + $0x68] sm:$0xff]  ;;  %v11666_v40 = vld [vmem:[#allocation97_spill] sm:$0xff] }
 0x4b8   : > { %v5833_v52 = vpop.f32.mrf.mxu3 }
 0x4b9   : > { %vm5112_vm0 = vcmp.ge.f32.partialorder %v5076_v60, 0.0  ;;  %v5148_v53 = vmul.f32 0.2, %v5076_v60  ;;  %v5909_v16 = vadd.f32 %v5833_v52, %v5574_v29  ;;  %v11668_v52 = vld [vmem:[#allocation79_spill] sm:$0xff] }
 0x4ba   : > { %v4958_v63 = vpop.f32.mrf.mxu1  ;;  %v5505_v19 = vpop.f32.mrf.mxu2 }
 0x4bb   : > { %v5184_v18 = vsel %vm5112_vm0, %v5076_v60, %v5148_v53  ;;  %v5005_v36 = vadd.f32 %v4958_v63, %v11051_v57  ;;  %v6244_v12 = vadd.f32 %v6168_v43, %v5909_v16  ;;  %v6171_v3 = vpop.f32.mrf.mxu0  ;;  %v5575_v57 = vadd.f32 %v11101_v22, %v5500_v26 }
 0x4bc   : > { %v8096_v6 = vpack.c.bf16 %v5184_v18, %v5183_v25  ;;  %v11669_v25 = vld [vmem:[#allocation81_spill] sm:$0xff] }
 0x4bd   : > { %v6276_v45 = vadd.f32 %v6244_v12, %v11661_v46  ;;  %5875 = vmatmul.bf16.gmra.mxu3 %v7622_v44  ;;  %v5041_v2 = vmul.f32 %v5005_v36, %v11662_v35 }
 0x4be   : > { %8541 = vst [vmem:[#allocation3 + $0x70] sm:$0xff] %v8096_v6   ;;  %6210 = vmatmul.bf16.gmra.mxu0 %v7648_v11  ;;  %v11670_v6 = vld [vmem:[#allocation82_spill] sm:$0xff]  ;;  %v11671_v11 = vld [vmem:[#allocation83_spill] sm:$0xff] }
 0x4bf   : > { %v8126_v55 = vpack.c.bf16 %v6276_v45, %v6275_v21  ;;  %v5077_v24 = vadd.f32 %v5041_v2, %v11663_v34 }
 0x4c0   : > { %v5836_v33 = vpop.f32.mrf.mxu3 }
 0x4c1   : > { %8546 = vst [vmem:[%s8881_s4 + $0x10] sm:$0xff] %v8126_v55   ;;  %v5910_v14 = vadd.f32 %v5836_v33, %v5575_v57  ;;  %v5149_v28 = vmul.f32 0.2, %v5077_v24  ;;  %vm5113_vm2 = vcmp.ge.f32.partialorder %v5077_v24, 0.0 }
 0x4c2   : > { %v4961_v8 = vpop.f32.mrf.mxu1  ;;  %v5507_v49 = vpop.f32.mrf.mxu2 }
 0x4c3   : > { %v5006_v13 = vadd.f32 %v4961_v8, %v11056_v58  ;;  %v6173_v59 = vpop.f32.mrf.mxu0  ;;  %v6245_v17 = vadd.f32 %v6171_v3, %v5910_v14  ;;  %v5185_v58 = vsel %vm5113_vm2, %v5077_v24, %v5149_v28  ;;  %v5578_v46 = vadd.f32 %v11101_v22, %v5507_v49 }
 0x4c5   : > { %v5042_v20 = vmul.f32 %v5006_v13, %v11664_v56  ;;  %v7598_v61 = vld [vmem:[#allocation3 + $0x70] sm:$0xff]  ;;  %v6277_v29 = vadd.f32 %v6245_v17, %v11666_v40 }
 0x4c6   : > { %v7623_v1 = vld [vmem:[#allocation3 + $0x6c] sm:$0xff] }
 0x4c7   : > { %v5078_v32 = vadd.f32 %v5042_v20, %v11665_v23  ;;  %5549 = vmatmul.bf16.gmra.mxu2 %v7598_v61  ;;  %v7649_v60 = vld [vmem:[#allocation3 + $0x70] sm:$0xff]  ;;  %v11672_v20 = vld [vmem:[#allocation34_spill] sm:$0xff]  ;;  %v11673_v61 = vld [vmem:[#allocation8_spill] sm:$0xff] }
 0x4c8   : > { %v5838_v50 = vpop.f32.mrf.mxu3  ;;  %v11674_v23 = vld [vmem:[#allocation85_spill] sm:$0xff] }
 0x4c9   : > { %vm5114_vm9 = vcmp.ge.f32.partialorder %v5078_v32, 0.0  ;;  %v5150_v26 = vmul.f32 0.2, %v5078_v32  ;;  %v5911_v9 = vadd.f32 %v5838_v50, %v5576_v10 }
 0x4ca   : > { %v4963_v54 = vpop.f32.mrf.mxu1  ;;  %v5510_v43 = vpop.f32.mrf.mxu2 }
 0x4cb   : > { %v5186_v41 = vsel %vm5114_vm9, %v5078_v32, %v5150_v26  ;;  %v5007_v4 = vadd.f32 %v4963_v54, %v11064_v7  ;;  %v6246_v31 = vadd.f32 %v6173_v59, %v5911_v9  ;;  %v6176_v5 = vpop.f32.mrf.mxu0  ;;  %v5577_v7 = vadd.f32 %v11101_v22, %v5505_v19  ;;  %v11675_v9 = vld [vmem:[#allocation87_spill] sm:$0xff] }
 0x4cc   : > { %v8101_v30 = vpack.c.bf16 %v5186_v41, %v5185_v58 }
 0x4cd   : > { %v6278_v51 = vadd.f32 %v6246_v31, %v11667_v62  ;;  %5880 = vmatmul.bf16.gmra.mxu3 %v7623_v1  ;;  %v5043_v53 = vmul.f32 %v5007_v4, %v11668_v52  ;;  %v11676_v31 = vld [vmem:[#allocation88_spill] sm:$0xff] }
 0x4ce   : > { %8542 = vst [vmem:[#allocation3 + $0x78] sm:$0xff] %v8101_v30   ;;  %6215 = vmatmul.bf16.gmra.mxu0 %v7649_v60 }
 0x4cf   : > { %v8131_v48 = vpack.c.bf16 %v6278_v51, %v6277_v29  ;;  %v5079_v18 = vadd.f32 %v5043_v53, %v11669_v25 }
 0x4d0   : > { %v5841_v16 = vpop.f32.mrf.mxu3 }
 0x4d1   : > { %8547 = vst [vmem:[%s8881_s4 + $0x18] sm:$0xff] %v8131_v48   ;;  %v5912_v38 = vadd.f32 %v5841_v16, %v5577_v7  ;;  %v5151_v45 = vmul.f32 0.2, %v5079_v18  ;;  %vm5115_vm4 = vcmp.ge.f32.partialorder %v5079_v18, 0.0 }
 0x4d2   : > { %v4966_v63 = vpop.f32.mrf.mxu1  ;;  %v5512_v12 = vpop.f32.mrf.mxu2 }
 0x4d3   : > { %v5008_v36 = vadd.f32 %v4966_v63, %v11069_v47  ;;  %v6178_v44 = vpop.f32.mrf.mxu0  ;;  %v6247_v55 = vadd.f32 %v6176_v5, %v5912_v38  ;;  %v5187_v47 = vsel %vm5115_vm4, %v5079_v18, %v5151_v45  ;;  %v5580_v40 = vadd.f32 %v11101_v22, %v5512_v12  ;;  %v11677_v12 = vld [vmem:[#allocation35_spill] sm:$0xff] }
 0x4d5   : > { %v5044_v3 = vmul.f32 %v5008_v36, %v11670_v6  ;;  %v7599_v21 = vld [vmem:[#allocation3 + $0x78] sm:$0xff]  ;;  %v6279_v14 = vadd.f32 %v6247_v55, %v11672_v20  ;;  %v11678_v6 = vld [vmem:[#allocation78_spill] sm:$0xff] }
 0x4d6   : > { %v7624_v59 = vld [vmem:[#allocation3 + $0x74] sm:$0xff] }
 0x4d7   : > { %v5080_v35 = vadd.f32 %v5044_v3, %v11671_v11  ;;  %5554 = vmatmul.bf16.gmra.mxu2 %v7599_v21  ;;  %v7650_v28 = vld [vmem:[#allocation3 + $0x78] sm:$0xff] }
 0x4d8   : > { %v5843_v2 = vpop.f32.mrf.mxu3  ;;  %v11680_v20 = vld [vmem:[#allocation80_spill] sm:$0xff] }
 0x4d9   : > { %vm5116_vm5 = vcmp.ge.f32.partialorder %v5080_v35, 0.0  ;;  %v5152_v19 = vmul.f32 0.2, %v5080_v35  ;;  %v5913_v33 = vadd.f32 %v5843_v2, %v5578_v46 }
 0x4da   : > { %v4968_v8 = vpop.f32.mrf.mxu1  ;;  %v5515_v24 = vpop.f32.mrf.mxu2 }
 0x4db   : > { %v5188_v57 = vsel %vm5116_vm5, %v5080_v35, %v5152_v19  ;;  %v5009_v34 = vadd.f32 %v4968_v8, %v11077_v0  ;;  %v6248_v13 = vadd.f32 %v6178_v44, %v5913_v33  ;;  %v6181_v56 = vpop.f32.mrf.mxu0  ;;  %v5579_v0 = vadd.f32 %v11101_v22, %v5510_v43 }
 0x4dc   : > { %v8106_v49 = vpack.c.bf16 %v5188_v57, %v5187_v47  ;;  %v5581_v11 = vadd.f32 %v11101_v22, %v5515_v24 }
 0x4dd   : > { %v6280_v10 = vadd.f32 %v6248_v13, %v11673_v61  ;;  %5885 = vmatmul.bf16.gmra.mxu3 %v7624_v59  ;;  %v5045_v32 = vmul.f32 %v5009_v34, %v11674_v23 }
 0x4de   : > { %8543 = vst [vmem:[#allocation3 + $0x80] sm:$0xff] %v8106_v49   ;;  %6220 = vmatmul.bf16.gmra.mxu0 %v7650_v28 }
 0x4df   : > { %v8136_v50 = vpack.c.bf16 %v6280_v10, %v6279_v14  ;;  %v5081_v54 = vadd.f32 %v5045_v32, %v11675_v9 }
 0x4e0   : > { %v5846_v26 = vpop.f32.mrf.mxu3 }
 0x4e1   : > { %8548 = vst [vmem:[%s8881_s4 + $0x20] sm:$0xff] %v8136_v50   ;;  %v5914_v30 = vadd.f32 %v5846_v26, %v5579_v0  ;;  %v5153_v29 = vmul.f32 0.2, %v5081_v54  ;;  %vm5117_vm6 = vcmp.ge.f32.partialorder %v5081_v54, 0.0 }
 0x4e2   : > { %v4971_v17 = vpop.f32.mrf.mxu1  ;;  %v5517_v41 = vpop.f32.mrf.mxu2 }
 0x4e3   : > { %v5010_v58 = vadd.f32 %v4971_v17, %v11084_v39  ;;  %v6183_v4 = vpop.f32.mrf.mxu0  ;;  %v6249_v60 = vadd.f32 %v6181_v56, %v5914_v30  ;;  %v5189_v39 = vsel %vm5117_vm6, %v5081_v54, %v5153_v29  ;;  %v5582_v8 = vadd.f32 %v11101_v22, %v5517_v41  ;;  %v11679_v56 = vld [vmem:[#allocation10_spill] sm:$0xff] }
 0x4e5   : > { %v5046_v1 = vmul.f32 %v5010_v58, %v11676_v31  ;;  %v7600_v5 = vld [vmem:[#allocation3 + $0x80] sm:$0xff] }
 0x4e6   : > { %v7625_v25 = vld [vmem:[#allocation3 + $0x7c] sm:$0xff] }
 0x4e7   : > { %v5082_v62 = vadd.f32 %v5046_v1, %v11616_v15  ;;  %5559 = vmatmul.bf16.gmra.mxu2 %v7600_v5  ;;  %v6281_v15 = vadd.f32 %v6249_v60, %v11677_v12  ;;  %v7651_v38 = vld [vmem:[#allocation3 + $0x80] sm:$0xff]  ;;  %v11682_v5 = vld [vmem:[#allocation84_spill] sm:$0xff] }
 0x4e8   : > { %v5848_v51 = vpop.f32.mrf.mxu3  ;;  %v11681_v1 = vld [vmem:[#allocation13_spill] sm:$0xff] }
 0x4e9   : > { %vm5118_vm1 = vcmp.ge.f32.partialorder %v5082_v62, 0.0  ;;  %v5154_v43 = vmul.f32 0.2, %v5082_v62  ;;  %v5915_v52 = vadd.f32 %v5848_v51, %v5580_v40 }
 0x4ea   : > { %v4973_v53 = vpop.f32.mrf.mxu1  ;;  %v5520_v63 = vpop.f32.mrf.mxu2 }
 0x4eb   : > { %v5190_v48 = vsel %vm5118_vm1, %v5082_v62, %v5154_v43  ;;  %v5011_v16 = vadd.f32 %v4973_v53, %v11090_v27  ;;  %v6250_v7 = vadd.f32 %v6183_v4, %v5915_v52  ;;  %v6186_v36 = vpop.f32.mrf.mxu0  ;;  %v5583_v23 = vadd.f32 %v11101_v22, %v5520_v63 }
 0x4ec   : > { %v8111_v18 = vpack.c.bf16 %v5190_v48, %v5189_v39 }
 0x4ed   : > { %v5047_v44 = vmul.f32 %v5011_v16, %v10332_v37  ;;  %v6282_v3 = vadd.f32 %v6250_v7, %v11678_v6  ;;  %5890 = vmatmul.bf16.gmra.mxu3 %v7625_v25 }
 0x4ee   : > { %8544 = vst [vmem:[#allocation3 + $0x88] sm:$0xff] %v8111_v18   ;;  %6225 = vmatmul.bf16.gmra.mxu0 %v7651_v38 }
 0x4ef   : > { %v5083_v21 = vadd.f32 %v5047_v44, %v10334_v42  ;;  %v8141_v46 = vpack.c.bf16 %v6282_v3, %v6281_v15  ;;  %v11684_v15 = vld [vmem:[#allocation86_spill] sm:$0xff] }
 0x4f0   : > { %v5851_v27 = vpop.f32.mrf.mxu3 }
 0x4f1   : > { %vm5119_vm15 = vcmp.ge.f32.partialorder %v5083_v21, 0.0  ;;  %v5155_v45 = vmul.f32 0.2, %v5083_v21  ;;  %8549 = vst [vmem:[%s8881_s4 + $0x28] sm:$0xff] %v8141_v46   ;;  %v5916_v37 = vadd.f32 %v5851_v27, %v5581_v11 }
 0x4f2   : > { %v5522_v2 = vpop.f32.mrf.mxu2 }
 0x4f3   : > { %v5191_v35 = vsel %vm5119_vm15, %v5083_v21, %v5155_v45  ;;  %v6188_v55 = vpop.f32.mrf.mxu0  ;;  %v6251_v47 = vadd.f32 %v6186_v36, %v5916_v37  ;;  %v5584_v17 = vadd.f32 %v11101_v22, %v5522_v2  ;;  %v11683_v36 = vld [vmem:[#allocation16_spill] sm:$0xff] }
 0x4f4   : > { %v5227_v19 = vpack.c.bf16 %v5191_v35, %v5191_v35 }
 0x4f5   : > { %v7601_v33 = vld [vmem:[#allocation3 + $0x88] sm:$0xff]  ;;  %v6283_v24 = vadd.f32 %v6251_v47, %v11679_v56 }
 0x4f6   : > { %5263 = vst [vmem:[#allocation3 + $0x90] sm:$0xf] %v5227_v19  ;;  %v7626_v59 = vld [vmem:[#allocation3 + $0x84] sm:$0xff] }
 0x4f7   : > { %5564 = vmatmul.bf16.gmra.mxu2 %v7601_v33  ;;  %v7652_v61 = vld [vmem:[#allocation3 + $0x88] sm:$0xff]  ;;  %v11685_v33 = vld [vmem:[#allocation19_spill] sm:$0xff] }
 0x4f8   : > { %v5853_v42 = vpop.f32.mrf.mxu3 }
 0x4f9   : > { %v5917_v57 = vadd.f32 %v5853_v42, %v5582_v8  ;;  %v11686_v42 = vld [vmem:[#allocation90_spill] sm:$0xff] }
 0x4fa   : > { %v5525_v34 = vpop.f32.mrf.mxu2 }
 0x4fb   : > { %v6252_v13 = vadd.f32 %v6188_v55, %v5917_v57  ;;  %v6191_v49 = vpop.f32.mrf.mxu0  ;;  %v5585_v43 = vadd.f32 %v11101_v22, %v5525_v34 }
 0x4fd   : > { %v6284_v14 = vadd.f32 %v6252_v13, %v11680_v20  ;;  %5895 = vmatmul.bf16.gmra.mxu3 %v7626_v59  ;;  %v7627_v4 = vld [vmem:[#allocation3 + $0x8c] sm:$0xff] }
 0x4fe   : > { %6230 = vmatmul.bf16.gmra.mxu0 %v7652_v61  ;;  %v7653_v29 = vld [vmem:[#allocation3 + $0x90] sm:$0xff] }
 0x4ff   : > { %v8146_v10 = vpack.c.bf16 %v6284_v14, %v6283_v24 }
 0x500   : > { %v5856_v28 = vpop.f32.mrf.mxu3 }
 0x501   : > { %8550 = vst [vmem:[%s8881_s4 + $0x30] sm:$0xff] %v8146_v10   ;;  %v5918_v26 = vadd.f32 %v5856_v28, %v5583_v23 }
 0x502   : > { %v5527_v32 = vpop.f32.mrf.mxu2 }
 0x503   : > { %v6193_v50 = vpop.f32.mrf.mxu0  ;;  %v6253_v9 = vadd.f32 %v6191_v49, %v5918_v26  ;;  %v5586_v39 = vadd.f32 %v11101_v22, %v5527_v32  ;;  %v11687_v32 = vld [vmem:[#allocation22_spill] sm:$0xff]  ;;  %v11688_v26 = vld [vmem:[#allocation25_spill] sm:$0xff] }
 0x505   : > { %v6285_v30 = vadd.f32 %v6253_v9, %v11681_v1 }
 0x508   : > { %v5858_v0 = vpop.f32.mrf.mxu3 }
 0x509   : > { %v5919_v54 = vadd.f32 %v5858_v0, %v5584_v17 }
 0x50a   : > { %v5530_v58 = vpop.f32.mrf.mxu2 }
 0x50b   : > { %v6254_v41 = vadd.f32 %v6193_v50, %v5919_v54  ;;  %v6196_v31 = vpop.f32.mrf.mxu0  ;;  %v5587_v38 = vadd.f32 %v11101_v22, %v5530_v58 }
 0x50d   : > { %v6286_v40 = vadd.f32 %v6254_v41, %v11682_v5  ;;  %5900 = vmatmul.bf16.gmra.mxu3 %v7627_v4 }
 0x50e   : > { %6235 = vmatmul.bf16.gmra.mxu0 %v7653_v29 }
 0x50f   : > { %v8151_v62 = vpack.c.bf16 %v6286_v40, %v6285_v30 }
 0x510   : > { %v5861_v51 = vpop.f32.mrf.mxu3 }
 0x511   : > { %8551 = vst [vmem:[%s8881_s4 + $0x38] sm:$0xff] %v8151_v62   ;;  %v5920_v53 = vadd.f32 %v5861_v51, %v5585_v43  ;;  %v11689_v51 = vld [vmem:[#allocation28_spill] sm:$0xff] }
 0x512   : > { %v5532_v60 = vpop.f32.mrf.mxu2 }
 0x513   : > { %v6198_v52 = vpop.f32.mrf.mxu0  ;;  %v6255_v16 = vadd.f32 %v6196_v31, %v5920_v53  ;;  %v5588_v45 = vadd.f32 %v11101_v22, %v5532_v60  ;;  %v11690_v60 = vld [vmem:[#allocation30_spill] sm:$0xff] }
 0x515   : > { %v6287_v12 = vadd.f32 %v6255_v16, %v11683_v36 }
 0x518   : > { %v5863_v48 = vpop.f32.mrf.mxu3 }
 0x519   : > { %v5921_v63 = vadd.f32 %v5863_v48, %v5586_v39 }
 0x51a   : > { %v5535_v7 = vpop.f32.mrf.mxu2 }
 0x51b   : > { %v6256_v25 = vadd.f32 %v6198_v52, %v5921_v63  ;;  %v6201_v18 = vpop.f32.mrf.mxu0  ;;  %v5589_v13 = vadd.f32 %v11101_v22, %v5535_v7 }
 0x51d   : > { %v6288_v44 = vadd.f32 %v6256_v25, %v11684_v15 }
 0x51f   : > { %v8156_v6 = vpack.c.bf16 %v6288_v44, %v6287_v12 }
 0x520   : > { %v5866_v3 = vpop.f32.mrf.mxu3 }
 0x521   : > { %8552 = vst [vmem:[%s8881_s4 + $0x40] sm:$0xff] %v8156_v6   ;;  %v5922_v27 = vadd.f32 %v5866_v3, %v5587_v38  ;;  %v11691_v3 = vld [vmem:[#allocation32_spill] sm:$0xff] }
 0x522   : > { %v5537_v21 = vpop.f32.mrf.mxu2 }
 0x523   : > { %v6203_v46 = vpop.f32.mrf.mxu0  ;;  %v6257_v35 = vadd.f32 %v6201_v18, %v5922_v27  ;;  %v5590_v24 = vadd.f32 %v11101_v22, %v5537_v21  ;;  %v11692_v21 = vld [vmem:[#allocation9_spill] sm:$0xff] }
 0x525   : > { %v6289_v8 = vadd.f32 %v6257_v35, %v11685_v33 }
 0x528   : > { %v5868_v11 = vpop.f32.mrf.mxu3 }
 0x529   : > { %v5923_v2 = vadd.f32 %v5868_v11, %v5588_v45 }
 0x52a   : > { %v5540_v19 = vpop.f32.mrf.mxu2 }
 0x52b   : > { %v6258_v55 = vadd.f32 %v6203_v46, %v5923_v2  ;;  %v6206_v37 = vpop.f32.mrf.mxu0  ;;  %v5591_v54 = vadd.f32 %v11101_v22, %v5540_v19 }
 0x52d   : > { %v6290_v47 = vadd.f32 %v6258_v55, %v11686_v42 }
 0x52f   : > { %v8161_v57 = vpack.c.bf16 %v6290_v47, %v6289_v8 }
 0x530   : > { %v5871_v34 = vpop.f32.mrf.mxu3 }
 0x531   : > { %8553 = vst [vmem:[%s8881_s4 + $0x48] sm:$0xff] %v8161_v57   ;;  %v5924_v56 = vadd.f32 %v5871_v34, %v5589_v13  ;;  %v11693_v34 = vld [vmem:[#allocation12_spill] sm:$0xff] }
 0x532   : > { %v5542_v59 = vpop.f32.mrf.mxu2 }
 0x533   : > { %v6208_v49 = vpop.f32.mrf.mxu0  ;;  %v6259_v14 = vadd.f32 %v6206_v37, %v5924_v56  ;;  %v5592_v31 = vadd.f32 %v11101_v22, %v5542_v59  ;;  %v11694_v59 = vld [vmem:[#allocation15_spill] sm:$0xff] }
 0x535   : > { %v6291_v50 = vadd.f32 %v6259_v14, %v11687_v32 }
 0x538   : > { %v5873_v20 = vpop.f32.mrf.mxu3 }
 0x539   : > { %v5925_v61 = vadd.f32 %v5873_v20, %v5590_v24 }
 0x53a   : > { %v5545_v10 = vpop.f32.mrf.mxu2 }
 0x53b   : > { %v6260_v28 = vadd.f32 %v6208_v49, %v5925_v61  ;;  %v6211_v23 = vpop.f32.mrf.mxu0  ;;  %v5593_v48 = vadd.f32 %v11101_v22, %v5545_v10 }
 0x53d   : > { %v6292_v17 = vadd.f32 %v6260_v28, %v11688_v26 }
 0x53f   : > { %v8166_v0 = vpack.c.bf16 %v6292_v17, %v6291_v50 }
 0x540   : > { %v5876_v9 = vpop.f32.mrf.mxu3 }
 0x541   : > { %8554 = vst [vmem:[%s8881_s4 + $0x50] sm:$0xff] %v8166_v0   ;;  %v5926_v4 = vadd.f32 %v5876_v9, %v5591_v54  ;;  %v11695_v9 = vld [vmem:[#allocation18_spill] sm:$0xff] }
 0x542   : > { %v5547_v58 = vpop.f32.mrf.mxu2 }
 0x543   : > { %v6213_v41 = vpop.f32.mrf.mxu0  ;;  %v6261_v30 = vadd.f32 %v6211_v23, %v5926_v4  ;;  %v5594_v25 = vadd.f32 %v11101_v22, %v5547_v58  ;;  %v11696_v58 = vld [vmem:[#allocation21_spill] sm:$0xff] }
 0x545   : > { %v6293_v43 = vadd.f32 %v6261_v30, %v11689_v51 }
 0x548   : > { %v5878_v1 = vpop.f32.mrf.mxu3 }
 0x549   : > { %v5927_v5 = vadd.f32 %v5878_v1, %v5592_v31 }
 0x54a   : > { %v5550_v40 = vpop.f32.mrf.mxu2 }
 0x54b   : > { %v6262_v29 = vadd.f32 %v6213_v41, %v5927_v5  ;;  %v6216_v62 = vpop.f32.mrf.mxu0  ;;  %v5595_v11 = vadd.f32 %v11101_v22, %v5550_v40 }
 0x54d   : > { %v6294_v52 = vadd.f32 %v6262_v29, %v11690_v60 }
 0x54f   : > { %v8171_v53 = vpack.c.bf16 %v6294_v52, %v6293_v43 }
 0x550   : > { %v5881_v39 = vpop.f32.mrf.mxu3 }
 0x551   : > { %8555 = vst [vmem:[%s8881_s4 + $0x58] sm:$0xff] %v8171_v53   ;;  %v5928_v7 = vadd.f32 %v5881_v39, %v5593_v48  ;;  %v11697_v53 = vld [vmem:[#allocation24_spill] sm:$0xff]  ;;  %v11698_v48 = vld [vmem:[#allocation27_spill] sm:$0xff] }
 0x552   : > { %v5552_v16 = vpop.f32.mrf.mxu2 }
 0x553   : > { %v6218_v63 = vpop.f32.mrf.mxu0  ;;  %v6263_v36 = vadd.f32 %v6216_v62, %v5928_v7  ;;  %v5596_v55 = vadd.f32 %v11101_v22, %v5552_v16 }
 0x555   : > { %v6295_v38 = vadd.f32 %v6263_v36, %v11691_v3 }
 0x558   : > { %v5883_v18 = vpop.f32.mrf.mxu3 }
 0x559   : > { %v5929_v12 = vadd.f32 %v5883_v18, %v5594_v25 }
 0x55a   : > { %v5555_v15 = vpop.f32.mrf.mxu2 }
 0x55b   : > { %v6264_v44 = vadd.f32 %v6218_v63, %v5929_v12  ;;  %v6221_v6 = vpop.f32.mrf.mxu0  ;;  %v5597_v20 = vadd.f32 %v11101_v22, %v5555_v15 }
 0x55d   : > { %v6296_v46 = vadd.f32 %v6264_v44, %v11692_v21 }
 0x55f   : > { %v8176_v27 = vpack.c.bf16 %v6296_v46, %v6295_v38 }
 0x560   : > { %v5886_v45 = vpop.f32.mrf.mxu3 }
 0x561   : > { %8556 = vst [vmem:[%s8881_s4 + $0x60] sm:$0xff] %v8176_v27   ;;  %v5930_v19 = vadd.f32 %v5886_v45, %v5595_v11 }
 0x562   : > { %v5557_v35 = vpop.f32.mrf.mxu2 }
 0x563   : > { %v6223_v2 = vpop.f32.mrf.mxu0  ;;  %v6265_v33 = vadd.f32 %v6221_v6, %v5930_v19  ;;  %v5598_v28 = vadd.f32 %v11101_v22, %v5557_v35 }
 0x565   : > { %v6297_v13 = vadd.f32 %v6265_v33, %v11693_v34 }
 0x568   : > { %v5888_v37 = vpop.f32.mrf.mxu3 }
 0x569   : > { %v5931_v8 = vadd.f32 %v5888_v37, %v5596_v55 }
 0x56a   : > { %v5560_v42 = vpop.f32.mrf.mxu2 }
 0x56b   : > { %v6266_v47 = vadd.f32 %v6223_v2, %v5931_v8  ;;  %v6226_v57 = vpop.f32.mrf.mxu0  ;;  %v5599_v1 = vadd.f32 %v11101_v22, %v5560_v42 }
 0x56d   : > { %v6298_v49 = vadd.f32 %v6266_v47, %v11694_v59 }
 0x56f   : > { %v8181_v56 = vpack.c.bf16 %v6298_v49, %v6297_v13 }
 0x570   : > { %v5891_v24 = vpop.f32.mrf.mxu3 }
 0x571   : > { %8557 = vst [vmem:[%s8881_s4 + $0x68] sm:$0xff] %v8181_v56   ;;  %v5932_v10 = vadd.f32 %v5891_v24, %v5597_v20 }
 0x572   : > { %v5562_v14 = vpop.f32.mrf.mxu2 }
 0x573   : > { %v6228_v61 = vpop.f32.mrf.mxu0  ;;  %v6267_v32 = vadd.f32 %v6226_v57, %v5932_v10  ;;  %v5600_v29 = vadd.f32 %v11101_v22, %v5562_v14 }
 0x575   : > { %v6299_v54 = vadd.f32 %v6267_v32, %v11695_v9 }
 0x578   : > { %v5893_v23 = vpop.f32.mrf.mxu3 }
 0x579   : > { %v5933_v50 = vadd.f32 %v5893_v23, %v5598_v28 }
 0x57a   : > { %v5565_v26 = vpop.f32.mrf.mxu2 }
 0x57b   : > { %v6268_v17 = vadd.f32 %v6228_v61, %v5933_v50  ;;  %v6231_v0 = vpop.f32.mrf.mxu0 }
 0x57d   : > { %v6300_v41 = vadd.f32 %v6268_v17, %v11696_v58 }
 0x57f   : > { %v8186_v4 = vpack.c.bf16 %v6300_v41, %v6299_v54 }
 0x580   : > { %v5896_v31 = vpop.f32.mrf.mxu3 }
 0x581   : > { %8558 = vst [vmem:[%s8881_s4 + $0x70] sm:$0xff] %v8186_v4   ;;  %v5934_v40 = vadd.f32 %v5896_v31, %v5599_v1 }
 0x582   : > { %v5566_v30 = vpop.f32.mrf.mxu2 }
 0x583   : > { %v6233_v5 = vpop.f32.mrf.mxu0  ;;  %v6269_v51 = vadd.f32 %v6231_v0, %v5934_v40 }
 0x585   : > { %v6301_v39 = vadd.f32 %v6269_v51, %v11697_v53 }
 0x588   : > { %v5898_v62 = vpop.f32.mrf.mxu3 }
 0x589   : > { %v5935_v43 = vadd.f32 %v5898_v62, %v5600_v29 }
 0x58b   : > { %v6270_v60 = vadd.f32 %v6233_v5, %v5935_v43  ;;  %v6236_v52 = vpop.f32.mrf.mxu0 }
 0x58d   : > { %v6302_v16 = vadd.f32 %v6270_v60, %v11698_v48 }
 0x58f   : > { %v8191_v63 = vpack.c.bf16 %v6302_v16, %v6301_v39 }
 0x590   : > { %v5901_v7 = vpop.f32.mrf.mxu3 }
 0x591   : > { %8559 = vst [vmem:[%s8881_s4 + $0x78] sm:$0xff] %v8191_v63  }
 0x593   : > { %v6237_v25 = vpop.f32.mrf.mxu0 }
 0x598   : > { %v5902_v18 = vpop.f32.mrf.mxu3 }
 0x599 PF: > { %s13_s16 = sadd.s32 1, %s8811_s16   ;;  %s11699_s12 = smov %s8803_s14 }
 0x59a   : > { %p10_p12 = scmp.ge.s32.totalorder %s13_s16, 8   ;;  %s11700_s13 = smov %s8807_s15 }
 0x59b   : > { %s11701_s14 = smov %s11704_s17  ;;  %s11702_s15 = smov %s11708_s18 }
 0x59c   :  { %12 = sbr.rel (!%p10_p12) target bundleno = 3 (0x3), region = 118 }
 0x5a1   :  { %6397 = vsyncmov [#allocation4] }
 0x5a4   :  { %s6398_s4 = vpop.sfrf %6397 }
 0x5a5   :  { %p7419_p13 = scmp.ne.s32.totalorder %s6398_s4, 0 }
 0x5a7   :  { %6402 = shalt.err (%p7419_p13)  }
 0x5a8   :  { %6404 = vsyncmov [#allocation4 + $0x1] }
 0x5ab   :  { %s6405_s28 = vpop.sfrf %6404 }
 0x5ac   :  { %p7420_p0 = scmp.ne.s32.totalorder %s6405_s28, 0 }
 0x5ae   :  { %6409 = shalt.err (%p7420_p0)  }

</bundles_post_ra>
